<compile_context>
chip_gen: v7x
topology: tpu7x:2x2x1
jax: 0.10.0
libtpu: 0.0.40
codegen_flags: <defaults>
</compile_context>

<pallas_src>
import functools

import jax
import jax.numpy as jnp
from jax import lax
from jax.experimental import pallas as pl
from jax.experimental.pallas import tpu as pltpu

LANE = 128          # lane width: channel dims padded to a multiple of this
TM = 512            # row tile for the memory-bound elementwise passes
BN_EPS = 1e-5


def _round_up(x, m):
    return (x + m - 1) // m * m


# ---------------------------------------------------------------------------
# Pallas kernels
# ---------------------------------------------------------------------------
def _conv3x3_bn_stats_kernel(x0_ref, x1_ref, x2_ref, w_ref, b_ref, m_ref,
                             y_ref, stats_ref, acc_ref, *, wp, lout_pad):
    """3x3x3 conv for one (n, d) output plane + bias + fused BN partial stats.

    x{0,1,2}_ref : (1, PLANE_PAD, Cin)   bf16  padded depth slices d, d+1, d+2
    w_ref        : (27, Cin, Cout)       bf16  taps in kd*9 + kh*3 + kw order
    b_ref        : (1, Cout)             f32   conv bias
    m_ref        : (LOUT_PAD, 1)         f32   1.0 on valid output rows, else 0.0
    y_ref        : (1, 1, LOUT_PAD, Cout) f32  conv+bias output (invalid rows = 0)
    stats_ref    : (1, 1, 8, Cout)       f32   row 0 = sum, row 1 = sum of squares
    acc_ref      : (LOUT_PAD, Cout)      f32   VMEM accumulator scratch
    """
    acc_ref[...] = jnp.zeros_like(acc_ref)
    planes = (x0_ref, x1_ref, x2_ref)
    for kd in range(3):
        for kh in range(3):
            for kw in range(3):
                s = kh * wp + kw
                acc_ref[...] += jnp.dot(
                    planes[kd][0, s:s + lout_pad, :],
                    w_ref[kd * 9 + kh * 3 + kw],
                    preferred_element_type=jnp.float32)

    val = (acc_ref[...] + b_ref[...]) * m_ref[...]   # zero out garbage rows
    y_ref[0, 0] = val

    psum = jnp.sum(val, axis=0, keepdims=True)
    psq = jnp.sum(val * val, axis=0, keepdims=True)
    pad = jnp.zeros((6, val.shape[1]), jnp.float32)
    stats_ref[0, 0] = jnp.concatenate([psum, psq, pad], axis=0)


def _bn_relu_kernel(y_ref, sc_ref, sh_ref, o_ref):
    z = y_ref[...] * sc_ref[...] + sh_ref[...]
    o_ref[...] = jnp.maximum(z, 0.0).astype(o_ref.dtype)


def _bn_relu_skip_kernel(y_ref, sc_ref, sh_ref, x_ref, w_ref, b_ref, o_ref):
    # BN+ReLU of block-2 conv output, fused with the 1x1x1 skip conv + residual.
    z = jnp.maximum(y_ref[...] * sc_ref[...] + sh_ref[...], 0.0)
    skip = jnp.dot(x_ref[...], w_ref[...],
                   preferred_element_type=jnp.float32) + b_ref[...]
    o_ref[...] = z + skip


# ---------------------------------------------------------------------------
# Pallas-backed forward pass
# ---------------------------------------------------------------------------
def res_conv_block_unetr(x_ncdhw, params):
    """x: (N, C_in, D, H, W) f32 -> (N, C_out, D, H, W) f32."""
    N, C_in, D, H, W = x_ncdhw.shape
    C_out = params["w1"].shape[0]
    f32, bf16 = jnp.float32, jnp.bfloat16

    Cip, Cop = _round_up(C_in, LANE), _round_up(C_out, LANE)
    Dp, Hp, Wp = D + 2, H + 2, W + 2
    LOUT = H * Wp                                   # output rows per plane (padded width)
    LOUT_PAD = _round_up(LOUT, 8)
    PLANE_PAD = _round_up(LOUT_PAD + 2 * Wp + 2, 16)
    M = N * D * H * W
    Mp = _round_up(M, TM)

    # -- parameter packing (channels-last, channel-padded, bf16 for MXU) ------
    def pack_conv_w(w):                              # torch (Co, Ci, 3, 3, 3)
        ci = w.shape[1]
        cip = _round_up(ci, LANE)
        wt = jnp.transpose(w, (2, 3, 4, 1, 0))       # (kd, kh, kw, Ci, Co)
        wt = jnp.pad(wt, ((0, 0),) * 3 + ((0, cip - ci), (0, Cop - C_out)))
        return wt.reshape(27, cip, Cop).astype(bf16)

    def pack_vec(v):                                 # (Co,) -> (1, Cop) f32
        return jnp.pad(v, (0, Cop - C_out)).reshape(1, Cop).astype(f32)

    w1p, b1p = pack_conv_w(params["w1"]), pack_vec(params["b1"])
    g1p, be1p = pack_vec(params["g1"]), pack_vec(params["be1"])
    w2p, b2p = pack_conv_w(params["w2"]), pack_vec(params["b2"])
    g2p, be2p = pack_vec(params["g2"]), pack_vec(params["be2"])
    ws = params["ws"].reshape(C_out, C_in)
    wsp = jnp.pad(jnp.transpose(ws),
                  ((0, Cip - C_in), (0, Cop - C_out))).astype(bf16)
    bsp = pack_vec(params["bs"])

    # -- activations -----------------------------------------------------------
    x_nd = jnp.transpose(x_ncdhw, (0, 2, 3, 4, 1)).astype(f32)    # NDHWC
    x_nd = jnp.pad(x_nd, ((0, 0),) * 4 + ((0, Cip - C_in),))
    x_clean = jnp.pad(x_nd.reshape(M, Cip), ((0, Mp - M), (0, 0))).astype(bf16)

    # validity mask over per-plane conv-output rows (row j valid iff it maps to
    # an interior (h, w) position on the padded-width output grid)
    j = jnp.arange(LOUT_PAD, dtype=jnp.int32)
    row_mask = (((j < LOUT) & ((j % Wp) < W)).astype(f32)).reshape(LOUT_PAD, 1)

    def to_planes(h_nd):      # (N, D, H, W, C) -> (N*Dp, PLANE_PAD, C), zero-pad
        c = h_nd.shape[-1]
        hp = jnp.pad(h_nd, ((0, 0), (1, 1), (1, 1), (1, 1), (0, 0)))
        hp = hp.reshape(N * Dp, Hp * Wp, c)
        return jnp.pad(hp, ((0, 0), (0, PLANE_PAD - Hp * Wp), (0, 0)))

    def conv_bn_stats(planes, w27, bias_row):
        cin = planes.shape[-1]
        kern = functools.partial(_conv3x3_bn_stats_kernel,
                                 wp=Wp, lout_pad=LOUT_PAD)

        def plane_spec(kd):
            return pl.BlockSpec((1, PLANE_PAD, cin),
                                lambda n, d, kd=kd: (n * Dp + d + kd, 0, 0))

        return pl.pallas_call(
            kern,
            grid_spec=pltpu.PrefetchScalarGridSpec(
                num_scalar_prefetch=0,
                grid=(N, D),
                in_specs=[
                    plane_spec(0), plane_spec(1), plane_spec(2),
                    pl.BlockSpec((27, cin, Cop), lambda n, d: (0, 0, 0)),
                    pl.BlockSpec((1, Cop), lambda n, d: (0, 0)),
                    pl.BlockSpec((LOUT_PAD, 1), lambda n, d: (0, 0)),
                ],
                out_specs=(
                    pl.BlockSpec((1, 1, LOUT_PAD, Cop), lambda n, d: (n, d, 0, 0)),
                    pl.BlockSpec((1, 1, 8, Cop), lambda n, d: (n, d, 0, 0)),
                ),
                scratch_shapes=[pltpu.VMEM((LOUT_PAD, Cop), f32)],
            ),
            out_shape=(
                jax.ShapeDtypeStruct((N, D, LOUT_PAD, Cop), f32),
                jax.ShapeDtypeStruct((N, D, 8, Cop), f32),
            ),
            compiler_params=pltpu.CompilerParams(
                dimension_semantics=("parallel", "parallel")),
        )(planes, planes, planes, w27, bias_row, row_mask)

    def bn_fold(stats, gamma_row, beta_row):
        psum = jnp.sum(stats[:, :, 0, :], axis=(0, 1))           # (Cop,)
        psq = jnp.sum(stats[:, :, 1, :], axis=(0, 1))            # (Cop,)
        mean = psum / M
        var = jnp.maximum(psq / M - mean * mean, 0.0)            # clamp >= 0
        scale = gamma_row * lax.rsqrt(var + BN_EPS).reshape(1, Cop)
        shift = beta_row - mean.reshape(1, Cop) * scale
        return scale.astype(f32), shift.astype(f32)

    def strip(y):             # (N, D, LOUT_PAD, Cop) -> clean (Mp, Cop) slab
        yv = y[:, :, :LOUT, :].reshape(N, D, H, Wp, Cop)[:, :, :, :W, :]
        return jnp.pad(yv.reshape(M, Cop), ((0, Mp - M), (0, 0)))

    def bn_relu(y, scale, shift, out_dtype):
        return pl.pallas_call(
            _bn_relu_kernel,
            out_shape=jax.ShapeDtypeStruct((Mp, Cop), out_dtype),
            grid=(Mp // TM,),
            in_specs=[pl.BlockSpec((TM, Cop), lambda i: (i, 0)),
                      pl.BlockSpec((1, Cop), lambda i: (0, 0)),
                      pl.BlockSpec((1, Cop), lambda i: (0, 0))],
            out_specs=pl.BlockSpec((TM, Cop), lambda i: (i, 0)),
            compiler_params=pltpu.CompilerParams(
                dimension_semantics=("parallel",)),
        )(y, scale, shift)

    def bn_relu_skip(y, scale, shift):
        return pl.pallas_call(
            _bn_relu_skip_kernel,
            out_shape=jax.ShapeDtypeStruct((Mp, Cop), f32),
            grid=(Mp // TM,),
            in_specs=[pl.BlockSpec((TM, Cop), lambda i: (i, 0)),
                      pl.BlockSpec((1, Cop), lambda i: (0, 0)),
                      pl.BlockSpec((1, Cop), lambda i: (0, 0)),
                      pl.BlockSpec((TM, Cip), lambda i: (i, 0)),
                      pl.BlockSpec((Cip, Cop), lambda i: (0, 0)),
                      pl.BlockSpec((1, Cop), lambda i: (0, 0))],
            out_specs=pl.BlockSpec((TM, Cop), lambda i: (i, 0)),
            compiler_params=pltpu.CompilerParams(
                dimension_semantics=("parallel",)),
        )(y, scale, shift, x_clean, wsp, bsp)

    # --- block 1: conv -> dropout(p=0, identity) -> BN -> ReLU ----------------
    y1, st1 = conv_bn_stats(to_planes(x_nd.astype(bf16)), w1p, b1p)
    sc1, sh1 = bn_fold(st1, g1p, be1p)
    h1 = bn_relu(strip(y1), sc1, sh1, bf16)                      # (Mp, Cop) bf16

    # --- block 2 ---------------------------------------------------------------
    h1_nd = h1[:M].reshape(N, D, H, W, Cop)
    y2, st2 = conv_bn_stats(to_planes(h1_nd), w2p, b2p)
    sc2, sh2 = bn_fold(st2, g2p, be2p)

    # --- fused: BN+ReLU(block 2) + 1x1x1 skip conv + residual add --------------
    out = bn_relu_skip(strip(y2), sc2, sh2)                      # (Mp, Cop) f32

    out = out[:M, :C_out].reshape(N, D, H, W, C_out)
    return jnp.transpose(out, (0, 4, 1, 2, 3))


# ---------------------------------------------------------------------------
# Parameters (PyTorch layouts) and pure-JAX reference
# ---------------------------------------------------------------------------
def make_params(key, c_in, c_out):
    ks = jax.random.split(key, 10)
    n = jax.random.normal
    return {
        "w1": 0.1 * n(ks[0], (c_out, c_in, 3, 3, 3), jnp.float32),
        "b1": 0.1 * n(ks[1], (c_out,), jnp.float32),
        "g1": 1.0 + 0.1 * n(ks[2], (c_out,), jnp.float32),
        "be1": 0.1 * n(ks[3], (c_out,), jnp.float32),
        "w2": 0.1 * n(ks[4], (c_out, c_out, 3, 3, 3), jnp.float32),
        "b2": 0.1 * n(ks[5], (c_out,), jnp.float32),
        "g2": 1.0 + 0.1 * n(ks[6], (c_out,), jnp.float32),
        "be2": 0.1 * n(ks[7], (c_out,), jnp.float32),
        "ws": 0.3 * n(ks[8], (c_out, c_in, 1, 1, 1), jnp.float32),
        "bs": 0.1 * n(ks[9], (c_out,), jnp.float32),
    }


def ref_res_conv_block_unetr(x_ncdhw, params):
    """Reference forward (mirrors the bf16-input / f32-accumulate numerics)."""
    f32, bf16 = jnp.float32, jnp.bfloat16
    x = jnp.transpose(x_ncdhw, (0, 2, 3, 4, 1)).astype(f32)
    C_out = params["w1"].shape[0]

    def conv3(h, w, b):
        wt = jnp.transpose(w, (2, 3, 4, 1, 0)).astype(bf16)      # DHWIO
        y = lax.conv_general_dilated(
            h.astype(bf16), wt, (1, 1, 1), ((1, 1), (1, 1), (1, 1)),
            dimension_numbers=("NDHWC", "DHWIO", "NDHWC"),
            preferred_element_type=f32)
        return y + b.reshape(1, 1, 1, 1, -1)

    def bn_relu(y, g, be):
        mean = jnp.mean(y, axis=(0, 1, 2, 3), keepdims=True)
        var = jnp.maximum(
            jnp.mean(y * y, axis=(0, 1, 2, 3), keepdims=True) - mean * mean, 0.0)
        z = (y - mean) * lax.rsqrt(var + BN_EPS) * g.reshape(1, 1, 1, 1, -1) \
            + be.reshape(1, 1, 1, 1, -1)
        return jnp.maximum(z, 0.0)

    h1 = bn_relu(conv3(x, params["w1"], params["b1"]), params["g1"], params["be1"])
    h2 = bn_relu(conv3(h1, params["w2"], params["b2"]), params["g2"], params["be2"])

    N, D, H, W, Ci = x.shape
    ws = jnp.transpose(params["ws"].reshape(C_out, Ci)).astype(bf16)   # (Ci, Co)
    skip = lax.dot_general(x.astype(bf16).reshape(-1, Ci), ws,
                           (((1,), (0,)), ((), ())),
                           preferred_element_type=f32)
    skip = skip.reshape(N, D, H, W, C_out) + params["bs"].reshape(1, 1, 1, 1, -1)

    out = h2 + skip
    return jnp.transpose(out, (0, 4, 1, 2, 3))


# ---------------------------------------------------------------------------
if __name__ == "__main__":
    N, C_in, C_out, D, H, W = 2, 4, 8, 16, 16, 16     # M = N*D*H*W = 8192

    key = jax.random.PRNGKey(0)
    kx, kp = jax.random.split(key)
    x = jax.random.normal(kx, (N, C_in, D, H, W), jnp.float32)
    params = make_params(kp, C_in, C_out)

    out = jax.block_until_ready(jax.jit(res_conv_block_unetr)(x, params))
    ref = jax.block_until_ready(ref_res_conv_block_unetr(x, params))

    assert out.shape == (N, C_out, D, H, W), out.shape
    max_err = jnp.max(jnp.abs(out - ref))
    assert jnp.allclose(out, ref, atol=3e-2, rtol=3e-2), \
        f"max abs err = {max_err}"

    print("KERNEL_OK")
</pallas_src>

<mosaic_0001>
module attributes {stable_mosaic.version = 11 : i64} {
  func.func @_conv3x3_bn_stats_kernel(%arg0: i32, %arg1: i32, %arg2: memref<1x336x128xbf16, #tpu.memory_space<vmem>>, %arg3: memref<1x336x128xbf16, #tpu.memory_space<vmem>>, %arg4: memref<1x336x128xbf16, #tpu.memory_space<vmem>>, %arg5: memref<27x128x128xbf16, #tpu.memory_space<vmem>>, %arg6: memref<1x128xf32, #tpu.memory_space<vmem>>, %arg7: memref<288x1xf32, #tpu.memory_space<vmem>>, %arg8: memref<1x1x288x128xf32, #tpu.memory_space<vmem>>, %arg9: memref<1x1x8x128xf32, #tpu.memory_space<vmem>>, %arg10: memref<288x128xf32, #tpu.memory_space<vmem>>) attributes {dimension_semantics = [#tpu.dimension_semantics<parallel>, #tpu.dimension_semantics<parallel>], iteration_bounds = array<i64: 2, 16>, scalar_prefetch = 0 : i64, scratch_operands = 1 : i64, tpu.core_type = #tpu.core_type<tc>, window_params = [{transform_indices = @transform_0, window_bounds = array<i64: 1, 336, 128>}, {transform_indices = @transform_1, window_bounds = array<i64: 1, 336, 128>}, {transform_indices = @transform_2, window_bounds = array<i64: 1, 336, 128>}, {pipeline_mode = #tpu.pipeline_mode<synchronous>, transform_indices = @transform_3, window_bounds = array<i64: 27, 128, 128>}, {pipeline_mode = #tpu.pipeline_mode<synchronous>, transform_indices = @transform_4, window_bounds = array<i64: 1, 128>}, {pipeline_mode = #tpu.pipeline_mode<synchronous>, transform_indices = @transform_5, window_bounds = array<i64: 288, 1>}, {transform_indices = @transform_6, window_bounds = array<i64: 1, 1, 288, 128>}, {transform_indices = @transform_7, window_bounds = array<i64: 1, 1, 8, 128>}]} {
    %cst = arith.constant 0.000000e+00 : f32
    %0 = vector.broadcast %cst : f32 to vector<288x128xf32>
    %c0 = arith.constant 0 : index
    %c0_0 = arith.constant 0 : index
    %1 = vector.load %arg10[%c0, %c0_0] : memref<288x128xf32, #tpu.memory_space<vmem>>, vector<288x128xf32>
    tpu.vector_store %arg10[%c0, %c0_0], %0 {strides = array<i32>} : memref<288x128xf32, #tpu.memory_space<vmem>>, vector<288x128xf32>,
    %c0_1 = arith.constant 0 : index
    %c0_2 = arith.constant 0 : index
    %2 = vector.load %arg10[%c0_1, %c0_2] : memref<288x128xf32, #tpu.memory_space<vmem>>, vector<288x128xf32>
    %c0_3 = arith.constant 0 : index
    %c0_4 = arith.constant 0 : index
    %c0_5 = arith.constant 0 : index
    %3 = vector.load %arg2[%c0_3, %c0_4, %c0_5] : memref<1x336x128xbf16, #tpu.memory_space<vmem>>, vector<1x288x128xbf16>
    %4 = vector.shape_cast %3 : vector<1x288x128xbf16> to vector<288x128xbf16>
    %c0_6 = arith.constant 0 : index
    %c0_7 = arith.constant 0 : index
    %c0_8 = arith.constant 0 : index
    %5 = vector.load %arg5[%c0_6, %c0_7, %c0_8] : memref<27x128x128xbf16, #tpu.memory_space<vmem>>, vector<1x128x128xbf16>
    %6 = vector.shape_cast %5 : vector<1x128x128xbf16> to vector<128x128xbf16>
    %cst_9 = arith.constant dense<0.000000e+00> : vector<288x128xf32>
    %7 = tpu.matmul %4, %6, %cst_9 {dimension_numbers = #tpu.dot_dimension_numbers<[1], [0], [0], [1], [0, 0, 1, 1], [], []>} : vector<288x128xbf16>, vector<128x128xbf16>, vector<288x128xf32> -> vector<288x128xf32>
    %8 = arith.addf %2, %7 : vector<288x128xf32>
    %c0_10 = arith.constant 0 : index
    %c0_11 = arith.constant 0 : index
    %9 = vector.load %arg10[%c0_10, %c0_11] : memref<288x128xf32, #tpu.memory_space<vmem>>, vector<288x128xf32>
    tpu.vector_store %arg10[%c0_10, %c0_11], %8 {strides = array<i32>} : memref<288x128xf32, #tpu.memory_space<vmem>>, vector<288x128xf32>,
    %c0_12 = arith.constant 0 : index
    %c0_13 = arith.constant 0 : index
    %10 = vector.load %arg10[%c0_12, %c0_13] : memref<288x128xf32, #tpu.memory_space<vmem>>, vector<288x128xf32>
    %c0_14 = arith.constant 0 : index
    %c1 = arith.constant 1 : index
    %c0_15 = arith.constant 0 : index
    %11 = vector.load %arg2[%c0_14, %c1, %c0_15] : memref<1x336x128xbf16, #tpu.memory_space<vmem>>, vector<1x288x128xbf16>
    %12 = vector.shape_cast %11 : vector<1x288x128xbf16> to vector<288x128xbf16>
    %c1_16 = arith.constant 1 : index
    %c0_17 = arith.constant 0 : index
    %c0_18 = arith.constant 0 : index
    %13 = vector.load %arg5[%c1_16, %c0_17, %c0_18] : memref<27x128x128xbf16, #tpu.memory_space<vmem>>, vector<1x128x128xbf16>
    %14 = vector.shape_cast %13 : vector<1x128x128xbf16> to vector<128x128xbf16>
    %cst_19 = arith.constant dense<0.000000e+00> : vector<288x128xf32>
    %15 = tpu.matmul %12, %14, %cst_19 {dimension_numbers = #tpu.dot_dimension_numbers<[1], [0], [0], [1], [0, 0, 1, 1], [], []>} : vector<288x128xbf16>, vector<128x128xbf16>, vector<288x128xf32> -> vector<288x128xf32>
    %16 = arith.addf %10, %15 : vector<288x128xf32>
    %c0_20 = arith.constant 0 : index
    %c0_21 = arith.constant 0 : index
    %17 = vector.load %arg10[%c0_20, %c0_21] : memref<288x128xf32, #tpu.memory_space<vmem>>, vector<288x128xf32>
    tpu.vector_store %arg10[%c0_20, %c0_21], %16 {strides = array<i32>} : memref<288x128xf32, #tpu.memory_space<vmem>>, vector<288x128xf32>,
    %c0_22 = arith.constant 0 : index
    %c0_23 = arith.constant 0 : index
    %18 = vector.load %arg10[%c0_22, %c0_23] : memref<288x128xf32, #tpu.memory_space<vmem>>, vector<288x128xf32>
    %c0_24 = arith.constant 0 : index
    %c2 = arith.constant 2 : index
    %c0_25 = arith.constant 0 : index
    %19 = vector.load %arg2[%c0_24, %c2, %c0_25] : memref<1x336x128xbf16, #tpu.memory_space<vmem>>, vector<1x288x128xbf16>
    %20 = vector.shape_cast %19 : vector<1x288x128xbf16> to vector<288x128xbf16>
    %c2_26 = arith.constant 2 : index
    %c0_27 = arith.constant 0 : index
    %c0_28 = arith.constant 0 : index
    %21 = vector.load %arg5[%c2_26, %c0_27, %c0_28] : memref<27x128x128xbf16, #tpu.memory_space<vmem>>, vector<1x128x128xbf16>
    %22 = vector.shape_cast %21 : vector<1x128x128xbf16> to vector<128x128xbf16>
    %cst_29 = arith.constant dense<0.000000e+00> : vector<288x128xf32>
    %23 = tpu.matmul %20, %22, %cst_29 {dimension_numbers = #tpu.dot_dimension_numbers<[1], [0], [0], [1], [0, 0, 1, 1], [], []>} : vector<288x128xbf16>, vector<128x128xbf16>, vector<288x128xf32> -> vector<288x128xf32>
    %24 = arith.addf %18, %23 : vector<288x128xf32>
    %c0_30 = arith.constant 0 : index
    %c0_31 = arith.constant 0 : index
    %25 = vector.load %arg10[%c0_30, %c0_31] : memref<288x128xf32, #tpu.memory_space<vmem>>, vector<288x128xf32>
    tpu.vector_store %arg10[%c0_30, %c0_31], %24 {strides = array<i32>} : memref<288x128xf32, #tpu.memory_space<vmem>>, vector<288x128xf32>,
    %c0_32 = arith.constant 0 : index
    %c0_33 = arith.constant 0 : index
    %26 = vector.load %arg10[%c0_32, %c0_33] : memref<288x128xf32, #tpu.memory_space<vmem>>, vector<288x128xf32>
    %c0_34 = arith.constant 0 : index
    %c18 = arith.constant 18 : index
    %c0_35 = arith.constant 0 : index
    %27 = vector.load %arg2[%c0_34, %c18, %c0_35] : memref<1x336x128xbf16, #tpu.memory_space<vmem>>, vector<1x288x128xbf16>
    %28 = vector.shape_cast %27 : vector<1x288x128xbf16> to vector<288x128xbf16>
    %c3 = arith.constant 3 : index
    %c0_36 = arith.constant 0 : index
    %c0_37 = arith.constant 0 : index
    %29 = vector.load %arg5[%c3, %c0_36, %c0_37] : memref<27x128x128xbf16, #tpu.memory_space<vmem>>, vector<1x128x128xbf16>
    %30 = vector.shape_cast %29 : vector<1x128x128xbf16> to vector<128x128xbf16>
    %cst_38 = arith.constant dense<0.000000e+00> : vector<288x128xf32>
    %31 = tpu.matmul %28, %30, %cst_38 {dimension_numbers = #tpu.dot_dimension_numbers<[1], [0], [0], [1], [0, 0, 1, 1], [], []>} : vector<288x128xbf16>, vector<128x128xbf16>, vector<288x128xf32> -> vector<288x128xf32>
    %32 = arith.addf %26, %31 : vector<288x128xf32>
    %c0_39 = arith.constant 0 : index
    %c0_40 = arith.constant 0 : index
    %33 = vector.load %arg10[%c0_39, %c0_40] : memref<288x128xf32, #tpu.memory_space<vmem>>, vector<288x128xf32>
    tpu.vector_store %arg10[%c0_39, %c0_40], %32 {strides = array<i32>} : memref<288x128xf32, #tpu.memory_space<vmem>>, vector<288x128xf32>,
    %c0_41 = arith.constant 0 : index
    %c0_42 = arith.constant 0 : index
    %34 = vector.load %arg10[%c0_41, %c0_42] : memref<288x128xf32, #tpu.memory_space<vmem>>, vector<288x128xf32>
    %c0_43 = arith.constant 0 : index
    %c19 = arith.constant 19 : index
    %c0_44 = arith.constant 0 : index
    %35 = vector.load %arg2[%c0_43, %c19, %c0_44] : memref<1x336x128xbf16, #tpu.memory_space<vmem>>, vector<1x288x128xbf16>
    %36 = vector.shape_cast %35 : vector<1x288x128xbf16> to vector<288x128xbf16>
    %c4 = arith.constant 4 : index
    %c0_45 = arith.constant 0 : index
    %c0_46 = arith.constant 0 : index
    %37 = vector.load %arg5[%c4, %c0_45, %c0_46] : memref<27x128x128xbf16, #tpu.memory_space<vmem>>, vector<1x128x128xbf16>
    %38 = vector.shape_cast %37 : vector<1x128x128xbf16> to vector<128x128xbf16>
    %cst_47 = arith.constant dense<0.000000e+00> : vector<288x128xf32>
    %39 = tpu.matmul %36, %38, %cst_47 {dimension_numbers = #tpu.dot_dimension_numbers<[1], [0], [0], [1], [0, 0, 1, 1], [], []>} : vector<288x128xbf16>, vector<128x128xbf16>, vector<288x128xf32> -> vector<288x128xf32>
    %40 = arith.addf %34, %39 : vector<288x128xf32>
    %c0_48 = arith.constant 0 : index
    %c0_49 = arith.constant 0 : index
    %41 = vector.load %arg10[%c0_48, %c0_49] : memref<288x128xf32, #tpu.memory_space<vmem>>, vector<288x128xf32>
    tpu.vector_store %arg10[%c0_48, %c0_49], %40 {strides = array<i32>} : memref<288x128xf32, #tpu.memory_space<vmem>>, vector<288x128xf32>,
    %c0_50 = arith.constant 0 : index
    %c0_51 = arith.constant 0 : index
    %42 = vector.load %arg10[%c0_50, %c0_51] : memref<288x128xf32, #tpu.memory_space<vmem>>, vector<288x128xf32>
    %c0_52 = arith.constant 0 : index
    %c20 = arith.constant 20 : index
    %c0_53 = arith.constant 0 : index
    %43 = vector.load %arg2[%c0_52, %c20, %c0_53] : memref<1x336x128xbf16, #tpu.memory_space<vmem>>, vector<1x288x128xbf16>
    %44 = vector.shape_cast %43 : vector<1x288x128xbf16> to vector<288x128xbf16>
    %c5 = arith.constant 5 : index
    %c0_54 = arith.constant 0 : index
    %c0_55 = arith.constant 0 : index
    %45 = vector.load %arg5[%c5, %c0_54, %c0_55] : memref<27x128x128xbf16, #tpu.memory_space<vmem>>, vector<1x128x128xbf16>
    %46 = vector.shape_cast %45 : vector<1x128x128xbf16> to vector<128x128xbf16>
    %cst_56 = arith.constant dense<0.000000e+00> : vector<288x128xf32>
    %47 = tpu.matmul %44, %46, %cst_56 {dimension_numbers = #tpu.dot_dimension_numbers<[1], [0], [0], [1], [0, 0, 1, 1], [], []>} : vector<288x128xbf16>, vector<128x128xbf16>, vector<288x128xf32> -> vector<288x128xf32>
    %48 = arith.addf %42, %47 : vector<288x128xf32>
    %c0_57 = arith.constant 0 : index
    %c0_58 = arith.constant 0 : index
    %49 = vector.load %arg10[%c0_57, %c0_58] : memref<288x128xf32, #tpu.memory_space<vmem>>, vector<288x128xf32>
    tpu.vector_store %arg10[%c0_57, %c0_58], %48 {strides = array<i32>} : memref<288x128xf32, #tpu.memory_space<vmem>>, vector<288x128xf32>,
    %c0_59 = arith.constant 0 : index
    %c0_60 = arith.constant 0 : index
    %50 = vector.load %arg10[%c0_59, %c0_60] : memref<288x128xf32, #tpu.memory_space<vmem>>, vector<288x128xf32>
    %c0_61 = arith.constant 0 : index
    %c36 = arith.constant 36 : index
    %c0_62 = arith.constant 0 : index
    %51 = vector.load %arg2[%c0_61, %c36, %c0_62] : memref<1x336x128xbf16, #tpu.memory_space<vmem>>, vector<1x288x128xbf16>
    %52 = vector.shape_cast %51 : vector<1x288x128xbf16> to vector<288x128xbf16>
    %c6 = arith.constant 6 : index
    %c0_63 = arith.constant 0 : index
    %c0_64 = arith.constant 0 : index
    %53 = vector.load %arg5[%c6, %c0_63, %c0_64] : memref<27x128x128xbf16, #tpu.memory_space<vmem>>, vector<1x128x128xbf16>
    %54 = vector.shape_cast %53 : vector<1x128x128xbf16> to vector<128x128xbf16>
    %cst_65 = arith.constant dense<0.000000e+00> : vector<288x128xf32>
    %55 = tpu.matmul %52, %54, %cst_65 {dimension_numbers = #tpu.dot_dimension_numbers<[1], [0], [0], [1], [0, 0, 1, 1], [], []>} : vector<288x128xbf16>, vector<128x128xbf16>, vector<288x128xf32> -> vector<288x128xf32>
    %56 = arith.addf %50, %55 : vector<288x128xf32>
    %c0_66 = arith.constant 0 : index
    %c0_67 = arith.constant 0 : index
    %57 = vector.load %arg10[%c0_66, %c0_67] : memref<288x128xf32, #tpu.memory_space<vmem>>, vector<288x128xf32>
    tpu.vector_store %arg10[%c0_66, %c0_67], %56 {strides = array<i32>} : memref<288x128xf32, #tpu.memory_space<vmem>>, vector<288x128xf32>,
    %c0_68 = arith.constant 0 : index
    %c0_69 = arith.constant 0 : index
    %58 = vector.load %arg10[%c0_68, %c0_69] : memref<288x128xf32, #tpu.memory_space<vmem>>, vector<288x128xf32>
    %c0_70 = arith.constant 0 : index
    %c37 = arith.constant 37 : index
    %c0_71 = arith.constant 0 : index
    %59 = vector.load %arg2[%c0_70, %c37, %c0_71] : memref<1x336x128xbf16, #tpu.memory_space<vmem>>, vector<1x288x128xbf16>
    %60 = vector.shape_cast %59 : vector<1x288x128xbf16> to vector<288x128xbf16>
    %c7 = arith.constant 7 : index
    %c0_72 = arith.constant 0 : index
    %c0_73 = arith.constant 0 : index
    %61 = vector.load %arg5[%c7, %c0_72, %c0_73] : memref<27x128x128xbf16, #tpu.memory_space<vmem>>, vector<1x128x128xbf16>
    %62 = vector.shape_cast %61 : vector<1x128x128xbf16> to vector<128x128xbf16>
    %cst_74 = arith.constant dense<0.000000e+00> : vector<288x128xf32>
    %63 = tpu.matmul %60, %62, %cst_74 {dimension_numbers = #tpu.dot_dimension_numbers<[1], [0], [0], [1], [0, 0, 1, 1], [], []>} : vector<288x128xbf16>, vector<128x128xbf16>, vector<288x128xf32> -> vector<288x128xf32>
    %64 = arith.addf %58, %63 : vector<288x128xf32>
    %c0_75 = arith.constant 0 : index
    %c0_76 = arith.constant 0 : index
    %65 = vector.load %arg10[%c0_75, %c0_76] : memref<288x128xf32, #tpu.memory_space<vmem>>, vector<288x128xf32>
    tpu.vector_store %arg10[%c0_75, %c0_76], %64 {strides = array<i32>} : memref<288x128xf32, #tpu.memory_space<vmem>>, vector<288x128xf32>,
    %c0_77 = arith.constant 0 : index
    %c0_78 = arith.constant 0 : index
    %66 = vector.load %arg10[%c0_77, %c0_78] : memref<288x128xf32, #tpu.memory_space<vmem>>, vector<288x128xf32>
    %c0_79 = arith.constant 0 : index
    %c38 = arith.constant 38 : index
    %c0_80 = arith.constant 0 : index
    %67 = vector.load %arg2[%c0_79, %c38, %c0_80] : memref<1x336x128xbf16, #tpu.memory_space<vmem>>, vector<1x288x128xbf16>
    %68 = vector.shape_cast %67 : vector<1x288x128xbf16> to vector<288x128xbf16>
    %c8 = arith.constant 8 : index
    %c0_81 = arith.constant 0 : index
    %c0_82 = arith.constant 0 : index
    %69 = vector.load %arg5[%c8, %c0_81, %c0_82] : memref<27x128x128xbf16, #tpu.memory_space<vmem>>, vector<1x128x128xbf16>
    %70 = vector.shape_cast %69 : vector<1x128x128xbf16> to vector<128x128xbf16>
    %cst_83 = arith.constant dense<0.000000e+00> : vector<288x128xf32>
    %71 = tpu.matmul %68, %70, %cst_83 {dimension_numbers = #tpu.dot_dimension_numbers<[1], [0], [0], [1], [0, 0, 1, 1], [], []>} : vector<288x128xbf16>, vector<128x128xbf16>, vector<288x128xf32> -> vector<288x128xf32>
    %72 = arith.addf %66, %71 : vector<288x128xf32>
    %c0_84 = arith.constant 0 : index
    %c0_85 = arith.constant 0 : index
    %73 = vector.load %arg10[%c0_84, %c0_85] : memref<288x128xf32, #tpu.memory_space<vmem>>, vector<288x128xf32>
    tpu.vector_store %arg10[%c0_84, %c0_85], %72 {strides = array<i32>} : memref<288x128xf32, #tpu.memory_space<vmem>>, vector<288x128xf32>,
    %c0_86 = arith.constant 0 : index
    %c0_87 = arith.constant 0 : index
    %74 = vector.load %arg10[%c0_86, %c0_87] : memref<288x128xf32, #tpu.memory_space<vmem>>, vector<288x128xf32>
    %c0_88 = arith.constant 0 : index
    %c0_89 = arith.constant 0 : index
    %c0_90 = arith.constant 0 : index
    %75 = vector.load %arg3[%c0_88, %c0_89, %c0_90] : memref<1x336x128xbf16, #tpu.memory_space<vmem>>, vector<1x288x128xbf16>
    %76 = vector.shape_cast %75 : vector<1x288x128xbf16> to vector<288x128xbf16>
    %c9 = arith.constant 9 : index
    %c0_91 = arith.constant 0 : index
    %c0_92 = arith.constant 0 : index
    %77 = vector.load %arg5[%c9, %c0_91, %c0_92] : memref<27x128x128xbf16, #tpu.memory_space<vmem>>, vector<1x128x128xbf16>
    %78 = vector.shape_cast %77 : vector<1x128x128xbf16> to vector<128x128xbf16>
    %cst_93 = arith.constant dense<0.000000e+00> : vector<288x128xf32>
    %79 = tpu.matmul %76, %78, %cst_93 {dimension_numbers = #tpu.dot_dimension_numbers<[1], [0], [0], [1], [0, 0, 1, 1], [], []>} : vector<288x128xbf16>, vector<128x128xbf16>, vector<288x128xf32> -> vector<288x128xf32>
    %80 = arith.addf %74, %79 : vector<288x128xf32>
    %c0_94 = arith.constant 0 : index
    %c0_95 = arith.constant 0 : index
    %81 = vector.load %arg10[%c0_94, %c0_95] : memref<288x128xf32, #tpu.memory_space<vmem>>, vector<288x128xf32>
    tpu.vector_store %arg10[%c0_94, %c0_95], %80 {strides = array<i32>} : memref<288x128xf32, #tpu.memory_space<vmem>>, vector<288x128xf32>,
    %c0_96 = arith.constant 0 : index
    %c0_97 = arith.constant 0 : index
    %82 = vector.load %arg10[%c0_96, %c0_97] : memref<288x128xf32, #tpu.memory_space<vmem>>, vector<288x128xf32>
    %c0_98 = arith.constant 0 : index
    %c1_99 = arith.constant 1 : index
    %c0_100 = arith.constant 0 : index
    %83 = vector.load %arg3[%c0_98, %c1_99, %c0_100] : memref<1x336x128xbf16, #tpu.memory_space<vmem>>, vector<1x288x128xbf16>
    %84 = vector.shape_cast %83 : vector<1x288x128xbf16> to vector<288x128xbf16>
    %c10 = arith.constant 10 : index
    %c0_101 = arith.constant 0 : index
    %c0_102 = arith.constant 0 : index
    %85 = vector.load %arg5[%c10, %c0_101, %c0_102] : memref<27x128x128xbf16, #tpu.memory_space<vmem>>, vector<1x128x128xbf16>
    %86 = vector.shape_cast %85 : vector<1x128x128xbf16> to vector<128x128xbf16>
    %cst_103 = arith.constant dense<0.000000e+00> : vector<288x128xf32>
    %87 = tpu.matmul %84, %86, %cst_103 {dimension_numbers = #tpu.dot_dimension_numbers<[1], [0], [0], [1], [0, 0, 1, 1], [], []>} : vector<288x128xbf16>, vector<128x128xbf16>, vector<288x128xf32> -> vector<288x128xf32>
    %88 = arith.addf %82, %87 : vector<288x128xf32>
    %c0_104 = arith.constant 0 : index
    %c0_105 = arith.constant 0 : index
    %89 = vector.load %arg10[%c0_104, %c0_105] : memref<288x128xf32, #tpu.memory_space<vmem>>, vector<288x128xf32>
    tpu.vector_store %arg10[%c0_104, %c0_105], %88 {strides = array<i32>} : memref<288x128xf32, #tpu.memory_space<vmem>>, vector<288x128xf32>,
    %c0_106 = arith.constant 0 : index
    %c0_107 = arith.constant 0 : index
    %90 = vector.load %arg10[%c0_106, %c0_107] : memref<288x128xf32, #tpu.memory_space<vmem>>, vector<288x128xf32>
    %c0_108 = arith.constant 0 : index
    %c2_109 = arith.constant 2 : index
    %c0_110 = arith.constant 0 : index
    %91 = vector.load %arg3[%c0_108, %c2_109, %c0_110] : memref<1x336x128xbf16, #tpu.memory_space<vmem>>, vector<1x288x128xbf16>
    %92 = vector.shape_cast %91 : vector<1x288x128xbf16> to vector<288x128xbf16>
    %c11 = arith.constant 11 : index
    %c0_111 = arith.constant 0 : index
    %c0_112 = arith.constant 0 : index
    %93 = vector.load %arg5[%c11, %c0_111, %c0_112] : memref<27x128x128xbf16, #tpu.memory_space<vmem>>, vector<1x128x128xbf16>
    %94 = vector.shape_cast %93 : vector<1x128x128xbf16> to vector<128x128xbf16>
    %cst_113 = arith.constant dense<0.000000e+00> : vector<288x128xf32>
    %95 = tpu.matmul %92, %94, %cst_113 {dimension_numbers = #tpu.dot_dimension_numbers<[1], [0], [0], [1], [0, 0, 1, 1], [], []>} : vector<288x128xbf16>, vector<128x128xbf16>, vector<288x128xf32> -> vector<288x128xf32>
    %96 = arith.addf %90, %95 : vector<288x128xf32>
    %c0_114 = arith.constant 0 : index
    %c0_115 = arith.constant 0 : index
    %97 = vector.load %arg10[%c0_114, %c0_115] : memref<288x128xf32, #tpu.memory_space<vmem>>, vector<288x128xf32>
    tpu.vector_store %arg10[%c0_114, %c0_115], %96 {strides = array<i32>} : memref<288x128xf32, #tpu.memory_space<vmem>>, vector<288x128xf32>,
    %c0_116 = arith.constant 0 : index
    %c0_117 = arith.constant 0 : index
    %98 = vector.load %arg10[%c0_116, %c0_117] : memref<288x128xf32, #tpu.memory_space<vmem>>, vector<288x128xf32>
    %c0_118 = arith.constant 0 : index
    %c18_119 = arith.constant 18 : index
    %c0_120 = arith.constant 0 : index
    %99 = vector.load %arg3[%c0_118, %c18_119, %c0_120] : memref<1x336x128xbf16, #tpu.memory_space<vmem>>, vector<1x288x128xbf16>
    %100 = vector.shape_cast %99 : vector<1x288x128xbf16> to vector<288x128xbf16>
    %c12 = arith.constant 12 : index
    %c0_121 = arith.constant 0 : index
    %c0_122 = arith.constant 0 : index
    %101 = vector.load %arg5[%c12, %c0_121, %c0_122] : memref<27x128x128xbf16, #tpu.memory_space<vmem>>, vector<1x128x128xbf16>
    %102 = vector.shape_cast %101 : vector<1x128x128xbf16> to vector<128x128xbf16>
    %cst_123 = arith.constant dense<0.000000e+00> : vector<288x128xf32>
    %103 = tpu.matmul %100, %102, %cst_123 {dimension_numbers = #tpu.dot_dimension_numbers<[1], [0], [0], [1], [0, 0, 1, 1], [], []>} : vector<288x128xbf16>, vector<128x128xbf16>, vector<288x128xf32> -> vector<288x128xf32>
    %104 = arith.addf %98, %103 : vector<288x128xf32>
    %c0_124 = arith.constant 0 : index
    %c0_125 = arith.constant 0 : index
    %105 = vector.load %arg10[%c0_124, %c0_125] : memref<288x128xf32, #tpu.memory_space<vmem>>, vector<288x128xf32>
    tpu.vector_store %arg10[%c0_124, %c0_125], %104 {strides = array<i32>} : memref<288x128xf32, #tpu.memory_space<vmem>>, vector<288x128xf32>,
    %c0_126 = arith.constant 0 : index
    %c0_127 = arith.constant 0 : index
    %106 = vector.load %arg10[%c0_126, %c0_127] : memref<288x128xf32, #tpu.memory_space<vmem>>, vector<288x128xf32>
    %c0_128 = arith.constant 0 : index
    %c19_129 = arith.constant 19 : index
    %c0_130 = arith.constant 0 : index
    %107 = vector.load %arg3[%c0_128, %c19_129, %c0_130] : memref<1x336x128xbf16, #tpu.memory_space<vmem>>, vector<1x288x128xbf16>
    %108 = vector.shape_cast %107 : vector<1x288x128xbf16> to vector<288x128xbf16>
    %c13 = arith.constant 13 : index
    %c0_131 = arith.constant 0 : index
    %c0_132 = arith.constant 0 : index
    %109 = vector.load %arg5[%c13, %c0_131, %c0_132] : memref<27x128x128xbf16, #tpu.memory_space<vmem>>, vector<1x128x128xbf16>
    %110 = vector.shape_cast %109 : vector<1x128x128xbf16> to vector<128x128xbf16>
    %cst_133 = arith.constant dense<0.000000e+00> : vector<288x128xf32>
    %111 = tpu.matmul %108, %110, %cst_133 {dimension_numbers = #tpu.dot_dimension_numbers<[1], [0], [0], [1], [0, 0, 1, 1], [], []>} : vector<288x128xbf16>, vector<128x128xbf16>, vector<288x128xf32> -> vector<288x128xf32>
    %112 = arith.addf %106, %111 : vector<288x128xf32>
    %c0_134 = arith.constant 0 : index
    %c0_135 = arith.constant 0 : index
    %113 = vector.load %arg10[%c0_134, %c0_135] : memref<288x128xf32, #tpu.memory_space<vmem>>, vector<288x128xf32>
    tpu.vector_store %arg10[%c0_134, %c0_135], %112 {strides = array<i32>} : memref<288x128xf32, #tpu.memory_space<vmem>>, vector<288x128xf32>,
    %c0_136 = arith.constant 0 : index
    %c0_137 = arith.constant 0 : index
    %114 = vector.load %arg10[%c0_136, %c0_137] : memref<288x128xf32, #tpu.memory_space<vmem>>, vector<288x128xf32>
    %c0_138 = arith.constant 0 : index
    %c20_139 = arith.constant 20 : index
    %c0_140 = arith.constant 0 : index
    %115 = vector.load %arg3[%c0_138, %c20_139, %c0_140] : memref<1x336x128xbf16, #tpu.memory_space<vmem>>, vector<1x288x128xbf16>
    %116 = vector.shape_cast %115 : vector<1x288x128xbf16> to vector<288x128xbf16>
    %c14 = arith.constant 14 : index
    %c0_141 = arith.constant 0 : index
    %c0_142 = arith.constant 0 : index
    %117 = vector.load %arg5[%c14, %c0_141, %c0_142] : memref<27x128x128xbf16, #tpu.memory_space<vmem>>, vector<1x128x128xbf16>
    %118 = vector.shape_cast %117 : vector<1x128x128xbf16> to vector<128x128xbf16>
    %cst_143 = arith.constant dense<0.000000e+00> : vector<288x128xf32>
    %119 = tpu.matmul %116, %118, %cst_143 {dimension_numbers = #tpu.dot_dimension_numbers<[1], [0], [0], [1], [0, 0, 1, 1], [], []>} : vector<288x128xbf16>, vector<128x128xbf16>, vector<288x128xf32> -> vector<288x128xf32>
    %120 = arith.addf %114, %119 : vector<288x128xf32>
    %c0_144 = arith.constant 0 : index
    %c0_145 = arith.constant 0 : index
    %121 = vector.load %arg10[%c0_144, %c0_145] : memref<288x128xf32, #tpu.memory_space<vmem>>, vector<288x128xf32>
    tpu.vector_store %arg10[%c0_144, %c0_145], %120 {strides = array<i32>} : memref<288x128xf32, #tpu.memory_space<vmem>>, vector<288x128xf32>,
    %c0_146 = arith.constant 0 : index
    %c0_147 = arith.constant 0 : index
    %122 = vector.load %arg10[%c0_146, %c0_147] : memref<288x128xf32, #tpu.memory_space<vmem>>, vector<288x128xf32>
    %c0_148 = arith.constant 0 : index
    %c36_149 = arith.constant 36 : index
    %c0_150 = arith.constant 0 : index
    %123 = vector.load %arg3[%c0_148, %c36_149, %c0_150] : memref<1x336x128xbf16, #tpu.memory_space<vmem>>, vector<1x288x128xbf16>
    %124 = vector.shape_cast %123 : vector<1x288x128xbf16> to vector<288x128xbf16>
    %c15 = arith.constant 15 : index
    %c0_151 = arith.constant 0 : index
    %c0_152 = arith.constant 0 : index
    %125 = vector.load %arg5[%c15, %c0_151, %c0_152] : memref<27x128x128xbf16, #tpu.memory_space<vmem>>, vector<1x128x128xbf16>
    %126 = vector.shape_cast %125 : vector<1x128x128xbf16> to vector<128x128xbf16>
    %cst_153 = arith.constant dense<0.000000e+00> : vector<288x128xf32>
    %127 = tpu.matmul %124, %126, %cst_153 {dimension_numbers = #tpu.dot_dimension_numbers<[1], [0], [0], [1], [0, 0, 1, 1], [], []>} : vector<288x128xbf16>, vector<128x128xbf16>, vector<288x128xf32> -> vector<288x128xf32>
    %128 = arith.addf %122, %127 : vector<288x128xf32>
    %c0_154 = arith.constant 0 : index
    %c0_155 = arith.constant 0 : index
    %129 = vector.load %arg10[%c0_154, %c0_155] : memref<288x128xf32, #tpu.memory_space<vmem>>, vector<288x128xf32>
    tpu.vector_store %arg10[%c0_154, %c0_155], %128 {strides = array<i32>} : memref<288x128xf32, #tpu.memory_space<vmem>>, vector<288x128xf32>,
    %c0_156 = arith.constant 0 : index
    %c0_157 = arith.constant 0 : index
    %130 = vector.load %arg10[%c0_156, %c0_157] : memref<288x128xf32, #tpu.memory_space<vmem>>, vector<288x128xf32>
    %c0_158 = arith.constant 0 : index
    %c37_159 = arith.constant 37 : index
    %c0_160 = arith.constant 0 : index
    %131 = vector.load %arg3[%c0_158, %c37_159, %c0_160] : memref<1x336x128xbf16, #tpu.memory_space<vmem>>, vector<1x288x128xbf16>
    %132 = vector.shape_cast %131 : vector<1x288x128xbf16> to vector<288x128xbf16>
    %c16 = arith.constant 16 : index
    %c0_161 = arith.constant 0 : index
    %c0_162 = arith.constant 0 : index
    %133 = vector.load %arg5[%c16, %c0_161, %c0_162] : memref<27x128x128xbf16, #tpu.memory_space<vmem>>, vector<1x128x128xbf16>
    %134 = vector.shape_cast %133 : vector<1x128x128xbf16> to vector<128x128xbf16>
    %cst_163 = arith.constant dense<0.000000e+00> : vector<288x128xf32>
    %135 = tpu.matmul %132, %134, %cst_163 {dimension_numbers = #tpu.dot_dimension_numbers<[1], [0], [0], [1], [0, 0, 1, 1], [], []>} : vector<288x128xbf16>, vector<128x128xbf16>, vector<288x128xf32> -> vector<288x128xf32>
    %136 = arith.addf %130, %135 : vector<288x128xf32>
    %c0_164 = arith.constant 0 : index
    %c0_165 = arith.constant 0 : index
    %137 = vector.load %arg10[%c0_164, %c0_165] : memref<288x128xf32, #tpu.memory_space<vmem>>, vector<288x128xf32>
    tpu.vector_store %arg10[%c0_164, %c0_165], %136 {strides = array<i32>} : memref<288x128xf32, #tpu.memory_space<vmem>>, vector<288x128xf32>,
    %c0_166 = arith.constant 0 : index
    %c0_167 = arith.constant 0 : index
    %138 = vector.load %arg10[%c0_166, %c0_167] : memref<288x128xf32, #tpu.memory_space<vmem>>, vector<288x128xf32>
    %c0_168 = arith.constant 0 : index
    %c38_169 = arith.constant 38 : index
    %c0_170 = arith.constant 0 : index
    %139 = vector.load %arg3[%c0_168, %c38_169, %c0_170] : memref<1x336x128xbf16, #tpu.memory_space<vmem>>, vector<1x288x128xbf16>
    %140 = vector.shape_cast %139 : vector<1x288x128xbf16> to vector<288x128xbf16>
    %c17 = arith.constant 17 : index
    %c0_171 = arith.constant 0 : index
    %c0_172 = arith.constant 0 : index
    %141 = vector.load %arg5[%c17, %c0_171, %c0_172] : memref<27x128x128xbf16, #tpu.memory_space<vmem>>, vector<1x128x128xbf16>
    %142 = vector.shape_cast %141 : vector<1x128x128xbf16> to vector<128x128xbf16>
    %cst_173 = arith.constant dense<0.000000e+00> : vector<288x128xf32>
    %143 = tpu.matmul %140, %142, %cst_173 {dimension_numbers = #tpu.dot_dimension_numbers<[1], [0], [0], [1], [0, 0, 1, 1], [], []>} : vector<288x128xbf16>, vector<128x128xbf16>, vector<288x128xf32> -> vector<288x128xf32>
    %144 = arith.addf %138, %143 : vector<288x128xf32>
    %c0_174 = arith.constant 0 : index
    %c0_175 = arith.constant 0 : index
    %145 = vector.load %arg10[%c0_174, %c0_175] : memref<288x128xf32, #tpu.memory_space<vmem>>, vector<288x128xf32>
    tpu.vector_store %arg10[%c0_174, %c0_175], %144 {strides = array<i32>} : memref<288x128xf32, #tpu.memory_space<vmem>>, vector<288x128xf32>,
    %c0_176 = arith.constant 0 : index
    %c0_177 = arith.constant 0 : index
    %146 = vector.load %arg10[%c0_176, %c0_177] : memref<288x128xf32, #tpu.memory_space<vmem>>, vector<288x128xf32>
    %c0_178 = arith.constant 0 : index
    %c0_179 = arith.constant 0 : index
    %c0_180 = arith.constant 0 : index
    %147 = vector.load %arg4[%c0_178, %c0_179, %c0_180] : memref<1x336x128xbf16, #tpu.memory_space<vmem>>, vector<1x288x128xbf16>
    %148 = vector.shape_cast %147 : vector<1x288x128xbf16> to vector<288x128xbf16>
    %c18_181 = arith.constant 18 : index
    %c0_182 = arith.constant 0 : index
    %c0_183 = arith.constant 0 : index
    %149 = vector.load %arg5[%c18_181, %c0_182, %c0_183] : memref<27x128x128xbf16, #tpu.memory_space<vmem>>, vector<1x128x128xbf16>
    %150 = vector.shape_cast %149 : vector<1x128x128xbf16> to vector<128x128xbf16>
    %cst_184 = arith.constant dense<0.000000e+00> : vector<288x128xf32>
    %151 = tpu.matmul %148, %150, %cst_184 {dimension_numbers = #tpu.dot_dimension_numbers<[1], [0], [0], [1], [0, 0, 1, 1], [], []>} : vector<288x128xbf16>, vector<128x128xbf16>, vector<288x128xf32> -> vector<288x128xf32>
    %152 = arith.addf %146, %151 : vector<288x128xf32>
    %c0_185 = arith.constant 0 : index
    %c0_186 = arith.constant 0 : index
    %153 = vector.load %arg10[%c0_185, %c0_186] : memref<288x128xf32, #tpu.memory_space<vmem>>, vector<288x128xf32>
    tpu.vector_store %arg10[%c0_185, %c0_186], %152 {strides = array<i32>} : memref<288x128xf32, #tpu.memory_space<vmem>>, vector<288x128xf32>,
    %c0_187 = arith.constant 0 : index
    %c0_188 = arith.constant 0 : index
    %154 = vector.load %arg10[%c0_187, %c0_188] : memref<288x128xf32, #tpu.memory_space<vmem>>, vector<288x128xf32>
    %c0_189 = arith.constant 0 : index
    %c1_190 = arith.constant 1 : index
    %c0_191 = arith.constant 0 : index
    %155 = vector.load %arg4[%c0_189, %c1_190, %c0_191] : memref<1x336x128xbf16, #tpu.memory_space<vmem>>, vector<1x288x128xbf16>
    %156 = vector.shape_cast %155 : vector<1x288x128xbf16> to vector<288x128xbf16>
    %c19_192 = arith.constant 19 : index
    %c0_193 = arith.constant 0 : index
    %c0_194 = arith.constant 0 : index
    %157 = vector.load %arg5[%c19_192, %c0_193, %c0_194] : memref<27x128x128xbf16, #tpu.memory_space<vmem>>, vector<1x128x128xbf16>
    %158 = vector.shape_cast %157 : vector<1x128x128xbf16> to vector<128x128xbf16>
    %cst_195 = arith.constant dense<0.000000e+00> : vector<288x128xf32>
    %159 = tpu.matmul %156, %158, %cst_195 {dimension_numbers = #tpu.dot_dimension_numbers<[1], [0], [0], [1], [0, 0, 1, 1], [], []>} : vector<288x128xbf16>, vector<128x128xbf16>, vector<288x128xf32> -> vector<288x128xf32>
    %160 = arith.addf %154, %159 : vector<288x128xf32>
    %c0_196 = arith.constant 0 : index
    %c0_197 = arith.constant 0 : index
    %161 = vector.load %arg10[%c0_196, %c0_197] : memref<288x128xf32, #tpu.memory_space<vmem>>, vector<288x128xf32>
    tpu.vector_store %arg10[%c0_196, %c0_197], %160 {strides = array<i32>} : memref<288x128xf32, #tpu.memory_space<vmem>>, vector<288x128xf32>,
    %c0_198 = arith.constant 0 : index
    %c0_199 = arith.constant 0 : index
    %162 = vector.load %arg10[%c0_198, %c0_199] : memref<288x128xf32, #tpu.memory_space<vmem>>, vector<288x128xf32>
    %c0_200 = arith.constant 0 : index
    %c2_201 = arith.constant 2 : index
    %c0_202 = arith.constant 0 : index
    %163 = vector.load %arg4[%c0_200, %c2_201, %c0_202] : memref<1x336x128xbf16, #tpu.memory_space<vmem>>, vector<1x288x128xbf16>
    %164 = vector.shape_cast %163 : vector<1x288x128xbf16> to vector<288x128xbf16>
    %c20_203 = arith.constant 20 : index
    %c0_204 = arith.constant 0 : index
    %c0_205 = arith.constant 0 : index
    %165 = vector.load %arg5[%c20_203, %c0_204, %c0_205] : memref<27x128x128xbf16, #tpu.memory_space<vmem>>, vector<1x128x128xbf16>
    %166 = vector.shape_cast %165 : vector<1x128x128xbf16> to vector<128x128xbf16>
    %cst_206 = arith.constant dense<0.000000e+00> : vector<288x128xf32>
    %167 = tpu.matmul %164, %166, %cst_206 {dimension_numbers = #tpu.dot_dimension_numbers<[1], [0], [0], [1], [0, 0, 1, 1], [], []>} : vector<288x128xbf16>, vector<128x128xbf16>, vector<288x128xf32> -> vector<288x128xf32>
    %168 = arith.addf %162, %167 : vector<288x128xf32>
    %c0_207 = arith.constant 0 : index
    %c0_208 = arith.constant 0 : index
    %169 = vector.load %arg10[%c0_207, %c0_208] : memref<288x128xf32, #tpu.memory_space<vmem>>, vector<288x128xf32>
    tpu.vector_store %arg10[%c0_207, %c0_208], %168 {strides = array<i32>} : memref<288x128xf32, #tpu.memory_space<vmem>>, vector<288x128xf32>,
    %c0_209 = arith.constant 0 : index
    %c0_210 = arith.constant 0 : index
    %170 = vector.load %arg10[%c0_209, %c0_210] : memref<288x128xf32, #tpu.memory_space<vmem>>, vector<288x128xf32>
    %c0_211 = arith.constant 0 : index
    %c18_212 = arith.constant 18 : index
    %c0_213 = arith.constant 0 : index
    %171 = vector.load %arg4[%c0_211, %c18_212, %c0_213] : memref<1x336x128xbf16, #tpu.memory_space<vmem>>, vector<1x288x128xbf16>
    %172 = vector.shape_cast %171 : vector<1x288x128xbf16> to vector<288x128xbf16>
    %c21 = arith.constant 21 : index
    %c0_214 = arith.constant 0 : index
    %c0_215 = arith.constant 0 : index
    %173 = vector.load %arg5[%c21, %c0_214, %c0_215] : memref<27x128x128xbf16, #tpu.memory_space<vmem>>, vector<1x128x128xbf16>
    %174 = vector.shape_cast %173 : vector<1x128x128xbf16> to vector<128x128xbf16>
    %cst_216 = arith.constant dense<0.000000e+00> : vector<288x128xf32>
    %175 = tpu.matmul %172, %174, %cst_216 {dimension_numbers = #tpu.dot_dimension_numbers<[1], [0], [0], [1], [0, 0, 1, 1], [], []>} : vector<288x128xbf16>, vector<128x128xbf16>, vector<288x128xf32> -> vector<288x128xf32>
    %176 = arith.addf %170, %175 : vector<288x128xf32>
    %c0_217 = arith.constant 0 : index
    %c0_218 = arith.constant 0 : index
    %177 = vector.load %arg10[%c0_217, %c0_218] : memref<288x128xf32, #tpu.memory_space<vmem>>, vector<288x128xf32>
    tpu.vector_store %arg10[%c0_217, %c0_218], %176 {strides = array<i32>} : memref<288x128xf32, #tpu.memory_space<vmem>>, vector<288x128xf32>,
    %c0_219 = arith.constant 0 : index
    %c0_220 = arith.constant 0 : index
    %178 = vector.load %arg10[%c0_219, %c0_220] : memref<288x128xf32, #tpu.memory_space<vmem>>, vector<288x128xf32>
    %c0_221 = arith.constant 0 : index
    %c19_222 = arith.constant 19 : index
    %c0_223 = arith.constant 0 : index
    %179 = vector.load %arg4[%c0_221, %c19_222, %c0_223] : memref<1x336x128xbf16, #tpu.memory_space<vmem>>, vector<1x288x128xbf16>
    %180 = vector.shape_cast %179 : vector<1x288x128xbf16> to vector<288x128xbf16>
    %c22 = arith.constant 22 : index
    %c0_224 = arith.constant 0 : index
    %c0_225 = arith.constant 0 : index
    %181 = vector.load %arg5[%c22, %c0_224, %c0_225] : memref<27x128x128xbf16, #tpu.memory_space<vmem>>, vector<1x128x128xbf16>
    %182 = vector.shape_cast %181 : vector<1x128x128xbf16> to vector<128x128xbf16>
    %cst_226 = arith.constant dense<0.000000e+00> : vector<288x128xf32>
    %183 = tpu.matmul %180, %182, %cst_226 {dimension_numbers = #tpu.dot_dimension_numbers<[1], [0], [0], [1], [0, 0, 1, 1], [], []>} : vector<288x128xbf16>, vector<128x128xbf16>, vector<288x128xf32> -> vector<288x128xf32>
    %184 = arith.addf %178, %183 : vector<288x128xf32>
    %c0_227 = arith.constant 0 : index
    %c0_228 = arith.constant 0 : index
    %185 = vector.load %arg10[%c0_227, %c0_228] : memref<288x128xf32, #tpu.memory_space<vmem>>, vector<288x128xf32>
    tpu.vector_store %arg10[%c0_227, %c0_228], %184 {strides = array<i32>} : memref<288x128xf32, #tpu.memory_space<vmem>>, vector<288x128xf32>,
    %c0_229 = arith.constant 0 : index
    %c0_230 = arith.constant 0 : index
    %186 = vector.load %arg10[%c0_229, %c0_230] : memref<288x128xf32, #tpu.memory_space<vmem>>, vector<288x128xf32>
    %c0_231 = arith.constant 0 : index
    %c20_232 = arith.constant 20 : index
    %c0_233 = arith.constant 0 : index
    %187 = vector.load %arg4[%c0_231, %c20_232, %c0_233] : memref<1x336x128xbf16, #tpu.memory_space<vmem>>, vector<1x288x128xbf16>
    %188 = vector.shape_cast %187 : vector<1x288x128xbf16> to vector<288x128xbf16>
    %c23 = arith.constant 23 : index
    %c0_234 = arith.constant 0 : index
    %c0_235 = arith.constant 0 : index
    %189 = vector.load %arg5[%c23, %c0_234, %c0_235] : memref<27x128x128xbf16, #tpu.memory_space<vmem>>, vector<1x128x128xbf16>
    %190 = vector.shape_cast %189 : vector<1x128x128xbf16> to vector<128x128xbf16>
    %cst_236 = arith.constant dense<0.000000e+00> : vector<288x128xf32>
    %191 = tpu.matmul %188, %190, %cst_236 {dimension_numbers = #tpu.dot_dimension_numbers<[1], [0], [0], [1], [0, 0, 1, 1], [], []>} : vector<288x128xbf16>, vector<128x128xbf16>, vector<288x128xf32> -> vector<288x128xf32>
    %192 = arith.addf %186, %191 : vector<288x128xf32>
    %c0_237 = arith.constant 0 : index
    %c0_238 = arith.constant 0 : index
    %193 = vector.load %arg10[%c0_237, %c0_238] : memref<288x128xf32, #tpu.memory_space<vmem>>, vector<288x128xf32>
    tpu.vector_store %arg10[%c0_237, %c0_238], %192 {strides = array<i32>} : memref<288x128xf32, #tpu.memory_space<vmem>>, vector<288x128xf32>,
    %c0_239 = arith.constant 0 : index
    %c0_240 = arith.constant 0 : index
    %194 = vector.load %arg10[%c0_239, %c0_240] : memref<288x128xf32, #tpu.memory_space<vmem>>, vector<288x128xf32>
    %c0_241 = arith.constant 0 : index
    %c36_242 = arith.constant 36 : index
    %c0_243 = arith.constant 0 : index
    %195 = vector.load %arg4[%c0_241, %c36_242, %c0_243] : memref<1x336x128xbf16, #tpu.memory_space<vmem>>, vector<1x288x128xbf16>
    %196 = vector.shape_cast %195 : vector<1x288x128xbf16> to vector<288x128xbf16>
    %c24 = arith.constant 24 : index
    %c0_244 = arith.constant 0 : index
    %c0_245 = arith.constant 0 : index
    %197 = vector.load %arg5[%c24, %c0_244, %c0_245] : memref<27x128x128xbf16, #tpu.memory_space<vmem>>, vector<1x128x128xbf16>
    %198 = vector.shape_cast %197 : vector<1x128x128xbf16> to vector<128x128xbf16>
    %cst_246 = arith.constant dense<0.000000e+00> : vector<288x128xf32>
    %199 = tpu.matmul %196, %198, %cst_246 {dimension_numbers = #tpu.dot_dimension_numbers<[1], [0], [0], [1], [0, 0, 1, 1], [], []>} : vector<288x128xbf16>, vector<128x128xbf16>, vector<288x128xf32> -> vector<288x128xf32>
    %200 = arith.addf %194, %199 : vector<288x128xf32>
    %c0_247 = arith.constant 0 : index
    %c0_248 = arith.constant 0 : index
    %201 = vector.load %arg10[%c0_247, %c0_248] : memref<288x128xf32, #tpu.memory_space<vmem>>, vector<288x128xf32>
    tpu.vector_store %arg10[%c0_247, %c0_248], %200 {strides = array<i32>} : memref<288x128xf32, #tpu.memory_space<vmem>>, vector<288x128xf32>,
    %c0_249 = arith.constant 0 : index
    %c0_250 = arith.constant 0 : index
    %202 = vector.load %arg10[%c0_249, %c0_250] : memref<288x128xf32, #tpu.memory_space<vmem>>, vector<288x128xf32>
    %c0_251 = arith.constant 0 : index
    %c37_252 = arith.constant 37 : index
    %c0_253 = arith.constant 0 : index
    %203 = vector.load %arg4[%c0_251, %c37_252, %c0_253] : memref<1x336x128xbf16, #tpu.memory_space<vmem>>, vector<1x288x128xbf16>
    %204 = vector.shape_cast %203 : vector<1x288x128xbf16> to vector<288x128xbf16>
    %c25 = arith.constant 25 : index
    %c0_254 = arith.constant 0 : index
    %c0_255 = arith.constant 0 : index
    %205 = vector.load %arg5[%c25, %c0_254, %c0_255] : memref<27x128x128xbf16, #tpu.memory_space<vmem>>, vector<1x128x128xbf16>
    %206 = vector.shape_cast %205 : vector<1x128x128xbf16> to vector<128x128xbf16>
    %cst_256 = arith.constant dense<0.000000e+00> : vector<288x128xf32>
    %207 = tpu.matmul %204, %206, %cst_256 {dimension_numbers = #tpu.dot_dimension_numbers<[1], [0], [0], [1], [0, 0, 1, 1], [], []>} : vector<288x128xbf16>, vector<128x128xbf16>, vector<288x128xf32> -> vector<288x128xf32>
    %208 = arith.addf %202, %207 : vector<288x128xf32>
    %c0_257 = arith.constant 0 : index
    %c0_258 = arith.constant 0 : index
    %209 = vector.load %arg10[%c0_257, %c0_258] : memref<288x128xf32, #tpu.memory_space<vmem>>, vector<288x128xf32>
    tpu.vector_store %arg10[%c0_257, %c0_258], %208 {strides = array<i32>} : memref<288x128xf32, #tpu.memory_space<vmem>>, vector<288x128xf32>,
    %c0_259 = arith.constant 0 : index
    %c0_260 = arith.constant 0 : index
    %210 = vector.load %arg10[%c0_259, %c0_260] : memref<288x128xf32, #tpu.memory_space<vmem>>, vector<288x128xf32>
    %c0_261 = arith.constant 0 : index
    %c38_262 = arith.constant 38 : index
    %c0_263 = arith.constant 0 : index
    %211 = vector.load %arg4[%c0_261, %c38_262, %c0_263] : memref<1x336x128xbf16, #tpu.memory_space<vmem>>, vector<1x288x128xbf16>
    %212 = vector.shape_cast %211 : vector<1x288x128xbf16> to vector<288x128xbf16>
    %c26 = arith.constant 26 : index
    %c0_264 = arith.constant 0 : index
    %c0_265 = arith.constant 0 : index
    %213 = vector.load %arg5[%c26, %c0_264, %c0_265] : memref<27x128x128xbf16, #tpu.memory_space<vmem>>, vector<1x128x128xbf16>
    %214 = vector.shape_cast %213 : vector<1x128x128xbf16> to vector<128x128xbf16>
    %cst_266 = arith.constant dense<0.000000e+00> : vector<288x128xf32>
    %215 = tpu.matmul %212, %214, %cst_266 {dimension_numbers = #tpu.dot_dimension_numbers<[1], [0], [0], [1], [0, 0, 1, 1], [], []>} : vector<288x128xbf16>, vector<128x128xbf16>, vector<288x128xf32> -> vector<288x128xf32>
    %216 = arith.addf %210, %215 : vector<288x128xf32>
    %c0_267 = arith.constant 0 : index
    %c0_268 = arith.constant 0 : index
    %217 = vector.load %arg10[%c0_267, %c0_268] : memref<288x128xf32, #tpu.memory_space<vmem>>, vector<288x128xf32>
    tpu.vector_store %arg10[%c0_267, %c0_268], %216 {strides = array<i32>} : memref<288x128xf32, #tpu.memory_space<vmem>>, vector<288x128xf32>,
    %c0_269 = arith.constant 0 : index
    %c0_270 = arith.constant 0 : index
    %218 = vector.load %arg10[%c0_269, %c0_270] : memref<288x128xf32, #tpu.memory_space<vmem>>, vector<288x128xf32>
    %c0_271 = arith.constant 0 : index
    %c0_272 = arith.constant 0 : index
    %219 = vector.load %arg6[%c0_271, %c0_272] : memref<1x128xf32, #tpu.memory_space<vmem>>, vector<1x128xf32>
    %220 = vector.broadcast %219 : vector<1x128xf32> to vector<288x128xf32>
    %221 = arith.addf %218, %220 : vector<288x128xf32>
    %c0_273 = arith.constant 0 : index
    %c0_274 = arith.constant 0 : index
    %222 = vector.load %arg7[%c0_273, %c0_274] : memref<288x1xf32, #tpu.memory_space<vmem>>, vector<288x1xf32>
    %223 = vector.broadcast %222 : vector<288x1xf32> to vector<288x128xf32>
    %224 = arith.mulf %221, %223 : vector<288x128xf32>
    %c0_275 = arith.constant 0 : index
    %c0_276 = arith.constant 0 : index
    %c0_277 = arith.constant 0 : index
    %c0_278 = arith.constant 0 : index
    %225 = vector.load %arg8[%c0_275, %c0_276, %c0_277, %c0_278] : memref<1x1x288x128xf32, #tpu.memory_space<vmem>>, vector<1x1x288x128xf32>
    %226 = vector.shape_cast %225 : vector<1x1x288x128xf32> to vector<288x128xf32>
    %227 = vector.shape_cast %224 : vector<288x128xf32> to vector<1x1x288x128xf32>
    tpu.vector_store %arg8[%c0_275, %c0_276, %c0_277, %c0_278], %227 {strides = array<i32>} : memref<1x1x288x128xf32, #tpu.memory_space<vmem>>, vector<1x1x288x128xf32>,
    %cst_279 = arith.constant dense<0.000000e+00> : vector<128xf32>
    %228 = vector.multi_reduction <add>, %224, %cst_279 [0] : vector<288x128xf32> to vector<128xf32>
    %229 = vector.shape_cast %228 : vector<128xf32> to vector<1x128xf32>
    %230 = arith.mulf %224, %224 : vector<288x128xf32>
    %cst_280 = arith.constant dense<0.000000e+00> : vector<128xf32>
    %231 = vector.multi_reduction <add>, %230, %cst_280 [0] : vector<288x128xf32> to vector<128xf32>
    %232 = vector.shape_cast %231 : vector<128xf32> to vector<1x128xf32>
    %cst_281 = arith.constant 0.000000e+00 : f32
    %233 = vector.broadcast %cst_281 : f32 to vector<6x128xf32>
    %234 = tpu.concatenate %229, %232, %233 in 0 : vector<1x128xf32>, vector<1x128xf32>, vector<6x128xf32> -> vector<8x128xf32>
    %c0_282 = arith.constant 0 : index
    %c0_283 = arith.constant 0 : index
    %c0_284 = arith.constant 0 : index
    %c0_285 = arith.constant 0 : index
    %235 = vector.load %arg9[%c0_282, %c0_283, %c0_284, %c0_285] : memref<1x1x8x128xf32, #tpu.memory_space<vmem>>, vector<1x1x8x128xf32>
    %236 = vector.shape_cast %235 : vector<1x1x8x128xf32> to vector<8x128xf32>
    %237 = vector.shape_cast %234 : vector<8x128xf32> to vector<1x1x8x128xf32>
    tpu.vector_store %arg9[%c0_282, %c0_283, %c0_284, %c0_285], %237 {strides = array<i32>} : memref<1x1x8x128xf32, #tpu.memory_space<vmem>>, vector<1x1x8x128xf32>,
    return
  }
  func.func @transform_0(%arg0: i32, %arg1: i32) -> (i32, i32, i32) {
    %c18_i32 = arith.constant 18 : i32
    %0 = arith.muli %arg0, %c18_i32 : i32
    %1 = arith.addi %0, %arg1 : i32
    %c0_i32 = arith.constant 0 : i32
    %2 = arith.addi %1, %c0_i32 : i32
    %c0_i32_0 = arith.constant 0 : i32
    %c0_i32_1 = arith.constant 0 : i32
    %c0_i32_2 = arith.constant 0 : i32
    return %2, %c0_i32_0, %c0_i32_1 : i32, i32, i32
  }
  func.func @transform_1(%arg0: i32, %arg1: i32) -> (i32, i32, i32) {
    %c18_i32 = arith.constant 18 : i32
    %0 = arith.muli %arg0, %c18_i32 : i32
    %1 = arith.addi %0, %arg1 : i32
    %c1_i32 = arith.constant 1 : i32
    %2 = arith.addi %1, %c1_i32 : i32
    %c0_i32 = arith.constant 0 : i32
    %c0_i32_0 = arith.constant 0 : i32
    %c0_i32_1 = arith.constant 0 : i32
    return %2, %c0_i32, %c0_i32_0 : i32, i32, i32
  }
  func.func @transform_2(%arg0: i32, %arg1: i32) -> (i32, i32, i32) {
    %c18_i32 = arith.constant 18 : i32
    %0 = arith.muli %arg0, %c18_i32 : i32
    %1 = arith.addi %0, %arg1 : i32
    %c2_i32 = arith.constant 2 : i32
    %2 = arith.addi %1, %c2_i32 : i32
    %c0_i32 = arith.constant 0 : i32
    %c0_i32_0 = arith.constant 0 : i32
    %c0_i32_1 = arith.constant 0 : i32
    return %2, %c0_i32, %c0_i32_0 : i32, i32, i32
  }
  func.func @transform_3(%arg0: i32, %arg1: i32) -> (i32, i32, i32) {
    %c0_i32 = arith.constant 0 : i32
    %c0_i32_0 = arith.constant 0 : i32
    %c0_i32_1 = arith.constant 0 : i32
    %c0_i32_2 = arith.constant 0 : i32
    return %c0_i32, %c0_i32_0, %c0_i32_1 : i32, i32, i32
  }
  func.func @transform_4(%arg0: i32, %arg1: i32) -> (i32, i32) {
    %c0_i32 = arith.constant 0 : i32
    %c0_i32_0 = arith.constant 0 : i32
    %c0_i32_1 = arith.constant 0 : i32
    return %c0_i32, %c0_i32_0 : i32, i32
  }
  func.func @transform_5(%arg0: i32, %arg1: i32) -> (i32, i32) {
    %c0_i32 = arith.constant 0 : i32
    %c0_i32_0 = arith.constant 0 : i32
    %c0_i32_1 = arith.constant 0 : i32
    return %c0_i32, %c0_i32_0 : i32, i32
  }
  func.func @transform_6(%arg0: i32, %arg1: i32) -> (i32, i32, i32, i32) {
    %c0_i32 = arith.constant 0 : i32
    %c0_i32_0 = arith.constant 0 : i32
    %c0_i32_1 = arith.constant 0 : i32
    return %arg0, %arg1, %c0_i32, %c0_i32_0 : i32, i32, i32, i32
  }
  func.func @transform_7(%arg0: i32, %arg1: i32) -> (i32, i32, i32, i32) {
    %c0_i32 = arith.constant 0 : i32
    %c0_i32_0 = arith.constant 0 : i32
    %c0_i32_1 = arith.constant 0 : i32
    return %arg0, %arg1, %c0_i32, %c0_i32_0 : i32, i32, i32, i32
  }
}

module attributes {stable_mosaic.version = 11 : i64} {
  func.func @_bn_relu_kernel(%arg0: i32, %arg1: memref<512x128xf32, #tpu.memory_space<vmem>>, %arg2: memref<1x128xf32, #tpu.memory_space<vmem>>, %arg3: memref<1x128xf32, #tpu.memory_space<vmem>>, %arg4: memref<512x128xbf16, #tpu.memory_space<vmem>>) attributes {dimension_semantics = [#tpu.dimension_semantics<parallel>], iteration_bounds = array<i64: 16>, scalar_prefetch = 0 : i64, scratch_operands = 0 : i64, tpu.core_type = #tpu.core_type<tc>, window_params = [{transform_indices = @transform_0, window_bounds = array<i64: 512, 128>}, {pipeline_mode = #tpu.pipeline_mode<synchronous>, transform_indices = @transform_1, window_bounds = array<i64: 1, 128>}, {pipeline_mode = #tpu.pipeline_mode<synchronous>, transform_indices = @transform_2, window_bounds = array<i64: 1, 128>}, {transform_indices = @transform_3, window_bounds = array<i64: 512, 128>}]} {
    %c0 = arith.constant 0 : index
    %c0_0 = arith.constant 0 : index
    %0 = vector.load %arg1[%c0, %c0_0] : memref<512x128xf32, #tpu.memory_space<vmem>>, vector<512x128xf32>
    %c0_1 = arith.constant 0 : index
    %c0_2 = arith.constant 0 : index
    %1 = vector.load %arg2[%c0_1, %c0_2] : memref<1x128xf32, #tpu.memory_space<vmem>>, vector<1x128xf32>
    %2 = vector.broadcast %1 : vector<1x128xf32> to vector<512x128xf32>
    %3 = arith.mulf %0, %2 : vector<512x128xf32>
    %c0_3 = arith.constant 0 : index
    %c0_4 = arith.constant 0 : index
    %4 = vector.load %arg3[%c0_3, %c0_4] : memref<1x128xf32, #tpu.memory_space<vmem>>, vector<1x128xf32>
    %5 = vector.broadcast %4 : vector<1x128xf32> to vector<512x128xf32>
    %6 = arith.addf %3, %5 : vector<512x128xf32>
    %cst = arith.constant 0.000000e+00 : f32
    %7 = vector.broadcast %cst : f32 to vector<512x128xf32>
    %8 = arith.maximumf %6, %7 : vector<512x128xf32>
    %9 = arith.truncf %8 : vector<512x128xf32> to vector<512x128xbf16>
    %c0_5 = arith.constant 0 : index
    %c0_6 = arith.constant 0 : index
    %10 = vector.load %arg4[%c0_5, %c0_6] : memref<512x128xbf16, #tpu.memory_space<vmem>>, vector<512x128xbf16>
    tpu.vector_store %arg4[%c0_5, %c0_6], %9 {strides = array<i32>} : memref<512x128xbf16, #tpu.memory_space<vmem>>, vector<512x128xbf16>,
    return
  }
  func.func @transform_0(%arg0: i32) -> (i32, i32) {
    %c0_i32 = arith.constant 0 : i32
    %c0_i32_0 = arith.constant 0 : i32
    return %arg0, %c0_i32 : i32, i32
  }
  func.func @transform_1(%arg0: i32) -> (i32, i32) {
    %c0_i32 = arith.constant 0 : i32
    %c0_i32_0 = arith.constant 0 : i32
    %c0_i32_1 = arith.constant 0 : i32
    return %c0_i32, %c0_i32_0 : i32, i32
  }
  func.func @transform_2(%arg0: i32) -> (i32, i32) {
    %c0_i32 = arith.constant 0 : i32
    %c0_i32_0 = arith.constant 0 : i32
    %c0_i32_1 = arith.constant 0 : i32
    return %c0_i32, %c0_i32_0 : i32, i32
  }
  func.func @transform_3(%arg0: i32) -> (i32, i32) {
    %c0_i32 = arith.constant 0 : i32
    %c0_i32_0 = arith.constant 0 : i32
    return %arg0, %c0_i32 : i32, i32
  }
}

module attributes {stable_mosaic.version = 11 : i64} {
  func.func @_bn_relu_skip_kernel(%arg0: i32, %arg1: memref<512x128xf32, #tpu.memory_space<vmem>>, %arg2: memref<1x128xf32, #tpu.memory_space<vmem>>, %arg3: memref<1x128xf32, #tpu.memory_space<vmem>>, %arg4: memref<512x128xbf16, #tpu.memory_space<vmem>>, %arg5: memref<128x128xbf16, #tpu.memory_space<vmem>>, %arg6: memref<1x128xf32, #tpu.memory_space<vmem>>, %arg7: memref<512x128xf32, #tpu.memory_space<vmem>>) attributes {dimension_semantics = [#tpu.dimension_semantics<parallel>], iteration_bounds = array<i64: 16>, scalar_prefetch = 0 : i64, scratch_operands = 0 : i64, tpu.core_type = #tpu.core_type<tc>, window_params = [{transform_indices = @transform_0, window_bounds = array<i64: 512, 128>}, {pipeline_mode = #tpu.pipeline_mode<synchronous>, transform_indices = @transform_1, window_bounds = array<i64: 1, 128>}, {pipeline_mode = #tpu.pipeline_mode<synchronous>, transform_indices = @transform_2, window_bounds = array<i64: 1, 128>}, {transform_indices = @transform_3, window_bounds = array<i64: 512, 128>}, {pipeline_mode = #tpu.pipeline_mode<synchronous>, transform_indices = @transform_4, window_bounds = array<i64: 128, 128>}, {pipeline_mode = #tpu.pipeline_mode<synchronous>, transform_indices = @transform_5, window_bounds = array<i64: 1, 128>}, {transform_indices = @transform_6, window_bounds = array<i64: 512, 128>}]} {
    %c0 = arith.constant 0 : index
    %c0_0 = arith.constant 0 : index
    %0 = vector.load %arg1[%c0, %c0_0] : memref<512x128xf32, #tpu.memory_space<vmem>>, vector<512x128xf32>
    %c0_1 = arith.constant 0 : index
    %c0_2 = arith.constant 0 : index
    %1 = vector.load %arg2[%c0_1, %c0_2] : memref<1x128xf32, #tpu.memory_space<vmem>>, vector<1x128xf32>
    %2 = vector.broadcast %1 : vector<1x128xf32> to vector<512x128xf32>
    %3 = arith.mulf %0, %2 : vector<512x128xf32>
    %c0_3 = arith.constant 0 : index
    %c0_4 = arith.constant 0 : index
    %4 = vector.load %arg3[%c0_3, %c0_4] : memref<1x128xf32, #tpu.memory_space<vmem>>, vector<1x128xf32>
    %5 = vector.broadcast %4 : vector<1x128xf32> to vector<512x128xf32>
    %6 = arith.addf %3, %5 : vector<512x128xf32>
    %cst = arith.constant 0.000000e+00 : f32
    %7 = vector.broadcast %cst : f32 to vector<512x128xf32>
    %8 = arith.maximumf %6, %7 : vector<512x128xf32>
    %c0_5 = arith.constant 0 : index
    %c0_6 = arith.constant 0 : index
    %9 = vector.load %arg4[%c0_5, %c0_6] : memref<512x128xbf16, #tpu.memory_space<vmem>>, vector<512x128xbf16>
    %c0_7 = arith.constant 0 : index
    %c0_8 = arith.constant 0 : index
    %10 = vector.load %arg5[%c0_7, %c0_8] : memref<128x128xbf16, #tpu.memory_space<vmem>>, vector<128x128xbf16>
    %cst_9 = arith.constant dense<0.000000e+00> : vector<512x128xf32>
    %11 = tpu.matmul %9, %10, %cst_9 {dimension_numbers = #tpu.dot_dimension_numbers<[1], [0], [0], [1], [0, 0, 1, 1], [], []>} : vector<512x128xbf16>, vector<128x128xbf16>, vector<512x128xf32> -> vector<512x128xf32>
    %c0_10 = arith.constant 0 : index
    %c0_11 = arith.constant 0 : index
    %12 = vector.load %arg6[%c0_10, %c0_11] : memref<1x128xf32, #tpu.memory_space<vmem>>, vector<1x128xf32>
    %13 = vector.broadcast %12 : vector<1x128xf32> to vector<512x128xf32>
    %14 = arith.addf %11, %13 : vector<512x128xf32>
    %15 = arith.addf %8, %14 : vector<512x128xf32>
    %c0_12 = arith.constant 0 : index
    %c0_13 = arith.constant 0 : index
    %16 = vector.load %arg7[%c0_12, %c0_13] : memref<512x128xf32, #tpu.memory_space<vmem>>, vector<512x128xf32>
    tpu.vector_store %arg7[%c0_12, %c0_13], %15 {strides = array<i32>} : memref<512x128xf32, #tpu.memory_space<vmem>>, vector<512x128xf32>,
    return
  }
  func.func @transform_0(%arg0: i32) -> (i32, i32) {
    %c0_i32 = arith.constant 0 : i32
    %c0_i32_0 = arith.constant 0 : i32
    return %arg0, %c0_i32 : i32, i32
  }
  func.func @transform_1(%arg0: i32) -> (i32, i32) {
    %c0_i32 = arith.constant 0 : i32
    %c0_i32_0 = arith.constant 0 : i32
    %c0_i32_1 = arith.constant 0 : i32
    return %c0_i32, %c0_i32_0 : i32, i32
  }
  func.func @transform_2(%arg0: i32) -> (i32, i32) {
    %c0_i32 = arith.constant 0 : i32
    %c0_i32_0 = arith.constant 0 : i32
    %c0_i32_1 = arith.constant 0 : i32
    return %c0_i32, %c0_i32_0 : i32, i32
  }
  func.func @transform_3(%arg0: i32) -> (i32, i32) {
    %c0_i32 = arith.constant 0 : i32
    %c0_i32_0 = arith.constant 0 : i32
    return %arg0, %c0_i32 : i32, i32
  }
  func.func @transform_4(%arg0: i32) -> (i32, i32) {
    %c0_i32 = arith.constant 0 : i32
    %c0_i32_0 = arith.constant 0 : i32
    %c0_i32_1 = arith.constant 0 : i32
    return %c0_i32, %c0_i32_0 : i32, i32
  }
  func.func @transform_5(%arg0: i32) -> (i32, i32) {
    %c0_i32 = arith.constant 0 : i32
    %c0_i32_0 = arith.constant 0 : i32
    %c0_i32_1 = arith.constant 0 : i32
    return %c0_i32, %c0_i32_0 : i32, i32
  }
  func.func @transform_6(%arg0: i32) -> (i32, i32) {
    %c0_i32 = arith.constant 0 : i32
    %c0_i32_0 = arith.constant 0 : i32
    return %arg0, %c0_i32 : i32, i32
  }
}

</mosaic_0001>

<bundles_post_ra>
// kernel: res_conv_block_unetr.4
= control target key start
LH: loop header
LB: loop body
LE: loop exit
PB: predicated region body
PF: predicated region fallthrough
CT: control target
= control target key end

     0   :  { %s21637_s24 = smov 0   ;;  %s21639_s25 = smov 0   ;;  %s23814_s0 = inlined_call_operand.vmem [shape: bf16[36,336,128], index: 0, kind: input, shape index: {}, may-alias: {0,1,2}]   ;;  %s23815_s1 = inlined_call_operand.vmem [shape: bf16[36,336,128], index: 1, kind: input, shape index: {}, may-alias: {0,1,2}]   ;;  %s23816_s2 = inlined_call_operand.vmem [shape: bf16[36,336,128], index: 2, kind: input, shape index: {}, may-alias: {0,1,2}]   ;;  %s23817_s3 = inlined_call_operand.vmem [shape: bf16[27,128,128], index: 3, kind: input, shape index: {}]   ;;  %s23818_s4 = inlined_call_operand.vmem [shape: f32[1,128], index: 4, kind: input, shape index: {}]   ;;  %s23819_s5 = inlined_call_operand.vmem [shape: f32[288,1], index: 5, kind: input, shape index: {}]   ;;  %s23820_s6 = inlined_call_operand.vmem [shape: f32[2,16,288,128], index: 6, kind: output, shape index: {0}]   ;;  %s23821_s7 = inlined_call_operand.vmem [shape: f32[2,16,8,128], index: 7, kind: output, shape index: {1}]  }
   0x1   :  { %s21641_s26 = smov 0   ;;  %s21643_s27 = smov 0  }
   0x2   :  { %s21645_s28 = smov 0  }
   0x3 LB: > { %s27_s29 = sadd.s32 1, %s21586_s26  ;;  %s30_s30 = sadd.s32 1, %s21590_s27  ;;  %s21594_s28 = sphi %s21645_s28, %s18_s28   ;;  %s21590_s27 = sphi %s21643_s27, %s23825_s27   ;;  %s21586_s26 = sphi %s21641_s26, %s23824_s26   ;;  %s21582_s25 = sphi %s21639_s25, %s23823_s25   ;;  %s21578_s24 = sphi %s21637_s24, %s23822_s24  }
   0x4   : > { %p28_p0 = scmp.ge.s32.totalorder %s27_s29, 16  ;;  %p16564_p1 = scmp.ge.s32.totalorder %s21594_s28, 1 }
   0x5   : > { %p308_p2 = scmp.lt.s32.totalorder %s21594_s28, 33 }
   0x6   : > { %s23827_s29 = smov (%p28_p0, %s27_s29), 0  ;;  %s23829_s30 = smov (!%p28_p0, %s30_s30), %s21590_s27 }
   0x7   : > { %p309_p3 = pnand %p16564_p1, %p308_p2  ;;  %p32_p4 = scmp.ge.s32.totalorder %s23829_s30, 2 }
   0x8   : > { %v20822_v0 = vld [vmem:[%s23817_s3] sm:$0xff] (!%p309_p3)   ;;  %s370_s10 = smul.u32 (!%p309_p3), 18, %s21582_s25  ;;  %v20824_v2 = vld [vmem:[%s23817_s3 + $0x8] sm:$0xff] (!%p309_p3)   ;;  %v20826_v4 = vld [vmem:[%s23817_s3 + $0x10] sm:$0xff] (!%p309_p3)   ;;  %vm2849_vm0 = vsmask.f32 (!%p309_p3), 6400 }
   0x9   : > { %s23831_s30 = smov (%p32_p4, %s23829_s30), 0  ;;  %312 = sbr.rel (%p309_p3) target bundleno = 1254 (0x4e6), region = 44 }
   0xa   : > { %v20823_v1 = vld [vmem:[%s23817_s3 + $0x340] sm:$0xff] (!%p309_p3)   ;;  %18418 = vmatprep.subr.bf16.mxu1 (!%p309_p3), %v20822_v0  ;;  %s21682_s15 = sadd.s32 (!%p309_p3), %s21578_s24, %s370_s10  ;;  %v20825_v3 = vld [vmem:[%s23817_s3 + $0x348] sm:$0xff] (!%p309_p3)   ;;  %v20827_v5 = vld [vmem:[%s23817_s3 + $0x350] sm:$0xff] (!%p309_p3)   ;;  %vm3518_vm1 = vcmask (!%p309_p3), 1045504   ;;  %vm1131_vm2 = vsmask.f32 (!%p309_p3), 7424 }
   0xb   : > { %19094 = vmatprep.subr.bf16.mxu0 (!%p309_p3), %v20823_v1  ;;  %18419 = vmatpush3.bf16.msra.mxu1 (!%p309_p3), %v20822_v0  ;;  %p372_p5 = scmp.lt.s32.totalorder (!%p309_p3), %s21682_s15, 35  ;;  %s381_s20 = sadd.s32 (!%p309_p3), 1, %s21682_s15  ;;  %v20828_v6 = vld [vmem:[%s23817_s3 + $0x18] sm:$0xff] (!%p309_p3)   ;;  %v20830_v8 = vld [vmem:[%s23817_s3 + $0x20] sm:$0xff] (!%p309_p3)   ;;  %v20832_v10 = vld [vmem:[%s23817_s3 + $0x28] sm:$0xff] (!%p309_p3)   ;;  %vm1778_vm3 = vcmask (!%p309_p3), 1046528  }
   0xc   : > { %19095 = vmatpush3.bf16.msra.mxu0 (!%p309_p3), %v20823_v1  ;;  %18420 = vmatprep.subr.bf16.mxu1 (!%p309_p3), %v20824_v2  ;;  %p382_p6 = scmp.lt.s32.totalorder (!%p309_p3), %s381_s20, 35  ;;  %v20829_v7 = vld [vmem:[%s23817_s3 + $0x358] sm:$0xff] (!%p309_p3)   ;;  %v20831_v9 = vld [vmem:[%s23817_s3 + $0x360] sm:$0xff] (!%p309_p3)   ;;  %v20833_v12 = vld [vmem:[%s23817_s3 + $0x368] sm:$0xff] (!%p309_p3)   ;;  %vm4589_vm4 = vsmask.f32 (!%p309_p3), 5376 }
   0xd   : > { %19096 = vmatprep.subr.bf16.mxu0 (!%p309_p3), %v20825_v3  ;;  %v20834_v13 = vld [vmem:[%s23817_s3 + $0x30] sm:$0xff] (!%p309_p3)   ;;  %v20836_v21 = vld [vmem:[%s23817_s3 + $0x38] sm:$0xff] (!%p309_p3)   ;;  %v20842_v32 = vld [vmem:[%s23817_s3 + $0x40] sm:$0xff] (!%p309_p3)   ;;  %s392_s18 = sadd.s32 (!%p309_p3), 2, %s21682_s15  ;;  %vm5258_vm5 = vcmask (!%p309_p3), 1044480   ;;  %p401_p8 = scmp.lt.s32.totalorder (!%p309_p3), %s21582_s25, 1 }
   0xe   : > { %v20835_v15 = vld [vmem:[%s23817_s3 + $0x370] sm:$0xff] (!%p309_p3)   ;;  %v20837_v30 = vld [vmem:[%s23817_s3 + $0x378] sm:$0xff] (!%p309_p3)   ;;  %v20844_v38 = vld [vmem:[%s23817_s3 + $0x380] sm:$0xff] (!%p309_p3)   ;;  %p393_p7 = scmp.lt.s32.totalorder (!%p309_p3), %s392_s18, 35  ;;  %p403_p9 = scmp.lt.s32.totalorder (!%p309_p3), %s21578_s24, 15  ;;  %vm16398_vm6 = vcmask (!%p309_p3), 1040384  }
   0xf   : > { %18421 = vmatpush3.bf16.msra.mxu1 (!%p309_p3), %v20824_v2  ;;  %v20845_v46 = vld [vmem:[%s23817_s3 + $0x388] sm:$0xff] (!%p309_p3)   ;;  %v20850_v58 = vld [vmem:[%s23817_s3 + $0x390] sm:$0xff] (!%p309_p3)   ;;  %vm16400_vm7 = vcmask (!%p309_p3), 1041408  }
  0x10   : > { %s373_s23 = scalar_select %p372_p5, %s21682_s15, 35  ;;  %19097 = vmatpush3.bf16.msra.mxu0 %v20825_v3  ;;  %18422 = vmatprep.subr.bf16.mxu1 %v20826_v4  ;;  %v20851_v53 = vld [vmem:[%s23817_s3 + $0x48] sm:$0xff]   ;;  %v20858_v3 = vld [vmem:[%s23817_s3 + $0x50] sm:$0xff]  }
  0x11   : > { %s23833_s20 = smov (!%p382_p6, %s381_s20), 35  ;;  %19098 = vmatprep.subr.bf16.mxu0 %v20827_v5  ;;  %s23835_s18 = smov (!%p393_p7, %s392_s18), 35 }
  0x12   : > { %s20774_s12 = smul.u32 168, %s373_s23  ;;  %s23837_s25 = smov (!%p401_p8, %s21582_s25), 1 }
  0x13   : > { %18423 = vmatpush3.bf16.msra.mxu1 %v20826_v4  ;;  %s20775_s13 = smul.u32 168, %s23833_s20  ;;  %s23839_s24 = smov (!%p403_p9, %s21578_s24), 15 }
  0x14   : > { %19099 = vmatpush3.bf16.msra.mxu0 %v20827_v5  ;;  %18424 = vmatprep.subr.bf16.mxu1 %v20828_v6  ;;  %s21711_s22 = scalar_lea.vmem %s23814_s0, %s20774_s12  ;;  %v20852_v5 = vld [vmem:[%s23817_s3 + $0x398] sm:$0xff]   ;;  %s20776_s9 = smul.u32 168, %s23835_s18 }
  0x15   : > { %19100 = vmatprep.subr.bf16.mxu0 %v20829_v7  ;;  %s21719_s10 = scalar_lea.vmem %s23815_s1, %s20775_s13  ;;  %v20838_v11 = vld [vmem:[%s21711_s22] sm:$0xff]   ;;  %v20841_v42 = vld [vmem:[%s21711_s22 + $0x8] sm:$0xff]   ;;  %v20846_v49 = vld [vmem:[%s21711_s22 + $0x10] sm:$0xff]   ;;  %s16569_s11 = sshll.u32 %s23837_s25, 4 }
  0x16   : > { %18434 = vmatprep.mubr.bf16.mxu1 %v20838_v11  ;;  %v20839_v14 = vld [vmem:[%s21719_s10 + $0x8] sm:$0xfe]   ;;  %v20840_v16 = vld [vmem:[%s21719_s10 + $0x10] sm:$0xff]   ;;  %v20843_v24 = vld [vmem:[%s21719_s10 + $0x18] sm:$0xff]   ;;  %s22243_s13 = scalar_lea.vmem %s23816_s2, %s20776_s9  ;;  %s415_s12 = sadd.s32 %s16569_s11, %s23839_s24 }
  0x17   : > { %18425 = vmatpush3.bf16.msra.mxu1 %v20828_v6  ;;  %v8005_v17 = vshrl.u32 %v20839_v14, 16  ;;  %v8008_v18 = vshll.u32 %v20839_v14, 16  ;;  %v8013_v19 = vshrl.u32 %v20840_v16, 16  ;;  %v8016_v20 = vshll.u32 %v20840_v16, 16  ;;  %v20847_v35 = vld [vmem:[%s21719_s10 + $0x20] sm:$0xff]   ;;  %v20849_v41 = vld [vmem:[%s21719_s10 + $0x28] sm:$0xff]  }
  0x18   : > { %19101 = vmatpush3.bf16.msra.mxu0 %v20829_v7  ;;  %18426 = vmatprep.subr.bf16.mxu1 %v20830_v8  ;;  %v8022_v28 = vshrl.u32 %v20843_v24, 16  ;;  %v8025_v29 = vshll.u32 %v20843_v24, 16  ;;  %v8031_v39 = vshrl.u32 %v20847_v35, 16  ;;  %v8034_v40 = vshll.u32 %v20847_v35, 16  ;;  %v20854_v55 = vld [vmem:[%s21719_s10 + $0x30] sm:$0xff]   ;;  %v20848_v56 = vld [vmem:[%s21711_s22 + $0x18] sm:$0xff]  }
  0x19   : > { %19102 = vmatprep.subr.bf16.mxu0 %v20831_v9  ;;  %v8007_v22 = vrot.slane %v8005_v17, 1  ;;  %v8010_v23 = vrot.slane %v8008_v18, 2  ;;  %v8015_v25 = vrot.slane %v8013_v19, 1  ;;  %v8018_v26 = vrot.slane %v8016_v20, 2  ;;  %v20856_v61 = vld [vmem:[%s21719_s10 + $0x38] sm:$0xff]   ;;  %v20853_v62 = vld [vmem:[%s21711_s22 + $0x20] sm:$0xff]  }
  0x1a   : > { %v8024_v33 = vrot.slane %v8022_v28, 1  ;;  %v8027_v34 = vrot.slane %v8025_v29, 2  ;;  %v8033_v43 = vrot.slane %v8031_v39, 1  ;;  %v8036_v44 = vrot.slane %v8034_v40, 2  ;;  %v20855_v11 = vld [vmem:[%s21711_s22 + $0x28] sm:$0xff]   ;;  %v20860_v17 = vld [vmem:[%s21711_s22 + $0x30] sm:$0xff]  }
  0x1b   : > { %18427 = vmatpush3.bf16.msra.mxu1 %v20830_v8  ;;  %v8011_v27 = vor.u32 %v8010_v23, %v8007_v22  ;;  %v8019_v31 = vor.u32 %v8018_v26, %v8015_v25  ;;  %v8040_v45 = vshrl.u32 %v20849_v41, 16  ;;  %v8043_v47 = vshll.u32 %v20849_v41, 16  ;;  %v20863_v16 = vld [vmem:[%s21719_s10 + $0x48] sm:$0xff]   ;;  %v20865_v22 = vld [vmem:[%s23817_s3 + $0x58] sm:$0xff]   ;;  %v20869_v28 = vld [vmem:[%s21719_s10 + $0x10] sm:$0xff]   ;;  %s16570_s14 = sshll.u32 %s415_s12, 3 }
  0x1c   : > { %19103 = vmatpush3.bf16.msra.mxu0 %v20831_v9  ;;  %18428 = vmatprep.subr.bf16.mxu1 %v20832_v10  ;;  %v8028_v37 = vor.u32 %v8027_v34, %v8024_v33  ;;  %v8037_v50 = vor.u32 %v8036_v44, %v8033_v43  ;;  %v8049_v59 = vshrl.u32 %v20854_v55, 16  ;;  %v8052_v60 = vshll.u32 %v20854_v55, 16  ;;  %v20859_v24 = vld [vmem:[%s23817_s3 + $0x3a8] sm:$0xff]   ;;  %v20872_v35 = vld [vmem:[%s23817_s3 + $0x60] sm:$0xff]   ;;  %v20871_v40 = vld [vmem:[%s21719_s10 + $0x18] sm:$0xff]  }
  0x1d   : > { %19104 = vmatprep.subr.bf16.mxu0 %v20833_v12  ;;  %v8020_v36 = vsel %vm2849_vm0, %v8011_v27, %v8019_v31  ;;  %v8042_v51 = vrot.slane %v8040_v45, 1  ;;  %v8045_v52 = vrot.slane %v8043_v47, 2  ;;  %v8058_v1 = vshrl.u32 %v20856_v61, 16  ;;  %v20878_v43 = vld [vmem:[%s23817_s3 + $0x68] sm:$0xff]   ;;  %v20875_v55 = vld [vmem:[%s21711_s22 + $0x58] sm:$0xff]  }
  0x1e   : > { %19110 = vmatprep.mubr.bf16.mxu0 %v8020_v36  ;;  %v8029_v48 = vsel %vm2849_vm0, %v8019_v31, %v8028_v37  ;;  %v8038_v54 = vsel %vm2849_vm0, %v8028_v37, %v8037_v50  ;;  %v8051_v63 = vrot.slane %v8049_v59, 1  ;;  %v8054_v0 = vrot.slane %v8052_v60, 2  ;;  %v20862_v36 = vld [vmem:[%s21711_s22 + $0x38] sm:$0xff]   ;;  %v20870_v44 = vld [vmem:[%s21711_s22 + $0x48] sm:$0xff]   ;;  %v20889_v59 = vld [vmem:[%s23817_s3 + $0x3d0] sm:$0xff]  }
  0x1f   : > { %18429 = vmatpush3.bf16.msra.mxu1 %v20832_v10  ;;  %v8046_v57 = vor.u32 %v8045_v52, %v8042_v51  ;;  %v8061_v2 = vshll.u32 %v20856_v61, 16  ;;  %v8060_v7 = vrot.slane %v8058_v1, 1  ;;  %v20861_v10 = vld [vmem:[%s21719_s10 + $0x40] sm:$0xff]   ;;  %v8076_v20 = vshrl.u32 %v20863_v16, 16  ;;  %v20866_v37 = vld [vmem:[%s23817_s3 + $0x3b8] sm:$0xff]   ;;  %v20883_v52 = vld [vmem:[%s23817_s3 + $0x3c8] sm:$0xff]  }
  0x20   : > { %19105 = vmatpush3.bf16.msra.mxu0 %v20833_v12  ;;  %18430 = vmatprep.subr.bf16.mxu1 %v20834_v13  ;;  %v8055_v6 = vor.u32 %v8054_v0, %v8051_v63  ;;  %v8067_v14 = vshrl.u32 %v20861_v10, 16  ;;  %v8673_v33 = vrot.slane %v20869_v28, 2  ;;  %v8675_v45 = vrot.slane %v20871_v40, 2  ;;  %v20882_v60 = vld [vmem:[%s21719_s10 + $0x38] sm:$0xff]   ;;  %v20886_v0 = vld [vmem:[%s21719_s10 + $0x40] sm:$0xff]  }
  0x21   : > { %19106 = vmatprep.subr.bf16.mxu0 %v20835_v15  ;;  %v8047_v4 = vsel %vm2849_vm0, %v8037_v50, %v8046_v57  ;;  %v8063_v8 = vrot.slane %v8061_v2, 2  ;;  %v8078_v26 = vrot.slane %v8076_v20, 1  ;;  %v20880_v50 = vld [vmem:[%s21719_s10 + $0x30] sm:$0xff]   ;;  %v8683_v1 = vrot.slane %v20882_v60, 2  ;;  %v20895_v2 = vld [vmem:[%s23817_s3 + $0x3d8] sm:$0xff]  }
  0x22   : > { %v8056_v9 = vsel %vm2849_vm0, %v8046_v57, %v8055_v6  ;;  %v8069_v18 = vrot.slane %v8067_v14, 1  ;;  %v8676_v51 = vsel %vm3518_vm1, %v8673_v33, %v8675_v45  ;;  %v20879_v57 = vld [vmem:[%s21711_s22 + $0x60] sm:$0xff]  }
  0x23   : > { %18431 = vmatpush3.bf16.msra.mxu1 %v20834_v13  ;;  %v8064_v12 = vor.u32 %v8063_v8, %v8060_v7  ;;  %v20857_v13 = vld [vmem:[%s23817_s3 + $0x3a0] sm:$0xff]   ;;  %v20892_v8 = vld [vmem:[%s21719_s10 + $0x50] sm:$0xff]  }
  0x24   : > { %19107 = vmatpush3.bf16.msra.mxu0 %v20835_v15  ;;  %18432 = vmatprep.subr.bf16.mxu1 %v20836_v21  ;;  %v8070_v15 = vshll.u32 %v20861_v10, 16 }
  0x25   : > { %19108 = vmatprep.subr.bf16.mxu0 %v20837_v30  ;;  %v8065_v23 = vsel %vm2849_vm0, %v8055_v6, %v8064_v12  ;;  %v20888_v6 = vld [vmem:[%s21719_s10 + $0x48] sm:$0xff]  }
  0x26   : > { %v8072_v19 = vrot.slane %v8070_v15, 2  ;;  %v20902_v15 = vld [vmem:[%s23817_s3 + $0x3e0] sm:$0xff]  }
  0x27   : > { %18433 = vmatpush3.bf16.msra.mxu1 %v20836_v21  ;;  %v8079_v21 = vshll.u32 %v20863_v16, 16  ;;  %v8689_v16 = vrot.slane %v20892_v8, 2  ;;  %v20913_v8 = vld [vmem:[%s23817_s3 + $0x90] sm:$0xff]  }
  0x28   : > { %19109 = vmatpush3.bf16.msra.mxu0 %v20837_v30  ;;  %18470 = vmatprep.subr.bf16.mxu1 %v20842_v32  ;;  %v8073_v25 = vor.u32 %v8072_v19, %v8069_v18  ;;  %v20868_v30 = vld [vmem:[%s21719_s10 + $0x8] sm:$0xfc]   ;;  %v20890_v18 = vld [vmem:[%s21711_s22 + $0x80] sm:$0xff]   ;;  %v20894_v19 = vld [vmem:[%s21719_s10 + $0x58] sm:$0xff]  }
  0x29   : > { %19146 = vmatprep.subr.bf16.mxu0 %v20844_v38  ;;  %v8081_v27 = vrot.slane %v8079_v21, 2  ;;  %v8672_v34 = vrot.slane %v20868_v30, 2  ;;  %v8691_v28 = vrot.slane %v20894_v19, 2  ;;  %v20917_v19 = vld [vmem:[%s21711_s22 + $0x40] sm:$0xff]  }
  0x2a   : > { %18435 = vmatmul.mubr.bf16.vlgmr.msra.gmra.mrb[0].mxu1 %v20841_v42  ;;  %v8074_v29 = vsel %vm2849_vm0, %v8064_v12, %v8073_v25  ;;  %v20874_v42 = vld [vmem:[%s21719_s10 + $0x20] sm:$0xff]   ;;  %v8687_v12 = vrot.slane %v20888_v6, 2 }
  0x2b   : > { %19111 = vmatmul.mubr.bf16.vlgmr.msra.gmra.mrb[0].mxu0 %v8029_v48  ;;  %18471 = vmatpush3.bf16.msra.mxu1 %v20842_v32  ;;  %v21791_v31 = vor.u32 %v8081_v27, %v8078_v26  ;;  %v20864_v32 = vld [vmem:[%s23817_s3 + $0x3b0] sm:$0xff]   ;;  %v8674_v41 = vsel %vm3518_vm1, %v8672_v34, %v8673_v33  ;;  %v8677_v47 = vrot.slane %v20874_v42, 2  ;;  %v20877_v48 = vld [vmem:[%s23817_s3 + $0x3c0] sm:$0xff]   ;;  %v20908_v26 = vld [vmem:[%s23817_s3 + $0x3e8] sm:$0xff]  }
  0x2c   : > { %19147 = vmatpush3.bf16.msra.mxu0 %v20844_v38  ;;  %18438 = vmatprep.mubr.bf16.mxu1 %v20846_v49  ;;  %v20867_v38 = vld [vmem:[%s21711_s22 + $0x40] sm:$0xff]   ;;  %v20876_v49 = vld [vmem:[%s21719_s10 + $0x28] sm:$0xff]   ;;  %v20899_v27 = vld [vmem:[%s21711_s22 + $0x10] sm:$0xff]  }
  0x2d   : > { %19148 = vmatprep.subr.bf16.mxu0 %v20845_v46  ;;  %19114 = vmatprep.mubr.bf16.mxu0 %v8038_v54  ;;  %v8083_v39 = vsel %vm2849_vm0, %v8073_v25, %v21791_v31  ;;  %v20884_v54 = vld [vmem:[%s23817_s3 + $0x70] sm:$0xff]   ;;  %v20898_v25 = vld [vmem:[%s21719_s10 + $0x60] sm:$0xff]   ;;  %v20903_v33 = vld [vmem:[%s21711_s22 + $0x18] sm:$0xff]   ;;  %v1152_v42 = vshrl.u32 %v20899_v27, 16 }
  0x2e   : > { %18472 = vmatprep.subr.bf16.mxu1 %v20851_v53  ;;  %v20893_v34 = vld [vmem:[%s21711_s22 + $0x88] sm:$0xff]  }
  0x2f   : > { %18473 = vmatpush3.bf16.msra.mxu1 %v20851_v53  ;;  %v8678_v53 = vsel %vm3518_vm1, %v8675_v45, %v8677_v47  ;;  %v20914_v45 = vld [vmem:[%s23817_s3 + $0x3f0] sm:$0xff]  }
  0x30   : > { %19149 = vmatpush3.bf16.msra.mxu0 %v20845_v46  ;;  %18474 = vmatprep.subr.bf16.mxu1 %v20858_v3  ;;  %v20873_v46 = vld [vmem:[%s21711_s22 + $0x50] sm:$0xff]  }
  0x31   : > { %19150 = vmatprep.subr.bf16.mxu0 %v20850_v58 }
  0x32   : > { %18439 = vmatmul.mubr.bf16.gmra.mrb[4].mxu1 %v20848_v56  ;;  %v8679_v56 = vrot.slane %v20876_v49, 2  ;;  %v20909_v49 = vld [vmem:[%s21711_s22 + $0x28] sm:$0xff]  }
  0x33   : > { %19115 = vmatmul.mubr.bf16.gmra.mrb[4].mxu0 %v8047_v4  ;;  %18442 = vmatprep.mubr.bf16.mxu1 %v20853_v62  ;;  %v20891_v62 = vld [vmem:[%s23817_s3 + $0x78] sm:$0xff]   ;;  %v20881_v4 = vld [vmem:[%s21711_s22 + $0x68] sm:$0xff]   ;;  %v1172_v60 = vshll.u32 %v20909_v49, 16 }
  0x34   : > { %19151 = vmatpush3.bf16.msra.mxu0 %v20850_v58  ;;  %19118 = vmatprep.mubr.bf16.mxu0 %v8056_v9  ;;  %v8681_v58 = vrot.slane %v20880_v50, 2  ;;  %v8680_v61 = vsel %vm3518_vm1, %v8677_v47, %v8679_v56  ;;  %v20896_v9 = vld [vmem:[%s21711_s22] sm:$0xff]  }
  0x35   : > { %19152 = vmatprep.subr.bf16.mxu0 %v20852_v5  ;;  %18475 = vmatpush3.bf16.msra.mxu1 %v20858_v3  ;;  %v8685_v3 = vrot.slane %v20886_v0, 2  ;;  %v1135_v14 = vshll.u32 %v20896_v9, 16  ;;  %v1133_v20 = vshrl.u32 %v20896_v9, 16  ;;  %v20907_v0 = vld [vmem:[%s23817_s3 + $0x88] sm:$0xff]   ;;  %v1174_v6 = vrot.slane %v1172_v60, 1  ;;  %v20915_v9 = vld [vmem:[%s21711_s22 + $0x38] sm:$0xff]  }
  0x36   : > { %18476 = vmatprep.subr.bf16.mxu1 %v20865_v22  ;;  %v8682_v63 = vsel %vm3518_vm1, %v8679_v56, %v8681_v58  ;;  %v8684_v7 = vsel %vm3518_vm1, %v8681_v58, %v8683_v1  ;;  %v20906_v56 = vld [vmem:[%s21719_s10 + $0x78] sm:$0xff]  }
  0x37   : > { %v8686_v10 = vsel %vm3518_vm1, %v8683_v1, %v8685_v3  ;;  %v8688_v21 = vsel %vm3518_vm1, %v8685_v3, %v8687_v12  ;;  %v20920_v58 = vld [vmem:[%s23817_s3 + $0x3f8] sm:$0xff]  }
  0x38   : > { %19153 = vmatpush3.bf16.msra.mxu0 %v20852_v5  ;;  %v20885_v5 = vld [vmem:[%s21711_s22 + $0x70] sm:$0xff]  }
  0x39   : > { %19154 = vmatprep.subr.bf16.mxu0 %v20857_v13  ;;  %18477 = vmatpush3.bf16.msra.mxu1 %v20865_v22  ;;  %v1137_v22 = vrot.slane %v1135_v14, 1 }
  0x3a   : > { %18443 = vmatmul.mubr.bf16.gmra.mrb[8].mxu1 %v20855_v11  ;;  %18478 = vmatprep.subr.bf16.mxu1 %v20872_v35  ;;  %v21852_v11 = vld [vmem:[%s23817_s3 + $0x80] sm:$0xff]  }
  0x3b   : > { %19119 = vmatmul.mubr.bf16.gmra.mrb[8].mxu0 %v8065_v23  ;;  %18446 = vmatprep.mubr.bf16.mxu1 %v20860_v17  ;;  %v20887_v17 = vld [vmem:[%s21711_s22 + $0x78] sm:$0xff]  }
  0x3c   : > { %19155 = vmatpush3.bf16.msra.mxu0 %v20857_v13  ;;  %19122 = vmatprep.mubr.bf16.mxu0 %v8074_v29  ;;  %v20897_v13 = vld [vmem:[%s21711_s22 + $0x8] sm:$0xff]   ;;  %v1138_v29 = vor.u32 %v1137_v22, %v1133_v20 }
  0x3d   : > { %19156 = vmatprep.subr.bf16.mxu0 %v20859_v24  ;;  %18479 = vmatpush3.bf16.msra.mxu1 %v20872_v35  ;;  %v1140_v23 = vshll.u32 %v20897_v13, 16  ;;  %v1144_v35 = vshrl.u32 %v20897_v13, 16  ;;  %v20912_v13 = vld [vmem:[%s21719_s10 + $0x88] sm:$0xff]  }
  0x3e   : > { %18480 = vmatprep.subr.bf16.mxu1 %v20878_v43 }
  0x3f   : > { %v1142_v30 = vrot.slane %v1140_v23, 1  ;;  %v21910_v23 = vld [vmem:[%s21711_s22 + $0x48] sm:$0xff]  }
  0x40   : > { %19157 = vmatpush3.bf16.msra.mxu0 %v20859_v24  ;;  %v8690_v24 = vsel %vm3518_vm1, %v8687_v12, %v8689_v16 }
  0x41   : > { %19158 = vmatprep.subr.bf16.mxu0 %v20864_v32  ;;  %18481 = vmatpush3.bf16.msra.mxu1 %v20878_v43  ;;  %v1143_v40 = vsel %vm1131_vm2, %v1138_v29, %v1142_v30  ;;  %v1156_v43 = vshll.u32 %v20903_v33, 16 }
  0x42   : > { %18447 = vmatmul.mubr.bf16.gmra.mrb[12].mxu1 %v20862_v36  ;;  %18482 = vmatprep.subr.bf16.mxu1 %v20884_v54  ;;  %v1148_v36 = vshll.u32 %v20899_v27, 16 }
  0x43   : > { %19123 = vmatmul.mubr.bf16.gmra.mrb[12].mxu0 %v8083_v39  ;;  %18450 = vmatprep.mubr.bf16.mxu1 %v20867_v38  ;;  %v20904_v38 = vld [vmem:[%s21719_s10 + $0x70] sm:$0xff]   ;;  %v8692_v39 = vsel %vm3518_vm1, %v8689_v16, %v8691_v28 }
  0x44   : > { %19159 = vmatpush3.bf16.msra.mxu0 %v20864_v32  ;;  %19162 = vmatprep.mubr.bf16.mxu0 %v8674_v41  ;;  %v8693_v32 = vrot.slane %v20898_v25, 2  ;;  %v1150_v47 = vrot.slane %v1148_v36, 1 }
  0x45   : > { %19160 = vmatprep.subr.bf16.mxu0 %v20866_v37  ;;  %18483 = vmatpush3.bf16.msra.mxu1 %v20884_v54 }
  0x46   : > { %18484 = vmatprep.subr.bf16.mxu1 %v20891_v62  ;;  %v8694_v41 = vsel %vm3518_vm1, %v8691_v28, %v8693_v32  ;;  %v1154_v50 = vor.u32 %v1152_v42, %v1150_v47 }
  0x48   : > { %19161 = vmatpush3.bf16.msra.mxu0 %v20866_v37  ;;  %v20901_v37 = vld [vmem:[%s21719_s10 + $0x68] sm:$0xff]  }
  0x49   : > { %19198 = vmatprep.subr.bf16.mxu0 %v20877_v48  ;;  %18485 = vmatpush3.bf16.msra.mxu1 %v20891_v62 }
  0x4a   : > { %18451 = vmatmul.mubr.bf16.gmra.mrb[16].mxu1 %v20870_v44  ;;  %18522 = vmatprep.subr.bf16.mxu1 %v21852_v11  ;;  %v20905_v44 = vld [vmem:[%s21711_s22 + $0x20] sm:$0xff]  }
  0x4b   : > { %19163 = vmatmul.mubr.bf16.vlgmr.msra.gmra.mrb[0].mxu0 %v8676_v51  ;;  %18454 = vmatprep.mubr.bf16.mxu1 %v20873_v46  ;;  %v1146_v46 = vor.u32 %v1144_v35, %v1142_v30  ;;  %v1158_v51 = vrot.slane %v1156_v43, 1  ;;  %v1192_v30 = vshrl.u32 %v20915_v9, 16  ;;  %v1200_v35 = vshrl.u32 %v20917_v19, 16  ;;  %v20932_v43 = vld [vmem:[%s23817_s3 + $0xa8] sm:$0xff]  }
  0x4c   : > { %19166 = vmatprep.mubr.bf16.mxu0 %v8678_v53  ;;  %19199 = vmatpush3.bf16.msra.mxu0 %v20877_v48  ;;  %v8695_v48 = vrot.slane %v20901_v37, 2  ;;  %v1164_v53 = vshll.u32 %v20905_v44, 16  ;;  %v1204_v37 = vshll.u32 %v21910_v23, 16 }
  0x4d   : > { %19200 = vmatprep.subr.bf16.mxu0 %v20883_v52  ;;  %v1151_v54 = vsel %vm1131_vm2, %v1146_v46, %v1150_v47  ;;  %v1159_v62 = vsel %vm1131_vm2, %v1154_v50, %v1158_v51 }
  0x4e   : > { %v1166_v1 = vrot.slane %v1164_v53, 1  ;;  %v20938_v53 = vld [vmem:[%s23817_s3 + $0xb0] sm:$0xff]  }
  0x50   : > { %19201 = vmatpush3.bf16.msra.mxu0 %v20883_v52  ;;  %v8697_v52 = vrot.slane %v20904_v38, 2  ;;  %v20923_v38 = vld [vmem:[%s21719_s10 + $0x18] sm:$0xff]  }
  0x51   : > { %19202 = vmatprep.subr.bf16.mxu0 %v20889_v59  ;;  %v9208_v50 = vrot.slane %v20923_v38, 2 }
  0x52   : > { %18455 = vmatmul.mubr.bf16.gmra.mrb[20].mxu1 %v20875_v55  ;;  %v1160_v55 = vshrl.u32 %v20903_v33, 16  ;;  %v20926_v33 = vld [vmem:[%s23817_s3 + $0xa0] sm:$0xff]  }
  0x53   : > { %19167 = vmatmul.mubr.bf16.gmra.mrb[4].mxu0 %v8680_v61  ;;  %18458 = vmatprep.mubr.bf16.mxu1 %v20879_v57  ;;  %v1168_v57 = vshrl.u32 %v20905_v44, 16  ;;  %v20910_v61 = vld [vmem:[%s21719_s10 + $0x80] sm:$0xff]  }
  0x54   : > { %19170 = vmatprep.mubr.bf16.mxu0 %v8682_v63  ;;  %19203 = vmatpush3.bf16.msra.mxu0 %v20889_v59  ;;  %v8696_v59 = vsel %vm3518_vm1, %v8693_v32, %v8695_v48  ;;  %v8698_v63 = vsel %vm3518_vm1, %v8695_v48, %v8697_v52  ;;  %v1162_v3 = vor.u32 %v1160_v55, %v1158_v51  ;;  %v20918_v32 = vld [vmem:[%s21719_s10 + $0x98] ss:$0 sps:$4 sm:$0x33]   ;;  %v1206_v48 = vrot.slane %v1204_v37, 1 }
  0x55   : > { %19204 = vmatprep.subr.bf16.mxu0 %v20895_v2  ;;  %v8707_v47 = vrot.slane %v20918_v32, 2  ;;  %v20927_v51 = vld [vmem:[%s21711_s22 + $0x58] sm:$0xff]  }
  0x58   : > { %19205 = vmatpush3.bf16.msra.mxu0 %v20895_v2  ;;  %v20911_v2 = vld [vmem:[%s21711_s22 + $0x30] sm:$0xff]  }
  0x59   : > { %19206 = vmatprep.subr.bf16.mxu0 %v20902_v15  ;;  %v1180_v12 = vshll.u32 %v20911_v2, 16  ;;  %v1184_v14 = vshrl.u32 %v20911_v2, 16 }
  0x5a   : > { %18459 = vmatmul.mubr.bf16.gmra.mrb[24].mxu1 %v20881_v4  ;;  %v8699_v4 = vrot.slane %v20906_v56, 2  ;;  %v1208_v56 = vshrl.u32 %v21910_v23, 16  ;;  %v21962_v23 = vld [vmem:[%s23817_s3 + $0xc0] sm:$0xff]  }
  0x5b   : > { %19171 = vmatmul.mubr.bf16.gmra.mrb[8].mxu0 %v8684_v7  ;;  %18462 = vmatprep.mubr.bf16.mxu1 %v20885_v5  ;;  %v1170_v5 = vor.u32 %v1168_v57, %v1166_v1  ;;  %v8701_v7 = vrot.slane %v20910_v61, 2  ;;  %v1182_v22 = vrot.slane %v1180_v12, 1  ;;  %v20925_v57 = vld [vmem:[%s21719_s10 + $0x20] sm:$0xff]   ;;  %v1220_v61 = vshll.u32 %v20927_v51, 16 }
  0x5c   : > { %19174 = vmatprep.mubr.bf16.mxu0 %v8686_v10  ;;  %19207 = vmatpush3.bf16.msra.mxu0 %v20902_v15  ;;  %v1176_v10 = vshrl.u32 %v20909_v49, 16  ;;  %v20916_v15 = vld [vmem:[%s21719_s10 + $0x90] sm:$0xff]   ;;  %v8700_v16 = vsel %vm3518_vm1, %v8697_v52, %v8699_v4 }
  0x5d   : > { %19208 = vmatprep.subr.bf16.mxu0 %v20908_v26  ;;  %v8702_v20 = vsel %vm3518_vm1, %v8699_v4, %v8701_v7  ;;  %v1186_v27 = vor.u32 %v1184_v14, %v1182_v22  ;;  %v8705_v29 = vrot.slane %v20916_v15, 2  ;;  %v20933_v4 = vld [vmem:[%s21711_s22 + $0x68] sm:$0xff]  }
  0x5e   : > { %v1178_v25 = vor.u32 %v1176_v10, %v1174_v6  ;;  %v20930_v10 = vld [vmem:[%s21719_s10 + $0x30] sm:$0xff]   ;;  %v1240_v32 = vshrl.u32 %v20933_v4, 16 }
  0x60   : > { %19209 = vmatpush3.bf16.msra.mxu0 %v20908_v26  ;;  %v8703_v26 = vrot.slane %v20912_v13, 2  ;;  %v1183_v36 = vsel %vm1131_vm2, %v1178_v25, %v1182_v22  ;;  %v1224_v13 = vshrl.u32 %v20927_v51, 16  ;;  %v9214_v22 = vrot.slane %v20930_v10, 2 }
  0x61   : > { %19210 = vmatprep.subr.bf16.mxu0 %v20914_v45 }
  0x62   : > { %18463 = vmatmul.mubr.bf16.gmra.mrb[28].mxu1 %v20887_v17  ;;  %v1175_v17 = vsel %vm1131_vm2, %v1170_v5, %v1174_v6  ;;  %v8706_v42 = vsel %vm3518_vm1, %v8703_v26, %v8705_v29  ;;  %v9210_v5 = vrot.slane %v20925_v57, 2 }
  0x63   : > { %19175 = vmatmul.mubr.bf16.gmra.mrb[12].mxu0 %v8688_v21  ;;  %18466 = vmatprep.mubr.bf16.mxu1 %v20890_v18  ;;  %v1188_v18 = vshll.u32 %v20915_v9, 16  ;;  %v20919_v21 = vld [vmem:[%s23817_s3 + $0x98] sm:$0xff]  }
  0x64   : > { %19178 = vmatprep.mubr.bf16.mxu0 %v8690_v24  ;;  %19211 = vmatpush3.bf16.msra.mxu0 %v20914_v45  ;;  %v21915_v24 = vld [vmem:[%s23817_s3 + $0x400] sm:$0xff]   ;;  %v20924_v45 = vld [vmem:[%s21711_s22 + $0x50] sm:$0xff]   ;;  %v9211_v14 = vsel %vm3518_vm1, %v9208_v50, %v9210_v5 }
  0x65   : > { %19212 = vmatprep.subr.bf16.mxu0 %v20920_v58  ;;  %v1190_v28 = vrot.slane %v1188_v18, 1  ;;  %v1216_v60 = vshrl.u32 %v20924_v45, 16 }
  0x67   : > { %v1194_v46 = vor.u32 %v1192_v30, %v1190_v28  ;;  %v20943_v30 = vld [vmem:[%s23817_s3 + $0x410] sm:$0xff]  }
  0x68   : > { %19213 = vmatpush3.bf16.msra.mxu0 %v20920_v58  ;;  %v8708_v58 = vsel %vm3518_vm1, %v8705_v29, %v8707_v47 }
  0x69   : > { %19250 = vmatprep.subr.bf16.mxu0 %v21915_v24 }
  0x6a   : > { %18467 = vmatmul.mubr.bf16.gmra.mrb[32].mxu1 %v20893_v34  ;;  %v1196_v34 = vshll.u32 %v20917_v19, 16 }
  0x6b   : > { %19179 = vmatmul.mubr.bf16.gmra.mrb[16].mxu0 %v8692_v39  ;;  %18486 = vmatprep.mubr.bf16.mxu1 %v1143_v40  ;;  %v8704_v39 = vsel %vm3518_vm1, %v8701_v7, %v8703_v26  ;;  %v1191_v40 = vsel %vm1131_vm2, %v1186_v27, %v1190_v28  ;;  %v1222_v7 = vrot.slane %v1220_v61, 1  ;;  %v20939_v27 = vld [vmem:[%s21711_s22 + $0x78] sm:$0xff]  }
  0x6c   : > { %19182 = vmatprep.mubr.bf16.mxu0 %v8694_v41  ;;  %v20922_v41 = vld [vmem:[%s21719_s10 + $0x10] sm:$0xfc]   ;;  %v1198_v44 = vrot.slane %v1196_v34, 1  ;;  %v1252_v38 = vshll.u32 %v20939_v27, 16  ;;  %v1256_v51 = vshrl.u32 %v20939_v27, 16 }
  0x6d   : > { %v9207_v52 = vrot.slane %v20922_v41, 2  ;;  %v1226_v25 = vor.u32 %v1224_v13, %v1222_v7  ;;  %v20949_v41 = vld [vmem:[%s23817_s3 + $0x418] sm:$0xff]   ;;  %v20955_v27 = vld [vmem:[%s21719_s10 + $0x70] sm:$0xff]  }
  0x6e   : > { %v1202_v49 = vor.u32 %v1200_v35, %v1198_v44  ;;  %v1199_v55 = vsel %vm1131_vm2, %v1194_v46, %v1198_v44  ;;  %v20936_v35 = vld [vmem:[%s21719_s10 + $0x40] sm:$0xff]   ;;  %v1254_v47 = vrot.slane %v1252_v38, 1 }
  0x6f   : > { %v20959_v38 = vld [vmem:[%s21711_s22 + $0x20] sm:$0xff]  }
  0x72   : > { %18487 = vmatmul.mubr.bf16.vlgmr.msra.gmra.mrb[0].mxu1 %v1151_v54  ;;  %v1212_v54 = vshll.u32 %v20924_v45, 16  ;;  %v9218_v45 = vrot.slane %v20936_v35, 2  ;;  %v9230_v35 = vrot.slane %v20955_v27, 2 }
  0x73   : > { %19183 = vmatmul.mubr.bf16.gmra.mrb[20].mxu0 %v8696_v59  ;;  %18523 = vmatpush3.bf16.msra.mxu1 %v21852_v11  ;;  %v1167_v11 = vsel %vm1131_vm2, %v1162_v3, %v1166_v1  ;;  %v1207_v59 = vsel %vm1131_vm2, %v1202_v49, %v1206_v48  ;;  %v20945_v1 = vld [vmem:[%s23817_s3 + $0xb8] sm:$0xff]   ;;  %v1210_v3 = vor.u32 %v1208_v56, %v1206_v48  ;;  %v20944_v48 = vld [vmem:[%s21711_s22 + $0x88] sm:$0xff]  }
  0x74   : > { %18490 = vmatprep.mubr.bf16.mxu1 %v1159_v62  ;;  %19186 = vmatprep.mubr.bf16.mxu0 %v8698_v63  ;;  %v20928_v62 = vld [vmem:[%s21719_s10 + $0x28] sm:$0xff]   ;;  %v20929_v63 = vld [vmem:[%s21711_s22 + $0x60] sm:$0xff]   ;;  %v1214_v2 = vrot.slane %v1212_v54, 1  ;;  %v20942_v54 = vld [vmem:[%s21719_s10 + $0x50] sm:$0xff]  }
  0x75   : > { %18524 = vmatprep.subr.bf16.mxu1 %v20907_v0  ;;  %v1228_v9 = vshll.u32 %v20929_v63, 16 }
  0x76   : > { %v1218_v6 = vor.u32 %v1216_v60, %v1214_v2  ;;  %v1215_v12 = vsel %vm1131_vm2, %v1210_v3, %v1214_v2  ;;  %v20947_v60 = vld [vmem:[%s21711_s22 + $0x90] ss:$0 sps:$4 sm:$0x11]  }
  0x77   : > { %18525 = vmatpush3.bf16.msra.mxu1 %v20907_v0  ;;  %v9209_v0 = vsel %vm3518_vm1, %v9207_v52, %v9208_v50  ;;  %v1230_v19 = vrot.slane %v1228_v9, 1  ;;  %v20956_v50 = vld [vmem:[%s23817_s3 + $0x420] sm:$0xff]   ;;  %v20951_v9 = vld [vmem:[%s21711_s22 + $0x8] sm:$0xff]  }
  0x78   : > { %18526 = vmatprep.subr.bf16.mxu1 %v20913_v8  ;;  %v1223_v15 = vsel %vm1131_vm2, %v1218_v6, %v1222_v7  ;;  %v1272_v6 = vshrl.u32 %v20944_v48, 16  ;;  %v1276_v7 = vshll.u32 %v20947_v60, 16 }
  0x79   : > { %v1231_v34 = vsel %vm1131_vm2, %v1226_v25, %v1230_v19 }
  0x7a   : > { %18491 = vmatmul.mubr.bf16.gmra.mrb[4].mxu1 %v1167_v11  ;;  %v1236_v11 = vshll.u32 %v20933_v4, 16 }
  0x7b   : > { %19187 = vmatmul.mubr.bf16.gmra.mrb[24].mxu0 %v8700_v16  ;;  %18494 = vmatprep.mubr.bf16.mxu1 %v1175_v17  ;;  %v1232_v16 = vshrl.u32 %v20929_v63, 16  ;;  %v20934_v17 = vld [vmem:[%s21719_s10 + $0x38] sm:$0xff]  }
  0x7c   : > { %19190 = vmatprep.mubr.bf16.mxu0 %v8702_v20  ;;  %18527 = vmatpush3.bf16.msra.mxu1 %v20913_v8  ;;  %v9212_v8 = vrot.slane %v20928_v62, 2  ;;  %v20935_v20 = vld [vmem:[%s21711_s22 + $0x70] sm:$0xff]   ;;  %v1238_v26 = vrot.slane %v1236_v11, 1  ;;  %v9216_v29 = vrot.slane %v20934_v17, 2  ;;  %v20962_v62 = vld [vmem:[%s23817_s3 + $0x428] sm:$0xff]  }
  0x7d   : > { %18528 = vmatprep.subr.bf16.mxu1 %v20919_v21  ;;  %v1234_v28 = vor.u32 %v1232_v16, %v1230_v19  ;;  %v20974_v16 = vld [vmem:[%s23817_s3 + $0x438] sm:$0xff]  }
  0x7e   : > { %v9213_v18 = vsel %vm3518_vm1, %v9210_v5, %v9212_v8  ;;  %v9215_v37 = vsel %vm3518_vm1, %v9212_v8, %v9214_v22  ;;  %v1242_v44 = vor.u32 %v1240_v32, %v1238_v26  ;;  %v9219_v56 = vsel %vm3518_vm1, %v9216_v29, %v9218_v45  ;;  %v20968_v5 = vld [vmem:[%s23817_s3 + $0x430] sm:$0xff]   ;;  %v20948_v8 = vld [vmem:[%s21719_s10 + $0x60] sm:$0xff]   ;;  %v20957_v32 = vld [vmem:[%s21711_s22 + $0x18] sm:$0xff]  }
  0x7f   : > { %v9226_v19 = vrot.slane %v20948_v8, 2  ;;  %v20980_v8 = vld [vmem:[%s23817_s3 + $0xe0] sm:$0xff]  }
  0x80   : > { %18529 = vmatpush3.bf16.msra.mxu1 %v20919_v21  ;;  %v20937_v21 = vld [vmem:[%s23817_s3 + $0x408] sm:$0xff]  }
  0x81   : > { %18530 = vmatprep.subr.bf16.mxu1 %v20926_v33 }
  0x82   : > { %18495 = vmatmul.mubr.bf16.gmra.mrb[8].mxu1 %v1183_v36  ;;  %v1248_v36 = vshrl.u32 %v20935_v20, 16 }
  0x83   : > { %19191 = vmatmul.mubr.bf16.gmra.mrb[28].mxu0 %v8704_v39  ;;  %18498 = vmatprep.mubr.bf16.mxu1 %v1191_v40  ;;  %v20940_v39 = vld [vmem:[%s21719_s10 + $0x48] sm:$0xff]   ;;  %v9217_v40 = vsel %vm3518_vm1, %v9214_v22, %v9216_v29 }
  0x84   : > { %19194 = vmatprep.mubr.bf16.mxu0 %v8706_v42  ;;  %18531 = vmatpush3.bf16.msra.mxu1 %v20926_v33  ;;  %v1244_v33 = vshll.u32 %v20935_v20, 16  ;;  %v9220_v49 = vrot.slane %v20940_v39, 2 }
  0x85   : > { %18532 = vmatprep.subr.bf16.mxu1 %v20932_v43 }
  0x86   : > { %v1246_v42 = vrot.slane %v1244_v33, 1  ;;  %v9221_v61 = vsel %vm3518_vm1, %v9218_v45, %v9220_v49  ;;  %v20958_v33 = vld [vmem:[%s21719_s10 + $0x78] sm:$0xff]   ;;  %v20961_v45 = vld [vmem:[%s23817_s3 + $0xc8] sm:$0xff]  }
  0x88   : > { %18533 = vmatpush3.bf16.msra.mxu1 %v20932_v43  ;;  %v20941_v43 = vld [vmem:[%s21711_s22 + $0x80] sm:$0xff]   ;;  %v1250_v46 = vor.u32 %v1248_v36, %v1246_v42  ;;  %v1784_v36 = vrot.slane %v20957_v32, 1 }
  0x89   : > { %18534 = vmatprep.subr.bf16.mxu1 %v20938_v53  ;;  %v1260_v52 = vshll.u32 %v20941_v43, 16 }
  0x8a   : > { %18499 = vmatmul.mubr.bf16.gmra.mrb[12].mxu1 %v1199_v55  ;;  %v1264_v55 = vshrl.u32 %v20941_v43, 16  ;;  %v1255_v57 = vsel %vm1131_vm2, %v1250_v46, %v1254_v47  ;;  %v20964_v46 = vld [vmem:[%s21719_s10 + $0x88] sm:$0xff]  }
  0x8b   : > { %19195 = vmatmul.mubr.bf16.gmra.mrb[32].mxu0 %v8708_v58  ;;  %18502 = vmatprep.mubr.bf16.mxu1 %v1207_v59  ;;  %v1268_v58 = vshll.u32 %v20944_v48, 16  ;;  %v20946_v59 = vld [vmem:[%s21719_s10 + $0x58] sm:$0xff]   ;;  %v1262_v63 = vrot.slane %v1260_v52, 1  ;;  %v20965_v52 = vld [vmem:[%s21711_s22 + $0x30] sm:$0xff]  }
  0x8c   : > { %19214 = vmatprep.mubr.bf16.mxu0 %v9209_v0  ;;  %18535 = vmatpush3.bf16.msra.mxu1 %v20938_v53  ;;  %v1247_v53 = vsel %vm1131_vm2, %v1242_v44, %v1246_v42  ;;  %v1258_v0 = vor.u32 %v1256_v51, %v1254_v47  ;;  %v9224_v4 = vrot.slane %v20946_v59, 2  ;;  %v1786_v47 = vrot.slane %v20959_v38, 1  ;;  %v20977_v59 = vld [vmem:[%s21719_s10 + $0x18] sm:$0xff]  }
  0x8d   : > { %18536 = vmatprep.subr.bf16.mxu1 %v20945_v1  ;;  %v1266_v2 = vor.u32 %v1264_v55, %v1262_v63  ;;  %v1270_v3 = vrot.slane %v1268_v58, 1  ;;  %v9236_v51 = vrot.slane %v20964_v46, 2  ;;  %v22043_v55 = vld [vmem:[%s21719_s10 + $0x98] sm:$0xff]  }
  0x8e   : > { %v1263_v10 = vsel %vm1131_vm2, %v1258_v0, %v1262_v63  ;;  %v20973_v58 = vld [vmem:[%s23817_s3 + $0xd8] sm:$0xff]  }
  0x8f   : > { %v1271_v11 = vsel %vm1131_vm2, %v1266_v2, %v1270_v3  ;;  %v1274_v17 = vor.u32 %v1272_v6, %v1270_v3  ;;  %v9240_v2 = vrot.slane %v22043_v55, 2  ;;  %v20972_v3 = vld [vmem:[%s21719_s10 + $0xa0] ss:$0 sps:$4 sm:$0x33]   ;;  %v20988_v38 = vld [vmem:[%s21719_s10 + $0x38] sm:$0xff]  }
  0x90   : > { %18537 = vmatpush3.bf16.msra.mxu1 %v20945_v1  ;;  %v9222_v1 = vrot.slane %v20942_v54, 2  ;;  %v22040_v54 = vld [vmem:[%s21711_s22 + $0x38] sm:$0xff]   ;;  %v22091_v55 = vld [vmem:[%s23817_s3 + $0x100] sm:$0xff]  }
  0x91   : > { %18574 = vmatprep.subr.bf16.mxu1 %v21962_v23  ;;  %v1792_v0 = vrot.slane %v22040_v54, 1  ;;  %v9790_v54 = vshll.u32 %v20988_v38, 16 }
  0x92   : > { %18503 = vmatmul.mubr.bf16.gmra.mrb[16].mxu1 %v1215_v12  ;;  %v20950_v12 = vld [vmem:[%s21711_s22] sm:$0xfe]   ;;  %v9223_v13 = vsel %vm3518_vm1, %v9220_v49, %v9222_v1 }
  0x93   : > { %19215 = vmatmul.mubr.bf16.vlgmr.msra.gmra.mrb[0].mxu0 %v9211_v14  ;;  %18506 = vmatprep.mubr.bf16.mxu1 %v1223_v15  ;;  %v9225_v14 = vsel %vm3518_vm1, %v9222_v1, %v9224_v4  ;;  %v20952_v15 = vld [vmem:[%s21719_s10 + $0x68] sm:$0xff]   ;;  %v1779_v20 = vrot.slane %v20950_v12, 1  ;;  %v20971_v1 = vld [vmem:[%s21711_s22 + $0x40] sm:$0xff]  }
  0x94   : > { %19218 = vmatprep.mubr.bf16.mxu0 %v9213_v18  ;;  %19251 = vmatpush3.bf16.msra.mxu0 %v21915_v24  ;;  %v1239_v24 = vsel %vm1131_vm2, %v1234_v28, %v1238_v26  ;;  %v1278_v18 = vrot.slane %v1276_v7, 1  ;;  %v9228_v22 = vrot.slane %v20952_v15, 2  ;;  %v20953_v26 = vld [vmem:[%s21711_s22 + $0x10] sm:$0xff]   ;;  %v9227_v28 = vsel %vm3518_vm1, %v9224_v4, %v9226_v19 }
  0x95   : > { %19252 = vmatprep.subr.bf16.mxu0 %v20937_v21  ;;  %v9751_v4 = vshrl.u32 %v20977_v59, 16  ;;  %v9754_v7 = vshll.u32 %v20977_v59, 16  ;;  %v1794_v12 = vrot.slane %v20971_v1, 1 }
  0x96   : > { %v1279_v25 = vsel %vm1131_vm2, %v1274_v17, %v1278_v18  ;;  %v9231_v42 = vsel %vm3518_vm1, %v9228_v22, %v9230_v35 }
  0x97   : > { %v9753_v15 = vrot.slane %v9751_v4, 2 }
  0x98   : > { %19253 = vmatpush3.bf16.msra.mxu0 %v20937_v21  ;;  %v1780_v21 = vrot.slane %v20951_v9, 1  ;;  %v22062_v9 = vld [vmem:[%s21711_s22 + $0x48] sm:$0xff]  }
  0x99   : > { %19254 = vmatprep.subr.bf16.mxu0 %v20943_v30 }
  0x9a   : > { %18507 = vmatmul.mubr.bf16.gmra.mrb[20].mxu1 %v1231_v34  ;;  %v1781_v29 = vsel %vm1778_vm3, %v1779_v20, %v1780_v21  ;;  %v1782_v34 = vrot.slane %v20953_v26, 1  ;;  %v9756_v20 = vrot.slane %v9754_v7, 3  ;;  %v20978_v26 = vld [vmem:[%s21711_s22 + $0x50] sm:$0xff]  }
  0x9b   : > { %19219 = vmatmul.mubr.bf16.gmra.mrb[4].mxu0 %v9215_v37  ;;  %18510 = vmatprep.mubr.bf16.mxu1 %v1239_v24  ;;  %v9232_v37 = vrot.slane %v20958_v33, 2  ;;  %v22019_v24 = vld [vmem:[%s23817_s3 + $0x440] sm:$0xff]  }
  0x9c   : > { %19222 = vmatprep.mubr.bf16.mxu0 %v9217_v40  ;;  %19255 = vmatpush3.bf16.msra.mxu0 %v20943_v30  ;;  %v9229_v30 = vsel %vm3518_vm1, %v9226_v19, %v9228_v22  ;;  %v1783_v39 = vsel %vm1778_vm3, %v1780_v21, %v1782_v34  ;;  %v20960_v40 = vld [vmem:[%s21719_s10 + $0x80] sm:$0xff]   ;;  %v1785_v43 = vsel %vm1778_vm3, %v1782_v34, %v1784_v36  ;;  %v20986_v21 = vld [vmem:[%s23817_s3 + $0xe8] sm:$0xff]   ;;  %v9242_v22 = vrot.slane %v20972_v3, 2  ;;  %v20992_v34 = vld [vmem:[%s23817_s3 + $0xf0] sm:$0xff]  }
  0x9d   : > { %19256 = vmatprep.subr.bf16.mxu0 %v20949_v41  ;;  %v9233_v44 = vsel %vm3518_vm1, %v9230_v35, %v9232_v37  ;;  %v9234_v48 = vrot.slane %v20960_v40, 2  ;;  %v9757_v32 = vor.u32 %v9756_v20, %v9753_v15  ;;  %v20981_v35 = vld [vmem:[%s21711_s22 + $0x58] sm:$0xff]   ;;  %v20991_v3 = vld [vmem:[%s23817_s3 + $0x448] sm:$0xff]   ;;  %v20989_v15 = vld [vmem:[%s21711_s22 + $0x70] sm:$0xff]  }
  0x9f   : > { %v9237_v60 = vsel %vm3518_vm1, %v9234_v48, %v9236_v51 }
  0xa0   : > { %19257 = vmatpush3.bf16.msra.mxu0 %v20949_v41  ;;  %v20963_v41 = vld [vmem:[%s21711_s22 + $0x28] sm:$0xff]  }
  0xa1   : > { %19258 = vmatprep.subr.bf16.mxu0 %v20956_v50  ;;  %v1788_v49 = vrot.slane %v20963_v41, 1 }
  0xa2   : > { %18511 = vmatmul.mubr.bf16.gmra.mrb[24].mxu1 %v1247_v53  ;;  %v20966_v53 = vld [vmem:[%s21719_s10 + $0x90] sm:$0xff]  }
  0xa3   : > { %19223 = vmatmul.mubr.bf16.gmra.mrb[8].mxu0 %v9219_v56  ;;  %18514 = vmatprep.mubr.bf16.mxu1 %v1255_v57  ;;  %v9235_v56 = vsel %vm3518_vm1, %v9232_v37, %v9234_v48  ;;  %v1789_v57 = vsel %vm1778_vm3, %v1786_v47, %v1788_v49  ;;  %v9238_v63 = vrot.slane %v20966_v53, 2  ;;  %v20984_v37 = vld [vmem:[%s21719_s10 + $0x30] sm:$0xff]   ;;  %v1800_v48 = vrot.slane %v20981_v35, 1 }
  0xa4   : > { %19226 = vmatprep.mubr.bf16.mxu0 %v9221_v61  ;;  %19259 = vmatpush3.bf16.msra.mxu0 %v20956_v50  ;;  %v20967_v50 = vld [vmem:[%s23817_s3 + $0xd0] sm:$0xff]  }
  0xa5   : > { %19260 = vmatprep.subr.bf16.mxu0 %v20962_v62  ;;  %v20976_v61 = vld [vmem:[%s21719_s10 + $0x10] sm:$0xfc]   ;;  %v9241_v17 = vsel %vm3518_vm1, %v9238_v63, %v9240_v2 }
  0xa6   : > { %v9746_v6 = vshll.u32 %v20976_v61, 16 }
  0xa8   : > { %19261 = vmatpush3.bf16.msra.mxu0 %v20962_v62  ;;  %v1790_v62 = vrot.slane %v20965_v52, 1  ;;  %v9748_v19 = vrot.slane %v9746_v6, 3 }
  0xa9   : > { %19262 = vmatprep.subr.bf16.mxu0 %v20968_v5 }
  0xaa   : > { %18515 = vmatmul.mubr.bf16.gmra.mrb[28].mxu1 %v1263_v10  ;;  %v1791_v10 = vsel %vm1778_vm3, %v1788_v49, %v1790_v62  ;;  %v9778_v49 = vshrl.u32 %v20984_v37, 16 }
  0xab   : > { %19227 = vmatmul.mubr.bf16.gmra.mrb[12].mxu0 %v9223_v13  ;;  %18518 = vmatprep.mubr.bf16.mxu1 %v1271_v11  ;;  %v20979_v13 = vld [vmem:[%s21719_s10 + $0x20] sm:$0xff]   ;;  %v9239_v11 = vsel %vm3518_vm1, %v9236_v51, %v9238_v63  ;;  %v9787_v51 = vshrl.u32 %v20988_v38, 16 }
  0xac   : > { %19230 = vmatprep.mubr.bf16.mxu0 %v9225_v14  ;;  %19263 = vmatpush3.bf16.msra.mxu0 %v20968_v5  ;;  %v9743_v5 = vshrl.u32 %v20976_v61, 16  ;;  %v1793_v14 = vsel %vm1778_vm3, %v1790_v62, %v1792_v0  ;;  %v9760_v27 = vshrl.u32 %v20979_v13, 16  ;;  %v20987_v62 = vld [vmem:[%s21711_s22 + $0x68] sm:$0xff]   ;;  %v20995_v38 = vld [vmem:[%s21711_s22 + $0x80] sm:$0xff]  }
  0xad   : > { %19264 = vmatprep.subr.bf16.mxu0 %v20974_v16  ;;  %v9789_v63 = vrot.slane %v9787_v51, 2 }
  0xae   : > { %v9745_v18 = vrot.slane %v9743_v5, 2  ;;  %v9762_v41 = vrot.slane %v9760_v27, 2 }
  0xb0   : > { %19265 = vmatpush3.bf16.msra.mxu0 %v20974_v16  ;;  %v20982_v16 = vld [vmem:[%s21719_s10 + $0x28] sm:$0xff]  }
  0xb1   : > { %19302 = vmatprep.subr.bf16.mxu0 %v22019_v24  ;;  %v9772_v33 = vshll.u32 %v20982_v16, 16 }
  0xb2   : > { %18519 = vmatmul.mubr.bf16.gmra.mrb[32].mxu1 %v1279_v25  ;;  %v1796_v25 = vrot.slane %v22062_v9, 1 }
  0xb3   : > { %19231 = vmatmul.mubr.bf16.gmra.mrb[16].mxu0 %v9227_v28  ;;  %18538 = vmatprep.mubr.bf16.mxu1 %v1781_v29  ;;  %v9763_v28 = vshll.u32 %v20979_v13, 16  ;;  %v9769_v29 = vshrl.u32 %v20982_v16, 16  ;;  %v9774_v46 = vrot.slane %v9772_v33, 3  ;;  %v20997_v13 = vld [vmem:[%s23817_s3 + $0x450] sm:$0xff]  }
  0xb4   : > { %19234 = vmatprep.mubr.bf16.mxu0 %v9229_v30  ;;  %v9749_v30 = vor.u32 %v9748_v19, %v9745_v18  ;;  %v1797_v40 = vsel %vm1778_vm3, %v1794_v12, %v1796_v25  ;;  %v20993_v18 = vld [vmem:[%s21711_s22 + $0x78] sm:$0xff]  }
  0xb5   : > { %v1808_v33 = vrot.slane %v20993_v18, 1  ;;  %v22158_v18 = vld [vmem:[%s23817_s3 + $0x480] sm:$0xff]  }
  0xba   : > { %18539 = vmatmul.mubr.bf16.vlgmr.msra.gmra.mrb[0].mxu1 %v1783_v39  ;;  %v9243_v39 = vsel %vm3518_vm1, %v9240_v2, %v9242_v22  ;;  %v9792_v2 = vrot.slane %v9790_v54, 3 }
  0xbb   : > { %19235 = vmatmul.mubr.bf16.gmra.mrb[20].mxu0 %v9231_v42  ;;  %18575 = vmatpush3.bf16.msra.mxu1 %v21962_v23  ;;  %v1787_v23 = vsel %vm1778_vm3, %v1784_v36, %v1786_v47  ;;  %v1795_v36 = vsel %vm1778_vm3, %v1792_v0, %v1794_v12  ;;  %v9765_v42 = vrot.slane %v9763_v28, 3  ;;  %v20999_v47 = vld [vmem:[%s23817_s3 + $0xf8] sm:$0xff]   ;;  %v20994_v0 = vld [vmem:[%s21719_s10 + $0x48] sm:$0xff]   ;;  %v1806_v28 = vrot.slane %v20989_v15, 1 }
  0xbc   : > { %18542 = vmatprep.mubr.bf16.mxu1 %v1785_v43  ;;  %19238 = vmatprep.mubr.bf16.mxu0 %v9233_v44  ;;  %v9758_v43 = vsel %vm4589_vm4, %v9749_v30, %v9757_v32  ;;  %v1798_v44 = vrot.slane %v20978_v26, 1  ;;  %v9805_v9 = vshrl.u32 %v20994_v0, 16  ;;  %v9808_v12 = vshll.u32 %v20994_v0, 16  ;;  %v21003_v26 = vld [vmem:[%s23817_s3 + $0x458] sm:$0xff]   ;;  %v21002_v30 = vld [vmem:[%s21719_s10 + $0x60] sm:$0xff]  }
  0xbd   : > { %18576 = vmatprep.subr.bf16.mxu1 %v20961_v45  ;;  %v9766_v52 = vor.u32 %v9765_v42, %v9762_v41  ;;  %v9835_v51 = vshll.u32 %v21002_v30, 16 }
  0xbe   : > { %v9807_v20 = vrot.slane %v9805_v9, 2 }
  0xbf   : > { %18577 = vmatpush3.bf16.msra.mxu1 %v20961_v45  ;;  %v9771_v45 = vrot.slane %v9769_v29, 2  ;;  %v9767_v59 = vsel %vm4589_vm4, %v9757_v32, %v9766_v52 }
  0xc0   : > { %18578 = vmatprep.subr.bf16.mxu1 %v20967_v50 }
  0xc1   : > { %v9775_v53 = vor.u32 %v9774_v46, %v9771_v45  ;;  %v1809_v45 = vsel %vm1778_vm3, %v1806_v28, %v1808_v33 }
  0xc2   : > { %18543 = vmatmul.mubr.bf16.gmra.mrb[4].mxu1 %v1787_v23  ;;  %v20983_v23 = vld [vmem:[%s21711_s22 + $0x60] sm:$0xff]  }
  0xc3   : > { %19239 = vmatmul.mubr.bf16.gmra.mrb[24].mxu0 %v9235_v56  ;;  %18546 = vmatprep.mubr.bf16.mxu1 %v1789_v57  ;;  %v1799_v56 = vsel %vm1778_vm3, %v1796_v25, %v1798_v44  ;;  %v9780_v57 = vrot.slane %v9778_v49, 2  ;;  %v9776_v1 = vsel %vm4589_vm4, %v9766_v52, %v9775_v53  ;;  %v1802_v4 = vrot.slane %v20983_v23, 1  ;;  %v21001_v23 = vld [vmem:[%s21711_s22 + $0x90] ss:$0 sps:$4 sm:$0x11]  }
  0xc4   : > { %19242 = vmatprep.mubr.bf16.mxu0 %v9237_v60  ;;  %18579 = vmatpush3.bf16.msra.mxu1 %v20967_v50  ;;  %v9781_v50 = vshll.u32 %v20984_v37, 16  ;;  %v1801_v60 = vsel %vm1778_vm3, %v1798_v44, %v1800_v48  ;;  %v9810_v25 = vrot.slane %v9808_v12, 3  ;;  %v21010_v37 = vld [vmem:[%s23817_s3 + $0x460] sm:$0xff]   ;;  %v1810_v52 = vrot.slane %v20995_v38, 1 }
  0xc5   : > { %18580 = vmatprep.subr.bf16.mxu1 %v20973_v58  ;;  %v1814_v9 = vrot.slane %v21001_v23, 1 }
  0xc6   : > { %v9783_v61 = vrot.slane %v9781_v50, 3  ;;  %v9811_v35 = vor.u32 %v9810_v25, %v9807_v20  ;;  %v21016_v50 = vld [vmem:[%s23817_s3 + $0x468] sm:$0xff]   ;;  %v1811_v0 = vsel %vm1778_vm3, %v1808_v33, %v1810_v52 }
  0xc8   : > { %18581 = vmatpush3.bf16.msra.mxu1 %v20973_v58  ;;  %v20990_v58 = vld [vmem:[%s21719_s10 + $0x40] sm:$0xff]   ;;  %v9784_v7 = vor.u32 %v9783_v61, %v9780_v57  ;;  %v21022_v61 = vld [vmem:[%s23817_s3 + $0x470] sm:$0xff]  }
  0xc9   : > { %18582 = vmatprep.subr.bf16.mxu1 %v20980_v8  ;;  %v9796_v5 = vshrl.u32 %v20990_v58, 16  ;;  %v9799_v6 = vshll.u32 %v20990_v58, 16 }
  0xca   : > { %18547 = vmatmul.mubr.bf16.gmra.mrb[8].mxu1 %v1791_v10  ;;  %v9793_v10 = vor.u32 %v9792_v2, %v9789_v63  ;;  %v21009_v63 = vld [vmem:[%s21719_s10 + $0x70] sm:$0xff]  }
  0xcb   : > { %19243 = vmatmul.mubr.bf16.gmra.mrb[28].mxu0 %v9239_v11  ;;  %18550 = vmatprep.mubr.bf16.mxu1 %v1793_v14  ;;  %v20996_v11 = vld [vmem:[%s21719_s10 + $0x50] sm:$0xff]   ;;  %v1803_v14 = vsel %vm1778_vm3, %v1800_v48, %v1802_v4  ;;  %v9798_v16 = vrot.slane %v9796_v5, 2  ;;  %v21012_v5 = vld [vmem:[%s21719_s10 + $0x78] sm:$0xff]  }
  0xcc   : > { %19246 = vmatprep.mubr.bf16.mxu0 %v9241_v17  ;;  %18583 = vmatpush3.bf16.msra.mxu1 %v20980_v8  ;;  %v1804_v8 = vrot.slane %v20987_v62, 1  ;;  %v9801_v17 = vrot.slane %v9799_v6, 3  ;;  %v9794_v22 = vsel %vm4589_vm4, %v9784_v7, %v9793_v10  ;;  %v9814_v27 = vshrl.u32 %v20996_v11, 16 }
  0xcd   : > { %18584 = vmatprep.subr.bf16.mxu1 %v20986_v21  ;;  %v9817_v29 = vshll.u32 %v20996_v11, 16  ;;  %v9837_v62 = vrot.slane %v9835_v51, 3  ;;  %v9859_v15 = vshrl.u32 %v21012_v5, 16 }
  0xce   : > { %v1805_v19 = vsel %vm1778_vm3, %v1802_v4, %v1804_v8  ;;  %v9802_v32 = vor.u32 %v9801_v17, %v9798_v16  ;;  %v1807_v41 = vsel %vm1778_vm3, %v1804_v8, %v1806_v28  ;;  %v21028_v8 = vld [vmem:[%s23817_s3 + $0x478] sm:$0xff]   ;;  %v9862_v17 = vshll.u32 %v21012_v5, 16  ;;  %v21014_v28 = vld [vmem:[%s21719_s10 + $0x80] sm:$0xff]  }
  0xcf   : > { %v9819_v42 = vrot.slane %v9817_v29, 3  ;;  %v9871_v38 = vshll.u32 %v21014_v28, 16 }
  0xd0   : > { %18585 = vmatpush3.bf16.msra.mxu1 %v20986_v21  ;;  %v21000_v21 = vld [vmem:[%s21719_s10 + $0x58] sm:$0xff]   ;;  %v9803_v44 = vsel %vm4589_vm4, %v9793_v10, %v9802_v32  ;;  %v9812_v48 = vsel %vm4589_vm4, %v9802_v32, %v9811_v35  ;;  %v9850_v10 = vshrl.u32 %v21009_v63, 16  ;;  %v21018_v32 = vld [vmem:[%s21719_s10 + $0x88] sm:$0xff]  }
  0xd1   : > { %18586 = vmatprep.subr.bf16.mxu1 %v20992_v34 }
  0xd2   : > { %18551 = vmatmul.mubr.bf16.gmra.mrb[12].mxu1 %v1795_v36  ;;  %v9826_v36 = vshll.u32 %v21000_v21, 16 }
  0xd3   : > { %19247 = vmatmul.mubr.bf16.gmra.mrb[32].mxu0 %v9243_v39  ;;  %18554 = vmatprep.mubr.bf16.mxu1 %v1797_v40  ;;  %v9816_v39 = vrot.slane %v9814_v27, 2  ;;  %v22126_v40 = vld [vmem:[%s21711_s22 + $0x88] sm:$0xff]   ;;  %v9861_v27 = vrot.slane %v9859_v15, 2 }
  0xd4   : > { %19266 = vmatprep.mubr.bf16.mxu0 %v9758_v43  ;;  %18587 = vmatpush3.bf16.msra.mxu1 %v20992_v34  ;;  %v9823_v34 = vshrl.u32 %v21000_v21, 16  ;;  %v9832_v43 = vshrl.u32 %v21002_v30, 16  ;;  %v9828_v49 = vrot.slane %v9826_v36, 3  ;;  %v9864_v30 = vrot.slane %v9862_v17, 3  ;;  %v21025_v17 = vld [vmem:[%s21711_s22 + $0x48] sm:$0xff]  }
  0xd5   : > { %18588 = vmatprep.subr.bf16.mxu1 %v20999_v47  ;;  %v9820_v54 = vor.u32 %v9819_v42, %v9816_v39  ;;  %v21017_v42 = vld [vmem:[%s21711_s22 + $0x30] sm:$0xff]  }
  0xd6   : > { %v9825_v46 = vrot.slane %v9823_v34, 2  ;;  %v9865_v39 = vor.u32 %v9864_v30, %v9861_v27  ;;  %v2323_v23 = vrot.slane %v21017_v42, 1  ;;  %v21030_v27 = vld [vmem:[%s21719_s10 + $0x10] sm:$0xf8]   ;;  %v2329_v30 = vrot.slane %v21025_v17, 1  ;;  %v21035_v42 = vld [vmem:[%s21711_s22 + $0x60] sm:$0xff]  }
  0xd7   : > { %v9821_v2 = vsel %vm4589_vm4, %v9811_v35, %v9820_v54  ;;  %v21013_v35 = vld [vmem:[%s21711_s22 + $0x28] sm:$0xff]  }
  0xd8   : > { %18589 = vmatpush3.bf16.msra.mxu1 %v20999_v47  ;;  %v21006_v47 = vld [vmem:[%s21719_s10 + $0x68] sm:$0xff]   ;;  %v9829_v58 = vor.u32 %v9828_v49, %v9825_v46  ;;  %v9873_v49 = vrot.slane %v9871_v38, 3  ;;  %v2321_v51 = vrot.slane %v21013_v35, 1 }
  0xd9   : > { %18626 = vmatprep.subr.bf16.mxu1 %v22091_v55  ;;  %v9841_v57 = vshrl.u32 %v21006_v47, 16 }
  0xda   : > { %18555 = vmatmul.mubr.bf16.gmra.mrb[16].mxu1 %v1799_v56  ;;  %v9834_v56 = vrot.slane %v9832_v43, 2  ;;  %v9830_v6 = vsel %vm4589_vm4, %v9820_v54, %v9829_v58  ;;  %v21024_v54 = vld [vmem:[%s21719_s10 + $0x98] sm:$0xff]  }
  0xdb   : > { %19267 = vmatmul.mubr.bf16.vlgmr.msra.gmra.mrb[0].mxu0 %v9767_v59  ;;  %18558 = vmatprep.mubr.bf16.mxu1 %v1801_v60  ;;  %v22139_v59 = vld [vmem:[%s21711_s22 + $0x10] sm:$0xff]   ;;  %v9844_v60 = vshll.u32 %v21006_v47, 16  ;;  %v9843_v4 = vrot.slane %v9841_v57, 2 }
  0xdc   : > { %19270 = vmatprep.mubr.bf16.mxu0 %v9776_v1  ;;  %19303 = vmatpush3.bf16.msra.mxu0 %v22019_v24  ;;  %v9785_v24 = vsel %vm4589_vm4, %v9775_v53, %v9784_v7  ;;  %v1812_v53 = vrot.slane %v22126_v40, 1  ;;  %v21004_v1 = vld [vmem:[%s21711_s22 + $0x8] sm:$0xfe]   ;;  %v2315_v12 = vrot.slane %v22139_v59, 1  ;;  %v9838_v11 = vor.u32 %v9837_v62, %v9834_v56  ;;  %v21021_v56 = vld [vmem:[%s23817_s3 + $0x110] sm:$0xff]  }
  0xdd   : > { %19304 = vmatprep.subr.bf16.mxu0 %v20991_v3  ;;  %v9846_v7 = vrot.slane %v9844_v60, 3  ;;  %v9877_v40 = vshrl.u32 %v21018_v32, 16  ;;  %v21026_v60 = vld [vmem:[%s21719_s10 + $0xa0] ss:$0 sps:$4 sm:$0x77]   ;;  %v9895_v62 = vshrl.u32 %v21024_v54, 16 }
  0xde   : > { %v1815_v20 = vsel %vm1778_vm3, %v1812_v53, %v1814_v9  ;;  %v9839_v25 = vsel %vm4589_vm4, %v9829_v58, %v9838_v11  ;;  %v21027_v9 = vld [vmem:[%s23817_s3 + $0x118] sm:$0xff]  }
  0xdf   : > { %v9847_v16 = vor.u32 %v9846_v7, %v9843_v4  ;;  %v2324_v4 = vsel %vm1778_vm3, %v2321_v51, %v2323_v23  ;;  %v9897_v7 = vrot.slane %v9895_v62, 2 }
  0xe0   : > { %19305 = vmatpush3.bf16.msra.mxu0 %v20991_v3  ;;  %v1813_v3 = vsel %vm1778_vm3, %v1810_v52, %v1812_v53  ;;  %v9879_v52 = vrot.slane %v9877_v40, 2 }
  0xe1   : > { %19306 = vmatprep.subr.bf16.mxu0 %v20997_v13  ;;  %v9848_v29 = vsel %vm4589_vm4, %v9838_v11, %v9847_v16 }
  0xe2   : > { %18559 = vmatmul.mubr.bf16.gmra.mrb[20].mxu1 %v1803_v14  ;;  %v2314_v14 = vrot.slane %v21004_v1, 1 }
  0xe3   : > { %19271 = vmatmul.mubr.bf16.gmra.mrb[4].mxu0 %v9785_v24  ;;  %18562 = vmatprep.mubr.bf16.mxu1 %v1805_v19  ;;  %v21007_v24 = vld [vmem:[%s21711_s22 + $0x18] sm:$0xff]   ;;  %v9852_v19 = vrot.slane %v9850_v10, 2 }
  0xe4   : > { %19274 = vmatprep.mubr.bf16.mxu0 %v9794_v22  ;;  %19307 = vmatpush3.bf16.msra.mxu0 %v20997_v13  ;;  %v9853_v13 = vshll.u32 %v21009_v63, 16  ;;  %v21011_v22 = vld [vmem:[%s21711_s22 + $0x20] sm:$0xff]   ;;  %v2317_v33 = vrot.slane %v21007_v24, 1  ;;  %v9898_v63 = vshll.u32 %v21024_v54, 16  ;;  %v21041_v54 = vld [vmem:[%s21711_s22 + $0x70] sm:$0xff]  }
  0xe5   : > { %19308 = vmatprep.subr.bf16.mxu0 %v21003_v26  ;;  %v2319_v34 = vrot.slane %v21011_v22, 1  ;;  %v21031_v22 = vld [vmem:[%s21719_s10 + $0x18] sm:$0xff]   ;;  %v2339_v62 = vrot.slane %v21041_v54, 1 }
  0xe6   : > { %v9855_v21 = vrot.slane %v9853_v13, 3  ;;  %v2318_v43 = vsel %vm1778_vm3, %v2315_v12, %v2317_v33  ;;  %v9907_v13 = vshll.u32 %v21026_v60, 16  ;;  %v10411_v35 = vrot.slane %v21031_v22, 3  ;;  %v21070_v22 = vld [vmem:[%s23817_s3 + $0x4a8] sm:$0xff]  }
  0xe7   : > { %v2320_v47 = vsel %vm1778_vm3, %v2317_v33, %v2319_v34  ;;  %v2322_v1 = vsel %vm1778_vm3, %v2319_v34, %v2321_v51  ;;  %v10410_v34 = vrot.slane %v21030_v27, 3  ;;  %v21037_v51 = vld [vmem:[%s21711_s22 + $0x68] sm:$0xff]  }
  0xe8   : > { %19309 = vmatpush3.bf16.msra.mxu0 %v21003_v26  ;;  %v2316_v26 = vsel %vm1778_vm3, %v2314_v14, %v2315_v12  ;;  %v9856_v36 = vor.u32 %v9855_v21, %v9852_v19  ;;  %v9904_v12 = vshrl.u32 %v21026_v60, 16  ;;  %v21029_v21 = vld [vmem:[%s21711_s22 + $0x50] sm:$0xff]   ;;  %v2337_v60 = vrot.slane %v21037_v51, 1 }
  0xe9   : > { %19310 = vmatprep.subr.bf16.mxu0 %v21010_v37 }
  0xea   : > { %18563 = vmatmul.mubr.bf16.gmra.mrb[24].mxu1 %v1807_v41  ;;  %v9880_v41 = vshll.u32 %v21018_v32, 16  ;;  %v9857_v46 = vsel %vm4589_vm4, %v9847_v16, %v9856_v36  ;;  %v21034_v16 = vld [vmem:[%s23817_s3 + $0x120] sm:$0xff]   ;;  %v9906_v19 = vrot.slane %v9904_v12, 2  ;;  %v2331_v32 = vrot.slane %v21029_v21, 1  ;;  %v21049_v12 = vld [vmem:[%s21711_s22 + $0x88] sm:$0xff]   ;;  %v21059_v21 = vld [vmem:[%s21711_s22 + $0x10] sm:$0xff]  }
  0xeb   : > { %19275 = vmatmul.mubr.bf16.gmra.mrb[8].mxu0 %v9803_v44  ;;  %18566 = vmatprep.mubr.bf16.mxu1 %v1809_v45  ;;  %v21015_v44 = vld [vmem:[%s23817_s3 + $0x108] sm:$0xff]   ;;  %v21020_v45 = vld [vmem:[%s21719_s10 + $0x90] sm:$0xff]  }
  0xec   : > { %19278 = vmatprep.mubr.bf16.mxu0 %v9812_v48  ;;  %19311 = vmatpush3.bf16.msra.mxu0 %v21010_v37  ;;  %v9868_v37 = vshrl.u32 %v21014_v28, 16  ;;  %v9882_v53 = vrot.slane %v9880_v41, 3  ;;  %v9886_v57 = vshrl.u32 %v21020_v45, 16  ;;  %v9889_v58 = vshll.u32 %v21020_v45, 16  ;;  %v21053_v45 = vld [vmem:[%s23817_s3 + $0x138] sm:$0xff]  }
  0xed   : > { %19312 = vmatprep.subr.bf16.mxu0 %v21016_v50  ;;  %v2332_v41 = vsel %vm1778_vm3, %v2329_v30, %v2331_v32 }
  0xee   : > { %v9870_v48 = vrot.slane %v9868_v37, 2  ;;  %v9891_v5 = vrot.slane %v9889_v58, 3  ;;  %v21032_v37 = vld [vmem:[%s21711_s22 + $0x58] sm:$0xff]  }
  0xf0   : > { %19313 = vmatpush3.bf16.msra.mxu0 %v21016_v50  ;;  %v9866_v50 = vsel %vm4589_vm4, %v9856_v36, %v9865_v39  ;;  %v9874_v59 = vor.u32 %v9873_v49, %v9870_v48  ;;  %v21046_v36 = vld [vmem:[%s23817_s3 + $0x130] sm:$0xff]   ;;  %v2335_v48 = vrot.slane %v21035_v42, 1 }
  0xf1   : > { %19314 = vmatprep.subr.bf16.mxu0 %v21022_v61 }
  0xf2   : > { %18567 = vmatmul.mubr.bf16.gmra.mrb[28].mxu1 %v1811_v0  ;;  %v21019_v0 = vld [vmem:[%s21711_s22 + $0x38] sm:$0xff]  }
  0xf3   : > { %19279 = vmatmul.mubr.bf16.gmra.mrb[12].mxu0 %v9821_v2  ;;  %18570 = vmatprep.mubr.bf16.mxu1 %v1813_v3  ;;  %v21023_v2 = vld [vmem:[%s21711_s22 + $0x40] sm:$0xff]   ;;  %v9875_v3 = vsel %vm4589_vm4, %v9865_v39, %v9874_v59  ;;  %v2325_v10 = vrot.slane %v21019_v0, 1  ;;  %v21051_v0 = vld [vmem:[%s23817_s3 + $0x490] sm:$0xff]  }
  0xf4   : > { %19282 = vmatprep.mubr.bf16.mxu0 %v9830_v6  ;;  %19315 = vmatpush3.bf16.msra.mxu0 %v21022_v61  ;;  %v9883_v61 = vor.u32 %v9882_v53, %v9879_v52  ;;  %v2327_v14 = vrot.slane %v21023_v2, 1  ;;  %v21033_v39 = vld [vmem:[%s21719_s10 + $0x20] sm:$0xff]   ;;  %v21038_v53 = vld [vmem:[%s21719_s10 + $0x30] sm:$0xff]  }
  0xf5   : > { %19316 = vmatprep.subr.bf16.mxu0 %v21028_v8  ;;  %v2326_v24 = vsel %vm1778_vm3, %v2323_v23, %v2325_v10  ;;  %v21044_v2 = vld [vmem:[%s21719_s10 + $0x40] sm:$0xff]  }
  0xf6   : > { %v9884_v6 = vsel %vm4589_vm4, %v9874_v59, %v9883_v61  ;;  %v2330_v38 = vsel %vm1778_vm3, %v2327_v14, %v2329_v30  ;;  %v21045_v59 = vld [vmem:[%s23817_s3 + $0x488] sm:$0xff]  }
  0xf8   : > { %19317 = vmatpush3.bf16.msra.mxu0 %v21028_v8  ;;  %v9900_v8 = vrot.slane %v9898_v63, 3 }
  0xf9   : > { %19354 = vmatprep.subr.bf16.mxu0 %v22158_v18 }
  0xfa   : > { %18571 = vmatmul.mubr.bf16.gmra.mrb[32].mxu1 %v1815_v20  ;;  %v9901_v15 = vor.u32 %v9900_v8, %v9897_v7  ;;  %v9909_v20 = vrot.slane %v9907_v13, 3  ;;  %v21050_v13 = vld [vmem:[%s21719_s10 + $0x50] sm:$0xff]  }
  0xfb   : > { %19283 = vmatmul.mubr.bf16.gmra.mrb[16].mxu0 %v9839_v25  ;;  %18590 = vmatprep.mubr.bf16.mxu1 %v2316_v26  ;;  %v2328_v26 = vsel %vm1778_vm3, %v2325_v10, %v2327_v14  ;;  %v22263_v14 = vld [vmem:[%s21711_s22 + $0x90] sm:$0xff]   ;;  %v10425_v27 = vrot.slane %v21050_v13, 3 }
  0xfc   : > { %19286 = vmatprep.mubr.bf16.mxu0 %v9848_v29  ;;  %v21040_v29 = vld [vmem:[%s23817_s3 + $0x128] sm:$0xff]   ;;  %v9910_v33 = vor.u32 %v9909_v20, %v9906_v19 }
  0xfe   : > { %v9911_v40 = vsel %vm4589_vm4, %v9901_v15, %v9910_v33  ;;  %v2859_v33 = vshrl.u32 %v21059_v21, 16 }
 0x102   : > { %18591 = vmatmul.mubr.bf16.vlgmr.msra.gmra.mrb[0].mxu1 %v2318_v43  ;;  %v21036_v43 = vld [vmem:[%s21719_s10 + $0x28] sm:$0xff]  }
 0x103   : > { %19287 = vmatmul.mubr.bf16.gmra.mrb[20].mxu0 %v9857_v46  ;;  %18627 = vmatpush3.bf16.msra.mxu1 %v22091_v55  ;;  %v9888_v55 = vrot.slane %v9886_v57, 2  ;;  %v2333_v46 = vrot.slane %v21032_v37, 1  ;;  %v10415_v49 = vrot.slane %v21036_v43, 3  ;;  %v21042_v57 = vld [vmem:[%s21719_s10 + $0x38] sm:$0xff]   ;;  %v21056_v37 = vld [vmem:[%s21719_s10 + $0x60] sm:$0xff]  }
 0x104   : > { %18594 = vmatprep.mubr.bf16.mxu1 %v2320_v47  ;;  %19290 = vmatprep.mubr.bf16.mxu0 %v9866_v50  ;;  %v10413_v47 = vrot.slane %v21033_v39, 3  ;;  %v22226_v50 = vld [vmem:[%s23817_s3 + $0x140] sm:$0xff]   ;;  %v10419_v63 = vrot.slane %v21042_v57, 3  ;;  %v22288_v39 = vld [vmem:[%s21719_s10 + $0x68] sm:$0xff]   ;;  %v10429_v54 = vrot.slane %v21056_v37, 3  ;;  %v21075_v37 = vld [vmem:[%s23817_s3 + $0x150] sm:$0xff]  }
 0x105   : > { %18628 = vmatprep.subr.bf16.mxu1 %v21015_v44  ;;  %v9892_v11 = vor.u32 %v9891_v5, %v9888_v55  ;;  %v2334_v52 = vsel %vm1778_vm3, %v2331_v32, %v2333_v46  ;;  %v2340_v5 = vsel %vm1778_vm3, %v2337_v60, %v2339_v62  ;;  %v10431_v57 = vrot.slane %v22288_v39, 3 }
 0x106   : > { %v10414_v23 = vsel %vm5258_vm5, %v10411_v35, %v10413_v47  ;;  %v10416_v58 = vsel %vm5258_vm5, %v10413_v47, %v10415_v49  ;;  %v21065_v47 = vld [vmem:[%s21711_s22 + $0x20] sm:$0xff]  }
 0x107   : > { %18629 = vmatpush3.bf16.msra.mxu1 %v21015_v44  ;;  %v9893_v25 = vsel %vm4589_vm4, %v9883_v61, %v9892_v11  ;;  %v9902_v28 = vsel %vm4589_vm4, %v9892_v11, %v9901_v15  ;;  %v10412_v44 = vsel %vm5258_vm5, %v10410_v34, %v10411_v35  ;;  %v10417_v61 = vrot.slane %v21038_v53, 3  ;;  %v21064_v15 = vld [vmem:[%s23817_s3 + $0x4a0] sm:$0xff]   ;;  %v21076_v35 = vld [vmem:[%s23817_s3 + $0x4b0] sm:$0xff]  }
 0x108   : > { %18630 = vmatprep.subr.bf16.mxu1 %v21021_v56  ;;  %v2862_v34 = vshll.u32 %v21059_v21, 16  ;;  %v21077_v21 = vld [vmem:[%s21711_s22 + $0x40] sm:$0xff]  }
 0x109   : > { %v10418_v55 = vsel %vm5258_vm5, %v10415_v49, %v10417_v61  ;;  %v10420_v7 = vsel %vm5258_vm5, %v10417_v61, %v10419_v63  ;;  %v21082_v49 = vld [vmem:[%s23817_s3 + $0x4b8] sm:$0xff]   ;;  %v22304_v61 = vld [vmem:[%s23817_s3 + $0x4c0] sm:$0xff]  }
 0x10a   : > { %18595 = vmatmul.mubr.bf16.gmra.mrb[4].mxu1 %v2322_v1  ;;  %v21043_v1 = vld [vmem:[%s21711_s22 + $0x78] sm:$0xff]  }
 0x10b   : > { %19291 = vmatmul.mubr.bf16.gmra.mrb[24].mxu0 %v9875_v3  ;;  %18598 = vmatprep.mubr.bf16.mxu1 %v2324_v4  ;;  %v2338_v3 = vsel %vm1778_vm3, %v2335_v48, %v2337_v60  ;;  %v21047_v4 = vld [vmem:[%s21711_s22 + $0x80] sm:$0xff]   ;;  %v2341_v8 = vrot.slane %v21043_v1, 1  ;;  %v2880_v60 = vshll.u32 %v21065_v47, 16 }
 0x10c   : > { %19294 = vmatprep.mubr.bf16.mxu0 %v9884_v6  ;;  %18631 = vmatpush3.bf16.msra.mxu1 %v21021_v56  ;;  %v2336_v56 = vsel %vm1778_vm3, %v2333_v46, %v2335_v48  ;;  %v21057_v6 = vld [vmem:[%s23817_s3 + $0x498] sm:$0xff]   ;;  %v2343_v10 = vrot.slane %v21047_v4, 1  ;;  %v2864_v46 = vrot.slane %v2862_v34, 2 }
 0x10d   : > { %18632 = vmatprep.subr.bf16.mxu1 %v21027_v9  ;;  %v2342_v17 = vsel %vm1778_vm3, %v2339_v62, %v2341_v8 }
 0x10e   : > { %v2344_v20 = vsel %vm1778_vm3, %v2341_v8, %v2343_v10 }
 0x110   : > { %18633 = vmatpush3.bf16.msra.mxu1 %v21027_v9  ;;  %v10421_v9 = vrot.slane %v21044_v2, 3  ;;  %v21071_v2 = vld [vmem:[%s21711_s22 + $0x30] sm:$0xff]  }
 0x111   : > { %18634 = vmatprep.subr.bf16.mxu1 %v21034_v16  ;;  %v2898_v13 = vshll.u32 %v21071_v2, 16 }
 0x112   : > { %18599 = vmatmul.mubr.bf16.gmra.mrb[8].mxu1 %v2326_v24  ;;  %v22271_v24 = vld [vmem:[%s21719_s10 + $0x58] sm:$0xff]   ;;  %v10422_v19 = vsel %vm5258_vm5, %v10419_v63, %v10421_v9  ;;  %v21067_v63 = vld [vmem:[%s21711_s22 + $0x28] sm:$0xff]  }
 0x113   : > { %19295 = vmatmul.mubr.bf16.gmra.mrb[28].mxu0 %v9893_v25  ;;  %18602 = vmatprep.mubr.bf16.mxu1 %v2328_v26  ;;  %v2345_v26 = vrot.slane %v21049_v12, 1  ;;  %v10427_v30 = vrot.slane %v22271_v24, 3  ;;  %v2895_v12 = vshrl.u32 %v21071_v2, 16 }
 0x114   : > { %19298 = vmatprep.mubr.bf16.mxu0 %v9902_v28  ;;  %18635 = vmatpush3.bf16.msra.mxu1 %v21034_v16  ;;  %v21058_v16 = vld [vmem:[%s21711_s22 + $0x8] sm:$0xfe]  }
 0x115   : > { %18636 = vmatprep.subr.bf16.mxu1 %v21040_v29  ;;  %v2851_v28 = vshrl.u32 %v21058_v16, 16  ;;  %v2854_v32 = vshll.u32 %v21058_v16, 16  ;;  %v10428_v48 = vsel %vm5258_vm5, %v10425_v27, %v10427_v30 }
 0x118   : > { %18637 = vmatpush3.bf16.msra.mxu1 %v21040_v29  ;;  %v2347_v29 = vrot.slane %v22263_v14, 1 }
 0x119   : > { %18638 = vmatprep.subr.bf16.mxu1 %v21046_v36 }
 0x11a   : > { %18603 = vmatmul.mubr.bf16.gmra.mrb[12].mxu1 %v2330_v38  ;;  %v2853_v38 = vrot.slane %v2851_v28, 1  ;;  %v2348_v43 = vsel %vm1778_vm3, %v2345_v26, %v2347_v29 }
 0x11b   : > { %19299 = vmatmul.mubr.bf16.gmra.mrb[32].mxu0 %v9911_v40  ;;  %18606 = vmatprep.mubr.bf16.mxu1 %v2332_v41  ;;  %v21061_v40 = vld [vmem:[%s21711_s22 + $0x18] sm:$0xff]   ;;  %v2346_v41 = vsel %vm1778_vm3, %v2343_v10, %v2345_v26  ;;  %v2889_v10 = vshll.u32 %v21067_v63, 16  ;;  %v2900_v26 = vrot.slane %v2898_v13, 2 }
 0x11c   : > { %19318 = vmatprep.mubr.bf16.mxu0 %v10412_v44  ;;  %18639 = vmatpush3.bf16.msra.mxu1 %v21046_v36  ;;  %v21055_v36 = vld [vmem:[%s21711_s22 + $0x98] ss:$0 sps:$4 sm:$0x11]   ;;  %v2856_v44 = vrot.slane %v2854_v32, 2  ;;  %v2868_v51 = vshrl.u32 %v21061_v40, 16  ;;  %v2871_v53 = vshll.u32 %v21061_v40, 16 }
 0x11d   : > { %18640 = vmatprep.subr.bf16.mxu1 %v21053_v45 }
 0x11e   : > { %v2870_v62 = vrot.slane %v2868_v51, 1  ;;  %v2873_v1 = vrot.slane %v2871_v53, 2 }
 0x120   : > { %18641 = vmatpush3.bf16.msra.mxu1 %v21053_v45  ;;  %v2861_v45 = vrot.slane %v2859_v33, 1  ;;  %v2874_v8 = vor.u32 %v2873_v1, %v2870_v62  ;;  %v21087_v62 = vld [vmem:[%s23817_s3 + $0x160] sm:$0xff]   ;;  %v21085_v1 = vld [vmem:[%s21711_s22 + $0x58] sm:$0xff]  }
 0x121   : > { %18678 = vmatprep.subr.bf16.mxu1 %v22226_v50 }
 0x122   : > { %18607 = vmatmul.mubr.bf16.gmra.mrb[16].mxu1 %v2334_v52  ;;  %v2349_v52 = vrot.slane %v21055_v36, 1 }
 0x123   : > { %19319 = vmatmul.mubr.bf16.vlgmr.msra.gmra.mrb[0].mxu0 %v10414_v23  ;;  %18610 = vmatprep.mubr.bf16.mxu1 %v2336_v56  ;;  %v2857_v23 = vor.u32 %v2856_v44, %v2853_v38  ;;  %v2865_v56 = vor.u32 %v2864_v46, %v2861_v45  ;;  %v2916_v38 = vshll.u32 %v21077_v21, 16  ;;  %v21078_v45 = vld [vmem:[%s21719_s10 + $0x98] sm:$0xff]  }
 0x124   : > { %19322 = vmatprep.mubr.bf16.mxu0 %v10416_v58  ;;  %19355 = vmatpush3.bf16.msra.mxu0 %v22158_v18  ;;  %v21048_v18 = vld [vmem:[%s21719_s10 + $0x48] sm:$0xff]   ;;  %v21063_v58 = vld [vmem:[%s21719_s10 + $0x70] sm:$0xff]  }
 0x125   : > { %19356 = vmatprep.subr.bf16.mxu0 %v21045_v59  ;;  %v10423_v11 = vrot.slane %v21048_v18, 3  ;;  %v2866_v4 = vsel %vm2849_vm0, %v2857_v23, %v2865_v56  ;;  %v2882_v18 = vrot.slane %v2880_v60, 2  ;;  %v2875_v24 = vsel %vm2849_vm0, %v2865_v56, %v2874_v8 }
 0x126   : > { %v10443_v60 = vrot.slane %v21078_v45, 3 }
 0x127   : > { %v10424_v25 = vsel %vm5258_vm5, %v10421_v9, %v10423_v11  ;;  %v10426_v42 = vsel %vm5258_vm5, %v10423_v11, %v10425_v27  ;;  %v10433_v9 = vrot.slane %v21063_v58, 3 }
 0x128   : > { %19357 = vmatpush3.bf16.msra.mxu0 %v21045_v59  ;;  %v2877_v59 = vshrl.u32 %v21065_v47, 16 }
 0x129   : > { %19358 = vmatprep.subr.bf16.mxu0 %v21051_v0 }
 0x12a   : > { %18611 = vmatmul.mubr.bf16.gmra.mrb[20].mxu1 %v2338_v3  ;;  %v10430_v3 = vsel %vm5258_vm5, %v10427_v30, %v10429_v54 }
 0x12b   : > { %19323 = vmatmul.mubr.bf16.gmra.mrb[4].mxu0 %v10418_v55  ;;  %18614 = vmatprep.mubr.bf16.mxu1 %v2340_v5  ;;  %v10432_v55 = vsel %vm5258_vm5, %v10429_v54, %v10431_v57  ;;  %v2879_v5 = vrot.slane %v2877_v59, 1 }
 0x12c   : > { %19326 = vmatprep.mubr.bf16.mxu0 %v10420_v7  ;;  %19359 = vmatpush3.bf16.msra.mxu0 %v21051_v0  ;;  %v2350_v0 = vsel %vm1778_vm3, %v2347_v29, %v2349_v52  ;;  %v2886_v7 = vshrl.u32 %v21067_v63, 16  ;;  %v21072_v29 = vld [vmem:[%s21719_s10 + $0x88] sm:$0xff]   ;;  %v21081_v52 = vld [vmem:[%s23817_s3 + $0x158] sm:$0xff]  }
 0x12d   : > { %19360 = vmatprep.subr.bf16.mxu0 %v21057_v6  ;;  %v2883_v11 = vor.u32 %v2882_v18, %v2879_v5  ;;  %v10439_v39 = vrot.slane %v21072_v29, 3 }
 0x12e   : > { %v2888_v16 = vrot.slane %v2886_v7, 1 }
 0x12f   : > { %v2884_v27 = vsel %vm2849_vm0, %v2874_v8, %v2883_v11  ;;  %v21093_v8 = vld [vmem:[%s23817_s3 + $0x168] sm:$0xff]  }
 0x130   : > { %19361 = vmatpush3.bf16.msra.mxu0 %v21057_v6  ;;  %v21066_v6 = vld [vmem:[%s21719_s10 + $0x78] sm:$0xff]  }
 0x131   : > { %19362 = vmatprep.subr.bf16.mxu0 %v21064_v15  ;;  %v10435_v14 = vrot.slane %v21066_v6, 3 }
 0x132   : > { %18615 = vmatmul.mubr.bf16.gmra.mrb[24].mxu1 %v2342_v17  ;;  %v21068_v17 = vld [vmem:[%s21719_s10 + $0x80] sm:$0xff]  }
 0x133   : > { %19327 = vmatmul.mubr.bf16.gmra.mrb[8].mxu0 %v10422_v19  ;;  %18618 = vmatprep.mubr.bf16.mxu1 %v2344_v20  ;;  %v2891_v19 = vrot.slane %v2889_v10, 2  ;;  %v21069_v20 = vld [vmem:[%s23817_s3 + $0x148] sm:$0xff]   ;;  %v10436_v28 = vsel %vm5258_vm5, %v10433_v9, %v10435_v14  ;;  %v10437_v34 = vrot.slane %v21068_v17, 3  ;;  %v21099_v17 = vld [vmem:[%s23817_s3 + $0x170] sm:$0xff]  }
 0x134   : > { %19330 = vmatprep.mubr.bf16.mxu0 %v10424_v25  ;;  %19363 = vmatpush3.bf16.msra.mxu0 %v21064_v15  ;;  %v21073_v15 = vld [vmem:[%s21711_s22 + $0x38] sm:$0xff]   ;;  %v2897_v25 = vrot.slane %v2895_v12, 1  ;;  %v2943_v12 = vshll.u32 %v21085_v1, 16 }
 0x135   : > { %19364 = vmatprep.subr.bf16.mxu0 %v21070_v22  ;;  %v2904_v30 = vshrl.u32 %v21073_v15, 16  ;;  %v2907_v32 = vshll.u32 %v21073_v15, 16  ;;  %v2892_v33 = vor.u32 %v2891_v19, %v2888_v16  ;;  %v10438_v46 = vsel %vm5258_vm5, %v10435_v14, %v10437_v34  ;;  %v21090_v16 = vld [vmem:[%s21711_s22 + $0x68] sm:$0xff]   ;;  %v21084_v19 = vld [vmem:[%s22243_s13] sm:$0xff]  }
 0x136   : > { %v2901_v36 = vor.u32 %v2900_v26, %v2897_v25  ;;  %v10440_v51 = vsel %vm5258_vm5, %v10437_v34, %v10439_v39  ;;  %v2958_v29 = vshrl.u32 %v21090_v16, 16 }
 0x137   : > { %v2906_v40 = vrot.slane %v2904_v30, 1  ;;  %v21106_v30 = vld [vmem:[%s23817_s3 + $0x178] sm:$0xff]  }
 0x138   : > { %19365 = vmatpush3.bf16.msra.mxu0 %v21070_v22  ;;  %v10434_v22 = vsel %vm5258_vm5, %v10431_v57, %v10433_v9  ;;  %v2902_v47 = vsel %vm2849_vm0, %v2892_v33, %v2901_v36  ;;  %v2940_v9 = vshrl.u32 %v21085_v1, 16 }
 0x139   : > { %19366 = vmatprep.subr.bf16.mxu0 %v21076_v35 }
 0x13a   : > { %18619 = vmatmul.mubr.bf16.gmra.mrb[28].mxu1 %v2346_v41  ;;  %v21074_v41 = vld [vmem:[%s21719_s10 + $0x90] sm:$0xff]  }
 0x13b   : > { %19331 = vmatmul.mubr.bf16.gmra.mrb[12].mxu0 %v10426_v42  ;;  %18622 = vmatprep.mubr.bf16.mxu1 %v2348_v43  ;;  %v2909_v42 = vrot.slane %v2907_v32, 2  ;;  %v21079_v43 = vld [vmem:[%s21711_s22 + $0x48] sm:$0xff]   ;;  %v10441_v23 = vrot.slane %v21074_v41, 3  ;;  %v2961_v32 = vshll.u32 %v21090_v16, 16 }
 0x13c   : > { %19334 = vmatprep.mubr.bf16.mxu0 %v10428_v48  ;;  %19367 = vmatpush3.bf16.msra.mxu0 %v21076_v35  ;;  %v2913_v35 = vshrl.u32 %v21077_v21, 16  ;;  %v2918_v48 = vrot.slane %v2916_v38, 2  ;;  %v2922_v53 = vshrl.u32 %v21079_v43, 16  ;;  %v2925_v56 = vshll.u32 %v21079_v43, 16 }
 0x13d   : > { %19368 = vmatprep.subr.bf16.mxu0 %v21082_v49  ;;  %v2910_v54 = vor.u32 %v2909_v42, %v2906_v40  ;;  %v10444_v7 = vsel %vm5258_vm5, %v10441_v23, %v10443_v60  ;;  %v2945_v21 = vrot.slane %v2943_v12, 2  ;;  %v2960_v38 = vrot.slane %v2958_v29, 1  ;;  %v22370_v40 = vld [vmem:[%s23817_s3 + $0x180] sm:$0xff]  }
 0x13e   : > { %v2915_v44 = vrot.slane %v2913_v35, 1  ;;  %v2924_v63 = vrot.slane %v2922_v53, 1  ;;  %v2963_v41 = vrot.slane %v2961_v32, 2  ;;  %v21100_v42 = vld [vmem:[%s21711_s22 + $0x80] sm:$0xff]  }
 0x13f   : > { %v2911_v2 = vsel %vm2849_vm0, %v2901_v36, %v2910_v54 }
 0x140   : > { %19369 = vmatpush3.bf16.msra.mxu0 %v21082_v49  ;;  %v21083_v49 = vld [vmem:[%s21711_s22 + $0x50] sm:$0xff]   ;;  %v2919_v57 = vor.u32 %v2918_v48, %v2915_v44 }
 0x141   : > { %19406 = vmatprep.subr.bf16.mxu0 %v22304_v61  ;;  %v2931_v58 = vshrl.u32 %v21083_v49, 16  ;;  %v2934_v59 = vshll.u32 %v21083_v49, 16  ;;  %v21089_v44 = vld [vmem:[%s22243_s13 + $0x10] sm:$0xff]   ;;  %v2964_v49 = vor.u32 %v2963_v41, %v2960_v38  ;;  %v22419_v38 = vld [vmem:[%s23817_s3 + $0x500] sm:$0xff]   ;;  %v21114_v41 = vld [vmem:[%s21711_s22 + $0x18] sm:$0xff]  }
 0x142   : > { %18623 = vmatmul.mubr.bf16.gmra.mrb[32].mxu1 %v2350_v0  ;;  %v21080_v0 = vld [vmem:[%s21719_s10 + $0xa0] ss:$0 sps:$4 sm:$0x77]   ;;  %v2920_v5 = vsel %vm2849_vm0, %v2910_v54, %v2919_v57  ;;  %v2988_v54 = vshll.u32 %v21100_v42, 16 }
 0x143   : > { %19335 = vmatmul.mubr.bf16.gmra.mrb[16].mxu0 %v10430_v3  ;;  %18642 = vmatprep.mubr.bf16.mxu1 %v2866_v4  ;;  %v2927_v3 = vrot.slane %v2925_v56, 2  ;;  %v21088_v4 = vld [vmem:[%s21711_s22 + $0x60] sm:$0xff]   ;;  %v2933_v18 = vrot.slane %v2931_v58, 1  ;;  %v2936_v6 = vrot.slane %v2934_v59, 2  ;;  %v21104_v56 = vld [vmem:[%s23817_s3 + $0x4d0] sm:$0xff]   ;;  %v21102_v59 = vld [vmem:[%s21711_s22 + $0x88] sm:$0xff]  }
 0x144   : > { %19338 = vmatprep.mubr.bf16.mxu0 %v10432_v55  ;;  %v10442_v55 = vsel %vm5258_vm5, %v10439_v39, %v10441_v23  ;;  %v2949_v13 = vshrl.u32 %v21088_v4, 16  ;;  %v2952_v15 = vshll.u32 %v21088_v4, 16  ;;  %v21096_v39 = vld [vmem:[%s21711_s22 + $0x78] sm:$0xff]   ;;  %v2990_v1 = vrot.slane %v2988_v54, 2  ;;  %v21122_v54 = vld [vmem:[%s23817_s3 + $0x188] sm:$0xff]  }
 0x145   : > { %v2928_v10 = vor.u32 %v2927_v3, %v2924_v63  ;;  %v2937_v14 = vor.u32 %v2936_v6, %v2933_v18  ;;  %v2976_v48 = vshrl.u32 %v21096_v39, 16  ;;  %v21091_v23 = vld [vmem:[%s22243_s13 + $0x18] sm:$0xff]   ;;  %v2994_v3 = vshrl.u32 %v21102_v59, 16 }
 0x146   : > { %v2997_v4 = vshll.u32 %v21102_v59, 16  ;;  %v21125_v59 = vld [vmem:[%s22243_s13 + $0x70] sm:$0xff]  }
 0x147   : > { %v2938_v26 = vsel %vm2849_vm0, %v2928_v10, %v2937_v14  ;;  %v2978_v58 = vrot.slane %v2976_v48, 1  ;;  %v2996_v12 = vrot.slane %v2994_v3, 1  ;;  %v21119_v48 = vld [vmem:[%s22243_s13 + $0x60] sm:$0xff]   ;;  %v21138_v3 = vld [vmem:[%s22243_s13 + $0x8] sm:$0xff]  }
 0x14a   : > { %18643 = vmatmul.mubr.bf16.vlgmr.msra.gmra.mrb[0].mxu1 %v2875_v24  ;;  %v2929_v24 = vsel %vm2849_vm0, %v2919_v57, %v2928_v10  ;;  %v21095_v57 = vld [vmem:[%s22243_s13 + $0x20] sm:$0xff]  }
 0x14b   : > { %19339 = vmatmul.mubr.bf16.gmra.mrb[20].mxu0 %v10434_v22  ;;  %18679 = vmatpush3.bf16.msra.mxu1 %v22226_v50  ;;  %v2893_v50 = vsel %vm2849_vm0, %v2883_v11, %v2892_v33  ;;  %v10445_v11 = vrot.slane %v21080_v0, 3  ;;  %v2951_v22 = vrot.slane %v2949_v13, 1  ;;  %v2999_v13 = vrot.slane %v2997_v4, 2  ;;  %v21127_v4 = vld [vmem:[%s22243_s13 + $0x78] sm:$0xff]  }
 0x14c   : > { %18646 = vmatprep.mubr.bf16.mxu1 %v2884_v27  ;;  %19342 = vmatprep.mubr.bf16.mxu0 %v10436_v28  ;;  %v2954_v27 = vrot.slane %v2952_v15, 2  ;;  %v21094_v28 = vld [vmem:[%s21711_s22 + $0x70] sm:$0xff]  }
 0x14d   : > { %18680 = vmatprep.subr.bf16.mxu1 %v21069_v20  ;;  %v10446_v25 = vsel %vm5258_vm5, %v10443_v60, %v10445_v11  ;;  %v2967_v35 = vshrl.u32 %v21094_v28, 16  ;;  %v2970_v36 = vshll.u32 %v21094_v28, 16 }
 0x14e   : > { %v2955_v34 = vor.u32 %v2954_v27, %v2951_v22  ;;  %v21103_v22 = vld [vmem:[%s22243_s13 + $0x38] sm:$0xff]  }
 0x14f   : > { %18681 = vmatpush3.bf16.msra.mxu1 %v21069_v20  ;;  %v2942_v20 = vrot.slane %v2940_v9, 1  ;;  %v2969_v45 = vrot.slane %v2967_v35, 1  ;;  %v21108_v9 = vld [vmem:[%s21711_s22 + $0x98] ss:$0 sps:$4 sm:$0x33]  }
 0x150   : > { %18682 = vmatprep.subr.bf16.mxu1 %v21075_v37  ;;  %v2965_v60 = vsel %vm2849_vm0, %v2955_v34, %v2964_v49 }
 0x151   : > { %v2946_v33 = vor.u32 %v2945_v21, %v2942_v20  ;;  %v3000_v20 = vor.u32 %v2999_v13, %v2996_v12  ;;  %v11447_v12 = vshll.u32 %v21138_v3, 16 }
 0x152   : > { %18647 = vmatmul.mubr.bf16.gmra.mrb[4].mxu1 %v2893_v50 }
 0x153   : > { %19343 = vmatmul.mubr.bf16.gmra.mrb[24].mxu0 %v10438_v46  ;;  %18650 = vmatprep.mubr.bf16.mxu1 %v2902_v47  ;;  %v2947_v43 = vsel %vm2849_vm0, %v2937_v14, %v2946_v33  ;;  %v2956_v50 = vsel %vm2849_vm0, %v2946_v33, %v2955_v34  ;;  %v2972_v46 = vrot.slane %v2970_v36, 2  ;;  %v21098_v47 = vld [vmem:[%s23817_s3 + $0x4c8] sm:$0xff]   ;;  %v21101_v14 = vld [vmem:[%s22243_s13 + $0x30] sm:$0xff]   ;;  %v21135_v34 = vld [vmem:[%s23817_s3 + $0x4f8] sm:$0xff]  }
 0x154   : > { %19346 = vmatprep.mubr.bf16.mxu0 %v10440_v51  ;;  %18683 = vmatpush3.bf16.msra.mxu1 %v21075_v37  ;;  %v21086_v37 = vld [vmem:[%s22243_s13 + $0x8] sm:$0xff]   ;;  %v2979_v51 = vshll.u32 %v21096_v39, 16  ;;  %v21112_v33 = vld [vmem:[%s21711_s22 + $0x10] sm:$0xff]  }
 0x155   : > { %18684 = vmatprep.subr.bf16.mxu1 %v21081_v52  ;;  %v2973_v53 = vor.u32 %v2972_v46, %v2969_v45  ;;  %v21109_v39 = vld [vmem:[%s22243_s13 + $0x48] sm:$0xff]   ;;  %v3522_v45 = vrot.slane %v21114_v41, 2  ;;  %v21116_v46 = vld [vmem:[%s22243_s13 + $0x58] sm:$0xff]  }
 0x157   : > { %v2974_v0 = vsel %vm2849_vm0, %v2964_v49, %v2973_v53 }
 0x158   : > { %18685 = vmatpush3.bf16.msra.mxu1 %v21081_v52  ;;  %v2985_v52 = vshrl.u32 %v21100_v42, 16 }
 0x159   : > { %18686 = vmatprep.subr.bf16.mxu1 %v21087_v62 }
 0x15a   : > { %18651 = vmatmul.mubr.bf16.gmra.mrb[8].mxu1 %v2911_v2  ;;  %v2987_v63 = vrot.slane %v2985_v52, 1  ;;  %v21110_v2 = vld [vmem:[%s23817_s3 + $0x4d8] sm:$0xff]   ;;  %v21124_v52 = vld [vmem:[%s21711_s22 + $0x30] sm:$0xff]  }
 0x15b   : > { %19347 = vmatmul.mubr.bf16.gmra.mrb[28].mxu0 %v10442_v55  ;;  %18654 = vmatprep.mubr.bf16.mxu1 %v2920_v5 }
 0x15c   : > { %19350 = vmatprep.mubr.bf16.mxu0 %v10444_v7  ;;  %18687 = vmatpush3.bf16.msra.mxu1 %v21087_v62  ;;  %v2981_v62 = vrot.slane %v2979_v51, 2  ;;  %v2991_v5 = vor.u32 %v2990_v1, %v2987_v63  ;;  %v21117_v7 = vld [vmem:[%s23817_s3 + $0x4e0] sm:$0xff]   ;;  %v21120_v51 = vld [vmem:[%s21711_s22 + $0x28] sm:$0xff]  }
 0x15d   : > { %18688 = vmatprep.subr.bf16.mxu1 %v21093_v8  ;;  %v21130_v63 = vld [vmem:[%s21711_s22 + $0x40] sm:$0xff]  }
 0x15e   : > { %v2982_v55 = vor.u32 %v2981_v62, %v2978_v58  ;;  %v3001_v29 = vsel %vm2849_vm0, %v2991_v5, %v3000_v20  ;;  %v21121_v58 = vld [vmem:[%s22243_s13 + $0x68] sm:$0xff]   ;;  %v21137_v1 = vld [vmem:[%s22243_s13] sm:$0xff]  }
 0x160   : > { %18689 = vmatpush3.bf16.msra.mxu1 %v21093_v8  ;;  %v21097_v8 = vld [vmem:[%s22243_s13 + $0x28] sm:$0xff]   ;;  %v2983_v10 = vsel %vm2849_vm0, %v2973_v53, %v2982_v55  ;;  %v2992_v11 = vsel %vm2849_vm0, %v2982_v55, %v2991_v5  ;;  %v11442_v55 = vshll.u32 %v21137_v1, 16  ;;  %v21141_v5 = vld [vmem:[%s23817_s3 + $0x1a0] sm:$0xff]  }
 0x161   : > { %18690 = vmatprep.subr.bf16.mxu1 %v21099_v17 }
 0x162   : > { %18655 = vmatmul.mubr.bf16.gmra.mrb[12].mxu1 %v2929_v24  ;;  %v3012_v24 = vshrl.u32 %v21108_v9, 16  ;;  %v11444_v13 = vrot.slane %v11442_v55, 1  ;;  %v21154_v55 = vld [vmem:[%s21711_s22 + $0x80] sm:$0xff]  }
 0x163   : > { %19351 = vmatmul.mubr.bf16.gmra.mrb[32].mxu0 %v10446_v25  ;;  %18658 = vmatprep.mubr.bf16.mxu1 %v2938_v26  ;;  %v21129_v25 = vld [vmem:[%s23817_s3 + $0x4f0] sm:$0xff]   ;;  %v21107_v26 = vld [vmem:[%s22243_s13 + $0x40] sm:$0xff]  }
 0x164   : > { %19370 = vmatprep.mubr.bf16.mxu0 %v21084_v19  ;;  %18691 = vmatpush3.bf16.msra.mxu1 %v21099_v17  ;;  %v21123_v17 = vld [vmem:[%s23817_s3 + $0x4e8] sm:$0xff]   ;;  %v3015_v19 = vshll.u32 %v21108_v9, 16  ;;  %v3014_v27 = vrot.slane %v3012_v24, 1 }
 0x165   : > { %18692 = vmatprep.subr.bf16.mxu1 %v21106_v30  ;;  %v21133_v24 = vld [vmem:[%s22243_s13 + $0x88] sm:$0xff]  }
 0x166   : > { %v3017_v28 = vrot.slane %v3015_v19, 2 }
 0x168   : > { %18693 = vmatpush3.bf16.msra.mxu1 %v21106_v30  ;;  %v21111_v30 = vld [vmem:[%s21711_s22 + $0x8] sm:$0xfc]   ;;  %v3018_v35 = vor.u32 %v3017_v28, %v3014_v27 }
 0x169   : > { %18730 = vmatprep.subr.bf16.mxu1 %v22370_v40  ;;  %v3519_v36 = vrot.slane %v21111_v30, 2 }
 0x16a   : > { %18659 = vmatmul.mubr.bf16.gmra.mrb[16].mxu1 %v2947_v43 }
 0x16b   : > { %19371 = vmatmul.mubr.bf16.vlgmr.msra.gmra.mrb[0].mxu0 %v21086_v37  ;;  %18662 = vmatprep.mubr.bf16.mxu1 %v2956_v50  ;;  %v3520_v37 = vrot.slane %v21112_v33, 2  ;;  %v21113_v50 = vld [vmem:[%s22243_s13 + $0x50] sm:$0xff]  }
 0x16c   : > { %19374 = vmatprep.mubr.bf16.mxu0 %v21089_v44  ;;  %19407 = vmatpush3.bf16.msra.mxu0 %v22304_v61  ;;  %v21105_v61 = vld [vmem:[%s21711_s22 + $0x90] sm:$0xff]   ;;  %v21118_v44 = vld [vmem:[%s21711_s22 + $0x20] sm:$0xff]  }
 0x16d   : > { %19408 = vmatprep.subr.bf16.mxu0 %v21098_v47  ;;  %v3003_v18 = vshrl.u32 %v21105_v61, 16  ;;  %v3006_v6 = vshll.u32 %v21105_v61, 16  ;;  %v3521_v43 = vsel %vm3518_vm1, %v3519_v36, %v3520_v37  ;;  %v3523_v49 = vsel %vm3518_vm1, %v3520_v37, %v3522_v45 }
 0x16f   : > { %v3005_v15 = vrot.slane %v3003_v18, 1  ;;  %v3008_v16 = vrot.slane %v3006_v6, 2  ;;  %v21131_v18 = vld [vmem:[%s22243_s13 + $0x80] sm:$0xff]   ;;  %v21132_v6 = vld [vmem:[%s21711_s22 + $0x48] sm:$0xff]  }
 0x170   : > { %19409 = vmatpush3.bf16.msra.mxu0 %v21098_v47  ;;  %v3524_v47 = vrot.slane %v21118_v44, 2  ;;  %v22483_v44 = vld [vmem:[%s23817_s3 + $0x1c0] sm:$0xff]  }
 0x171   : > { %19410 = vmatprep.subr.bf16.mxu0 %v21104_v56  ;;  %v3009_v21 = vor.u32 %v3008_v16, %v3005_v15  ;;  %v21140_v15 = vld [vmem:[%s22243_s13 + $0x10] sm:$0xff]  }
 0x172   : > { %18663 = vmatmul.mubr.bf16.gmra.mrb[20].mxu1 %v2965_v60  ;;  %v3525_v53 = vsel %vm3518_vm1, %v3522_v45, %v3524_v47  ;;  %v21126_v60 = vld [vmem:[%s21711_s22 + $0x38] sm:$0xff]   ;;  %v11455_v27 = vshll.u32 %v21140_v15, 16  ;;  %v11459_v30 = vshrl.u32 %v21140_v15, 16  ;;  %v21144_v45 = vld [vmem:[%s21711_s22 + $0x68] sm:$0xff]  }
 0x173   : > { %19375 = vmatmul.mubr.bf16.gmra.mrb[4].mxu0 %v21091_v23  ;;  %18666 = vmatprep.mubr.bf16.mxu1 %v2974_v0  ;;  %v3010_v32 = vsel %vm2849_vm0, %v3000_v20, %v3009_v21  ;;  %v3019_v42 = vsel %vm2849_vm0, %v3009_v21, %v3018_v35  ;;  %v3526_v23 = vrot.slane %v21120_v51, 2  ;;  %v21134_v0 = vld [vmem:[%s23817_s3 + $0x198] sm:$0xff]   ;;  %v3530_v61 = vrot.slane %v21126_v60, 2  ;;  %v21153_v21 = vld [vmem:[%s23817_s3 + $0x1b0] sm:$0xff]   ;;  %v21145_v35 = vld [vmem:[%s22243_s13 + $0x20] sm:$0xff]  }
 0x174   : > { %19378 = vmatprep.mubr.bf16.mxu0 %v21095_v57  ;;  %19411 = vmatpush3.bf16.msra.mxu0 %v21104_v56  ;;  %v3528_v56 = vrot.slane %v21124_v52, 2  ;;  %v21128_v57 = vld [vmem:[%s23817_s3 + $0x190] sm:$0xff]   ;;  %v11449_v20 = vrot.slane %v11447_v12, 1  ;;  %v11457_v37 = vrot.slane %v11455_v27, 1  ;;  %v11475_v51 = vshrl.u32 %v21145_v35, 16  ;;  %v21157_v12 = vld [vmem:[%s22243_s13 + $0x40] sm:$0xff]  }
 0x175   : > { %19412 = vmatprep.subr.bf16.mxu0 %v21110_v2  ;;  %v3527_v62 = vsel %vm3518_vm1, %v3524_v47, %v3526_v23  ;;  %v11471_v47 = vshll.u32 %v21145_v35, 16  ;;  %v11507_v27 = vshrl.u32 %v21157_v12, 16 }
 0x178   : > { %19413 = vmatpush3.bf16.msra.mxu0 %v21110_v2  ;;  %v3532_v2 = vrot.slane %v21130_v63, 2  ;;  %v21155_v63 = vld [vmem:[%s22243_s13 + $0x38] sm:$0xff]  }
 0x179   : > { %19414 = vmatprep.subr.bf16.mxu0 %v21117_v7 }
 0x17a   : > { %18667 = vmatmul.mubr.bf16.gmra.mrb[24].mxu1 %v2983_v10  ;;  %v3533_v9 = vsel %vm3518_vm1, %v3530_v61, %v3532_v2  ;;  %v11440_v10 = vshrl.u32 %v21137_v1, 16  ;;  %v21158_v1 = vld [vmem:[%s23817_s3 + $0x510] sm:$0xff]  }
 0x17b   : > { %19379 = vmatmul.mubr.bf16.gmra.mrb[8].mxu0 %v21097_v8  ;;  %18670 = vmatprep.mubr.bf16.mxu1 %v2992_v11  ;;  %v21136_v8 = vld [vmem:[%s21711_s22 + $0x50] sm:$0xff]   ;;  %v21147_v11 = vld [vmem:[%s23817_s3 + $0x1a8] sm:$0xff]  }
 0x17c   : > { %19382 = vmatprep.mubr.bf16.mxu0 %v21101_v14  ;;  %19415 = vmatpush3.bf16.msra.mxu0 %v21117_v7  ;;  %v3531_v7 = vsel %vm3518_vm1, %v3528_v56, %v3530_v61  ;;  %v3534_v14 = vrot.slane %v21132_v6, 2  ;;  %v3536_v16 = vrot.slane %v21136_v8, 2  ;;  %v11445_v19 = vor.u32 %v11444_v13, %v11440_v10  ;;  %v21150_v61 = vld [vmem:[%s21711_s22 + $0x78] sm:$0xff]  }
 0x17d   : > { %19416 = vmatprep.subr.bf16.mxu0 %v21123_v17  ;;  %v21164_v8 = vld [vmem:[%s23817_s3 + $0x518] sm:$0xff]  }
 0x17e   : > { %v3537_v28 = vsel %vm3518_vm1, %v3534_v14, %v3536_v16 }
 0x180   : > { %19417 = vmatpush3.bf16.msra.mxu0 %v21123_v17  ;;  %v21143_v17 = vld [vmem:[%s22243_s13 + $0x18] sm:$0xff]  }
 0x181   : > { %19418 = vmatprep.subr.bf16.mxu0 %v21129_v25  ;;  %v11463_v33 = vshll.u32 %v21143_v17, 16 }
 0x182   : > { %18671 = vmatmul.mubr.bf16.gmra.mrb[28].mxu1 %v3001_v29  ;;  %v21142_v29 = vld [vmem:[%s21711_s22 + $0x60] sm:$0xff]  }
 0x183   : > { %19383 = vmatmul.mubr.bf16.gmra.mrb[12].mxu0 %v21103_v22  ;;  %18674 = vmatprep.mubr.bf16.mxu1 %v3010_v32  ;;  %v21139_v22 = vld [vmem:[%s21711_s22 + $0x58] sm:$0xff]   ;;  %v11450_v32 = vsel %vm1131_vm2, %v11445_v19, %v11449_v20  ;;  %v3540_v41 = vrot.slane %v21142_v29, 2 }
 0x184   : > { %19386 = vmatprep.mubr.bf16.mxu0 %v21107_v26  ;;  %19419 = vmatpush3.bf16.msra.mxu0 %v21129_v25  ;;  %v3535_v25 = vsel %vm3518_vm1, %v3532_v2, %v3534_v14  ;;  %v11451_v26 = vshrl.u32 %v21138_v3, 16  ;;  %v3538_v36 = vrot.slane %v21139_v22, 2  ;;  %v21161_v14 = vld [vmem:[%s22243_s13 + $0x48] sm:$0xff]  }
 0x185   : > { %19420 = vmatprep.subr.bf16.mxu0 %v21135_v34  ;;  %v11511_v29 = vshll.u32 %v21161_v14, 16 }
 0x188   : > { %19421 = vmatpush3.bf16.msra.mxu0 %v21135_v34  ;;  %v21160_v34 = vld [vmem:[%s23817_s3 + $0x1b8] sm:$0xff]  }
 0x189   : > { %19458 = vmatprep.subr.bf16.mxu0 %v22419_v38 }
 0x18a   : > { %18675 = vmatmul.mubr.bf16.gmra.mrb[32].mxu1 %v3019_v42  ;;  %v21149_v42 = vld [vmem:[%s22243_s13 + $0x28] sm:$0xff]  }
 0x18b   : > { %19387 = vmatmul.mubr.bf16.gmra.mrb[16].mxu0 %v21109_v39  ;;  %18694 = vmatprep.mubr.bf16.mxu1 %v3521_v43  ;;  %v11453_v39 = vor.u32 %v11451_v26, %v11449_v20  ;;  %v11461_v43 = vor.u32 %v11459_v30, %v11457_v37  ;;  %v11483_v3 = vshrl.u32 %v21149_v42, 16  ;;  %v11499_v20 = vshrl.u32 %v21155_v63, 16  ;;  %v21159_v26 = vld [vmem:[%s21711_s22 + $0x90] sm:$0xff]   ;;  %v21177_v30 = vld [vmem:[%s23817_s3 + $0x528] sm:$0xff]  }
 0x18c   : > { %19390 = vmatprep.mubr.bf16.mxu0 %v21113_v50  ;;  %v11465_v50 = vrot.slane %v11463_v33, 1 }
 0x18d   : > { %v11458_v52 = vsel %vm1131_vm2, %v11453_v39, %v11457_v37  ;;  %v11513_v39 = vrot.slane %v11511_v29, 1 }
 0x192   : > { %18695 = vmatmul.mubr.bf16.vlgmr.msra.gmra.mrb[0].mxu1 %v3523_v49  ;;  %v21148_v49 = vld [vmem:[%s21711_s22 + $0x70] sm:$0xff]  }
 0x193   : > { %19391 = vmatmul.mubr.bf16.gmra.mrb[20].mxu0 %v21116_v46  ;;  %18731 = vmatpush3.bf16.msra.mxu1 %v22370_v40  ;;  %v3529_v40 = vsel %vm3518_vm1, %v3526_v23, %v3528_v56  ;;  %v11467_v46 = vshrl.u32 %v21143_v17, 16  ;;  %v21152_v23 = vld [vmem:[%s23817_s3 + $0x508] sm:$0xff]   ;;  %v11466_v56 = vsel %vm1131_vm2, %v11461_v43, %v11465_v50  ;;  %v21171_v17 = vld [vmem:[%s23817_s3 + $0x520] sm:$0xff]   ;;  %v21183_v43 = vld [vmem:[%s23817_s3 + $0x530] sm:$0xff]  }
 0x194   : > { %18698 = vmatprep.mubr.bf16.mxu1 %v3525_v53  ;;  %19394 = vmatprep.mubr.bf16.mxu0 %v21119_v48  ;;  %v3539_v48 = vsel %vm3518_vm1, %v3536_v16, %v3538_v36  ;;  %v3541_v53 = vsel %vm3518_vm1, %v3538_v36, %v3540_v41  ;;  %v3552_v36 = vrot.slane %v21159_v26, 2 }
 0x195   : > { %18732 = vmatprep.subr.bf16.mxu1 %v21122_v54  ;;  %v11469_v60 = vor.u32 %v11467_v46, %v11465_v50  ;;  %v11515_v50 = vshrl.u32 %v21161_v14, 16  ;;  %v21179_v14 = vld [vmem:[%s22243_s13 + $0x78] sm:$0xff]  }
 0x197   : > { %18733 = vmatpush3.bf16.msra.mxu1 %v21122_v54  ;;  %v11479_v54 = vshll.u32 %v21149_v42, 16  ;;  %v21167_v42 = vld [vmem:[%s22243_s13 + $0x58] sm:$0xff]  }
 0x198   : > { %18734 = vmatprep.subr.bf16.mxu1 %v21128_v57 }
 0x19a   : > { %18699 = vmatmul.mubr.bf16.gmra.mrb[4].mxu1 %v3527_v62  ;;  %v3544_v62 = vrot.slane %v21148_v49, 2 }
 0x19b   : > { %19395 = vmatmul.mubr.bf16.gmra.mrb[24].mxu0 %v21121_v58  ;;  %18702 = vmatprep.mubr.bf16.mxu1 %v3529_v40  ;;  %v11473_v58 = vrot.slane %v11471_v47, 1  ;;  %v21165_v47 = vld [vmem:[%s21711_s22 + $0x10] sm:$0xfc]  }
 0x19c   : > { %19398 = vmatprep.mubr.bf16.mxu0 %v21125_v59  ;;  %18735 = vmatpush3.bf16.msra.mxu1 %v21128_v57  ;;  %v3542_v57 = vrot.slane %v21144_v45, 2  ;;  %v21151_v59 = vld [vmem:[%s22243_s13 + $0x30] sm:$0xff]  }
 0x19d   : > { %18736 = vmatprep.subr.bf16.mxu1 %v21134_v0  ;;  %v11477_v40 = vor.u32 %v11475_v51, %v11473_v58  ;;  %v11491_v6 = vshrl.u32 %v21151_v59, 16  ;;  %v21166_v51 = vld [vmem:[%s21711_s22 + $0x18] sm:$0xff]  }
 0x19e   : > { %v3543_v2 = vsel %vm3518_vm1, %v3540_v41, %v3542_v57  ;;  %v21162_v41 = vld [vmem:[%s21711_s22 + $0x98] ss:$0 sps:$4 sm:$0x33]  }
 0x1a0   : > { %18737 = vmatpush3.bf16.msra.mxu1 %v21134_v0  ;;  %v11481_v0 = vrot.slane %v11479_v54, 1  ;;  %v11527_v54 = vshll.u32 %v21167_v42, 16 }
 0x1a1   : > { %18738 = vmatprep.subr.bf16.mxu1 %v21141_v5 }
 0x1a2   : > { %18703 = vmatmul.mubr.bf16.gmra.mrb[8].mxu1 %v3531_v7  ;;  %v11495_v7 = vshll.u32 %v21155_v63, 16  ;;  %v11485_v13 = vor.u32 %v11483_v3, %v11481_v0  ;;  %v4055_v63 = vrot.slane %v21166_v51, 2  ;;  %v21187_v51 = vld [vmem:[%s22243_s13 + $0x90] ss:$0 sps:$4 sm:$0x11]  }
 0x1a3   : > { %19399 = vmatmul.mubr.bf16.gmra.mrb[28].mxu0 %v21127_v4  ;;  %18706 = vmatprep.mubr.bf16.mxu1 %v3533_v9  ;;  %v11487_v4 = vshll.u32 %v21151_v59, 16  ;;  %v3546_v9 = vrot.slane %v21150_v61, 2  ;;  %v21173_v59 = vld [vmem:[%s22243_s13 + $0x68] sm:$0xff]   ;;  %v22545_v61 = vld [vmem:[%s23817_s3 + $0x540] sm:$0xff]  }
 0x1a4   : > { %19402 = vmatprep.mubr.bf16.mxu0 %v21131_v18  ;;  %18739 = vmatpush3.bf16.msra.mxu1 %v21141_v5  ;;  %v11474_v5 = vsel %vm1131_vm2, %v11469_v60, %v11473_v58  ;;  %v11482_v18 = vsel %vm1131_vm2, %v11477_v40, %v11481_v0  ;;  %v11497_v16 = vrot.slane %v11495_v7, 1  ;;  %v11517_v60 = vor.u32 %v11515_v50, %v11513_v39 }
 0x1a5   : > { %18740 = vmatprep.subr.bf16.mxu1 %v21147_v11  ;;  %v11489_v10 = vrot.slane %v11487_v4, 1  ;;  %v3547_v19 = vsel %vm3518_vm1, %v3544_v62, %v3546_v9  ;;  %v11529_v0 = vrot.slane %v11527_v54, 1 }
 0x1a6   : > { %v11501_v35 = vor.u32 %v11499_v20, %v11497_v16  ;;  %v11547_v20 = vshrl.u32 %v21173_v59, 16 }
 0x1a7   : > { %v11493_v15 = vor.u32 %v11491_v6, %v11489_v10  ;;  %v11490_v22 = vsel %vm1131_vm2, %v11485_v13, %v11489_v10  ;;  %v21175_v10 = vld [vmem:[%s22243_s13 + $0x70] sm:$0xff]  }
 0x1a8   : > { %18741 = vmatpush3.bf16.msra.mxu1 %v21147_v11  ;;  %v3548_v11 = vrot.slane %v21154_v55, 2  ;;  %v21172_v55 = vld [vmem:[%s21711_s22 + $0x28] sm:$0xff]  }
 0x1a9   : > { %18742 = vmatprep.subr.bf16.mxu1 %v21153_v21  ;;  %v4059_v13 = vrot.slane %v21172_v55, 2 }
 0x1aa   : > { %18707 = vmatmul.mubr.bf16.gmra.mrb[12].mxu1 %v3535_v25  ;;  %v3549_v25 = vsel %vm3518_vm1, %v3546_v9, %v3548_v11 }
 0x1ab   : > { %19403 = vmatmul.mubr.bf16.gmra.mrb[32].mxu0 %v21133_v24  ;;  %18710 = vmatprep.mubr.bf16.mxu1 %v3537_v28  ;;  %v21156_v24 = vld [vmem:[%s21711_s22 + $0x88] sm:$0xff]   ;;  %v11498_v28 = vsel %vm1131_vm2, %v11493_v15, %v11497_v16  ;;  %v21174_v16 = vld [vmem:[%s21711_s22 + $0x30] sm:$0xff]  }
 0x1ac   : > { %19422 = vmatprep.mubr.bf16.mxu0 %v11450_v32  ;;  %18743 = vmatpush3.bf16.msra.mxu1 %v21153_v21  ;;  %v11503_v21 = vshll.u32 %v21157_v12, 16  ;;  %v21163_v32 = vld [vmem:[%s22243_s13 + $0x50] sm:$0xff]   ;;  %v3550_v33 = vrot.slane %v21156_v24, 2  ;;  %v11551_v24 = vshll.u32 %v21175_v10, 16  ;;  %v4061_v29 = vrot.slane %v21174_v16, 2 }
 0x1ad   : > { %18744 = vmatprep.subr.bf16.mxu1 %v21160_v34  ;;  %v11519_v45 = vshll.u32 %v21163_v32, 16 }
 0x1ae   : > { %v3551_v46 = vsel %vm3518_vm1, %v3548_v11, %v3550_v33  ;;  %v3553_v49 = vsel %vm3518_vm1, %v3550_v33, %v3552_v36 }
 0x1af   : > { %v11521_v58 = vrot.slane %v11519_v45, 1  ;;  %v11563_v45 = vshrl.u32 %v21179_v14, 16 }
 0x1b0   : > { %18745 = vmatpush3.bf16.msra.mxu1 %v21160_v34  ;;  %v11505_v34 = vrot.slane %v11503_v21, 1  ;;  %v21176_v21 = vld [vmem:[%s23817_s3 + $0x1c8] sm:$0xff]  }
 0x1b1   : > { %18782 = vmatprep.subr.bf16.mxu1 %v22483_v44 }
 0x1b2   : > { %18711 = vmatmul.mubr.bf16.gmra.mrb[16].mxu1 %v3539_v48  ;;  %v11509_v37 = vor.u32 %v11507_v27, %v11505_v34  ;;  %v11506_v48 = vsel %vm1131_vm2, %v11501_v35, %v11505_v34  ;;  %v11555_v27 = vshrl.u32 %v21175_v10, 16  ;;  %v21182_v35 = vld [vmem:[%s23817_s3 + $0x1d0] sm:$0xff]  }
 0x1b3   : > { %19423 = vmatmul.mubr.bf16.vlgmr.msra.gmra.mrb[0].mxu0 %v11458_v52  ;;  %18714 = vmatprep.mubr.bf16.mxu1 %v3541_v53  ;;  %v11523_v52 = vshrl.u32 %v21163_v32, 16  ;;  %v21181_v32 = vld [vmem:[%s22243_s13 + $0x80] sm:$0xff]   ;;  %v21207_v10 = vld [vmem:[%s23817_s3 + $0x1f0] sm:$0xff]  }
 0x1b4   : > { %19426 = vmatprep.mubr.bf16.mxu0 %v11466_v56  ;;  %19459 = vmatpush3.bf16.msra.mxu0 %v22419_v38  ;;  %v3545_v38 = vsel %vm3518_vm1, %v3542_v57, %v3544_v62  ;;  %v11514_v53 = vsel %vm1131_vm2, %v11509_v37, %v11513_v39  ;;  %v21170_v56 = vld [vmem:[%s22243_s13 + $0x60] sm:$0xff]   ;;  %v3554_v57 = vrot.slane %v21162_v41, 2  ;;  %v4054_v62 = vrot.slane %v21165_v47, 2  ;;  %v21185_v39 = vld [vmem:[%s22243_s13 + $0x88] sm:$0xff]  }
 0x1b5   : > { %19460 = vmatprep.subr.bf16.mxu0 %v21152_v23  ;;  %v11525_v40 = vor.u32 %v11523_v52, %v11521_v58  ;;  %v11535_v3 = vshll.u32 %v21170_v56, 16  ;;  %v11539_v7 = vshrl.u32 %v21170_v56, 16  ;;  %v4062_v41 = vsel %vm3518_vm1, %v4059_v13, %v4061_v29  ;;  %v21188_v52 = vld [vmem:[%s23817_s3 + $0x1d8] sm:$0xff]  }
 0x1b6   : > { %v3555_v4 = vsel %vm3518_vm1, %v3552_v36, %v3554_v57  ;;  %v11571_v47 = vshrl.u32 %v21181_v32, 16 }
 0x1b7   : > { %v11530_v6 = vsel %vm1131_vm2, %v11525_v40, %v11529_v0  ;;  %v11537_v9 = vrot.slane %v11535_v3, 1  ;;  %v21190_v40 = vld [vmem:[%s21711_s22 + $0x58] sm:$0xff]   ;;  %v21191_v3 = vld [vmem:[%s22243_s13] sm:$0xfe]  }
 0x1b8   : > { %19461 = vmatpush3.bf16.msra.mxu0 %v21152_v23  ;;  %v21189_v23 = vld [vmem:[%s23817_s3 + $0x538] sm:$0xff]  }
 0x1b9   : > { %19462 = vmatprep.subr.bf16.mxu0 %v21158_v1  ;;  %v11541_v15 = vor.u32 %v11539_v7, %v11537_v9 }
 0x1ba   : > { %18715 = vmatmul.mubr.bf16.gmra.mrb[20].mxu1 %v3543_v2  ;;  %v11531_v2 = vshrl.u32 %v21167_v42, 16  ;;  %v11567_v42 = vshll.u32 %v21181_v32, 16 }
 0x1bb   : > { %19427 = vmatmul.mubr.bf16.gmra.mrb[4].mxu0 %v11474_v5  ;;  %18718 = vmatprep.mubr.bf16.mxu1 %v3545_v38  ;;  %v11543_v5 = vshll.u32 %v21173_v59, 16  ;;  %v11522_v38 = vsel %vm1131_vm2, %v11517_v60, %v11521_v58  ;;  %v21195_v59 = vld [vmem:[%s23817_s3 + $0x1e0] sm:$0xff]   ;;  %v21186_v60 = vld [vmem:[%s21711_s22 + $0x50] sm:$0xff]  }
 0x1bc   : > { %19430 = vmatprep.mubr.bf16.mxu0 %v11482_v18  ;;  %19463 = vmatpush3.bf16.msra.mxu0 %v21158_v1  ;;  %v21168_v1 = vld [vmem:[%s21711_s22 + $0x20] sm:$0xff]   ;;  %v4056_v18 = vsel %vm3518_vm1, %v4054_v62, %v4055_v63  ;;  %v11533_v12 = vor.u32 %v11531_v2, %v11529_v0  ;;  %v11569_v54 = vrot.slane %v11567_v42, 1  ;;  %v11579_v2 = vshrl.u32 %v21185_v39, 16 }
 0x1bd   : > { %19464 = vmatprep.subr.bf16.mxu0 %v21164_v8  ;;  %v11545_v11 = vrot.slane %v11543_v5, 1  ;;  %v21201_v5 = vld [vmem:[%s23817_s3 + $0x1e8] sm:$0xff]  }
 0x1be   : > { %v11573_v57 = vor.u32 %v11571_v47, %v11569_v54 }
 0x1bf   : > { %v11546_v26 = vsel %vm1131_vm2, %v11541_v15, %v11545_v11  ;;  %v11549_v33 = vor.u32 %v11547_v20, %v11545_v11  ;;  %v21194_v11 = vld [vmem:[%s22243_s13 + $0x10] sm:$0xff]  }
 0x1c0   : > { %19465 = vmatpush3.bf16.msra.mxu0 %v21164_v8  ;;  %v4057_v8 = vrot.slane %v21168_v1, 2 }
 0x1c1   : > { %19466 = vmatprep.subr.bf16.mxu0 %v21171_v17 }
 0x1c2   : > { %18719 = vmatmul.mubr.bf16.gmra.mrb[24].mxu1 %v3547_v19  ;;  %v11538_v19 = vsel %vm1131_vm2, %v11533_v12, %v11537_v9  ;;  %v21193_v12 = vld [vmem:[%s21711_s22 + $0x60] sm:$0xff]  }
 0x1c3   : > { %19431 = vmatmul.mubr.bf16.gmra.mrb[8].mxu0 %v11490_v22  ;;  %18722 = vmatprep.mubr.bf16.mxu1 %v3549_v25  ;;  %v21178_v22 = vld [vmem:[%s21711_s22 + $0x38] sm:$0xff]   ;;  %v4060_v25 = vsel %vm3518_vm1, %v4057_v8, %v4059_v13  ;;  %v4073_v20 = vrot.slane %v21193_v12, 2  ;;  %v21217_v12 = vld [vmem:[%s22243_s13 + $0x50] sm:$0xff]  }
 0x1c4   : > { %19434 = vmatprep.mubr.bf16.mxu0 %v11498_v28  ;;  %19467 = vmatpush3.bf16.msra.mxu0 %v21171_v17  ;;  %v4058_v17 = vsel %vm3518_vm1, %v4055_v63, %v4057_v8  ;;  %v11559_v28 = vshll.u32 %v21179_v14, 16  ;;  %v4063_v34 = vrot.slane %v21178_v22, 2  ;;  %v11583_v63 = vshll.u32 %v21187_v51, 16  ;;  %v21196_v14 = vld [vmem:[%s21711_s22 + $0x68] sm:$0xff]   ;;  %v21218_v51 = vld [vmem:[%s23817_s3 + $0x558] sm:$0xff]  }
 0x1c5   : > { %19468 = vmatprep.subr.bf16.mxu0 %v21177_v30  ;;  %v12085_v8 = vrot.slane %v21191_v3, 1  ;;  %v4075_v22 = vrot.slane %v21196_v14, 2 }
 0x1c6   : > { %v11561_v37 = vrot.slane %v11559_v28, 1  ;;  %v4064_v50 = vsel %vm3518_vm1, %v4061_v29, %v4063_v34  ;;  %v21199_v28 = vld [vmem:[%s22243_s13 + $0x20] sm:$0xff]  }
 0x1c8   : > { %19469 = vmatpush3.bf16.msra.mxu0 %v21177_v30  ;;  %v11553_v30 = vrot.slane %v11551_v24, 1 }
 0x1c9   : > { %19470 = vmatprep.subr.bf16.mxu0 %v21183_v43 }
 0x1ca   : > { %18723 = vmatmul.mubr.bf16.gmra.mrb[28].mxu1 %v3551_v46  ;;  %v11557_v36 = vor.u32 %v11555_v27, %v11553_v30  ;;  %v21184_v46 = vld [vmem:[%s21711_s22 + $0x48] sm:$0xff]   ;;  %v22612_v27 = vld [vmem:[%s23817_s3 + $0x200] sm:$0xff]  }
 0x1cb   : > { %19435 = vmatmul.mubr.bf16.gmra.mrb[12].mxu0 %v11506_v48  ;;  %18726 = vmatprep.mubr.bf16.mxu1 %v3553_v49  ;;  %v11575_v49 = vshll.u32 %v21185_v39, 16  ;;  %v4067_v56 = vrot.slane %v21184_v46, 2  ;;  %v12092_v39 = vrot.slane %v21199_v28, 1  ;;  %v21208_v46 = vld [vmem:[%s21711_s22 + $0x88] sm:$0xff]   ;;  %v12104_v28 = vrot.slane %v21217_v12, 1 }
 0x1cc   : > { %19438 = vmatprep.mubr.bf16.mxu0 %v11514_v53  ;;  %19471 = vmatpush3.bf16.msra.mxu0 %v21183_v43  ;;  %v11554_v43 = vsel %vm1131_vm2, %v11549_v33, %v11553_v30  ;;  %v11562_v48 = vsel %vm1131_vm2, %v11557_v36, %v11561_v37  ;;  %v21202_v30 = vld [vmem:[%s21711_s22 + $0x78] sm:$0xff]   ;;  %v4076_v33 = vsel %vm3518_vm1, %v4073_v20, %v4075_v22  ;;  %v21206_v36 = vld [vmem:[%s23817_s3 + $0x548] sm:$0xff]  }
 0x1cd   : > { %19472 = vmatprep.subr.bf16.mxu0 %v21189_v23  ;;  %v11577_v58 = vrot.slane %v11575_v49, 1 }
 0x1cf   : > { %v11578_v55 = vsel %vm1131_vm2, %v11573_v57, %v11577_v58  ;;  %v11581_v7 = vor.u32 %v11579_v2, %v11577_v58  ;;  %v21225_v58 = vld [vmem:[%s23817_s3 + $0x560] sm:$0xff]  }
 0x1d0   : > { %19473 = vmatpush3.bf16.msra.mxu0 %v21189_v23  ;;  %v11565_v23 = vor.u32 %v11563_v45, %v11561_v37 }
 0x1d1   : > { %19510 = vmatprep.subr.bf16.mxu0 %v22545_v61 }
 0x1d2   : > { %18727 = vmatmul.mubr.bf16.gmra.mrb[32].mxu1 %v3555_v4  ;;  %v11570_v0 = vsel %vm1131_vm2, %v11565_v23, %v11569_v54  ;;  %v21192_v4 = vld [vmem:[%s22243_s13 + $0x8] sm:$0xff]   ;;  %v21210_v54 = vld [vmem:[%s21711_s22 + $0x90] sm:$0xff]   ;;  %v4083_v23 = vrot.slane %v21208_v46, 2  ;;  %v21232_v46 = vld [vmem:[%s21711_s22 + $0x38] sm:$0xff]  }
 0x1d3   : > { %19439 = vmatmul.mubr.bf16.gmra.mrb[16].mxu0 %v11522_v38  ;;  %18746 = vmatprep.mubr.bf16.mxu1 %v4056_v18  ;;  %v4069_v38 = vrot.slane %v21186_v60, 2  ;;  %v11585_v18 = vrot.slane %v11583_v63, 1  ;;  %v12086_v9 = vrot.slane %v21192_v4, 1  ;;  %v21219_v63 = vld [vmem:[%s21711_s22 + $0x10] sm:$0xfc]   ;;  %v4085_v3 = vrot.slane %v21210_v54, 2 }
 0x1d4   : > { %19442 = vmatprep.mubr.bf16.mxu0 %v11530_v6  ;;  %v4071_v6 = vrot.slane %v21190_v40, 2  ;;  %v21231_v4 = vld [vmem:[%s23817_s3 + $0x568] sm:$0xff]  }
 0x1d5   : > { %v4070_v13 = vsel %vm3518_vm1, %v4067_v56, %v4069_v38  ;;  %v11586_v15 = vsel %vm1131_vm2, %v11581_v7, %v11585_v18  ;;  %v12087_v24 = vsel %vm1778_vm3, %v12085_v8, %v12086_v9  ;;  %v4594_v18 = vshll.u32 %v21219_v63, 16 }
 0x1d6   : > { %v4072_v16 = vsel %vm3518_vm1, %v4069_v38, %v4071_v6  ;;  %v4074_v29 = vsel %vm3518_vm1, %v4071_v6, %v4073_v20  ;;  %v4591_v38 = vshrl.u32 %v21219_v63, 16  ;;  %v21216_v6 = vld [vmem:[%s21711_s22 + $0xa0] ss:$0 sps:$4 sm:$0x33]  }
 0x1d8   : > { %v4593_v14 = vrot.slane %v4591_v38, 2  ;;  %v21233_v38 = vld [vmem:[%s22243_s13 + $0x78] sm:$0xff]  }
 0x1da   : > { %18747 = vmatmul.mubr.bf16.vlgmr.msra.gmra.mrb[0].mxu1 %v4058_v17  ;;  %v21197_v17 = vld [vmem:[%s22243_s13 + $0x18] sm:$0xff]  }
 0x1db   : > { %19443 = vmatmul.mubr.bf16.gmra.mrb[20].mxu0 %v11538_v19  ;;  %18783 = vmatpush3.bf16.msra.mxu1 %v22483_v44  ;;  %v21180_v44 = vld [vmem:[%s21711_s22 + $0x40] sm:$0xff]   ;;  %v21214_v19 = vld [vmem:[%s23817_s3 + $0x1f8] sm:$0xff]  }
 0x1dc   : > { %18750 = vmatprep.mubr.bf16.mxu1 %v4060_v25  ;;  %19446 = vmatprep.mubr.bf16.mxu0 %v11546_v26  ;;  %v4065_v53 = vrot.slane %v21180_v44, 2  ;;  %v12090_v25 = vrot.slane %v21197_v17, 1  ;;  %v21198_v26 = vld [vmem:[%s21711_s22 + $0x70] sm:$0xff]   ;;  %v21204_v44 = vld [vmem:[%s21711_s22 + $0x80] sm:$0xff]  }
 0x1dd   : > { %18784 = vmatprep.subr.bf16.mxu1 %v21176_v21  ;;  %v4077_v37 = vrot.slane %v21198_v26, 2  ;;  %v4089_v26 = vrot.slane %v21216_v6, 2 }
 0x1de   : > { %v4066_v62 = vsel %vm3518_vm1, %v4063_v34, %v4065_v53  ;;  %v4068_v1 = vsel %vm3518_vm1, %v4065_v53, %v4067_v56  ;;  %v21203_v34 = vld [vmem:[%s22243_s13 + $0x28] sm:$0xff]   ;;  %v12093_v47 = vsel %vm1778_vm3, %v12090_v25, %v12092_v39  ;;  %v21211_v56 = vld [vmem:[%s22243_s13 + $0x40] sm:$0xff]  }
 0x1df   : > { %18785 = vmatpush3.bf16.msra.mxu1 %v21176_v21  ;;  %v12088_v21 = vrot.slane %v21194_v11, 1  ;;  %v12094_v42 = vrot.slane %v21203_v34, 1  ;;  %v4078_v45 = vsel %vm3518_vm1, %v4075_v22, %v4077_v37 }
 0x1e0   : > { %18786 = vmatprep.subr.bf16.mxu1 %v21182_v35 }
 0x1e1   : > { %v12089_v32 = vsel %vm1778_vm3, %v12086_v9, %v12088_v21  ;;  %v12095_v49 = vsel %vm1778_vm3, %v12092_v39, %v12094_v42  ;;  %v22678_v39 = vld [vmem:[%s23817_s3 + $0x580] sm:$0xff]  }
 0x1e2   : > { %18751 = vmatmul.mubr.bf16.gmra.mrb[4].mxu1 %v4062_v41  ;;  %v4079_v41 = vrot.slane %v21202_v30, 2 }
 0x1e3   : > { %19447 = vmatmul.mubr.bf16.gmra.mrb[24].mxu0 %v11554_v43  ;;  %18754 = vmatprep.mubr.bf16.mxu1 %v4064_v50  ;;  %v21212_v43 = vld [vmem:[%s23817_s3 + $0x550] sm:$0xff]  }
 0x1e4   : > { %19450 = vmatprep.mubr.bf16.mxu0 %v11562_v48  ;;  %18787 = vmatpush3.bf16.msra.mxu1 %v21182_v35  ;;  %v12091_v35 = vsel %vm1778_vm3, %v12088_v21, %v12090_v25  ;;  %v21205_v50 = vld [vmem:[%s22243_s13 + $0x30] sm:$0xff]   ;;  %v4080_v48 = vsel %vm3518_vm1, %v4077_v37, %v4079_v41  ;;  %v21226_v21 = vld [vmem:[%s21711_s22 + $0x28] sm:$0xff]   ;;  %v21243_v25 = vld [vmem:[%s23817_s3 + $0x578] sm:$0xff]  }
 0x1e5   : > { %18788 = vmatprep.subr.bf16.mxu1 %v21188_v52  ;;  %v12096_v53 = vrot.slane %v21205_v50, 1  ;;  %v4620_v37 = vshll.u32 %v21226_v21, 16 }
 0x1e7   : > { %v12097_v40 = vsel %vm1778_vm3, %v12094_v42, %v12096_v53 }
 0x1e8   : > { %18789 = vmatpush3.bf16.msra.mxu1 %v21188_v52  ;;  %v4081_v52 = vrot.slane %v21204_v44, 2 }
 0x1e9   : > { %18790 = vmatprep.subr.bf16.mxu1 %v21195_v59 }
 0x1ea   : > { %18755 = vmatmul.mubr.bf16.gmra.mrb[8].mxu1 %v4066_v62  ;;  %v4082_v60 = vsel %vm3518_vm1, %v4079_v41, %v4081_v52  ;;  %v22648_v62 = vld [vmem:[%s22243_s13 + $0x48] sm:$0xff]   ;;  %v21224_v41 = vld [vmem:[%s22243_s13 + $0x60] sm:$0xff]  }
 0x1eb   : > { %19451 = vmatmul.mubr.bf16.gmra.mrb[28].mxu0 %v11570_v0  ;;  %18758 = vmatprep.mubr.bf16.mxu1 %v4068_v1  ;;  %v4084_v0 = vsel %vm3518_vm1, %v4081_v52, %v4083_v23  ;;  %v21220_v1 = vld [vmem:[%s21711_s22 + $0x18] sm:$0xff]   ;;  %v12102_v9 = vrot.slane %v22648_v62, 1  ;;  %v21229_v62 = vld [vmem:[%s22243_s13 + $0x70] sm:$0xff]  }
 0x1ec   : > { %19454 = vmatprep.mubr.bf16.mxu0 %v11578_v55  ;;  %18791 = vmatpush3.bf16.msra.mxu1 %v21195_v59  ;;  %v21213_v59 = vld [vmem:[%s21711_s22 + $0x98] sm:$0xff]   ;;  %v12100_v55 = vrot.slane %v21211_v56, 1  ;;  %v4599_v7 = vshrl.u32 %v21220_v1, 16  ;;  %v4602_v8 = vshll.u32 %v21220_v1, 16  ;;  %v4638_v56 = vshll.u32 %v21232_v46, 16 }
 0x1ed   : > { %18792 = vmatprep.subr.bf16.mxu1 %v21201_v5  ;;  %v12105_v50 = vsel %vm1778_vm3, %v12102_v9, %v12104_v28  ;;  %v12112_v12 = vrot.slane %v21229_v62, 1 }
 0x1ee   : > { %v4604_v20 = vrot.slane %v4602_v8, 3  ;;  %v12103_v22 = vsel %vm1778_vm3, %v12100_v55, %v12102_v9  ;;  %v21236_v8 = vld [vmem:[%s23817_s3 + $0x210] sm:$0xff]  }
 0x1f0   : > { %18793 = vmatpush3.bf16.msra.mxu1 %v21201_v5  ;;  %v4087_v5 = vrot.slane %v21213_v59, 2  ;;  %v21234_v59 = vld [vmem:[%s21711_s22 + $0x40] sm:$0xff]  }
 0x1f1   : > { %18794 = vmatprep.subr.bf16.mxu1 %v21207_v10 }
 0x1f2   : > { %18759 = vmatmul.mubr.bf16.gmra.mrb[12].mxu1 %v4070_v13  ;;  %v4086_v13 = vsel %vm3518_vm1, %v4083_v23, %v4085_v3  ;;  %v4088_v17 = vsel %vm3518_vm1, %v4085_v3, %v4087_v5  ;;  %v4090_v44 = vsel %vm3518_vm1, %v4087_v5, %v4089_v26  ;;  %v4635_v23 = vshrl.u32 %v21232_v46, 16  ;;  %v21230_v5 = vld [vmem:[%s23817_s3 + $0x208] sm:$0xff]   ;;  %v22721_v46 = vld [vmem:[%s22243_s13 + $0x10] sm:$0xff]  }
 0x1f3   : > { %19455 = vmatmul.mubr.bf16.gmra.mrb[32].mxu0 %v11586_v15  ;;  %18762 = vmatprep.mubr.bf16.mxu1 %v4072_v16  ;;  %v21221_v15 = vld [vmem:[%s22243_s13 + $0x58] sm:$0xff]   ;;  %v21222_v16 = vld [vmem:[%s21711_s22 + $0x20] sm:$0xff]   ;;  %v4640_v3 = vrot.slane %v4638_v56, 3  ;;  %v21255_v56 = vld [vmem:[%s23817_s3 + $0x228] sm:$0xff]  }
 0x1f4   : > { %19474 = vmatprep.mubr.bf16.mxu0 %v12087_v24  ;;  %18795 = vmatpush3.bf16.msra.mxu1 %v21207_v10  ;;  %v21237_v10 = vld [vmem:[%s23817_s3 + $0x570] sm:$0xff]   ;;  %v4596_v24 = vrot.slane %v4594_v18, 3  ;;  %v4611_v30 = vshll.u32 %v21222_v16, 16  ;;  %v12106_v34 = vrot.slane %v21221_v15, 1  ;;  %v4644_v18 = vshrl.u32 %v21234_v59, 16  ;;  %v21244_v15 = vld [vmem:[%s21711_s22 + $0x58] sm:$0xff]  }
 0x1f5   : > { %18796 = vmatprep.subr.bf16.mxu1 %v21214_v19 }
 0x1f8   : > { %18797 = vmatpush3.bf16.msra.mxu1 %v21214_v19  ;;  %v4601_v19 = vrot.slane %v4599_v7, 2  ;;  %v4647_v7 = vshll.u32 %v21234_v59, 16  ;;  %v21252_v59 = vld [vmem:[%s21711_s22 + $0x70] sm:$0xff]  }
 0x1f9   : > { %18834 = vmatprep.subr.bf16.mxu1 %v22612_v27 }
 0x1fa   : > { %18763 = vmatmul.mubr.bf16.gmra.mrb[16].mxu1 %v4074_v29  ;;  %v4608_v29 = vshrl.u32 %v21222_v16, 16  ;;  %v4646_v16 = vrot.slane %v4644_v18, 2 }
 0x1fb   : > { %19475 = vmatmul.mubr.bf16.vlgmr.msra.gmra.mrb[0].mxu0 %v12089_v32  ;;  %18766 = vmatprep.mubr.bf16.mxu1 %v4076_v33  ;;  %v4597_v32 = vor.u32 %v4596_v24, %v4593_v14  ;;  %v4605_v33 = vor.u32 %v4604_v20, %v4601_v19  ;;  %v12114_v14 = vrot.slane %v21233_v38, 1  ;;  %v4649_v24 = vrot.slane %v4647_v7, 3 }
 0x1fc   : > { %19478 = vmatprep.mubr.bf16.mxu0 %v12091_v35  ;;  %19511 = vmatpush3.bf16.msra.mxu0 %v22545_v61  ;;  %v21209_v61 = vld [vmem:[%s22243_s13 + $0x38] sm:$0xff]   ;;  %v4617_v35 = vshrl.u32 %v21226_v21, 16  ;;  %v4610_v42 = vrot.slane %v4608_v29, 2  ;;  %v22708_v21 = vld [vmem:[%s22243_s13 + $0x88] sm:$0xff]   ;;  %v4701_v7 = vshll.u32 %v21252_v59, 16 }
 0x1fd   : > { %19512 = vmatprep.subr.bf16.mxu0 %v21206_v36  ;;  %v12098_v57 = vrot.slane %v21209_v61, 1  ;;  %v4622_v61 = vrot.slane %v4620_v37, 3  ;;  %v12115_v29 = vsel %vm1778_vm3, %v12112_v12, %v12114_v14  ;;  %v21247_v37 = vld [vmem:[%s21711_s22 + $0x60] sm:$0xff]  }
 0x1ff   : > { %v12099_v2 = vsel %vm1778_vm3, %v12096_v53, %v12098_v57  ;;  %v12101_v11 = vsel %vm1778_vm3, %v12098_v57, %v12100_v55  ;;  %v12108_v53 = vrot.slane %v21224_v41, 1 }
 0x200   : > { %19513 = vmatpush3.bf16.msra.mxu0 %v21206_v36  ;;  %v21228_v36 = vld [vmem:[%s21711_s22 + $0x30] sm:$0xff]  }
 0x201   : > { %19514 = vmatprep.subr.bf16.mxu0 %v21212_v43  ;;  %v4629_v54 = vshll.u32 %v21228_v36, 16  ;;  %v12109_v1 = vsel %vm1778_vm3, %v12106_v34, %v12108_v53 }
 0x202   : > { %18767 = vmatmul.mubr.bf16.gmra.mrb[20].mxu1 %v4078_v45  ;;  %v4606_v45 = vsel %vm4589_vm4, %v4597_v32, %v4605_v33  ;;  %v4671_v32 = vshrl.u32 %v21244_v15, 16 }
 0x203   : > { %19479 = vmatmul.mubr.bf16.gmra.mrb[4].mxu0 %v12093_v47  ;;  %18770 = vmatprep.mubr.bf16.mxu1 %v4080_v48  ;;  %v12107_v47 = vsel %vm1778_vm3, %v12104_v28, %v12106_v34  ;;  %v4619_v48 = vrot.slane %v4617_v35, 2  ;;  %v4650_v34 = vor.u32 %v4649_v24, %v4646_v16 }
 0x204   : > { %19482 = vmatprep.mubr.bf16.mxu0 %v12095_v49  ;;  %19515 = vmatpush3.bf16.msra.mxu0 %v21212_v43  ;;  %v4613_v43 = vrot.slane %v4611_v30, 3  ;;  %v21227_v49 = vld [vmem:[%s22243_s13 + $0x68] sm:$0xff]   ;;  %v21242_v30 = vld [vmem:[%s23817_s3 + $0x218] sm:$0xff]  }
 0x205   : > { %19516 = vmatprep.subr.bf16.mxu0 %v21218_v51  ;;  %v4623_v57 = vor.u32 %v4622_v61, %v4619_v48  ;;  %v21250_v61 = vld [vmem:[%s21711_s22 + $0x68] sm:$0xff]  }
 0x206   : > { %v4614_v52 = vor.u32 %v4613_v43, %v4610_v42  ;;  %v21241_v43 = vld [vmem:[%s22243_s13 + $0x90] ss:$0 sps:$4 sm:$0x11]  }
 0x207   : > { %v12120_v62 = vrot.slane %v21241_v43, 1  ;;  %v21267_v43 = vld [vmem:[%s21711_s22 + $0x98] sm:$0xff]  }
 0x208   : > { %19517 = vmatpush3.bf16.msra.mxu0 %v21218_v51  ;;  %v4626_v51 = vshrl.u32 %v21228_v36, 16  ;;  %v4615_v63 = vsel %vm4589_vm4, %v4605_v33, %v4614_v52  ;;  %v4674_v33 = vshll.u32 %v21244_v15, 16  ;;  %v12118_v36 = vrot.slane %v22708_v21, 1  ;;  %v21268_v15 = vld [vmem:[%s23817_s3 + $0x238] sm:$0xff]  }
 0x209   : > { %19518 = vmatprep.subr.bf16.mxu0 %v21225_v58 }
 0x20a   : > { %18771 = vmatmul.mubr.bf16.gmra.mrb[24].mxu1 %v4082_v60  ;;  %v4628_v60 = vrot.slane %v4626_v51, 2  ;;  %v4676_v48 = vrot.slane %v4674_v33, 3  ;;  %v4680_v51 = vshrl.u32 %v21247_v37, 16 }
 0x20b   : > { %19483 = vmatmul.mubr.bf16.gmra.mrb[8].mxu0 %v12097_v40  ;;  %18774 = vmatprep.mubr.bf16.mxu1 %v4084_v0  ;;  %v4631_v40 = vrot.slane %v4629_v54, 3  ;;  %v21238_v0 = vld [vmem:[%s21711_s22 + $0x48] sm:$0xff]  }
 0x20c   : > { %19486 = vmatprep.mubr.bf16.mxu0 %v12099_v2  ;;  %19519 = vmatpush3.bf16.msra.mxu0 %v21225_v58  ;;  %v12110_v58 = vrot.slane %v21227_v49, 1  ;;  %v4637_v2 = vrot.slane %v4635_v23, 2  ;;  %v4653_v9 = vshrl.u32 %v21238_v0, 16 }
 0x20d   : > { %19520 = vmatprep.subr.bf16.mxu0 %v21231_v4  ;;  %v4632_v6 = vor.u32 %v4631_v40, %v4628_v60  ;;  %v12621_v40 = vrot.slane %v22721_v46, 1 }
 0x20e   : > { %v12111_v55 = vsel %vm1778_vm3, %v12108_v53, %v12110_v58  ;;  %v4655_v19 = vrot.slane %v4653_v9, 2  ;;  %v12121_v9 = vsel %vm1778_vm3, %v12118_v36, %v12120_v62 }
 0x210   : > { %19521 = vmatpush3.bf16.msra.mxu0 %v21231_v4  ;;  %v4624_v4 = vsel %vm4589_vm4, %v4614_v52, %v4623_v57  ;;  %v4683_v52 = vshll.u32 %v21247_v37, 16 }
 0x211   : > { %19522 = vmatprep.subr.bf16.mxu0 %v21237_v10 }
 0x212   : > { %18775 = vmatmul.mubr.bf16.gmra.mrb[28].mxu1 %v4086_v13  ;;  %v4641_v13 = vor.u32 %v4640_v3, %v4637_v2  ;;  %v4685_v2 = vrot.slane %v4683_v52, 3  ;;  %v21256_v3 = vld [vmem:[%s21711_s22 + $0x78] sm:$0xff]   ;;  %v21266_v52 = vld [vmem:[%s23817_s3 + $0x590] sm:$0xff]  }
 0x213   : > { %19487 = vmatmul.mubr.bf16.gmra.mrb[12].mxu0 %v12101_v11  ;;  %18778 = vmatprep.mubr.bf16.mxu1 %v4088_v17  ;;  %v21240_v11 = vld [vmem:[%s21711_s22 + $0x50] sm:$0xff]   ;;  %v21235_v17 = vld [vmem:[%s22243_s13 + $0x80] sm:$0xff]  }
 0x214   : > { %19490 = vmatprep.mubr.bf16.mxu0 %v12103_v22  ;;  %19523 = vmatpush3.bf16.msra.mxu0 %v21237_v10  ;;  %v4656_v10 = vshll.u32 %v21238_v0, 16  ;;  %v12113_v22 = vsel %vm1778_vm3, %v12110_v58, %v12112_v12  ;;  %v4662_v26 = vshrl.u32 %v21240_v11, 16  ;;  %v4665_v28 = vshll.u32 %v21240_v11, 16 }
 0x215   : > { %19524 = vmatprep.subr.bf16.mxu0 %v21243_v25  ;;  %v12116_v35 = vrot.slane %v21235_v17, 1  ;;  %v4651_v49 = vsel %vm4589_vm4, %v4641_v13, %v4650_v34  ;;  %v4692_v58 = vshll.u32 %v21250_v61, 16  ;;  %v4707_v12 = vshrl.u32 %v21256_v3, 16 }
 0x216   : > { %v4658_v20 = vrot.slane %v4656_v10, 3  ;;  %v4667_v42 = vrot.slane %v4665_v28, 3  ;;  %v22756_v28 = vld [vmem:[%s22243_s13 + $0x30] sm:$0xff]  }
 0x217   : > { %v12117_v53 = vsel %vm1778_vm3, %v12114_v14, %v12116_v35  ;;  %v12119_v23 = vsel %vm1778_vm3, %v12116_v35, %v12118_v36  ;;  %v4694_v18 = vrot.slane %v4692_v58, 3  ;;  %v4710_v14 = vshll.u32 %v21256_v3, 16 }
 0x218   : > { %19525 = vmatpush3.bf16.msra.mxu0 %v21243_v25  ;;  %v4642_v25 = vsel %vm4589_vm4, %v4632_v6, %v4641_v13  ;;  %v4659_v41 = vor.u32 %v4658_v20, %v4655_v19  ;;  %v21258_v13 = vld [vmem:[%s21711_s22 + $0x80] sm:$0xff]   ;;  %v4703_v20 = vrot.slane %v4701_v7, 3  ;;  %v4709_v21 = vrot.slane %v4707_v12, 2  ;;  %v21269_v7 = vld [vmem:[%s22243_s13 + $0x50] sm:$0xff]  }
 0x219   : > { %19562 = vmatprep.subr.bf16.mxu0 %v22678_v39  ;;  %v12629_v46 = vrot.slane %v22756_v28, 1  ;;  %v4746_v58 = vshll.u32 %v21267_v43, 16 }
 0x21a   : > { %18779 = vmatmul.mubr.bf16.gmra.mrb[32].mxu1 %v4090_v44  ;;  %v4664_v44 = vrot.slane %v4662_v26, 2  ;;  %v4660_v54 = vsel %vm4589_vm4, %v4650_v34, %v4659_v41  ;;  %v4712_v26 = vrot.slane %v4710_v14, 3  ;;  %v21260_v34 = vld [vmem:[%s23817_s3 + $0x588] sm:$0xff]  }
 0x21b   : > { %19491 = vmatmul.mubr.bf16.gmra.mrb[16].mxu0 %v12105_v50  ;;  %18798 = vmatprep.mubr.bf16.mxu1 %v4606_v45  ;;  %v4673_v50 = vrot.slane %v4671_v32, 2  ;;  %v21245_v45 = vld [vmem:[%s22243_s13 + $0x8] sm:$0xfe]   ;;  %v4719_v32 = vshll.u32 %v21258_v13, 16 }
 0x21c   : > { %19494 = vmatprep.mubr.bf16.mxu0 %v12107_v47  ;;  %v21249_v47 = vld [vmem:[%s23817_s3 + $0x220] sm:$0xff]   ;;  %v4668_v60 = vor.u32 %v4667_v42, %v4664_v44  ;;  %v21264_v42 = vld [vmem:[%s21711_s22 + $0x90] sm:$0xff]  }
 0x21d   : > { %v4677_v0 = vor.u32 %v4676_v48, %v4673_v50  ;;  %v4713_v48 = vor.u32 %v4712_v26, %v4709_v21  ;;  %v21291_v21 = vld [vmem:[%s23817_s3 + $0x5b0] sm:$0xff]   ;;  %v21275_v26 = vld [vmem:[%s22243_s13 + $0x60] sm:$0xff]  }
 0x21f   : > { %v4678_v10 = vsel %vm4589_vm4, %v4668_v60, %v4677_v0 }
 0x222   : > { %18799 = vmatmul.mubr.bf16.vlgmr.msra.gmra.mrb[0].mxu1 %v4615_v63  ;;  %v12620_v63 = vrot.slane %v21245_v45, 1 }
 0x223   : > { %19495 = vmatmul.mubr.bf16.gmra.mrb[20].mxu0 %v12109_v1  ;;  %18835 = vmatpush3.bf16.msra.mxu1 %v22612_v27  ;;  %v4633_v27 = vsel %vm4589_vm4, %v4623_v57, %v4632_v6  ;;  %v4689_v57 = vshrl.u32 %v21250_v61, 16  ;;  %v4682_v1 = vrot.slane %v4680_v51, 2  ;;  %v4698_v6 = vshrl.u32 %v21252_v59, 16 }
 0x224   : > { %18802 = vmatprep.mubr.bf16.mxu1 %v4624_v4  ;;  %19498 = vmatprep.mubr.bf16.mxu0 %v12111_v55  ;;  %v21261_v4 = vld [vmem:[%s23817_s3 + $0x230] sm:$0xff]   ;;  %v21248_v55 = vld [vmem:[%s22243_s13 + $0x18] sm:$0xff]   ;;  %v12622_v11 = vsel %vm1778_vm3, %v12620_v63, %v12621_v40  ;;  %v4721_v61 = vrot.slane %v4719_v32, 3  ;;  %v21270_v63 = vld [vmem:[%s21711_s22 + $0xa0] ss:$0 sps:$4 sm:$0x77]  }
 0x225   : > { %18836 = vmatprep.subr.bf16.mxu1 %v21230_v5  ;;  %v4691_v38 = vrot.slane %v4689_v57, 2  ;;  %v4686_v16 = vor.u32 %v4685_v2, %v4682_v1  ;;  %v12623_v17 = vrot.slane %v21248_v55, 1  ;;  %v4700_v19 = vrot.slane %v4698_v6, 2 }
 0x226   : > { %v4743_v57 = vshrl.u32 %v21267_v43, 16  ;;  %v4748_v6 = vrot.slane %v4746_v58, 3  ;;  %v21276_v43 = vld [vmem:[%s21711_s22 + $0x20] sm:$0xff]  }
 0x227   : > { %18837 = vmatpush3.bf16.msra.mxu1 %v21230_v5  ;;  %v22742_v5 = vld [vmem:[%s22243_s13 + $0x20] sm:$0xff]   ;;  %v4695_v24 = vor.u32 %v4694_v18, %v4691_v38  ;;  %v4687_v33 = vsel %vm4589_vm4, %v4677_v0, %v4686_v16  ;;  %v12624_v35 = vsel %vm1778_vm3, %v12621_v40, %v12623_v17  ;;  %v4704_v50 = vor.u32 %v4703_v20, %v4700_v19  ;;  %v21265_v38 = vld [vmem:[%s22243_s13 + $0x48] sm:$0xff]   ;;  %v21271_v20 = vld [vmem:[%s22243_s13 + $0x58] sm:$0xff]  }
 0x228   : > { %18838 = vmatprep.subr.bf16.mxu1 %v21236_v8  ;;  %v4745_v18 = vrot.slane %v4743_v57, 2  ;;  %v21286_v57 = vld [vmem:[%s21711_s22 + $0x38] sm:$0xff]  }
 0x229   : > { %v4696_v36 = vsel %vm4589_vm4, %v4686_v16, %v4695_v24  ;;  %v4705_v59 = vsel %vm4589_vm4, %v4695_v24, %v4704_v50  ;;  %v4714_v62 = vsel %vm4589_vm4, %v4704_v50, %v4713_v48  ;;  %v12635_v16 = vrot.slane %v21265_v38, 1  ;;  %v21278_v50 = vld [vmem:[%s22243_s13 + $0x68] sm:$0xff]  }
 0x22a   : > { %18803 = vmatmul.mubr.bf16.gmra.mrb[4].mxu1 %v4633_v27  ;;  %v12625_v27 = vrot.slane %v22742_v5, 1  ;;  %v21279_v5 = vld [vmem:[%s23817_s3 + $0x5a0] sm:$0xff]   ;;  %v22847_v38 = vld [vmem:[%s21711_s22 + $0x48] sm:$0xff]  }
 0x22b   : > { %19499 = vmatmul.mubr.bf16.gmra.mrb[24].mxu0 %v12113_v22  ;;  %18806 = vmatprep.mubr.bf16.mxu1 %v4642_v25  ;;  %v21262_v22 = vld [vmem:[%s21711_s22 + $0x88] sm:$0xff]  }
 0x22c   : > { %19502 = vmatprep.mubr.bf16.mxu0 %v12115_v29  ;;  %18839 = vmatpush3.bf16.msra.mxu1 %v21236_v8  ;;  %v4669_v8 = vsel %vm4589_vm4, %v4659_v41, %v4668_v60  ;;  %v21253_v25 = vld [vmem:[%s22243_s13 + $0x28] sm:$0xff]   ;;  %v22761_v29 = vld [vmem:[%s23817_s3 + $0x240] sm:$0xff]   ;;  %v4725_v37 = vshrl.u32 %v21262_v22, 16  ;;  %v4728_v41 = vshll.u32 %v21262_v22, 16  ;;  %v12626_v44 = vsel %vm1778_vm3, %v12623_v17, %v12625_v27  ;;  %v21273_v22 = vld [vmem:[%s21711_s22 + $0x10] sm:$0xf8]  }
 0x22d   : > { %18840 = vmatprep.subr.bf16.mxu1 %v21242_v30  ;;  %v12627_v45 = vrot.slane %v21253_v25, 1  ;;  %v4749_v17 = vor.u32 %v4748_v6, %v4745_v18  ;;  %v21274_v25 = vld [vmem:[%s21711_s22 + $0x18] sm:$0xff]   ;;  %v22850_v18 = vld [vmem:[%s22243_s13 + $0x90] sm:$0xff]  }
 0x22e   : > { %v4730_v51 = vrot.slane %v4728_v41, 3  ;;  %v5260_v41 = vrot.slane %v21274_v25, 3  ;;  %v21303_v25 = vld [vmem:[%s23817_s3 + $0x260] sm:$0xff]  }
 0x22f   : > { %v12628_v60 = vsel %vm1778_vm3, %v12625_v27, %v12627_v45  ;;  %v12630_v40 = vsel %vm1778_vm3, %v12627_v45, %v12629_v46  ;;  %v12637_v27 = vrot.slane %v21269_v7, 1  ;;  %v21280_v45 = vld [vmem:[%s21711_s22 + $0x28] sm:$0xff]  }
 0x230   : > { %18841 = vmatpush3.bf16.msra.mxu1 %v21242_v30  ;;  %v4716_v30 = vshrl.u32 %v21258_v13, 16  ;;  %v4755_v13 = vshll.u32 %v21270_v63, 16 }
 0x231   : > { %18842 = vmatprep.subr.bf16.mxu1 %v21249_v47 }
 0x232   : > { %18807 = vmatmul.mubr.bf16.gmra.mrb[8].mxu1 %v4651_v49  ;;  %v4727_v49 = vrot.slane %v4725_v37, 2  ;;  %v4757_v19 = vrot.slane %v4755_v13, 3  ;;  %v5259_v37 = vrot.slane %v21273_v22, 3 }
 0x233   : > { %19503 = vmatmul.mubr.bf16.gmra.mrb[28].mxu0 %v12117_v53  ;;  %18810 = vmatprep.mubr.bf16.mxu1 %v4660_v54  ;;  %v21259_v53 = vld [vmem:[%s22243_s13 + $0x38] sm:$0xff]   ;;  %v4734_v54 = vshrl.u32 %v21264_v42, 16 }
 0x234   : > { %19506 = vmatprep.mubr.bf16.mxu0 %v12119_v23  ;;  %18843 = vmatpush3.bf16.msra.mxu1 %v21249_v47  ;;  %v4718_v47 = vrot.slane %v4716_v30, 2  ;;  %v4737_v23 = vshll.u32 %v21264_v42, 16  ;;  %v12631_v1 = vrot.slane %v21259_v53, 1  ;;  %v4731_v2 = vor.u32 %v4730_v51, %v4727_v49  ;;  %v22817_v42 = vld [vmem:[%s23817_s3 + $0x5c0] sm:$0xff]  }
 0x235   : > { %18844 = vmatprep.subr.bf16.mxu1 %v21255_v56  ;;  %v5262_v51 = vrot.slane %v21276_v43, 3  ;;  %v5264_v53 = vrot.slane %v21280_v45, 3 }
 0x236   : > { %v4722_v0 = vor.u32 %v4721_v61, %v4718_v47  ;;  %v4739_v55 = vrot.slane %v4737_v23, 3  ;;  %v21281_v61 = vld [vmem:[%s22243_s13 + $0x70] sm:$0xff]  }
 0x237   : > { %v21282_v23 = vld [vmem:[%s21711_s22 + $0x30] sm:$0xff]   ;;  %v5263_v58 = vsel %vm5258_vm5, %v5260_v41, %v5262_v51 }
 0x238   : > { %18845 = vmatpush3.bf16.msra.mxu1 %v21255_v56  ;;  %v21263_v56 = vld [vmem:[%s22243_s13 + $0x40] sm:$0xff]   ;;  %v4732_v12 = vsel %vm4589_vm4, %v4722_v0, %v4731_v2 }
 0x239   : > { %18846 = vmatprep.subr.bf16.mxu1 %v21261_v4  ;;  %v12633_v3 = vrot.slane %v21263_v56, 1  ;;  %v21283_v56 = vld [vmem:[%s22243_s13 + $0x78] sm:$0xff]  }
 0x23a   : > { %18811 = vmatmul.mubr.bf16.gmra.mrb[12].mxu1 %v4669_v8  ;;  %v4752_v8 = vshrl.u32 %v21270_v63, 16 }
 0x23b   : > { %19507 = vmatmul.mubr.bf16.gmra.mrb[32].mxu0 %v12121_v9  ;;  %18814 = vmatprep.mubr.bf16.mxu1 %v4678_v10  ;;  %v4723_v9 = vsel %vm4589_vm4, %v4713_v48, %v4722_v0  ;;  %v12632_v10 = vsel %vm1778_vm3, %v12629_v46, %v12631_v1  ;;  %v12634_v14 = vsel %vm1778_vm3, %v12631_v1, %v12633_v3  ;;  %v12647_v0 = vrot.slane %v21283_v56, 1 }
 0x23c   : > { %19526 = vmatprep.mubr.bf16.mxu0 %v12622_v11  ;;  %18847 = vmatpush3.bf16.msra.mxu1 %v21261_v4  ;;  %v4736_v4 = vrot.slane %v4734_v54, 2  ;;  %v21285_v11 = vld [vmem:[%s23817_s3 + $0x5a8] sm:$0xff]   ;;  %v4754_v24 = vrot.slane %v4752_v8, 2  ;;  %v12636_v30 = vsel %vm1778_vm3, %v12633_v3, %v12635_v16  ;;  %v5261_v48 = vsel %vm5258_vm5, %v5259_v37, %v5260_v41  ;;  %v21290_v3 = vld [vmem:[%s23817_s3 + $0x250] sm:$0xff]  }
 0x23d   : > { %18848 = vmatprep.subr.bf16.mxu1 %v21268_v15  ;;  %v12645_v54 = vrot.slane %v21281_v61, 1  ;;  %v5268_v1 = vrot.slane %v21286_v57, 3  ;;  %v21309_v37 = vld [vmem:[%s23817_s3 + $0x268] sm:$0xff]   ;;  %v21311_v57 = vld [vmem:[%s22243_s13 + $0x30] sm:$0xff]  }
 0x23e   : > { %v21307_v61 = vld [vmem:[%s22243_s13 + $0x28] sm:$0xff]  }
 0x23f   : > { %v12648_v7 = vsel %vm1778_vm3, %v12645_v54, %v12647_v0 }
 0x240   : > { %18849 = vmatpush3.bf16.msra.mxu1 %v21268_v15  ;;  %v4740_v15 = vor.u32 %v4739_v55, %v4736_v4  ;;  %v21299_v4 = vld [vmem:[%s22243_s13 + $0x8] sm:$0xfe]   ;;  %v21288_v55 = vld [vmem:[%s21711_s22 + $0x40] sm:$0xff]  }
 0x241   : > { %18886 = vmatprep.subr.bf16.mxu1 %v22761_v29  ;;  %v13159_v13 = vshll.u32 %v21299_v4, 16 }
 0x242   : > { %18815 = vmatmul.mubr.bf16.gmra.mrb[16].mxu1 %v4687_v33  ;;  %v4741_v28 = vsel %vm4589_vm4, %v4731_v2, %v4740_v15  ;;  %v4750_v32 = vsel %vm4589_vm4, %v4740_v15, %v4749_v17  ;;  %v21297_v33 = vld [vmem:[%s23817_s3 + $0x5b8] sm:$0xff]   ;;  %v5270_v15 = vrot.slane %v21288_v55, 3 }
 0x243   : > { %19527 = vmatmul.mubr.bf16.vlgmr.msra.gmra.mrb[0].mxu0 %v12624_v35  ;;  %18818 = vmatprep.mubr.bf16.mxu1 %v4696_v36  ;;  %v4758_v35 = vor.u32 %v4757_v19, %v4754_v24  ;;  %v12639_v36 = vrot.slane %v21271_v20, 1  ;;  %v21294_v24 = vld [vmem:[%s21711_s22 + $0x50] sm:$0xff]   ;;  %v21295_v20 = vld [vmem:[%s22243_s13 + $0x98] ss:$0 sps:$4 sm:$0x11]  }
 0x244   : > { %19530 = vmatprep.mubr.bf16.mxu0 %v12626_v44  ;;  %19563 = vmatpush3.bf16.msra.mxu0 %v22678_v39  ;;  %v21272_v39 = vld [vmem:[%s23817_s3 + $0x598] sm:$0xff]   ;;  %v12641_v44 = vrot.slane %v21275_v26, 1  ;;  %v13161_v26 = vrot.slane %v13159_v13, 2  ;;  %v12655_v45 = vrot.slane %v21295_v20, 1 }
 0x245   : > { %19564 = vmatprep.subr.bf16.mxu0 %v21260_v34  ;;  %v4759_v46 = vsel %vm4589_vm4, %v4749_v17, %v4758_v35  ;;  %v12640_v47 = vsel %vm1778_vm3, %v12637_v27, %v12639_v36  ;;  %v5272_v17 = vrot.slane %v22847_v38, 3 }
 0x246   : > { %v12642_v49 = vsel %vm1778_vm3, %v12639_v36, %v12641_v44 }
 0x247   : > { %v5273_v35 = vsel %vm5258_vm5, %v5270_v15, %v5272_v17 }
 0x248   : > { %19565 = vmatpush3.bf16.msra.mxu0 %v21260_v34  ;;  %v12638_v34 = vsel %vm1778_vm3, %v12635_v16, %v12637_v27  ;;  %v12653_v27 = vrot.slane %v22850_v18, 1  ;;  %v21306_v18 = vld [vmem:[%s21711_s22 + $0x70] sm:$0xff]  }
 0x249   : > { %19566 = vmatprep.subr.bf16.mxu0 %v21266_v52  ;;  %v5282_v20 = vrot.slane %v21306_v18, 3 }
 0x24a   : > { %18819 = vmatmul.mubr.bf16.gmra.mrb[20].mxu1 %v4705_v59  ;;  %v21284_v59 = vld [vmem:[%s23817_s3 + $0x248] sm:$0xff]  }
 0x24b   : > { %19531 = vmatmul.mubr.bf16.gmra.mrb[4].mxu0 %v12628_v60  ;;  %18822 = vmatprep.mubr.bf16.mxu1 %v4714_v62  ;;  %v21287_v60 = vld [vmem:[%s22243_s13 + $0x80] sm:$0xff]   ;;  %v5265_v62 = vsel %vm5258_vm5, %v5262_v51, %v5264_v53 }
 0x24c   : > { %19534 = vmatprep.mubr.bf16.mxu0 %v12630_v40  ;;  %19567 = vmatpush3.bf16.msra.mxu0 %v21266_v52  ;;  %v12643_v52 = vrot.slane %v21278_v50, 1  ;;  %v5266_v40 = vrot.slane %v21282_v23, 3  ;;  %v12649_v2 = vrot.slane %v21287_v60, 1  ;;  %v22886_v23 = vld [vmem:[%s21711_s22 + $0x68] sm:$0xff]  }
 0x24d   : > { %19568 = vmatprep.subr.bf16.mxu0 %v21272_v39  ;;  %v5280_v55 = vrot.slane %v22886_v23, 3  ;;  %v21332_v23 = vld [vmem:[%s23817_s3 + $0x5e0] sm:$0xff]  }
 0x24e   : > { %v12646_v63 = vsel %vm1778_vm3, %v12643_v52, %v12645_v54  ;;  %v5267_v6 = vsel %vm5258_vm5, %v5264_v53, %v5266_v40  ;;  %v5269_v8 = vsel %vm5258_vm5, %v5266_v40, %v5268_v1  ;;  %v21301_v53 = vld [vmem:[%s21711_s22 + $0x60] sm:$0xff]   ;;  %v13194_v40 = vshll.u32 %v21307_v61, 16 }
 0x250   : > { %19569 = vmatpush3.bf16.msra.mxu0 %v21272_v39  ;;  %v12644_v39 = vsel %vm1778_vm3, %v12641_v44, %v12643_v52  ;;  %v5274_v44 = vrot.slane %v21294_v24, 3 }
 0x251   : > { %19570 = vmatprep.subr.bf16.mxu0 %v21279_v5 }
 0x252   : > { %18823 = vmatmul.mubr.bf16.gmra.mrb[24].mxu1 %v4723_v9  ;;  %v21296_v9 = vld [vmem:[%s23817_s3 + $0x258] sm:$0xff]  }
 0x253   : > { %19535 = vmatmul.mubr.bf16.gmra.mrb[8].mxu0 %v12632_v10  ;;  %18826 = vmatprep.mubr.bf16.mxu1 %v4732_v12  ;;  %v12650_v10 = vsel %vm1778_vm3, %v12647_v0, %v12649_v2  ;;  %v13156_v12 = vshrl.u32 %v21299_v4, 16  ;;  %v21322_v0 = vld [vmem:[%s23817_s3 + $0x278] sm:$0xff]  }
 0x254   : > { %19538 = vmatprep.mubr.bf16.mxu0 %v12634_v14  ;;  %19571 = vmatpush3.bf16.msra.mxu0 %v21279_v5  ;;  %v21289_v5 = vld [vmem:[%s22243_s13 + $0x88] sm:$0xff]   ;;  %v21302_v14 = vld [vmem:[%s22243_s13 + $0x18] sm:$0xff]  }
 0x255   : > { %19572 = vmatprep.subr.bf16.mxu0 %v21285_v11  ;;  %v12651_v16 = vrot.slane %v21289_v5, 1  ;;  %v13158_v22 = vrot.slane %v13156_v12, 1  ;;  %v13176_v43 = vshll.u32 %v21302_v14, 16  ;;  %v21313_v5 = vld [vmem:[%s22243_s13 + $0x38] sm:$0xff]   ;;  %v21317_v12 = vld [vmem:[%s22243_s13 + $0x40] sm:$0xff]  }
 0x256   : > { %v13218_v24 = vshrl.u32 %v21317_v12, 16 }
 0x257   : > { %v12654_v41 = vsel %vm1778_vm3, %v12651_v16, %v12653_v27  ;;  %v13162_v51 = vor.u32 %v13161_v26, %v13158_v22  ;;  %v13178_v54 = vrot.slane %v13176_v43, 2 }
 0x258   : > { %19573 = vmatpush3.bf16.msra.mxu0 %v21285_v11 }
 0x259   : > { %19574 = vmatprep.subr.bf16.mxu0 %v21291_v21 }
 0x25a   : > { %18827 = vmatmul.mubr.bf16.gmra.mrb[28].mxu1 %v4741_v28 }
 0x25b   : > { %19539 = vmatmul.mubr.bf16.gmra.mrb[12].mxu0 %v12636_v30  ;;  %18830 = vmatprep.mubr.bf16.mxu1 %v4750_v32  ;;  %v13173_v30 = vshrl.u32 %v21302_v14, 16  ;;  %v21305_v32 = vld [vmem:[%s22243_s13 + $0x20] sm:$0xff]  }
 0x25c   : > { %19542 = vmatprep.mubr.bf16.mxu0 %v12638_v34  ;;  %19575 = vmatpush3.bf16.msra.mxu0 %v21291_v21  ;;  %v22866_v21 = vld [vmem:[%s21711_s22 + $0x58] sm:$0xff]   ;;  %v12652_v34 = vsel %vm1778_vm3, %v12649_v2, %v12651_v16  ;;  %v13182_v50 = vshrl.u32 %v21305_v32, 16  ;;  %v13203_v2 = vshll.u32 %v21311_v57, 16  ;;  %v13209_v16 = vshrl.u32 %v21313_v5, 16 }
 0x25d   : > { %19576 = vmatprep.subr.bf16.mxu0 %v21297_v33 }
 0x25e   : > { %v13184_v56 = vrot.slane %v13182_v50, 1  ;;  %v21326_v50 = vld [vmem:[%s23817_s3 + $0x5d8] sm:$0xff]  }
 0x260   : > { %19577 = vmatpush3.bf16.msra.mxu0 %v21297_v33  ;;  %v5271_v33 = vsel %vm5258_vm5, %v5268_v1, %v5270_v15  ;;  %v13200_v1 = vshrl.u32 %v21311_v57, 16 }
 0x261   : > { %19614 = vmatprep.subr.bf16.mxu0 %v22817_v42 }
 0x262   : > { %18831 = vmatmul.mubr.bf16.gmra.mrb[32].mxu1 %v4759_v46  ;;  %v5276_v46 = vrot.slane %v22866_v21, 3 }
 0x263   : > { %19543 = vmatmul.mubr.bf16.gmra.mrb[16].mxu0 %v12640_v47  ;;  %18850 = vmatprep.mubr.bf16.mxu1 %v5261_v48  ;;  %v13175_v47 = vrot.slane %v13173_v30, 1  ;;  %v13185_v48 = vshll.u32 %v21305_v32, 16  ;;  %v21320_v30 = vld [vmem:[%s23817_s3 + $0x5d0] sm:$0xff]   ;;  %v13211_v32 = vrot.slane %v13209_v16, 1 }
 0x264   : > { %19546 = vmatprep.mubr.bf16.mxu0 %v12642_v49  ;;  %v21315_v49 = vld [vmem:[%s23817_s3 + $0x270] sm:$0xff]  }
 0x265   : > { %v13187_v60 = vrot.slane %v13185_v48, 2  ;;  %v13179_v4 = vor.u32 %v13178_v54, %v13175_v47  ;;  %v21325_v47 = vld [vmem:[%s22243_s13 + $0x58] sm:$0xff]  }
 0x267   : > { %v13188_v38 = vor.u32 %v13187_v60, %v13184_v56 }
 0x26a   : > { %18851 = vmatmul.mubr.bf16.vlgmr.msra.gmra.mrb[0].mxu1 %v5263_v58  ;;  %v5275_v58 = vsel %vm5258_vm5, %v5272_v17, %v5274_v44  ;;  %v13212_v17 = vshll.u32 %v21313_v5, 16 }
 0x26b   : > { %19547 = vmatmul.mubr.bf16.gmra.mrb[20].mxu0 %v12644_v39  ;;  %18887 = vmatpush3.bf16.msra.mxu1 %v22761_v29  ;;  %v21300_v29 = vld [vmem:[%s22243_s13 + $0x10] sm:$0xff]   ;;  %v5277_v39 = vsel %vm5258_vm5, %v5274_v44, %v5276_v46 }
 0x26c   : > { %18854 = vmatprep.mubr.bf16.mxu1 %v5265_v62  ;;  %19550 = vmatprep.mubr.bf16.mxu0 %v12646_v63  ;;  %v13164_v11 = vshrl.u32 %v21300_v29, 16  ;;  %v13167_v19 = vshll.u32 %v21300_v29, 16  ;;  %v13191_v62 = vshrl.u32 %v21307_v61, 16 }
 0x26d   : > { %18888 = vmatprep.subr.bf16.mxu1 %v21284_v59 }
 0x26e   : > { %v13166_v28 = vrot.slane %v13164_v11, 1  ;;  %v13169_v36 = vrot.slane %v13167_v19, 2  ;;  %v13193_v29 = vrot.slane %v13191_v62, 1  ;;  %v21314_v11 = vld [vmem:[%s23817_s3 + $0x5c8] sm:$0xff]   ;;  %v13221_v19 = vshll.u32 %v21317_v12, 16 }
 0x26f   : > { %18889 = vmatpush3.bf16.msra.mxu1 %v21284_v59  ;;  %v12656_v59 = vsel %vm1778_vm3, %v12653_v27, %v12655_v45  ;;  %v13189_v27 = vsel %vm2849_vm0, %v13179_v4, %v13188_v38 }
 0x270   : > { %18890 = vmatprep.subr.bf16.mxu1 %v21290_v3  ;;  %v13170_v52 = vor.u32 %v13169_v36, %v13166_v28  ;;  %v21312_v28 = vld [vmem:[%s21711_s22 + $0x80] sm:$0xff]   ;;  %v13223_v36 = vrot.slane %v13221_v19, 2 }
 0x271   : > { %v5286_v48 = vrot.slane %v21312_v28, 3  ;;  %v21336_v28 = vld [vmem:[%s22243_s13 + $0x78] sm:$0xff]  }
 0x272   : > { %18855 = vmatmul.mubr.bf16.gmra.mrb[4].mxu1 %v5267_v6  ;;  %v13171_v63 = vsel %vm2849_vm0, %v13162_v51, %v13170_v52  ;;  %v22902_v6 = vld [vmem:[%s23817_s3 + $0x280] sm:$0xff]   ;;  %v13180_v14 = vsel %vm2849_vm0, %v13170_v52, %v13179_v4 }
 0x273   : > { %19551 = vmatmul.mubr.bf16.gmra.mrb[24].mxu0 %v12648_v7  ;;  %18858 = vmatprep.mubr.bf16.mxu1 %v5269_v8  ;;  %v13196_v7 = vrot.slane %v13194_v40, 2  ;;  %v22905_v8 = vld [vmem:[%s21711_s22 + $0x78] sm:$0xff]  }
 0x274   : > { %19554 = vmatprep.mubr.bf16.mxu0 %v12650_v10  ;;  %18891 = vmatpush3.bf16.msra.mxu1 %v21290_v3  ;;  %v5278_v3 = vrot.slane %v21301_v53, 3  ;;  %v13205_v10 = vrot.slane %v13203_v2, 2  ;;  %v5284_v22 = vrot.slane %v22905_v8, 3  ;;  %v21318_v53 = vld [vmem:[%s21711_s22 + $0x90] sm:$0xff]  }
 0x275   : > { %18892 = vmatprep.subr.bf16.mxu1 %v21296_v9  ;;  %v13197_v21 = vor.u32 %v13196_v7, %v13193_v29  ;;  %v5290_v5 = vrot.slane %v21318_v53, 3  ;;  %v21331_v29 = vld [vmem:[%s22243_s13 + $0x68] sm:$0xff]   ;;  %v21324_v8 = vld [vmem:[%s21711_s22 + $0xa0] ss:$0 sps:$4 sm:$0x77]  }
 0x276   : > { %v5279_v13 = vsel %vm5258_vm5, %v5276_v46, %v5278_v3  ;;  %v5281_v15 = vsel %vm5258_vm5, %v5278_v3, %v5280_v55  ;;  %v5285_v44 = vsel %vm5258_vm5, %v5282_v20, %v5284_v22  ;;  %v5287_v60 = vsel %vm5258_vm5, %v5284_v22, %v5286_v48  ;;  %v21338_v3 = vld [vmem:[%s23817_s3 + $0x5e8] sm:$0xff]  }
 0x277   : > { %v5294_v22 = vrot.slane %v21324_v8, 3  ;;  %v21349_v8 = vld [vmem:[%s23817_s3 + $0x298] sm:$0xff]  }
 0x278   : > { %18893 = vmatpush3.bf16.msra.mxu1 %v21296_v9  ;;  %v13202_v9 = vrot.slane %v13200_v1, 1 }
 0x279   : > { %18894 = vmatprep.subr.bf16.mxu1 %v21303_v25 }
 0x27a   : > { %18859 = vmatmul.mubr.bf16.gmra.mrb[8].mxu1 %v5271_v33  ;;  %v13206_v26 = vor.u32 %v13205_v10, %v13202_v9  ;;  %v13214_v33 = vrot.slane %v13212_v17, 2  ;;  %v21344_v10 = vld [vmem:[%s23817_s3 + $0x5f0] sm:$0xff]  }
 0x27b   : > { %19555 = vmatmul.mubr.bf16.gmra.mrb[28].mxu0 %v12652_v34  ;;  %18862 = vmatprep.mubr.bf16.mxu1 %v5273_v35  ;;  %v22924_v34 = vld [vmem:[%s21711_s22 + $0x88] sm:$0xff]   ;;  %v13220_v35 = vrot.slane %v13218_v24, 1  ;;  %v21350_v24 = vld [vmem:[%s23817_s3 + $0x5f8] sm:$0xff]  }
 0x27c   : > { %19558 = vmatprep.mubr.bf16.mxu0 %v12654_v41  ;;  %18895 = vmatpush3.bf16.msra.mxu1 %v21303_v25  ;;  %v21319_v25 = vld [vmem:[%s22243_s13 + $0x48] sm:$0xff]   ;;  %v13198_v41 = vsel %vm2849_vm0, %v13188_v38, %v13197_v21  ;;  %v13207_v45 = vsel %vm2849_vm0, %v13197_v21, %v13206_v26  ;;  %v13215_v61 = vor.u32 %v13214_v33, %v13211_v32  ;;  %v22967_v33 = vld [vmem:[%s23817_s3 + $0x600] sm:$0xff]  }
 0x27d   : > { %18896 = vmatprep.subr.bf16.mxu1 %v21309_v37  ;;  %v13227_v43 = vshrl.u32 %v21319_v25, 16  ;;  %v13230_v46 = vshll.u32 %v21319_v25, 16  ;;  %v13224_v52 = vor.u32 %v13223_v36, %v13220_v35 }
 0x27e   : > { %v13216_v62 = vsel %vm2849_vm0, %v13206_v26, %v13215_v61 }
 0x27f   : > { %v13229_v56 = vrot.slane %v13227_v43, 1  ;;  %v13232_v57 = vrot.slane %v13230_v46, 2  ;;  %v13225_v1 = vsel %vm2849_vm0, %v13215_v61, %v13224_v52  ;;  %v13281_v43 = vshrl.u32 %v21336_v28, 16  ;;  %v21342_v61 = vld [vmem:[%s22243_s13 + $0x88] sm:$0xff]  }
 0x280   : > { %18897 = vmatpush3.bf16.msra.mxu1 %v21309_v37  ;;  %v21323_v37 = vld [vmem:[%s22243_s13 + $0x50] sm:$0xff]  }
 0x281   : > { %18898 = vmatprep.subr.bf16.mxu1 %v21315_v49  ;;  %v13236_v51 = vshrl.u32 %v21323_v37, 16  ;;  %v13239_v54 = vshll.u32 %v21323_v37, 16  ;;  %v13233_v38 = vor.u32 %v13232_v57, %v13229_v56  ;;  %v21340_v37 = vld [vmem:[%s22243_s13 + $0x80] sm:$0xff]   ;;  %v13283_v53 = vrot.slane %v13281_v43, 1  ;;  %v21346_v56 = vld [vmem:[%s22243_s13 + $0x90] sm:$0xff]   ;;  %v21337_v57 = vld [vmem:[%s23817_s3 + $0x288] sm:$0xff]  }
 0x282   : > { %18863 = vmatmul.mubr.bf16.gmra.mrb[12].mxu1 %v5275_v58  ;;  %v21321_v58 = vld [vmem:[%s21711_s22 + $0x98] sm:$0xff]   ;;  %v13290_v46 = vshrl.u32 %v21340_v37, 16  ;;  %s417_s22 = scalar_lea.vmem %s23821_s7, %s16570_s14 }
 0x283   : > { %19559 = vmatmul.mubr.bf16.gmra.mrb[32].mxu0 %v12656_v59  ;;  %18866 = vmatprep.mubr.bf16.mxu1 %v5277_v39  ;;  %v13245_v59 = vshrl.u32 %v21325_v47, 16  ;;  %v21328_v39 = vld [vmem:[%s22243_s13 + $0x60] sm:$0xff]   ;;  %v13238_v40 = vrot.slane %v13236_v51, 1  ;;  %v13241_v2 = vrot.slane %v13239_v54, 2  ;;  %v5292_v18 = vrot.slane %v21321_v58, 3 }
 0x284   : > { %19578 = vmatprep.mubr.bf16.mxu0 %v13171_v63  ;;  %18899 = vmatpush3.bf16.msra.mxu1 %v21315_v49  ;;  %v5288_v49 = vrot.slane %v22924_v34, 3  ;;  %v13254_v4 = vshrl.u32 %v21328_v39, 16  ;;  %v13234_v16 = vsel %vm2849_vm0, %v13224_v52, %v13233_v38  ;;  %v21333_v52 = vld [vmem:[%s21719_s10 + $0x10] sm:$0xff]  }
 0x285   : > { %18900 = vmatprep.subr.bf16.mxu1 %v21322_v0  ;;  %v13242_v7 = vor.u32 %v13241_v2, %v13238_v40  ;;  %v13247_v9 = vrot.slane %v13245_v59, 1  ;;  %v5293_v17 = vsel %vm5258_vm5, %v5290_v5, %v5292_v18  ;;  %v13308_v40 = vshrl.u32 %v21346_v56, 16  ;;  %v21343_v2 = vld [vmem:[%s23817_s3 + $0x290] sm:$0xff]  }
 0x286   : > { %v5289_v63 = vsel %vm5258_vm5, %v5286_v48, %v5288_v49  ;;  %v13293_v48 = vshll.u32 %v21340_v37, 16  ;;  %v21375_v37 = vld [vmem:[%s23817_s3 + $0x2b8] sm:$0xff]  }
 0x287   : > { %v13243_v19 = vsel %vm2849_vm0, %v13233_v38, %v13242_v7 }
 0x288   : > { %18901 = vmatpush3.bf16.msra.mxu1 %v21322_v0  ;;  %v13248_v0 = vshll.u32 %v21325_v47, 16  ;;  %v13295_v59 = vrot.slane %v13293_v48, 2 }
 0x289   : > { %18938 = vmatprep.subr.bf16.mxu1 %v22902_v6 }
 0x28a   : > { %18867 = vmatmul.mubr.bf16.gmra.mrb[16].mxu1 %v5279_v13  ;;  %v13250_v12 = vrot.slane %v13248_v0, 2  ;;  %v13256_v13 = vrot.slane %v13254_v4, 1  ;;  %v21335_v0 = vld [vmem:[%s21719_s10 + $0x18] sm:$0xff]   ;;  %v21339_v4 = vld [vmem:[%s21719_s10 + $0x20] sm:$0xff]  }
 0x28b   : > { %19579 = vmatmul.mubr.bf16.vlgmr.msra.gmra.mrb[0].mxu0 %v13180_v14  ;;  %18870 = vmatprep.mubr.bf16.mxu1 %v5281_v15  ;;  %v21334_v14 = vld [vmem:[%s22243_s13 + $0x70] sm:$0xff]   ;;  %v5291_v15 = vsel %vm5258_vm5, %v5288_v49, %v5290_v5  ;;  %v21329_v49 = vld [vmem:[%s21719_s10 + $0x8] sm:$0xff]  }
 0x28c   : > { %19582 = vmatprep.mubr.bf16.mxu0 %v13189_v27  ;;  %19615 = vmatpush3.bf16.msra.mxu0 %v22817_v42  ;;  %v5283_v42 = vsel %vm5258_vm5, %v5280_v55, %v5282_v20  ;;  %v13257_v55 = vshll.u32 %v21328_v39, 16  ;;  %v13263_v27 = vshrl.u32 %v21331_v29, 16  ;;  %v13266_v20 = vshll.u32 %v21331_v29, 16 }
 0x28d   : > { %19616 = vmatprep.subr.bf16.mxu0 %v21314_v11  ;;  %v13272_v21 = vshrl.u32 %v21334_v14, 16  ;;  %v13251_v25 = vor.u32 %v13250_v12, %v13247_v9  ;;  %v13275_v26 = vshll.u32 %v21334_v14, 16  ;;  %v13299_v39 = vshrl.u32 %v21342_v61, 16  ;;  %v21356_v14 = vld [vmem:[%s23817_s3 + $0x2a0] sm:$0xff]  }
 0x28e   : > { %v13265_v34 = vrot.slane %v13263_v27, 1  ;;  %v13268_v35 = vrot.slane %v13266_v20, 2  ;;  %v21353_v27 = vld [vmem:[%s22243_s13 + $0x10] sm:$0xff]   ;;  %v21362_v20 = vld [vmem:[%s23817_s3 + $0x2a8] sm:$0xff]  }
 0x28f   : > { %v13274_v36 = vrot.slane %v13272_v21, 1  ;;  %v13301_v5 = vrot.slane %v13299_v39, 1  ;;  %v21365_v39 = vld [vmem:[%s21719_s10 + $0x68] sm:$0xff]  }
 0x290   : > { %19617 = vmatpush3.bf16.msra.mxu0 %v21314_v11  ;;  %v13259_v11 = vrot.slane %v13257_v55, 2  ;;  %v13269_v47 = vor.u32 %v13268_v35, %v13265_v34  ;;  %v21355_v34 = vld [vmem:[%s22243_s13 + $0x18] sm:$0xff]   ;;  %v21358_v35 = vld [vmem:[%s22243_s13 + $0x20] sm:$0xff]  }
 0x291   : > { %19618 = vmatprep.subr.bf16.mxu0 %v21320_v30  ;;  %v13828_v43 = vrot.slane %v21358_v35, 2 }
 0x292   : > { %18871 = vmatmul.mubr.bf16.gmra.mrb[20].mxu1 %v5283_v42  ;;  %v13260_v32 = vor.u32 %v13259_v11, %v13256_v13  ;;  %v5295_v42 = vsel %vm5258_vm5, %v5292_v18, %v5294_v22  ;;  %v13310_v18 = vrot.slane %v13308_v40, 1  ;;  %v21347_v22 = vld [vmem:[%s21719_s10 + $0x38] sm:$0xff]   ;;  %v21386_v40 = vld [vmem:[%s23817_s3 + $0x620] sm:$0xff]  }
 0x293   : > { %19583 = vmatmul.mubr.bf16.gmra.mrb[4].mxu0 %v13198_v41  ;;  %18874 = vmatprep.mubr.bf16.mxu1 %v5285_v44  ;;  %v13252_v41 = vsel %vm2849_vm0, %v13242_v7, %v13251_v25  ;;  %v13277_v44 = vrot.slane %v13275_v26, 2 }
 0x294   : > { %19586 = vmatprep.mubr.bf16.mxu0 %v13207_v45  ;;  %19619 = vmatpush3.bf16.msra.mxu0 %v21320_v30  ;;  %v21327_v30 = vld [vmem:[%s21719_s10] sm:$0xff]   ;;  %v13284_v45 = vshll.u32 %v21336_v28, 16  ;;  %v13270_v58 = vsel %vm2849_vm0, %v13260_v32, %v13269_v47  ;;  %v13824_v28 = vrot.slane %v21353_v27, 2  ;;  %v21377_v27 = vld [vmem:[%s21719_s10 + $0x88] sm:$0xff]  }
 0x295   : > { %19620 = vmatprep.subr.bf16.mxu0 %v21326_v50  ;;  %v13278_v51 = vor.u32 %v13277_v44, %v13274_v36  ;;  %v13826_v44 = vrot.slane %v21355_v34, 2  ;;  %v21388_v34 = vld [vmem:[%s22243_s13 + $0x70] sm:$0xff]  }
 0x296   : > { %v13286_v54 = vrot.slane %v13284_v45, 2  ;;  %v21357_v45 = vld [vmem:[%s21719_s10 + $0x50] sm:$0xff]  }
 0x297   : > { %v13827_v48 = vsel %vm3518_vm1, %v13824_v28, %v13826_v44 }
 0x298   : > { %19621 = vmatpush3.bf16.msra.mxu0 %v21326_v50  ;;  %v13261_v50 = vsel %vm2849_vm0, %v13251_v25, %v13260_v32  ;;  %v21351_v32 = vld [vmem:[%s21719_s10 + $0x40] sm:$0xff]  }
 0x299   : > { %19622 = vmatprep.subr.bf16.mxu0 %v21332_v23 }
 0x29a   : > { %18875 = vmatmul.mubr.bf16.gmra.mrb[24].mxu1 %v5287_v60  ;;  %v21348_v60 = vld [vmem:[%s22243_s13 + $0x98] ss:$0 sps:$4 sm:$0x33]  }
 0x29b   : > { %19587 = vmatmul.mubr.bf16.gmra.mrb[8].mxu0 %v13216_v62  ;;  %18878 = vmatprep.mubr.bf16.mxu1 %v5289_v63  ;;  %v13279_v62 = vsel %vm2849_vm0, %v13269_v47, %v13278_v51  ;;  %v13302_v63 = vshll.u32 %v21342_v61, 16  ;;  %v13317_v29 = vshrl.u32 %v21348_v60, 16  ;;  %v13320_v13 = vshll.u32 %v21348_v60, 16  ;;  %v21364_v47 = vld [vmem:[%s22243_s13 + $0x30] sm:$0xff]   ;;  %v21367_v61 = vld [vmem:[%s23817_s3 + $0x608] sm:$0xff]  }
 0x29c   : > { %19590 = vmatprep.mubr.bf16.mxu0 %v13225_v1  ;;  %19623 = vmatpush3.bf16.msra.mxu0 %v21332_v23  ;;  %v13292_v23 = vrot.slane %v13290_v46, 1  ;;  %v13287_v1 = vor.u32 %v13286_v54, %v13283_v53  ;;  %v21360_v46 = vld [vmem:[%s22243_s13 + $0x28] sm:$0xff]   ;;  %v21373_v53 = vld [vmem:[%s23817_s3 + $0x610] sm:$0xff]   ;;  %v21359_v54 = vld [vmem:[%s21719_s10 + $0x58] sm:$0xff]  }
 0x29d   : > { %19624 = vmatprep.subr.bf16.mxu0 %v21338_v3  ;;  %v13304_v38 = vrot.slane %v13302_v63, 2 }
 0x29e   : > { %v13296_v55 = vor.u32 %v13295_v59, %v13292_v23  ;;  %v21363_v23 = vld [vmem:[%s21719_s10 + $0x60] sm:$0xff]  }
 0x29f   : > { %v13305_v12 = vor.u32 %v13304_v38, %v13301_v5  ;;  %v21370_v59 = vld [vmem:[%s22243_s13 + $0x40] sm:$0xff]   ;;  %v21381_v5 = vld [vmem:[%s21719_s10 + $0x8] sm:$0xff]  }
 0x2a0   : > { %19625 = vmatpush3.bf16.msra.mxu0 %v21338_v3  ;;  %v13311_v3 = vshll.u32 %v21346_v56, 16  ;;  %v13297_v9 = vsel %vm2849_vm0, %v13287_v1, %v13296_v55  ;;  %v13836_v63 = vrot.slane %v21370_v59, 2 }
 0x2a1   : > { %19626 = vmatprep.subr.bf16.mxu0 %v21344_v10 }
 0x2a2   : > { %18879 = vmatmul.mubr.bf16.gmra.mrb[28].mxu1 %v5291_v15  ;;  %v13313_v7 = vrot.slane %v13311_v3, 2  ;;  %v21345_v15 = vld [vmem:[%s21719_s10 + $0x30] sm:$0xff]  }
 0x2a3   : > { %19591 = vmatmul.mubr.bf16.gmra.mrb[12].mxu0 %v13234_v16  ;;  %18882 = vmatprep.mubr.bf16.mxu1 %v5293_v17  ;;  %v13319_v16 = vrot.slane %v13317_v29, 1  ;;  %v21352_v17 = vld [vmem:[%s22243_s13 + $0x8] sm:$0xfc]  }
 0x2a4   : > { %19594 = vmatprep.mubr.bf16.mxu0 %v13243_v19  ;;  %19627 = vmatpush3.bf16.msra.mxu0 %v21344_v10  ;;  %v21341_v10 = vld [vmem:[%s21719_s10 + $0x28] sm:$0xff]   ;;  %v13314_v11 = vor.u32 %v13313_v7, %v13310_v18  ;;  %v13322_v19 = vrot.slane %v13320_v13, 2  ;;  %v13823_v26 = vrot.slane %v21352_v17, 2  ;;  %v21371_v18 = vld [vmem:[%s21719_s10 + $0x78] sm:$0xff]   ;;  %v6296_v13 = vshll.u32 %v21381_v5, 16  ;;  %v21383_v17 = vld [vmem:[%s21719_s10 + $0x10] sm:$0xff]  }
 0x2a5   : > { %19628 = vmatprep.subr.bf16.mxu0 %v21350_v24 }
 0x2a6   : > { %v13315_v21 = vsel %vm2849_vm0, %v13305_v12, %v13314_v11  ;;  %v13323_v25 = vor.u32 %v13322_v19, %v13319_v16  ;;  %v21404_v16 = vld [vmem:[%s23817_s3 + $0x638] sm:$0xff]  }
 0x2a8   : > { %19629 = vmatpush3.bf16.msra.mxu0 %v21350_v24  ;;  %v13306_v24 = vsel %vm2849_vm0, %v13296_v55, %v13305_v12  ;;  %v13324_v36 = vsel %vm2849_vm0, %v13314_v11, %v13323_v25  ;;  %v21392_v55 = vld [vmem:[%s23817_s3 + $0x628] sm:$0xff]   ;;  %v21382_v11 = vld [vmem:[%s22243_s13 + $0x60] sm:$0xff]  }
 0x2a9   : > { %19666 = vmatprep.subr.bf16.mxu0 %v22967_v33  ;;  %v23079_v25 = vld [vmem:[%s23817_s3 + $0x640] sm:$0xff]  }
 0x2aa   : > { %18883 = vmatmul.mubr.bf16.gmra.mrb[32].mxu1 %v5295_v42  ;;  %v13825_v42 = vsel %vm3518_vm1, %v13823_v26, %v13824_v28  ;;  %v6300_v26 = vshrl.u32 %v21381_v5, 16  ;;  %v6304_v28 = vshll.u32 %v21383_v17, 16  ;;  %v21396_v5 = vld [vmem:[%s22243_s13 + $0x88] sm:$0xff]  }
 0x2ab   : > { %19595 = vmatmul.mubr.bf16.gmra.mrb[16].mxu0 %v13252_v41  ;;  %18902 = vmatprep.mubr.bf16.mxu1 %v21327_v30  ;;  %v21368_v30 = vld [vmem:[%s23817_s3 + $0x2b0] sm:$0xff]   ;;  %v21354_v41 = vld [vmem:[%s21719_s10 + $0x48] sm:$0xff]  }
 0x2ac   : > { %19598 = vmatprep.mubr.bf16.mxu0 %v13261_v50  ;;  %v23023_v50 = vld [vmem:[%s23817_s3 + $0x2c0] sm:$0xff]  }
 0x2b2   : > { %18903 = vmatmul.mubr.bf16.vlgmr.msra.gmra.mrb[0].mxu1 %v21329_v49  ;;  %v13829_v49 = vsel %vm3518_vm1, %v13826_v44, %v13828_v43  ;;  %v21393_v44 = vld [vmem:[%s21719_s10 + $0x28] sm:$0xff]  }
 0x2b3   : > { %19599 = vmatmul.mubr.bf16.gmra.mrb[20].mxu0 %v13270_v58  ;;  %18939 = vmatpush3.bf16.msra.mxu1 %v22902_v6  ;;  %v13288_v6 = vsel %vm2849_vm0, %v13278_v51, %v13287_v1  ;;  %v13830_v51 = vrot.slane %v21360_v46, 2  ;;  %v21380_v1 = vld [vmem:[%s21719_s10] sm:$0xff]  }
 0x2b4   : > { %18906 = vmatprep.mubr.bf16.mxu1 %v21333_v52  ;;  %19602 = vmatprep.mubr.bf16.mxu0 %v13279_v62  ;;  %v13832_v52 = vrot.slane %v21364_v47, 2  ;;  %v21369_v62 = vld [vmem:[%s21719_s10 + $0x70] sm:$0xff]   ;;  %v6291_v38 = vshll.u32 %v21380_v1, 16 }
 0x2b5   : > { %18940 = vmatprep.subr.bf16.mxu1 %v21337_v57  ;;  %v13831_v56 = vsel %vm3518_vm1, %v13828_v43, %v13830_v51 }
 0x2b6   : > { %v13833_v58 = vsel %vm3518_vm1, %v13830_v51, %v13832_v52  ;;  %v6293_v12 = vrot.slane %v6291_v38, 1 }
 0x2b7   : > { %18941 = vmatpush3.bf16.msra.mxu1 %v21337_v57  ;;  %v21366_v57 = vld [vmem:[%s22243_s13 + $0x38] sm:$0xff]  }
 0x2b8   : > { %18942 = vmatprep.subr.bf16.mxu1 %v21343_v2  ;;  %v13834_v60 = vrot.slane %v21366_v57, 2  ;;  %v21394_v57 = vld [vmem:[%s22243_s13 + $0x80] sm:$0xff]  }
 0x2ba   : > { %18907 = vmatmul.mubr.bf16.gmra.mrb[4].mxu1 %v21335_v0  ;;  %v21372_v0 = vld [vmem:[%s22243_s13 + $0x48] sm:$0xff]   ;;  %v13835_v3 = vsel %vm3518_vm1, %v13832_v52, %v13834_v60  ;;  %v21390_v52 = vld [vmem:[%s22243_s13 + $0x78] sm:$0xff]  }
 0x2bb   : > { %19603 = vmatmul.mubr.bf16.gmra.mrb[24].mxu0 %v13288_v6  ;;  %18910 = vmatprep.mubr.bf16.mxu1 %v21339_v4  ;;  %v13837_v4 = vsel %vm3518_vm1, %v13834_v60, %v13836_v63  ;;  %v13838_v29 = vrot.slane %v21372_v0, 2  ;;  %v21374_v6 = vld [vmem:[%s21719_s10 + $0x80] sm:$0xff]  }
 0x2bc   : > { %19606 = vmatprep.mubr.bf16.mxu0 %v13297_v9  ;;  %18943 = vmatpush3.bf16.msra.mxu1 %v21343_v2  ;;  %v21376_v2 = vld [vmem:[%s22243_s13 + $0x50] sm:$0xff]   ;;  %v21378_v9 = vld [vmem:[%s22243_s13 + $0x58] sm:$0xff]  }
 0x2bd   : > { %18944 = vmatprep.subr.bf16.mxu1 %v21349_v8  ;;  %v13840_v7 = vrot.slane %v21376_v2, 2  ;;  %v21397_v2 = vld [vmem:[%s23817_s3 + $0x2d0] sm:$0xff]  }
 0x2c0   : > { %18945 = vmatpush3.bf16.msra.mxu1 %v21349_v8  ;;  %v21398_v8 = vld [vmem:[%s23817_s3 + $0x630] sm:$0xff]  }
 0x2c1   : > { %18946 = vmatprep.subr.bf16.mxu1 %v21356_v14 }
 0x2c2   : > { %18911 = vmatmul.mubr.bf16.gmra.mrb[8].mxu1 %v21341_v10  ;;  %v6289_v10 = vshrl.u32 %v21380_v1, 16 }
 0x2c3   : > { %19607 = vmatmul.mubr.bf16.gmra.mrb[28].mxu0 %v13306_v24  ;;  %18914 = vmatprep.mubr.bf16.mxu1 %v21345_v15  ;;  %v13841_v15 = vsel %vm3518_vm1, %v13838_v29, %v13840_v7  ;;  %v13842_v24 = vrot.slane %v21378_v9, 2 }
 0x2c4   : > { %19610 = vmatprep.mubr.bf16.mxu0 %v13315_v21  ;;  %18947 = vmatpush3.bf16.msra.mxu1 %v21356_v14  ;;  %v13839_v14 = vsel %vm3518_vm1, %v13836_v63, %v13838_v29  ;;  %v6294_v19 = vor.u32 %v6293_v12, %v6289_v10  ;;  %v13844_v21 = vrot.slane %v21382_v11, 2  ;;  %v21400_v29 = vld [vmem:[%s22243_s13 + $0x90] sm:$0xff]   ;;  %v21403_v10 = vld [vmem:[%s23817_s3 + $0x2d8] sm:$0xff]  }
 0x2c5   : > { %18948 = vmatprep.subr.bf16.mxu1 %v21362_v20  ;;  %v13843_v35 = vsel %vm3518_vm1, %v13840_v7, %v13842_v24 }
 0x2c8   : > { %18949 = vmatpush3.bf16.msra.mxu1 %v21362_v20  ;;  %v6298_v20 = vrot.slane %v6296_v13, 1  ;;  %v21405_v13 = vld [vmem:[%s21719_s10 + $0x48] sm:$0xff]  }
 0x2c9   : > { %18950 = vmatprep.subr.bf16.mxu1 %v21368_v30 }
 0x2ca   : > { %18915 = vmatmul.mubr.bf16.gmra.mrb[12].mxu1 %v21347_v22  ;;  %v21387_v22 = vld [vmem:[%s21719_s10 + $0x18] sm:$0xff]   ;;  %v6302_v43 = vor.u32 %v6300_v26, %v6298_v20 }
 0x2cb   : > { %19611 = vmatmul.mubr.bf16.gmra.mrb[32].mxu0 %v13324_v36  ;;  %18918 = vmatprep.mubr.bf16.mxu1 %v21351_v32  ;;  %v6308_v32 = vshrl.u32 %v21383_v17, 16  ;;  %v6299_v36 = vsel %vm1131_vm2, %v6294_v19, %v6298_v20  ;;  %v13856_v17 = vrot.slane %v21400_v29, 2  ;;  %v21402_v20 = vld [vmem:[%s22243_s13 + $0x98] ss:$0 sps:$4 sm:$0x33]  }
 0x2cc   : > { %19630 = vmatprep.mubr.bf16.mxu0 %v13825_v42  ;;  %18951 = vmatpush3.bf16.msra.mxu1 %v21368_v30  ;;  %v21385_v30 = vld [vmem:[%s22243_s13 + $0x68] sm:$0xff]   ;;  %v6312_v42 = vshll.u32 %v21387_v22, 16  ;;  %v21418_v29 = vld [vmem:[%s22243_s13 + $0x38] sm:$0xff]  }
 0x2cd   : > { %18952 = vmatprep.subr.bf16.mxu1 %v21375_v37  ;;  %v13846_v46 = vrot.slane %v21385_v30, 2  ;;  %v21407_v30 = vld [vmem:[%s22243_s13 + $0x18] sm:$0xff]  }
 0x2d0   : > { %18953 = vmatpush3.bf16.msra.mxu1 %v21375_v37  ;;  %v13845_v37 = vsel %vm3518_vm1, %v13842_v24, %v13844_v21 }
 0x2d1   : > { %18990 = vmatprep.subr.bf16.mxu1 %v23023_v50 }
 0x2d2   : > { %18919 = vmatmul.mubr.bf16.gmra.mrb[16].mxu1 %v21354_v41  ;;  %v21389_v41 = vld [vmem:[%s21719_s10 + $0x20] sm:$0xff]  }
 0x2d3   : > { %19631 = vmatmul.mubr.bf16.vlgmr.msra.gmra.mrb[0].mxu0 %v13827_v48  ;;  %18922 = vmatprep.mubr.bf16.mxu1 %v21357_v45  ;;  %v6306_v45 = vrot.slane %v6304_v28, 1  ;;  %v6314_v48 = vrot.slane %v6312_v42, 1  ;;  %v6320_v51 = vshll.u32 %v21389_v41, 16  ;;  %v21406_v28 = vld [vmem:[%s22243_s13 + $0x10] sm:$0xfc]  }
 0x2d4   : > { %19634 = vmatprep.mubr.bf16.mxu0 %v13829_v49  ;;  %19667 = vmatpush3.bf16.msra.mxu0 %v22967_v33  ;;  %v21379_v33 = vld [vmem:[%s23817_s3 + $0x618] sm:$0xff]   ;;  %v6316_v49 = vshrl.u32 %v21387_v22, 16  ;;  %v6360_v22 = vshll.u32 %v21405_v13, 16 }
 0x2d5   : > { %19668 = vmatprep.subr.bf16.mxu0 %v21367_v61  ;;  %v6310_v47 = vor.u32 %v6308_v32, %v6306_v45  ;;  %v6322_v60 = vrot.slane %v6320_v51, 1 }
 0x2d6   : > { %v6318_v63 = vor.u32 %v6316_v49, %v6314_v48  ;;  %v21422_v49 = vld [vmem:[%s23817_s3 + $0x2f0] sm:$0xff]  }
 0x2d7   : > { %v6315_v59 = vsel %vm1131_vm2, %v6310_v47, %v6314_v48  ;;  %v14358_v47 = vrot.slane %v21406_v28, 2  ;;  %v14359_v48 = vrot.slane %v21407_v30, 2 }
 0x2d8   : > { %19669 = vmatpush3.bf16.msra.mxu0 %v21367_v61  ;;  %v13848_v61 = vrot.slane %v21388_v34, 2 }
 0x2d9   : > { %19670 = vmatprep.subr.bf16.mxu0 %v21373_v53 }
 0x2da   : > { %18923 = vmatmul.mubr.bf16.gmra.mrb[20].mxu1 %v21359_v54  ;;  %v6328_v54 = vshll.u32 %v21393_v44, 16 }
 0x2db   : > { %19635 = vmatmul.mubr.bf16.gmra.mrb[4].mxu0 %v13831_v56  ;;  %18926 = vmatprep.mubr.bf16.mxu1 %v21363_v23  ;;  %v6307_v23 = vsel %vm1131_vm2, %v6302_v43, %v6306_v45  ;;  %v21391_v56 = vld [vmem:[%s23817_s3 + $0x2c8] sm:$0xff]   ;;  %v13858_v43 = vrot.slane %v21402_v20, 2 }
 0x2dc   : > { %19638 = vmatprep.mubr.bf16.mxu0 %v13833_v58  ;;  %19671 = vmatpush3.bf16.msra.mxu0 %v21373_v53  ;;  %v6324_v53 = vshrl.u32 %v21389_v41, 16  ;;  %v13847_v58 = vsel %vm3518_vm1, %v13844_v21, %v13846_v46  ;;  %v6330_v1 = vrot.slane %v6328_v54, 1  ;;  %v21411_v41 = vld [vmem:[%s21719_s10 + $0x58] sm:$0xff]  }
 0x2dd   : > { %19672 = vmatprep.subr.bf16.mxu0 %v21379_v33  ;;  %v6376_v54 = vshll.u32 %v21411_v41, 16 }
 0x2de   : > { %v6326_v0 = vor.u32 %v6324_v53, %v6322_v60 }
 0x2e0   : > { %19673 = vmatpush3.bf16.msra.mxu0 %v21379_v33  ;;  %v13849_v33 = vsel %vm3518_vm1, %v13846_v46, %v13848_v61  ;;  %v6331_v7 = vsel %vm1131_vm2, %v6326_v0, %v6330_v1  ;;  %v6362_v46 = vrot.slane %v6360_v22, 1 }
 0x2e1   : > { %19674 = vmatprep.subr.bf16.mxu0 %v21386_v40 }
 0x2e2   : > { %18927 = vmatmul.mubr.bf16.gmra.mrb[24].mxu1 %v21365_v39  ;;  %v21395_v39 = vld [vmem:[%s21719_s10 + $0x30] sm:$0xff]  }
 0x2e3   : > { %19639 = vmatmul.mubr.bf16.gmra.mrb[8].mxu0 %v13835_v3  ;;  %18930 = vmatprep.mubr.bf16.mxu1 %v21369_v62  ;;  %v21399_v62 = vld [vmem:[%s21719_s10 + $0x38] sm:$0xff]   ;;  %v13852_v3 = vrot.slane %v21394_v57, 2  ;;  %v6340_v38 = vshrl.u32 %v21395_v39, 16  ;;  %v13859_v57 = vsel %vm3518_vm1, %v13856_v17, %v13858_v43  ;;  %v21428_v43 = vld [vmem:[%s21719_s10 + $0x88] sm:$0xff]  }
 0x2e4   : > { %19642 = vmatprep.mubr.bf16.mxu0 %v13837_v4  ;;  %19675 = vmatpush3.bf16.msra.mxu0 %v21386_v40  ;;  %v13850_v40 = vrot.slane %v21390_v52, 2  ;;  %v6332_v4 = vshrl.u32 %v21393_v44, 16  ;;  %v6348_v24 = vshrl.u32 %v21399_v62, 16  ;;  %v21409_v52 = vld [vmem:[%s22243_s13 + $0x20] sm:$0xff]  }
 0x2e5   : > { %19676 = vmatprep.subr.bf16.mxu0 %v21392_v55 }
 0x2e6   : > { %v13853_v9 = vsel %vm3518_vm1, %v13850_v40, %v13852_v3  ;;  %v6334_v11 = vor.u32 %v6332_v4, %v6330_v1  ;;  %v6378_v1 = vrot.slane %v6376_v54, 1  ;;  %v23147_v4 = vld [vmem:[%s23817_s3 + $0x300] sm:$0xff]   ;;  %v6424_v54 = vshll.u32 %v21428_v43, 16 }
 0x2e8   : > { %19677 = vmatpush3.bf16.msra.mxu0 %v21392_v55  ;;  %v6336_v55 = vshll.u32 %v21395_v39, 16  ;;  %v21429_v39 = vld [vmem:[%s23817_s3 + $0x2f8] sm:$0xff]  }
 0x2e9   : > { %19678 = vmatprep.subr.bf16.mxu0 %v21398_v8 }
 0x2ea   : > { %18931 = vmatmul.mubr.bf16.gmra.mrb[28].mxu1 %v21371_v18  ;;  %v6323_v18 = vsel %vm1131_vm2, %v6318_v63, %v6322_v60  ;;  %v6338_v12 = vrot.slane %v6336_v55, 1 }
 0x2eb   : > { %19643 = vmatmul.mubr.bf16.gmra.mrb[12].mxu0 %v13839_v14  ;;  %18934 = vmatprep.mubr.bf16.mxu1 %v21374_v6  ;;  %v13851_v6 = vsel %vm3518_vm1, %v13848_v61, %v13850_v40  ;;  %v13854_v14 = vrot.slane %v21396_v5, 2  ;;  %v6364_v61 = vshrl.u32 %v21405_v13, 16  ;;  %v14361_v40 = vrot.slane %v21409_v52, 2  ;;  %v21414_v5 = vld [vmem:[%s22243_s13 + $0x30] sm:$0xff]  }
 0x2ec   : > { %19646 = vmatprep.mubr.bf16.mxu0 %v13841_v15  ;;  %19679 = vmatpush3.bf16.msra.mxu0 %v21398_v8  ;;  %v21401_v8 = vld [vmem:[%s21719_s10 + $0x40] sm:$0xff]   ;;  %v6342_v15 = vor.u32 %v6340_v38, %v6338_v12  ;;  %v6339_v26 = vsel %vm1131_vm2, %v6334_v11, %v6338_v12  ;;  %v21419_v12 = vld [vmem:[%s21719_s10 + $0x70] sm:$0xff]   ;;  %v14365_v11 = vrot.slane %v21414_v5, 2 }
 0x2ed   : > { %19680 = vmatprep.subr.bf16.mxu0 %v21404_v16  ;;  %v6352_v19 = vshll.u32 %v21401_v8, 16  ;;  %v6356_v21 = vshrl.u32 %v21401_v8, 16  ;;  %v13855_v32 = vsel %vm3518_vm1, %v13852_v3, %v13854_v14  ;;  %v6366_v63 = vor.u32 %v6364_v61, %v6362_v46  ;;  %v21426_v52 = vld [vmem:[%s22243_s13 + $0x50] sm:$0xff]   ;;  %v21432_v5 = vld [vmem:[%s22243_s13 + $0x60] sm:$0xff]  }
 0x2ee   : > { %v6380_v3 = vshrl.u32 %v21411_v41, 16 }
 0x2ef   : > { %v6354_v42 = vrot.slane %v6352_v19, 1 }
 0x2f0   : > { %19681 = vmatpush3.bf16.msra.mxu0 %v21404_v16  ;;  %v6382_v13 = vor.u32 %v6380_v3, %v6378_v1 }
 0x2f1   : > { %19718 = vmatprep.subr.bf16.mxu0 %v23079_v25  ;;  %v6358_v45 = vor.u32 %v6356_v21, %v6354_v42 }
 0x2f2   : > { %18935 = vmatmul.mubr.bf16.gmra.mrb[32].mxu1 %v21377_v27  ;;  %v21410_v27 = vld [vmem:[%s23817_s3 + $0x2e0] sm:$0xff]  }
 0x2f3   : > { %19647 = vmatmul.mubr.bf16.gmra.mrb[16].mxu0 %v13843_v35  ;;  %18954 = vmatprep.mubr.bf16.mxu1 %v6299_v36  ;;  %v21408_v35 = vld [vmem:[%s21719_s10 + $0x50] sm:$0xff]   ;;  %v13857_v36 = vsel %vm3518_vm1, %v13854_v14, %v13856_v17  ;;  %v14367_v17 = vrot.slane %v21418_v29, 2  ;;  %v21436_v29 = vld [vmem:[%s22243_s13 + $0x68] sm:$0xff]  }
 0x2f4   : > { %19650 = vmatprep.mubr.bf16.mxu0 %v13845_v37  ;;  %v21416_v37 = vld [vmem:[%s23817_s3 + $0x2e8] sm:$0xff]   ;;  %v6368_v51 = vshll.u32 %v21408_v35, 16  ;;  %v6372_v53 = vshrl.u32 %v21408_v35, 16 }
 0x2f5   : > { %v14368_v30 = vsel %vm3518_vm1, %v14365_v11, %v14367_v17 }
 0x2f6   : > { %v6370_v60 = vrot.slane %v6368_v51, 1 }
 0x2f8   : > { %v6374_v0 = vor.u32 %v6372_v53, %v6370_v60 }
 0x2fa   : > { %18955 = vmatmul.mubr.bf16.vlgmr.msra.gmra.mrb[0].mxu1 %v6307_v23 }
 0x2fb   : > { %19651 = vmatmul.mubr.bf16.gmra.mrb[20].mxu0 %v13847_v58  ;;  %18991 = vmatpush3.bf16.msra.mxu1 %v23023_v50  ;;  %v6344_v50 = vshll.u32 %v21399_v62, 16  ;;  %v6363_v58 = vsel %vm1131_vm2, %v6358_v45, %v6362_v46  ;;  %v21417_v62 = vld [vmem:[%s21719_s10 + $0x68] sm:$0xff]   ;;  %v21440_v46 = vld [vmem:[%s23817_s3 + $0x660] sm:$0xff]  }
 0x2fc   : > { %18958 = vmatprep.mubr.bf16.mxu1 %v6315_v59  ;;  %19654 = vmatprep.mubr.bf16.mxu0 %v13849_v33  ;;  %v21413_v59 = vld [vmem:[%s21719_s10 + $0x60] sm:$0xff]   ;;  %v14360_v33 = vsel %vm3518_vm1, %v14358_v47, %v14359_v48  ;;  %v6396_v20 = vshrl.u32 %v21417_v62, 16 }
 0x2fd   : > { %18992 = vmatprep.subr.bf16.mxu1 %v21391_v56  ;;  %v6346_v16 = vrot.slane %v6344_v50, 1  ;;  %v6384_v55 = vshll.u32 %v21413_v59, 16  ;;  %v6388_v38 = vshrl.u32 %v21413_v59, 16  ;;  %v6392_v50 = vshll.u32 %v21417_v62, 16 }
 0x2fe   : > { %v6426_v62 = vrot.slane %v6424_v54, 1 }
 0x2ff   : > { %18993 = vmatpush3.bf16.msra.mxu1 %v21391_v56  ;;  %v6347_v34 = vsel %vm1131_vm2, %v6342_v15, %v6346_v16  ;;  %v6350_v44 = vor.u32 %v6348_v24, %v6346_v16  ;;  %v21412_v56 = vld [vmem:[%s22243_s13 + $0x28] sm:$0xff]   ;;  %v6394_v15 = vrot.slane %v6392_v50, 1  ;;  %v21423_v16 = vld [vmem:[%s21719_s10 + $0x78] sm:$0xff]   ;;  %v6400_v24 = vshll.u32 %v21419_v12, 16 }
 0x300   : > { %18994 = vmatprep.subr.bf16.mxu1 %v21397_v2  ;;  %v6408_v28 = vshll.u32 %v21423_v16, 16  ;;  %v6412_v61 = vshrl.u32 %v21423_v16, 16  ;;  %v21435_v50 = vld [vmem:[%s21719_s10 + $0x8] sm:$0xff]  }
 0x301   : > { %v6355_v23 = vsel %vm1131_vm2, %v6350_v44, %v6354_v42  ;;  %v6402_v35 = vrot.slane %v6400_v24, 1 }
 0x302   : > { %18959 = vmatmul.mubr.bf16.gmra.mrb[4].mxu1 %v6323_v18  ;;  %v6371_v18 = vsel %vm1131_vm2, %v6366_v63, %v6370_v60  ;;  %v6410_v44 = vrot.slane %v6408_v28, 1 }
 0x303   : > { %19655 = vmatmul.mubr.bf16.gmra.mrb[24].mxu0 %v13851_v6  ;;  %18962 = vmatprep.mubr.bf16.mxu1 %v6331_v7  ;;  %v14362_v6 = vsel %vm3518_vm1, %v14359_v48, %v14361_v40  ;;  %v6379_v7 = vsel %vm1131_vm2, %v6374_v0, %v6378_v1  ;;  %v6428_v1 = vshrl.u32 %v21428_v43, 16  ;;  %v15992_v43 = vld [vmem:[%s23819_s5] sm:$0xff] }
 0x304   : > { %19658 = vmatprep.mubr.bf16.mxu0 %v13853_v9  ;;  %18995 = vmatpush3.bf16.msra.mxu1 %v21397_v2  ;;  %v14363_v2 = vrot.slane %v21412_v56, 2  ;;  %v21421_v9 = vld [vmem:[%s23817_s3 + $0x648] sm:$0xff]   ;;  %v21430_v56 = vld [vmem:[%s22243_s13 + $0x58] sm:$0xff]   ;;  %v6414_v59 = vor.u32 %v6412_v61, %v6410_v44  ;;  %v21596_v61 = vmov 0  }
 0x305   : > { %18996 = vmatprep.subr.bf16.mxu1 %v21403_v10  ;;  %v14375_v63 = vrot.slane %v21430_v56, 2  ;;  %20820 = vset.pattern.permute.xlu0 %v21596_v61  ;;  %v23247_v56 = vld [vmem:[%s21719_s10 + $0x38] sm:$0xff]  }
 0x306   : > { %v14364_v8 = vsel %vm3518_vm1, %v14361_v40, %v14363_v2  ;;  %v14366_v21 = vsel %vm3518_vm1, %v14363_v2, %v14365_v11  ;;  %v21452_v40 = vld [vmem:[%s23817_s3 + $0x670] sm:$0xff]   ;;  %v23206_v11 = vld [vmem:[%s23817_s3 + $0x680] sm:$0xff]   ;;  %16030 = vperm.xlu0 %20820, %v15992_v43   ;;  %20821 = vset.pattern.permute.xlu1 %v21596_v61 }
 0x308   : > { %18997 = vmatpush3.bf16.msra.mxu1 %v21403_v10  ;;  %v6386_v10 = vrot.slane %v6384_v55, 1 }
 0x309   : > { %18998 = vmatprep.subr.bf16.mxu1 %v21410_v27 }
 0x30a   : > { %18963 = vmatmul.mubr.bf16.gmra.mrb[8].mxu1 %v6339_v26  ;;  %v6390_v14 = vor.u32 %v6388_v38, %v6386_v10  ;;  %v6387_v19 = vsel %vm1131_vm2, %v6382_v13, %v6386_v10  ;;  %v6404_v26 = vshrl.u32 %v21419_v12, 16  ;;  %v21434_v38 = vld [vmem:[%s21719_s10] sm:$0xfe]   ;;  %v6935_v12 = vrot.slane %v21435_v50, 1  ;;  %v15997_v50 = vld [vmem:[%s23819_s5 + $0x28] sm:$0xff] }
 0x30b   : > { %19659 = vmatmul.mubr.bf16.gmra.mrb[28].mxu0 %v13855_v32  ;;  %18966 = vmatprep.mubr.bf16.mxu1 %v6347_v34  ;;  %v21424_v32 = vld [vmem:[%s22243_s13 + $0x48] sm:$0xff]   ;;  %v21433_v34 = vld [vmem:[%s23817_s3 + $0x658] sm:$0xff]   ;;  %v6934_v10 = vrot.slane %v21434_v38, 1  ;;  %v14379_v13 = vrot.slane %v21436_v29, 2  ;;  %v21464_v38 = vld [vmem:[%s23817_s3 + $0x320] sm:$0xff]  }
 0x30c   : > { %19662 = vmatprep.mubr.bf16.mxu0 %v13857_v36  ;;  %18999 = vmatpush3.bf16.msra.mxu1 %v21410_v27  ;;  %v21427_v27 = vld [vmem:[%s23817_s3 + $0x650] sm:$0xff]   ;;  %v6395_v22 = vsel %vm1131_vm2, %v6390_v14, %v6394_v15  ;;  %v21425_v36 = vld [vmem:[%s21719_s10 + $0x80] sm:$0xff]   ;;  %v6406_v41 = vor.u32 %v6404_v26, %v6402_v35  ;;  %v14371_v45 = vrot.slane %v21424_v32, 2 }
 0x30d   : > { %19000 = vmatprep.subr.bf16.mxu1 %v21416_v37  ;;  %v6416_v47 = vshll.u32 %v21425_v36, 16  ;;  %v6420_v53 = vshrl.u32 %v21425_v36, 16  ;;  %v21455_v29 = vld [vmem:[%s21719_s10 + $0x40] sm:$0xff]  }
 0x30e   : > { %v6411_v51 = vsel %vm1131_vm2, %v6406_v41, %v6410_v44  ;;  %v21448_v41 = vld [vmem:[%s22243_s13 + $0x88] sm:$0xff]  }
 0x310   : > { %19001 = vmatpush3.bf16.msra.mxu1 %v21416_v37  ;;  %v6398_v37 = vor.u32 %v6396_v20, %v6394_v15  ;;  %v21437_v15 = vld [vmem:[%s21719_s10 + $0x10] sm:$0xff]   ;;  %v21442_v20 = vld [vmem:[%s22243_s13 + $0x78] sm:$0xff]  }
 0x311   : > { %19002 = vmatprep.subr.bf16.mxu1 %v21422_v49  ;;  %v14383_v26 = vrot.slane %v21442_v20, 2  ;;  %v15999_v20 = vld [vmem:[%s23819_s5 + $0x38] sm:$0xff] }
 0x312   : > { %18967 = vmatmul.mubr.bf16.gmra.mrb[12].mxu1 %v6355_v23  ;;  %v6403_v48 = vsel %vm1131_vm2, %v6398_v37, %v6402_v35  ;;  %v21447_v35 = vld [vmem:[%s21719_s10 + $0x28] sm:$0xff]  }
 0x313   : > { %19663 = vmatmul.mubr.bf16.gmra.mrb[32].mxu0 %v13859_v57  ;;  %18970 = vmatprep.mubr.bf16.mxu1 %v6363_v58  ;;  %v21446_v57 = vld [vmem:[%s23817_s3 + $0x668] sm:$0xff]   ;;  %v6418_v58 = vrot.slane %v6416_v47, 1  ;;  %v21451_v47 = vld [vmem:[%s23817_s3 + $0x310] sm:$0xff]  }
 0x314   : > { %19682 = vmatprep.mubr.bf16.mxu0 %v14360_v33  ;;  %19003 = vmatpush3.bf16.msra.mxu1 %v21422_v49  ;;  %v21431_v33 = vld [vmem:[%s21719_s10 + $0x90] ss:$0 sps:$4 sm:$0x11]  }
 0x315   : > { %19004 = vmatprep.subr.bf16.mxu1 %v21429_v39  ;;  %v6422_v60 = vor.u32 %v6420_v53, %v6418_v58  ;;  %v6419_v0 = vsel %vm1131_vm2, %v6414_v59, %v6418_v58  ;;  %v6432_v2 = vshll.u32 %v21431_v33, 16  ;;  %v21457_v59 = vld [vmem:[%s23817_s3 + $0x318] sm:$0xff]   ;;  %v21460_v33 = vld [vmem:[%s22243_s13 + $0x10] sm:$0xfc]  }
 0x317   : > { %v6427_v55 = vsel %vm1131_vm2, %v6422_v60, %v6426_v62 }
 0x318   : > { %19005 = vmatpush3.bf16.msra.mxu1 %v21429_v39  ;;  %v14373_v39 = vrot.slane %v21426_v52, 2  ;;  %v15993_v52 = vld [vmem:[%s23819_s5 + $0x8] sm:$0xff] }
 0x319   : > { %19042 = vmatprep.subr.bf16.mxu1 %v23147_v4  ;;  %16035 = vperm.xlu0 %20820, %v15993_v52   ;;  %v21472_v52 = vld [vmem:[%s22243_s13 + $0x38] sm:$0xff]  }
 0x31a   : > { %18971 = vmatmul.mubr.bf16.gmra.mrb[16].mxu1 %v6371_v18  ;;  %v14374_v3 = vsel %vm3518_vm1, %v14371_v45, %v14373_v39  ;;  %v14376_v18 = vsel %vm3518_vm1, %v14373_v39, %v14375_v63  ;;  %v21461_v39 = vld [vmem:[%s22243_s13 + $0x18] sm:$0xff]  }
 0x31b   : > { %19683 = vmatmul.mubr.bf16.vlgmr.msra.gmra.mrb[0].mxu0 %v14362_v6  ;;  %18974 = vmatprep.mubr.bf16.mxu1 %v6379_v7  ;;  %v21458_v6 = vld [vmem:[%s23817_s3 + $0x678] sm:$0xff]   ;;  %v6430_v7 = vor.u32 %v6428_v1, %v6426_v62 }
 0x31c   : > { %19686 = vmatprep.mubr.bf16.mxu0 %v14364_v8  ;;  %19719 = vmatpush3.bf16.msra.mxu0 %v23079_v25  ;;  %v21420_v25 = vld [vmem:[%s22243_s13 + $0x40] sm:$0xff]   ;;  %v6434_v8 = vrot.slane %v6432_v2, 1  ;;  %v15995_v62 = vld [vmem:[%s23819_s5 + $0x18] sm:$0xff]  ;;  %v14894_v2 = vshrl.u32 %v21460_v33, 16 }
 0x31d   : > { %19720 = vmatprep.subr.bf16.mxu0 %v21421_v9  ;;  %v14369_v42 = vrot.slane %v21420_v25, 2 }
 0x31e   : > { %v6435_v14 = vsel %vm1131_vm2, %v6430_v7, %v6434_v8 }
 0x31f   : > { %v14370_v49 = vsel %vm3518_vm1, %v14367_v17, %v14369_v42  ;;  %v14372_v23 = vsel %vm3518_vm1, %v14369_v42, %v14371_v45  ;;  %v6936_v17 = vsel %vm1778_vm3, %v6934_v10, %v6935_v12  ;;  %v21445_v42 = vld [vmem:[%s23817_s3 + $0x308] sm:$0xff]   ;;  %v21456_v10 = vld [vmem:[%s22243_s13 + $0xa0] ss:$0 sps:$4 sm:$0x33]  }
 0x320   : > { %19721 = vmatpush3.bf16.msra.mxu0 %v21421_v9  ;;  %v14377_v9 = vrot.slane %v21432_v5, 2  ;;  %v14905_v5 = vshll.u32 %v21461_v39, 16 }
 0x321   : > { %19722 = vmatprep.subr.bf16.mxu0 %v21427_v27 }
 0x322   : > { %18975 = vmatmul.mubr.bf16.gmra.mrb[20].mxu1 %v6387_v19  ;;  %v14378_v16 = vsel %vm3518_vm1, %v14375_v63, %v14377_v9  ;;  %v14380_v24 = vsel %vm3518_vm1, %v14377_v9, %v14379_v13  ;;  %v21441_v19 = vld [vmem:[%s21719_s10 + $0x18] sm:$0xff]   ;;  %v15996_v63 = vld [vmem:[%s23819_s5 + $0x20] sm:$0xff] }
 0x323   : > { %19687 = vmatmul.mubr.bf16.gmra.mrb[4].mxu0 %v14366_v21  ;;  %18978 = vmatprep.mubr.bf16.mxu1 %v6395_v22  ;;  %v6937_v21 = vrot.slane %v21437_v15, 1  ;;  %v6939_v25 = vrot.slane %v21441_v19, 1  ;;  %v6949_v19 = vrot.slane %v21455_v29, 1 }
 0x324   : > { %19690 = vmatprep.mubr.bf16.mxu0 %v14368_v30  ;;  %19723 = vmatpush3.bf16.msra.mxu0 %v21427_v27  ;;  %v21439_v27 = vld [vmem:[%s22243_s13 + $0x70] sm:$0xff]   ;;  %v21443_v30 = vld [vmem:[%s21719_s10 + $0x20] sm:$0xff]  }
 0x325   : > { %19724 = vmatprep.subr.bf16.mxu0 %v21433_v34  ;;  %v14381_v22 = vrot.slane %v21439_v27, 2  ;;  %v6938_v28 = vsel %vm1778_vm3, %v6935_v12, %v6937_v21  ;;  %v6940_v36 = vsel %vm1778_vm3, %v6937_v21, %v6939_v25  ;;  %v6941_v44 = vrot.slane %v21443_v30, 1  ;;  %16050 = vperm.xlu0 %20820, %v15996_v63   ;;  %v23282_v12 = vld [vmem:[%s21719_s10 + $0x48] sm:$0xff]   ;;  %v16000_v21 = vld [vmem:[%s23819_s5 + $0x40] sm:$0xff] }
 0x326   : > { %v21466_v27 = vld [vmem:[%s22243_s13 + $0x28] sm:$0xff]  }
 0x327   : > { %v14382_v32 = vsel %vm3518_vm1, %v14379_v13, %v14381_v22  ;;  %v14384_v37 = vsel %vm3518_vm1, %v14381_v22, %v14383_v26  ;;  %v21463_v13 = vld [vmem:[%s22243_s13 + $0x20] sm:$0xff]   ;;  %v14393_v22 = vrot.slane %v21456_v10, 2  ;;  %v16005_v63 = vld [vmem:[%s23819_s5 + $0x68] sm:$0xff] }
 0x328   : > { %19725 = vmatpush3.bf16.msra.mxu0 %v21433_v34  ;;  %v21444_v34 = vld [vmem:[%s22243_s13 + $0x80] sm:$0xff]  }
 0x329   : > { %19726 = vmatprep.subr.bf16.mxu0 %v21440_v46  ;;  %v14385_v45 = vrot.slane %v21444_v34, 2  ;;  %v14920_v34 = vshrl.u32 %v21466_v27, 16 }
 0x32a   : > { %18979 = vmatmul.mubr.bf16.gmra.mrb[24].mxu1 %v6403_v48  ;;  %v15994_v48 = vld [vmem:[%s23819_s5 + $0x10] sm:$0xff] }
 0x32b   : > { %19691 = vmatmul.mubr.bf16.gmra.mrb[8].mxu0 %v14370_v49  ;;  %18982 = vmatprep.mubr.bf16.mxu1 %v6411_v51  ;;  %v6942_v49 = vsel %vm1778_vm3, %v6939_v25, %v6941_v44  ;;  %v21449_v51 = vld [vmem:[%s21719_s10 + $0x30] sm:$0xff]   ;;  %v14386_v53 = vsel %vm3518_vm1, %v14383_v26, %v14385_v45  ;;  %v6951_v25 = vrot.slane %v23282_v12, 1  ;;  %v14911_v26 = vshrl.u32 %v21463_v13, 16  ;;  %v16007_v12 = vld [vmem:[%s23819_s5 + $0x78] sm:$0xff] }
 0x32c   : > { %19694 = vmatprep.mubr.bf16.mxu0 %v14372_v23  ;;  %19727 = vmatpush3.bf16.msra.mxu0 %v21440_v46  ;;  %v6943_v46 = vrot.slane %v21447_v35, 1  ;;  %v21450_v23 = vld [vmem:[%s22243_s13 + $0x90] sm:$0xff]   ;;  %v6945_v60 = vrot.slane %v21449_v51, 1  ;;  %v14923_v35 = vshll.u32 %v21466_v27, 16 }
 0x32d   : > { %19728 = vmatprep.subr.bf16.mxu0 %v21446_v57  ;;  %16040 = vperm.xlu1 %20821, %v15994_v48   ;;  %v23310_v48 = vld [vmem:[%s21719_s10 + $0x58] sm:$0xff]  }
 0x32e   : > { %v6944_v54 = vsel %vm1778_vm3, %v6941_v44, %v6943_v46  ;;  %v16002_v44 = vld [vmem:[%s23819_s5 + $0x50] sm:$0xff]  ;;  %v14925_v51 = vrot.slane %v14923_v35, 3 }
 0x32f   : > { %v21480_v35 = vld [vmem:[%s22243_s13 + $0x50] sm:$0xff]  }
 0x330   : > { %19729 = vmatpush3.bf16.msra.mxu0 %v21446_v57  ;;  %v23250_v57 = vld [vmem:[%s22243_s13 + $0x98] sm:$0xff]  }
 0x331   : > { %19730 = vmatprep.subr.bf16.mxu0 %v21452_v40  ;;  %v14391_v1 = vrot.slane %v23250_v57, 2  ;;  %16045 = vperm.xlu1 %20821, %v15995_v62   ;;  %v14941_v62 = vshll.u32 %v21472_v52, 16 }
 0x332   : > { %18983 = vmatmul.mubr.bf16.gmra.mrb[28].mxu1 %v6419_v0  ;;  %v6947_v0 = vrot.slane %v23247_v56, 1  ;;  %v16004_v56 = vld [vmem:[%s23819_s5 + $0x60] sm:$0xff] }
 0x333   : > { %19695 = vmatmul.mubr.bf16.gmra.mrb[12].mxu0 %v14374_v3  ;;  %18986 = vmatprep.mubr.bf16.mxu1 %v6427_v55  ;;  %v14897_v3 = vshll.u32 %v21460_v33, 16  ;;  %v14902_v55 = vshrl.u32 %v21461_v39, 16  ;;  %v14394_v43 = vsel %vm3518_vm1, %v14391_v1, %v14393_v22  ;;  %v21473_v22 = vld [vmem:[%s21719_s10 + $0x70] sm:$0xff]  }
 0x334   : > { %19698 = vmatprep.mubr.bf16.mxu0 %v14376_v18  ;;  %19731 = vmatpush3.bf16.msra.mxu0 %v21452_v40  ;;  %v14389_v40 = vrot.slane %v21450_v23, 2  ;;  %v6946_v18 = vsel %vm1778_vm3, %v6943_v46, %v6945_v60  ;;  %v6948_v8 = vsel %vm1778_vm3, %v6945_v60, %v6947_v0  ;;  %v14913_v46 = vrot.slane %v14911_v26, 2  ;;  %v16003_v23 = vld [vmem:[%s23819_s5 + $0x58] sm:$0xff] }
 0x335   : > { %19732 = vmatprep.subr.bf16.mxu0 %v21458_v6  ;;  %v14899_v15 = vrot.slane %v14897_v3, 3  ;;  %16055 = vperm.xlu1 %20821, %v15997_v50   ;;  %v14938_v60 = vshrl.u32 %v21472_v52, 16  ;;  %v21474_v50 = vld [vmem:[%s22243_s13 + $0x40] sm:$0xff]  }
 0x336   : > { %v14392_v9 = vsel %vm3518_vm1, %v14389_v40, %v14391_v1  ;;  %v16006_v1 = vld [vmem:[%s23819_s5 + $0x70] sm:$0xff] }
 0x337   : > { %v14940_v29 = vrot.slane %v14938_v60, 2 }
 0x338   : > { %19733 = vmatpush3.bf16.msra.mxu0 %v21458_v6  ;;  %v15998_v6 = vld [vmem:[%s23819_s5 + $0x30] sm:$0xff] }
 0x339   : > { %19770 = vmatprep.subr.bf16.mxu0 %v23206_v11  ;;  %16060 = vperm.xlu0 %20820, %v15998_v6   ;;  %v14943_v6 = vrot.slane %v14941_v62, 3  ;;  %v23402_v62 = vld [vmem:[%s21719_s10 + $0x88] sm:$0xff]  }
 0x33a   : > { %18987 = vmatmul.mubr.bf16.gmra.mrb[32].mxu1 %v6435_v14  ;;  %v14896_v14 = vrot.slane %v14894_v2, 2  ;;  %16065 = vperm.xlu1 %20821, %v15999_v20   ;;  %v21481_v20 = vld [vmem:[%s23817_s3 + $0x690] sm:$0xff]  }
 0x33b   : > { %19699 = vmatmul.mubr.bf16.gmra.mrb[16].mxu0 %v14378_v16  ;;  %19006 = vmatprep.mubr.bf16.mxu1 %v6936_v17  ;;  %v14904_v16 = vrot.slane %v14902_v55, 2  ;;  %v14907_v17 = vrot.slane %v14905_v5, 3  ;;  %v14944_v27 = vor.u32 %v14943_v6, %v14940_v29  ;;  %v6967_v29 = vrot.slane %v23402_v62, 1 }
 0x33c   : > { %19702 = vmatprep.mubr.bf16.mxu0 %v14380_v24  ;;  %v21470_v24 = vld [vmem:[%s23817_s3 + $0x328] sm:$0xff]   ;;  %v14900_v30 = vor.u32 %v14899_v15, %v14896_v14 }
 0x33d   : > { %16070 = vperm.xlu0 %20820, %v16000_v21  }
 0x341   : > { %16080 = vperm.xlu0 %20820, %v16002_v44   ;;  %v21487_v44 = vld [vmem:[%s23817_s3 + $0x698] sm:$0xff]  }
 0x342   : > { %19007 = vmatmul.mubr.bf16.vlgmr.msra.gmra.mrb[0].mxu1 %v6938_v28  ;;  %v14914_v28 = vshll.u32 %v21463_v13, 16  ;;  %v16008_v13 = vld [vmem:[%s23819_s5 + $0x80] sm:$0xff] }
 0x343   : > { %19703 = vmatmul.mubr.bf16.gmra.mrb[20].mxu0 %v14382_v32  ;;  %19043 = vmatpush3.bf16.msra.mxu1 %v23147_v4  ;;  %v14387_v4 = vrot.slane %v21448_v41, 2  ;;  %v14908_v32 = vor.u32 %v14907_v17, %v14904_v16  ;;  %v21462_v41 = vld [vmem:[%s21719_s10 + $0x50] sm:$0xff]   ;;  %v14947_v16 = vshrl.u32 %v21474_v50, 16  ;;  %v14950_v17 = vshll.u32 %v21474_v50, 16  ;;  %v16016_v50 = vld [vmem:[%s23819_s5 + $0xc0] sm:$0xff] }
 0x344   : > { %19010 = vmatprep.mubr.bf16.mxu1 %v6940_v36  ;;  %19706 = vmatprep.mubr.bf16.mxu0 %v14384_v37  ;;  %v21476_v36 = vld [vmem:[%s23817_s3 + $0x330] sm:$0xff]   ;;  %v16001_v37 = vld [vmem:[%s23819_s5 + $0x48] sm:$0xff] }
 0x345   : > { %19044 = vmatprep.subr.bf16.mxu1 %v21445_v42  ;;  %v14388_v58 = vsel %vm3518_vm1, %v14385_v45, %v14387_v4  ;;  %v14390_v7 = vsel %vm3518_vm1, %v14387_v4, %v14389_v40  ;;  %v6952_v45 = vsel %vm1778_vm3, %v6949_v19, %v6951_v25  ;;  %v21468_v4 = vld [vmem:[%s22243_s13 + $0x30] sm:$0xff]   ;;  %v14909_v61 = vsel %vm4589_vm4, %v14900_v30, %v14908_v32 }
 0x346   : > { %16075 = vperm.xlu1 %20821, %v16001_v37   ;;  %v14932_v33 = vshll.u32 %v21468_v4, 16  ;;  %16090 = vperm.xlu0 %20820, %v16004_v56   ;;  %v14949_v30 = vrot.slane %v14947_v16, 2  ;;  %v21479_v56 = vld [vmem:[%s21719_s10 + $0x80] sm:$0xff]  }
 0x347   : > { %19045 = vmatpush3.bf16.msra.mxu1 %v21445_v42  ;;  %v6950_v42 = vsel %vm1778_vm3, %v6947_v0, %v6949_v19  ;;  %v21467_v0 = vld [vmem:[%s21719_s10 + $0x60] sm:$0xff]  }
 0x348   : > { %19046 = vmatprep.subr.bf16.mxu1 %v21451_v47  ;;  %v14934_v5 = vrot.slane %v14932_v33, 3  ;;  %v6957_v10 = vrot.slane %v21467_v0, 1 }
 0x34a   : > { %19011 = vmatmul.mubr.bf16.gmra.mrb[4].mxu1 %v6942_v49  ;;  %v14922_v49 = vrot.slane %v14920_v34, 2  ;;  %16085 = vperm.xlu1 %20821, %v16003_v23   ;;  %v23372_v34 = vld [vmem:[%s21719_s10 + $0x78] sm:$0xff]  }
 0x34b   : > { %19707 = vmatmul.mubr.bf16.gmra.mrb[24].mxu0 %v14386_v53  ;;  %19014 = vmatprep.mubr.bf16.mxu1 %v6944_v54  ;;  %v21483_v53 = vld [vmem:[%s23817_s3 + $0x338] sm:$0xff]   ;;  %v6953_v54 = vrot.slane %v21462_v41, 1 }
 0x34c   : > { %19710 = vmatprep.mubr.bf16.mxu0 %v14388_v58  ;;  %19047 = vmatpush3.bf16.msra.mxu1 %v21451_v47  ;;  %v14916_v47 = vrot.slane %v14914_v28, 3  ;;  %v6955_v58 = vrot.slane %v23310_v48, 1  ;;  %v14926_v39 = vor.u32 %v14925_v51, %v14922_v49  ;;  %v21484_v41 = vld [vmem:[%s22243_s13 + $0x58] sm:$0xff]   ;;  %v6963_v48 = vrot.slane %v23372_v34, 1 }
 0x34d   : > { %19048 = vmatprep.subr.bf16.mxu1 %v21457_v59  ;;  %v6954_v40 = vsel %vm1778_vm3, %v6951_v25, %v6953_v54  ;;  %16100 = vperm.xlu0 %20820, %v16006_v1   ;;  %v16010_v25 = vld [vmem:[%s23819_s5 + $0x90] sm:$0xff]  ;;  %v14974_v51 = vshrl.u32 %v21484_v41, 16  ;;  %v14977_v52 = vshll.u32 %v21484_v41, 16  ;;  %v21490_v1 = vld [vmem:[%s22243_s13 + $0x68] sm:$0xff]  }
 0x34e   : > { %v14917_v57 = vor.u32 %v14916_v47, %v14913_v46  ;;  %v6956_v3 = vsel %vm1778_vm3, %v6953_v54, %v6955_v58  ;;  %16095 = vperm.xlu1 %20821, %v16005_v63   ;;  %v6958_v21 = vsel %vm1778_vm3, %v6955_v58, %v6957_v10  ;;  %v16012_v46 = vld [vmem:[%s23819_s5 + $0xa0] sm:$0xff]  ;;  %v16013_v54 = vld [vmem:[%s23819_s5 + $0xa8] sm:$0xff]  ;;  %v16014_v58 = vld [vmem:[%s23819_s5 + $0xb0] sm:$0xff] }
 0x34f   : > { %v14979_v0 = vrot.slane %v14977_v52, 3 }
 0x350   : > { %19049 = vmatpush3.bf16.msra.mxu1 %v21457_v59  ;;  %v14929_v59 = vshrl.u32 %v21468_v4, 16  ;;  %v14918_v2 = vsel %vm4589_vm4, %v14908_v32, %v14917_v57  ;;  %v14952_v32 = vrot.slane %v14950_v17, 3  ;;  %v14965_v4 = vshrl.u32 %v21480_v35, 16  ;;  %v16018_v17 = vld [vmem:[%s23819_s5 + $0xd0] sm:$0xff] }
 0x351   : > { %19050 = vmatprep.subr.bf16.mxu1 %v21464_v38  ;;  %16110 = vperm.xlu0 %20820, %v16008_v13  }
 0x352   : > { %19015 = vmatmul.mubr.bf16.gmra.mrb[8].mxu1 %v6946_v18  ;;  %v14931_v55 = vrot.slane %v14929_v59, 2  ;;  %v14927_v18 = vsel %vm4589_vm4, %v14917_v57, %v14926_v39  ;;  %16105 = vperm.xlu1 %20821, %v16007_v12   ;;  %v14953_v47 = vor.u32 %v14952_v32, %v14949_v30  ;;  %v21486_v57 = vld [vmem:[%s22243_s13 + $0x60] sm:$0xff]   ;;  %v16017_v12 = vld [vmem:[%s23819_s5 + $0xc8] sm:$0xff]  ;;  %v16019_v30 = vld [vmem:[%s23819_s5 + $0xd8] sm:$0xff] }
 0x353   : > { %19711 = vmatmul.mubr.bf16.gmra.mrb[28].mxu0 %v14390_v7  ;;  %19018 = vmatprep.mubr.bf16.mxu1 %v6948_v8  ;;  %v21475_v7 = vld [vmem:[%s23817_s3 + $0x688] sm:$0xff]  }
 0x354   : > { %19714 = vmatprep.mubr.bf16.mxu0 %v14392_v9  ;;  %19051 = vmatpush3.bf16.msra.mxu1 %v21464_v38  ;;  %v23336_v38 = vld [vmem:[%s21719_s10 + $0x68] sm:$0xff]   ;;  %v23347_v9 = vld [vmem:[%s23817_s3 + $0x340] sm:$0xff]   ;;  %v14935_v14 = vor.u32 %v14934_v5, %v14931_v55  ;;  %v14954_v59 = vsel %vm4589_vm4, %v14944_v27, %v14953_v47  ;;  %v6965_v55 = vrot.slane %v21479_v56, 1  ;;  %v14983_v5 = vshrl.u32 %v21486_v57, 16 }
 0x355   : > { %19052 = vmatprep.subr.bf16.mxu1 %v21470_v24  ;;  %v21478_v8 = vld [vmem:[%s22243_s13 + $0x48] sm:$0xff]   ;;  %v6959_v15 = vrot.slane %v23336_v38, 1  ;;  %16120 = vperm.xlu0 %20820, %v16010_v25   ;;  %v14986_v38 = vshll.u32 %v21486_v57, 16 }
 0x356   : > { %v14959_v19 = vshll.u32 %v21478_v8, 16  ;;  %v14936_v26 = vsel %vm4589_vm4, %v14926_v39, %v14935_v14  ;;  %v14967_v39 = vrot.slane %v14965_v4, 2  ;;  %v6966_v13 = vsel %vm1778_vm3, %v6963_v48, %v6965_v55  ;;  %v16022_v4 = vld [vmem:[%s23819_s5 + $0xf0] sm:$0xff] }
 0x357   : > { %v6960_v28 = vsel %vm1778_vm3, %v6957_v10, %v6959_v15  ;;  %v21503_v10 = vld [vmem:[%s23817_s3 + $0x6b0] sm:$0xff]   ;;  %v14988_v16 = vrot.slane %v14986_v38, 3 }
 0x358   : > { %19053 = vmatpush3.bf16.msra.mxu1 %v21470_v24  ;;  %v14956_v24 = vshrl.u32 %v21478_v8, 16  ;;  %v14995_v8 = vshll.u32 %v21490_v1, 16  ;;  %v16026_v38 = vld [vmem:[%s23819_s5 + $0x110] sm:$0xff] }
 0x359   : > { %19054 = vmatprep.subr.bf16.mxu1 %v21476_v36  ;;  %16130 = vperm.xlu0 %20820, %v16012_v46   ;;  %v16021_v46 = vld [vmem:[%s23819_s5 + $0xe8] sm:$0xff] }
 0x35a   : > { %19019 = vmatmul.mubr.bf16.gmra.mrb[12].mxu1 %v6950_v42  ;;  %v14958_v37 = vrot.slane %v14956_v24, 2  ;;  %v14961_v42 = vrot.slane %v14959_v19, 3  ;;  %v6968_v24 = vsel %vm1778_vm3, %v6965_v55, %v6967_v29  ;;  %v21488_v19 = vld [vmem:[%s21719_s10 + $0x8] sm:$0xfe]   ;;  %v14997_v25 = vrot.slane %v14995_v8, 3 }
 0x35b   : > { %19715 = vmatmul.mubr.bf16.gmra.mrb[32].mxu0 %v14394_v43  ;;  %19022 = vmatprep.mubr.bf16.mxu1 %v6952_v45  ;;  %v6961_v43 = vrot.slane %v21473_v22, 1  ;;  %v16011_v45 = vld [vmem:[%s23819_s5 + $0x98] sm:$0xff] }
 0x35c   : > { %19734 = vmatprep.mubr.bf16.mxu0 %v14909_v61  ;;  %19055 = vmatpush3.bf16.msra.mxu1 %v21476_v36  ;;  %v14945_v36 = vsel %vm4589_vm4, %v14935_v14, %v14944_v27  ;;  %v14968_v61 = vshll.u32 %v21480_v35, 16  ;;  %v14962_v49 = vor.u32 %v14961_v42, %v14958_v37  ;;  %v21485_v14 = vld [vmem:[%s21719_s10 + $0x90] ss:$0 sps:$4 sm:$0x11]   ;;  %v16020_v35 = vld [vmem:[%s23819_s5 + $0xe0] sm:$0xff] }
 0x35d   : > { %19056 = vmatprep.subr.bf16.mxu1 %v21483_v53  ;;  %v6962_v23 = vsel %vm1778_vm3, %v6959_v15, %v6961_v43  ;;  %v6964_v33 = vsel %vm1778_vm3, %v6961_v43, %v6963_v48  ;;  %16140 = vperm.xlu0 %20820, %v16014_v58   ;;  %v14985_v15 = vrot.slane %v14983_v5, 2  ;;  %v6969_v32 = vrot.slane %v21485_v14, 1  ;;  %v21491_v48 = vld [vmem:[%s21719_s10 + $0x18] sm:$0xff]   ;;  %v21500_v58 = vld [vmem:[%s22243_s13 + $0x88] sm:$0xff]  }
 0x35e   : > { %v14970_v60 = vrot.slane %v14968_v61, 3  ;;  %v14963_v63 = vsel %vm4589_vm4, %v14953_v47, %v14962_v49  ;;  %v21496_v5 = vld [vmem:[%s21719_s10 + $0x28] sm:$0xff]   ;;  %v21505_v14 = vld [vmem:[%s22243_s13 + $0x98] sm:$0xff]  }
 0x35f   : > { %v14989_v34 = vor.u32 %v14988_v16, %v14985_v15  ;;  %v6970_v47 = vsel %vm1778_vm3, %v6967_v29, %v6969_v32  ;;  %v16027_v15 = vld [vmem:[%s23819_s5 + $0x118] sm:$0xff]  ;;  %v7476_v16 = vrot.slane %v21496_v5, 1  ;;  %v21514_v5 = vld [vmem:[%s21719_s10 + $0x60] sm:$0xff]  }
 0x360   : > { %19057 = vmatpush3.bf16.msra.mxu1 %v21483_v53  ;;  %v21493_v53 = vld [vmem:[%s23817_s3 + $0x6a0] sm:$0xff]  }
 0x361   : > { %19822 = vmatprep.subr.bf16.mxu1 %v23347_v9  ;;  %16150 = vperm.xlu0 %20820, %v16016_v50  }
 0x362   : > { %19023 = vmatmul.mubr.bf16.gmra.mrb[16].mxu1 %v6954_v40  ;;  %v14976_v40 = vrot.slane %v14974_v51, 2 }
 0x363   : > { %19735 = vmatmul.mubr.bf16.vlgmr.msra.gmra.mrb[0].mxu0 %v14918_v2  ;;  %19026 = vmatprep.mubr.bf16.mxu1 %v6956_v3  ;;  %v21498_v2 = vld [vmem:[%s23817_s3 + $0x6a8] sm:$0xff]   ;;  %v16015_v3 = vld [vmem:[%s23819_s5 + $0xb8] sm:$0xff] }
 0x364   : > { %19738 = vmatprep.mubr.bf16.mxu0 %v14927_v18  ;;  %19771 = vmatpush3.bf16.msra.mxu0 %v23206_v11  ;;  %v16009_v11 = vld [vmem:[%s23819_s5 + $0x88] sm:$0xff]  ;;  %v14971_v18 = vor.u32 %v14970_v60, %v14967_v39  ;;  %v14980_v6 = vor.u32 %v14979_v0, %v14976_v40  ;;  %v16024_v39 = vld [vmem:[%s23819_s5 + $0x100] sm:$0xff] }
 0x365   : > { %19772 = vmatprep.subr.bf16.mxu0 %v21475_v7  ;;  %16115 = vperm.xlu1 %20821, %v16009_v11   ;;  %v21492_v11 = vld [vmem:[%s22243_s13 + $0x70] sm:$0xff]  }
 0x366   : > { %v14972_v27 = vsel %vm4589_vm4, %v14962_v49, %v14971_v18  ;;  %16160 = vperm.xlu0 %20820, %v16018_v17   ;;  %v15001_v42 = vshrl.u32 %v21492_v11, 16  ;;  %v15004_v41 = vshll.u32 %v21492_v11, 16  ;;  %v14990_v61 = vsel %vm4589_vm4, %v14980_v6, %v14989_v34 }
 0x368   : > { %19773 = vmatpush3.bf16.msra.mxu0 %v21475_v7  ;;  %v14992_v7 = vshrl.u32 %v21490_v1, 16  ;;  %v15003_v51 = vrot.slane %v15001_v42, 2  ;;  %v15006_v52 = vrot.slane %v15004_v41, 3  ;;  %v15028_v1 = vshrl.u32 %v21500_v58, 16 }
 0x369   : > { %19774 = vmatprep.subr.bf16.mxu0 %v21481_v20  ;;  %16125 = vperm.xlu1 %20821, %v16011_v45  }
 0x36a   : > { %19027 = vmatmul.mubr.bf16.gmra.mrb[20].mxu1 %v6958_v21  ;;  %v14981_v21 = vsel %vm4589_vm4, %v14971_v18, %v14980_v6  ;;  %v14994_v22 = vrot.slane %v14992_v7, 2  ;;  %16170 = vperm.xlu0 %20820, %v16020_v35   ;;  %v15007_v60 = vor.u32 %v15006_v52, %v15003_v51  ;;  %v21499_v6 = vld [vmem:[%s21719_s10 + $0x30] sm:$0xff]   ;;  %v21504_v35 = vld [vmem:[%s21719_s10 + $0x40] sm:$0xff]  }
 0x36b   : > { %19739 = vmatmul.mubr.bf16.gmra.mrb[4].mxu0 %v14936_v26  ;;  %19030 = vmatprep.mubr.bf16.mxu1 %v6960_v28  ;;  %v21495_v26 = vld [vmem:[%s22243_s13 + $0x78] sm:$0xff]   ;;  %v21502_v7 = vld [vmem:[%s22243_s13 + $0x90] sm:$0xff]  }
 0x36c   : > { %19742 = vmatprep.mubr.bf16.mxu0 %v14945_v36  ;;  %19775 = vmatpush3.bf16.msra.mxu0 %v21481_v20  ;;  %v23431_v20 = vld [vmem:[%s21719_s10 + $0x10] sm:$0xff]   ;;  %v21508_v28 = vld [vmem:[%s23817_s3 + $0x6b8] sm:$0xff]   ;;  %v7469_v36 = vrot.slane %v21488_v19, 1  ;;  %v15010_v43 = vshrl.u32 %v21495_v26, 16  ;;  %v15013_v45 = vshll.u32 %v21495_v26, 16  ;;  %v15040_v19 = vshll.u32 %v21502_v7, 16 }
 0x36d   : > { %19776 = vmatprep.subr.bf16.mxu0 %v21487_v44  ;;  %16135 = vperm.xlu1 %20821, %v16013_v54   ;;  %v7470_v37 = vrot.slane %v23431_v20, 1  ;;  %v21549_v20 = vld [vmem:[%s23817_s3 + $0x348] sm:$0xff]  }
 0x36e   : > { %v15012_v56 = vrot.slane %v15010_v43, 2  ;;  %v15015_v57 = vrot.slane %v15013_v45, 3  ;;  %16180 = vperm.xlu0 %20820, %v16022_v4   ;;  %v15042_v32 = vrot.slane %v15040_v19, 3  ;;  %v7482_v45 = vrot.slane %v21504_v35, 1  ;;  %v21551_v4 = vld [vmem:[%s23817_s3 + $0x358] sm:$0xff]  }
 0x36f   : > { %v7471_v49 = vsel %vm1778_vm3, %v7469_v36, %v7470_v37  ;;  %v21507_v36 = vld [vmem:[%s22243_s13 + $0xa0] ss:$0 sps:$4 sm:$0x77]  }
 0x370   : > { %19777 = vmatpush3.bf16.msra.mxu0 %v21487_v44  ;;  %v14998_v44 = vor.u32 %v14997_v25, %v14994_v22  ;;  %v15016_v0 = vor.u32 %v15015_v57, %v15012_v56  ;;  %v15049_v22 = vshll.u32 %v21505_v14, 16  ;;  %v21501_v25 = vld [vmem:[%s21719_s10 + $0x38] sm:$0xff]   ;;  %v21510_v57 = vld [vmem:[%s22243_s13 + $0x10] sm:$0xf8]  }
 0x371   : > { %19778 = vmatprep.subr.bf16.mxu0 %v21493_v53  ;;  %16145 = vperm.xlu1 %20821, %v16015_v3   ;;  %v16025_v3 = vld [vmem:[%s23819_s5 + $0x108] sm:$0xff] }
 0x372   : > { %19031 = vmatmul.mubr.bf16.gmra.mrb[24].mxu1 %v6962_v23  ;;  %v14999_v54 = vsel %vm4589_vm4, %v14989_v34, %v14998_v44  ;;  %v21494_v23 = vld [vmem:[%s21719_s10 + $0x20] sm:$0xff]   ;;  %16190 = vperm.xlu0 %20820, %v16024_v39   ;;  %v15008_v50 = vsel %vm4589_vm4, %v14998_v44, %v15007_v60  ;;  %v21550_v34 = vld [vmem:[%s23817_s3 + $0x350] sm:$0xff]   ;;  %v15051_v41 = vrot.slane %v15049_v22, 3  ;;  %v7480_v44 = vrot.slane %v21501_v25, 1 }
 0x373   : > { %19743 = vmatmul.mubr.bf16.gmra.mrb[8].mxu0 %v14954_v59  ;;  %19034 = vmatprep.mubr.bf16.mxu1 %v6964_v33  ;;  %v16023_v59 = vld [vmem:[%s23819_s5 + $0xf8] sm:$0xff]  ;;  %v7472_v33 = vrot.slane %v21491_v48, 1  ;;  %v7474_v40 = vrot.slane %v21494_v23, 1  ;;  %v21509_v23 = vld [vmem:[%s21719_s10 + $0x50] sm:$0xff]  }
 0x374   : > { %19746 = vmatprep.mubr.bf16.mxu0 %v14963_v63  ;;  %19779 = vmatpush3.bf16.msra.mxu0 %v21493_v53  ;;  %v21497_v53 = vld [vmem:[%s22243_s13 + $0x80] sm:$0xff]   ;;  %v7483_v52 = vsel %vm1778_vm3, %v7480_v44, %v7482_v45 }
 0x375   : > { %19780 = vmatprep.subr.bf16.mxu0 %v21498_v2  ;;  %16155 = vperm.xlu1 %20821, %v16017_v12   ;;  %v15019_v62 = vshrl.u32 %v21497_v53, 16  ;;  %v15022_v63 = vshll.u32 %v21497_v53, 16  ;;  %v7473_v55 = vsel %vm1778_vm3, %v7470_v37, %v7472_v33  ;;  %v7475_v8 = vsel %vm1778_vm3, %v7472_v33, %v7474_v40 }
 0x376   : > { %v15030_v12 = vrot.slane %v15028_v1, 2  ;;  %16200 = vperm.xlu0 %20820, %v16026_v38   ;;  %v21512_v1 = vld [vmem:[%s21719_s10 + $0x58] sm:$0xff]  }
 0x377   : > { %v15021_v18 = vrot.slane %v15019_v62, 2  ;;  %v15024_v29 = vrot.slane %v15022_v63, 3  ;;  %v15561_v62 = vrot.slane %v21510_v57, 3  ;;  %v21528_v57 = vld [vmem:[%s21719_s10 + $0x98] ss:$0 sps:$4 sm:$0x11]  }
 0x378   : > { %19781 = vmatpush3.bf16.msra.mxu0 %v21498_v2  ;;  %v15031_v2 = vshll.u32 %v21500_v58, 16  ;;  %v21511_v58 = vld [vmem:[%s22243_s13 + $0x18] sm:$0xff]  }
 0x379   : > { %19782 = vmatprep.subr.bf16.mxu0 %v21503_v10  ;;  %16165 = vperm.xlu1 %20821, %v16019_v30   ;;  %v15025_v17 = vor.u32 %v15024_v29, %v15021_v18  ;;  %v15562_v63 = vrot.slane %v21511_v58, 3  ;;  %v21554_v18 = vld [vmem:[%s23817_s3 + $0x370] sm:$0xff]   ;;  %v7488_v29 = vrot.slane %v21512_v1, 1  ;;  %v21532_v58 = vld [vmem:[%s21719_s10 + $0x58] sm:$0xff]   ;;  %v7504_v1 = vrot.slane %v21528_v57, 1 }
 0x37a   : > { %19035 = vmatmul.mubr.bf16.gmra.mrb[28].mxu1 %v6966_v13  ;;  %v15033_v13 = vrot.slane %v15031_v2, 3  ;;  %v21541_v57 = vld [vmem:[%s22243_s13 + $0x90] sm:$0xff]  }
 0x37b   : > { %19747 = vmatmul.mubr.bf16.gmra.mrb[12].mxu0 %v14972_v27  ;;  %19038 = vmatprep.mubr.bf16.mxu1 %v6968_v24  ;;  %v7478_v27 = vrot.slane %v21499_v6, 1  ;;  %v15037_v24 = vshrl.u32 %v21502_v7, 16  ;;  %v15026_v26 = vsel %vm4589_vm4, %v15016_v0, %v15025_v17  ;;  %v15563_v38 = vsel %vm5258_vm5, %v15561_v62, %v15562_v63 }
 0x37c   : > { %19750 = vmatprep.mubr.bf16.mxu0 %v14981_v21  ;;  %19783 = vmatpush3.bf16.msra.mxu0 %v21503_v10  ;;  %v15017_v10 = vsel %vm4589_vm4, %v15007_v60, %v15016_v0  ;;  %v15034_v11 = vor.u32 %v15033_v13, %v15030_v12  ;;  %v15046_v21 = vshrl.u32 %v21505_v14, 16  ;;  %v7486_v60 = vrot.slane %v21509_v23, 1  ;;  %v21516_v13 = vld [vmem:[%s21719_s10 + $0x68] sm:$0xff]  }
 0x37d   : > { %19784 = vmatprep.subr.bf16.mxu0 %v21508_v28  ;;  %16175 = vperm.xlu1 %20821, %v16021_v46   ;;  %v15039_v30 = vrot.slane %v15037_v24, 2  ;;  %v15055_v46 = vshrl.u32 %v21507_v36, 16  ;;  %v7490_v7 = vrot.slane %v21514_v5, 1  ;;  %v21519_v24 = vld [vmem:[%s22243_s13 + $0x38] sm:$0xff]   ;;  %v7492_v19 = vrot.slane %v21516_v13, 1  ;;  %v21533_v13 = vld [vmem:[%s22243_s13 + $0x70] sm:$0xff]  }
 0x37e   : > { %v15035_v37 = vsel %vm4589_vm4, %v15025_v17, %v15034_v11  ;;  %v15048_v42 = vrot.slane %v15046_v21, 2  ;;  %v7489_v12 = vsel %vm1778_vm3, %v7486_v60, %v7488_v29  ;;  %v21518_v17 = vld [vmem:[%s21719_s10 + $0x70] sm:$0xff]   ;;  %v15570_v21 = vrot.slane %v21519_v24, 3 }
 0x37f   : > { %v15043_v43 = vor.u32 %v15042_v32, %v15039_v30  ;;  %v15057_v53 = vrot.slane %v15055_v46, 2  ;;  %v7493_v22 = vsel %vm1778_vm3, %v7490_v7, %v7492_v19  ;;  %v21522_v30 = vld [vmem:[%s21719_s10 + $0x80] sm:$0xff]   ;;  %v21525_v46 = vld [vmem:[%s22243_s13 + $0x50] sm:$0xff]  }
 0x380   : > { %19785 = vmatpush3.bf16.msra.mxu0 %v21508_v28  ;;  %v7479_v28 = vsel %vm1778_vm3, %v7476_v16, %v7478_v27  ;;  %v15052_v48 = vor.u32 %v15051_v41, %v15048_v42 }
 0x381   : > { %16185 = vperm.xlu1 %20821, %v16023_v59   ;;  %v15044_v51 = vsel %vm4589_vm4, %v15034_v11, %v15043_v43  ;;  %v21552_v59 = vld [vmem:[%s23817_s3 + $0x360] sm:$0xff]   ;;  %v7494_v11 = vrot.slane %v21518_v17, 1 }
 0x382   : > { %19039 = vmatmul.mubr.bf16.gmra.mrb[32].mxu1 %v6970_v47  ;;  %v15058_v47 = vshll.u32 %v21507_v36, 16  ;;  %v15053_v56 = vsel %vm4589_vm4, %v15043_v43, %v15052_v48 }
 0x383   : > { %19751 = vmatmul.mubr.bf16.gmra.mrb[16].mxu0 %v14990_v61  ;;  %19058 = vmatprep.mubr.bf16.mxu1 %v7471_v49  ;;  %v7481_v61 = vsel %vm1778_vm3, %v7478_v27, %v7480_v44  ;;  %v21506_v49 = vld [vmem:[%s21719_s10 + $0x48] sm:$0xff]  }
 0x384   : > { %19754 = vmatprep.mubr.bf16.mxu0 %v14999_v54  ;;  %v15060_v54 = vrot.slane %v15058_v47, 3  ;;  %v7484_v33 = vrot.slane %v21506_v49, 1  ;;  %v21524_v44 = vld [vmem:[%s21719_s10 + $0x88] sm:$0xff]   ;;  %v21526_v47 = vld [vmem:[%s21719_s10 + $0x90] sm:$0xff]  }
 0x385   : > { %16195 = vperm.xlu1 %20821, %v16025_v3   ;;  %v7500_v49 = vrot.slane %v21524_v44, 1  ;;  %v21539_v44 = vld [vmem:[%s22243_s13 + $0x88] sm:$0xff]  }
 0x386   : > { %v15061_v39 = vor.u32 %v15060_v54, %v15057_v53  ;;  %v7485_v0 = vsel %vm1778_vm3, %v7482_v45, %v7484_v33  ;;  %v7487_v3 = vsel %vm1778_vm3, %v7484_v33, %v7486_v60 }
 0x388   : > { %v15062_v2 = vsel %vm4589_vm4, %v15052_v48, %v15061_v39  ;;  %v21530_v48 = vld [vmem:[%s21719_s10 + $0x50] sm:$0xff]   ;;  %v21529_v39 = vld [vmem:[%s22243_s13 + $0x60] sm:$0xff]  }
 0x389   : > { %16205 = vperm.xlu1 %20821, %v16027_v15   ;;  %v7491_v15 = vsel %vm1778_vm3, %v7488_v29, %v7490_v7  ;;  %v8085_v53 = vshrl.u32 %v21530_v48, 16  ;;  %v8088_v54 = vshll.u32 %v21530_v48, 16 }
 0x38a   : > { %19059 = vmatmul.mubr.bf16.vlgmr.msra.gmra.mrb[0].mxu1 %v7473_v55  ;;  %v21513_v55 = vld [vmem:[%s22243_s13 + $0x20] sm:$0xff]  }
 0x38b   : > { %19755 = vmatmul.mubr.bf16.gmra.mrb[20].mxu0 %v15008_v50  ;;  %19830 = vmatpush3.bf16.msra.mxu1 %v23347_v9  ;;  %v7477_v9 = vsel %vm1778_vm3, %v7474_v40, %v7476_v16  ;;  %v21553_v40 = vld [vmem:[%s23817_s3 + $0x368] sm:$0xff]   ;;  %v15564_v6 = vrot.slane %v21513_v55, 3  ;;  %v21517_v16 = vld [vmem:[%s22243_s13 + $0x30] sm:$0xff]   ;;  %v8087_v60 = vrot.slane %v8085_v53, 1  ;;  %v8090_v62 = vrot.slane %v8088_v54, 2 }
 0x38c   : > { %19062 = vmatprep.mubr.bf16.mxu1 %v7475_v8  ;;  %19758 = vmatprep.mubr.bf16.mxu0 %v15017_v10  ;;  %v21515_v50 = vld [vmem:[%s22243_s13 + $0x28] sm:$0xff]   ;;  %v21555_v10 = vld [vmem:[%s23817_s3 + $0x378] sm:$0xff]   ;;  %v15580_v55 = vrot.slane %v21529_v39, 3 }
 0x38d   : > { %19823 = vmatprep.subr.bf16.mxu1 %v21549_v20  ;;  %v15566_v8 = vrot.slane %v21515_v50, 3  ;;  %v15565_v14 = vsel %vm5258_vm5, %v15562_v63, %v15564_v6  ;;  %v21534_v63 = vld [vmem:[%s21719_s10 + $0x60] sm:$0xff]   ;;  %v8091_v5 = vor.u32 %v8090_v62, %v8087_v60  ;;  %v21544_v54 = vld [vmem:[%s21719_s10 + $0x88] sm:$0xff]   ;;  %v21543_v60 = vld [vmem:[%s22243_s13 + $0x98] sm:$0xff]  }
 0x38e   : > { %v8106_v50 = vshll.u32 %v21534_v63, 16 }
 0x38f   : > { %19831 = vmatpush3.bf16.msra.mxu1 %v21549_v20  ;;  %v15567_v27 = vsel %vm5258_vm5, %v15564_v6, %v15566_v8  ;;  %v15568_v20 = vrot.slane %v21517_v16, 3  ;;  %v21538_v16 = vld [vmem:[%s21719_s10 + $0x70] sm:$0xff]  }
 0x390   : > { %19824 = vmatprep.subr.bf16.mxu1 %v21550_v34 }
 0x391   : > { %v15569_v25 = vsel %vm5258_vm5, %v15566_v8, %v15568_v20  ;;  %v15571_v32 = vsel %vm5258_vm5, %v15568_v20, %v15570_v21  ;;  %v21536_v8 = vld [vmem:[%s21719_s10 + $0x68] sm:$0xff]  }
 0x392   : > { %19063 = vmatmul.mubr.bf16.gmra.mrb[4].mxu1 %v7477_v9  ;;  %v21520_v9 = vld [vmem:[%s21719_s10 + $0x78] sm:$0xff]   ;;  %v8115_v20 = vshll.u32 %v21536_v8, 16 }
 0x393   : > { %19759 = vmatmul.mubr.bf16.gmra.mrb[24].mxu0 %v15026_v26  ;;  %19066 = vmatprep.mubr.bf16.mxu1 %v7479_v28  ;;  %v7495_v26 = vsel %vm1778_vm3, %v7492_v19, %v7494_v11  ;;  %v21521_v28 = vld [vmem:[%s22243_s13 + $0x40] sm:$0xff]   ;;  %v7496_v35 = vrot.slane %v21520_v9, 1  ;;  %v8112_v19 = vshrl.u32 %v21536_v8, 16 }
 0x394   : > { %19762 = vmatprep.mubr.bf16.mxu0 %v15035_v37  ;;  %19832 = vmatpush3.bf16.msra.mxu1 %v21550_v34  ;;  %v21523_v34 = vld [vmem:[%s22243_s13 + $0x48] sm:$0xff]   ;;  %v15572_v36 = vrot.slane %v21521_v28, 3  ;;  %v7498_v37 = vrot.slane %v21522_v30, 1  ;;  %v8117_v28 = vrot.slane %v8115_v20, 2  ;;  %v21540_v30 = vld [vmem:[%s21719_s10 + $0x78] sm:$0xff]  }
 0x395   : > { %19825 = vmatprep.subr.bf16.mxu1 %v21551_v4  ;;  %v15574_v42 = vrot.slane %v21523_v34, 3  ;;  %v7497_v41 = vsel %vm1778_vm3, %v7494_v11, %v7496_v35  ;;  %v15584_v11 = vrot.slane %v21533_v13, 3 }
 0x396   : > { %v15573_v43 = vsel %vm5258_vm5, %v15570_v21, %v15572_v36  ;;  %v7499_v45 = vsel %vm1778_vm3, %v7496_v35, %v7498_v37  ;;  %v8121_v21 = vshrl.u32 %v21538_v16, 16  ;;  %v21537_v35 = vld [vmem:[%s22243_s13 + $0x80] sm:$0xff]  }
 0x398   : > { %19833 = vmatpush3.bf16.msra.mxu1 %v21551_v4  ;;  %v15575_v4 = vsel %vm5258_vm5, %v15572_v36, %v15574_v42  ;;  %v8123_v36 = vrot.slane %v8121_v21, 1 }
 0x399   : > { %19826 = vmatprep.subr.bf16.mxu1 %v21552_v59 }
 0x39a   : > { %19067 = vmatmul.mubr.bf16.gmra.mrb[8].mxu1 %v7481_v61  ;;  %v21527_v61 = vld [vmem:[%s22243_s13 + $0x58] sm:$0xff]  }
 0x39b   : > { %19763 = vmatmul.mubr.bf16.gmra.mrb[28].mxu0 %v15044_v51  ;;  %19070 = vmatprep.mubr.bf16.mxu1 %v7483_v52  ;;  %v15576_v51 = vrot.slane %v21525_v46, 3  ;;  %v7502_v52 = vrot.slane %v21526_v47, 1  ;;  %v15578_v23 = vrot.slane %v21527_v61, 3  ;;  %v8133_v46 = vshll.u32 %v21540_v30, 16 }
 0x39c   : > { %19766 = vmatprep.mubr.bf16.mxu0 %v15053_v56  ;;  %19834 = vmatpush3.bf16.msra.mxu1 %v21552_v59  ;;  %v7501_v56 = vsel %vm1778_vm3, %v7498_v37, %v7500_v49  ;;  %v15588_v47 = vrot.slane %v21537_v35, 3 }
 0x39d   : > { %19827 = vmatprep.subr.bf16.mxu1 %v21553_v40  ;;  %v15577_v59 = vsel %vm5258_vm5, %v15574_v42, %v15576_v51  ;;  %v7503_v33 = vsel %vm1778_vm3, %v7500_v49, %v7502_v52  ;;  %v7505_v29 = vsel %vm1778_vm3, %v7502_v52, %v7504_v1  ;;  %v21542_v42 = vld [vmem:[%s21719_s10 + $0x80] sm:$0xff]   ;;  %v15590_v49 = vrot.slane %v21539_v44, 3 }
 0x39e   : > { %v8142_v61 = vshll.u32 %v21542_v42, 16  ;;  %v8135_v53 = vrot.slane %v8133_v46, 2 }
 0x39f   : > { %v15591_v39 = vsel %vm5258_vm5, %v15588_v47, %v15590_v49 }
 0x3a0   : > { %19835 = vmatpush3.bf16.msra.mxu1 %v21553_v40  ;;  %v15579_v40 = vsel %vm5258_vm5, %v15576_v51, %v15578_v23 }
 0x3a1   : > { %19828 = vmatprep.subr.bf16.mxu1 %v21554_v18 }
 0x3a2   : > { %19071 = vmatmul.mubr.bf16.gmra.mrb[12].mxu1 %v7485_v0  ;;  %v21531_v0 = vld [vmem:[%s22243_s13 + $0x68] sm:$0xff]  }
 0x3a3   : > { %19767 = vmatmul.mubr.bf16.gmra.mrb[32].mxu0 %v15062_v2  ;;  %19074 = vmatprep.mubr.bf16.mxu1 %v7487_v3  ;;  %v8094_v2 = vshrl.u32 %v21532_v58, 16  ;;  %v8097_v3 = vshll.u32 %v21532_v58, 16 }
 0x3a4   : > { %19786 = vmatprep.mubr.bf16.mxu0 %v15563_v38  ;;  %19836 = vmatpush3.bf16.msra.mxu1 %v21554_v18  ;;  %v8103_v38 = vshrl.u32 %v21534_v63, 16  ;;  %v15582_v18 = vrot.slane %v21531_v0, 3  ;;  %v8148_v63 = vshrl.u32 %v21544_v54, 16  ;;  %v15592_v0 = vrot.slane %v21541_v57, 3 }
 0x3a5   : > { %19829 = vmatprep.subr.bf16.mxu1 %v21555_v10  ;;  %v8096_v6 = vrot.slane %v8094_v2, 1  ;;  %v8099_v7 = vrot.slane %v8097_v3, 2 }
 0x3a6   : > { %v15583_v17 = vsel %vm5258_vm5, %v15580_v55, %v15582_v18 }
 0x3a7   : > { %v8100_v24 = vor.u32 %v8099_v7, %v8096_v6  ;;  %v21545_v7 = vld [vmem:[%s22243_s13 + $0xa0] ss:$0 sps:$4 sm:$0x77]  }
 0x3a8   : > { %19837 = vmatpush3.bf16.msra.mxu1 %v21555_v10  ;;  %v15581_v10 = vsel %vm5258_vm5, %v15578_v23, %v15580_v55  ;;  %v15594_v55 = vrot.slane %v21543_v60, 3 }
 0x3aa   : > { %19075 = vmatmul.mubr.bf16.gmra.mrb[16].mxu1 %v7489_v12  ;;  %v8092_v12 = vsel %vm2849_vm0, %v21791_v31, %v8091_v5 }
 0x3ab   : > { %19787 = vmatmul.mubr.bf16.vlgmr.msra.gmra.mrb[0].mxu0 %v15565_v14  ;;  %19078 = vmatprep.mubr.bf16.mxu1 %v7491_v15  ;;  %v8105_v14 = vrot.slane %v8103_v38, 1  ;;  %v8108_v15 = vrot.slane %v8106_v50, 2  ;;  %v8150_v38 = vrot.slane %v8148_v63, 1 }
 0x3ac   : > { %19790 = vmatprep.mubr.bf16.mxu0 %v15567_v27  ;;  %v21535_v27 = vld [vmem:[%s22243_s13 + $0x78] sm:$0xff]   ;;  %s20777_s13 = smul.u32 36, %s23839_s24 }
 0x3ad   : > { %v8109_v31 = vor.u32 %v8108_v15, %v8105_v14  ;;  %v15586_v9 = vrot.slane %v21535_v27, 3 }
 0x3af   : > { %v8110_v34 = vsel %vm2849_vm0, %v8100_v24, %v8109_v31  ;;  %v15589_v23 = vsel %vm5258_vm5, %v15586_v9, %v15588_v47 }
 0x3b2   : > { %19079 = vmatmul.mubr.bf16.gmra.mrb[20].mxu1 %v7493_v22  ;;  %v8124_v22 = vshll.u32 %v21538_v16, 16  ;;  %v15596_v16 = vrot.slane %v21545_v7, 3 }
 0x3b3   : > { %19791 = vmatmul.mubr.bf16.gmra.mrb[4].mxu0 %v15569_v25  ;;  %19082 = vmatprep.mubr.bf16.mxu1 %v7495_v26  ;;  %v8101_v25 = vsel %vm2849_vm0, %v8091_v5, %v8100_v24  ;;  %v8114_v26 = vrot.slane %v8112_v19, 1 }
 0x3b4   : > { %19794 = vmatprep.mubr.bf16.mxu0 %v15571_v32  ;;  %v15585_v32 = vsel %vm5258_vm5, %v15582_v18, %v15584_v11  ;;  %v8126_v37 = vrot.slane %v8124_v22, 2  ;;  %v21547_v18 = vld [vmem:[%s21719_s10 + $0x98] ss:$0 sps:$4 sm:$0x33]   ;;  %v15597_v20 = vsel %vm5258_vm5, %v15594_v55, %v15596_v16  ;;  %v16031_v22 = vpop.permute.xlu0 %16030 }
 0x3b5   : > { %v8166_v14 = vshrl.u32 %v21547_v18, 16  ;;  %v8169_v15 = vshll.u32 %v21547_v18, 16 }
 0x3b6   : > { %v8127_v48 = vor.u32 %v8126_v37, %v8123_v36 }
 0x3b7   : > { %v8168_v24 = vrot.slane %v8166_v14, 1  ;;  %v8171_v19 = vrot.slane %v8169_v15, 2 }
 0x3ba   : > { %19083 = vmatmul.mubr.bf16.gmra.mrb[24].mxu1 %v7497_v41  ;;  %v15587_v41 = vsel %vm5258_vm5, %v15584_v11, %v15586_v9  ;;  %v16041_v9 = vpop.permute.xlu1 %16040 }
 0x3bb   : > { %19795 = vmatmul.mubr.bf16.gmra.mrb[8].mxu0 %v15573_v43  ;;  %19086 = vmatprep.mubr.bf16.mxu1 %v7499_v45  ;;  %v8118_v43 = vor.u32 %v8117_v28, %v8114_v26  ;;  %v8130_v45 = vshrl.u32 %v21540_v30, 16 }
 0x3bc   : > { %19798 = vmatprep.mubr.bf16.mxu0 %v15575_v4  ;;  %v8139_v4 = vshrl.u32 %v21542_v42, 16 }
 0x3bd   : > { %v8119_v51 = vsel %vm2849_vm0, %v8109_v31, %v8118_v43  ;;  %v8132_v52 = vrot.slane %v8130_v45, 1  ;;  %v8172_v31 = vor.u32 %v8171_v19, %v8168_v24 }
 0x3be   : > { %v8141_v58 = vrot.slane %v8139_v4, 1 }
 0x3bf   : > { %v8136_v62 = vor.u32 %v8135_v53, %v8132_v52 }
 0x3c1   : > { %v8137_v5 = vsel %vm2849_vm0, %v8127_v48, %v8136_v62 }
 0x3c2   : > { %19087 = vmatmul.mubr.bf16.gmra.mrb[28].mxu1 %v7501_v56  ;;  %v8128_v56 = vsel %vm2849_vm0, %v8118_v43, %v8127_v48 }
 0x3c3   : > { %19799 = vmatmul.mubr.bf16.gmra.mrb[12].mxu0 %v15577_v59  ;;  %19090 = vmatprep.mubr.bf16.mxu1 %v7503_v33  ;;  %v8144_v59 = vrot.slane %v8142_v61, 2  ;;  %v21546_v33 = vld [vmem:[%s21719_s10 + $0x90] sm:$0xff]   ;;  %s20778_s10 = smul.u32 576, %s23837_s25 }
 0x3c4   : > { %19802 = vmatprep.mubr.bf16.mxu0 %v15579_v40  ;;  %v8151_v40 = vshll.u32 %v21544_v54, 16  ;;  %v8157_v2 = vshrl.u32 %v21546_v33, 16  ;;  %v8160_v3 = vshll.u32 %v21546_v33, 16 }
 0x3c5   : > { %v8145_v1 = vor.u32 %v8144_v59, %v8141_v58  ;;  %s407_s19 = sadd.s32 %s20778_s10, %s20777_s13  ;;  %v23644_v58 = vld [vmem:[%s23818_s4] ss:$0 sm:$0xff] }
 0x3c6   : > { %v8153_v50 = vrot.slane %v8151_v40, 2  ;;  %v8159_v8 = vrot.slane %v8157_v2, 1  ;;  %s16568_s23 = sshll.u32 %s407_s19, 3 }
 0x3c7   : > { %v8146_v6 = vsel %vm2849_vm0, %v8136_v62, %v8145_v1  ;;  %s23654_s9 = scalar_lea.vmem %s23820_s6, %s16568_s23 }
 0x3c8   : > { %v8154_v13 = vor.u32 %v8153_v50, %v8150_v38 }
 0x3ca   : > { %19091 = vmatmul.mubr.bf16.gmra.mrb[32].mxu1 %v7505_v29  ;;  %v15593_v29 = vsel %vm5258_vm5, %v15590_v49, %v15592_v0  ;;  %v8155_v27 = vsel %vm2849_vm0, %v8145_v1, %v8154_v13 }
 0x3cb   : > { %19803 = vmatmul.mubr.bf16.gmra.mrb[16].mxu0 %v15581_v10  ;;  %19126 = vmatprep.mubr.bf16.mxu1 %v8092_v12  ;;  %v8162_v10 = vrot.slane %v8160_v3, 2  ;;  %v15595_v12 = vsel %vm5258_vm5, %v15592_v0, %v15594_v55 }
 0x3cc   : > { %19806 = vmatprep.mubr.bf16.mxu0 %v15583_v17 }
 0x3cd   : > { %v8163_v17 = vor.u32 %v8162_v10, %v8159_v8 }
 0x3cf   : > { %v8164_v11 = vsel %vm2849_vm0, %v8154_v13, %v8163_v17  ;;  %v8173_v21 = vsel %vm2849_vm0, %v8163_v17, %v8172_v31 }
 0x3d2   : > { %19127 = vmatmul.mubr.bf16.vlgmr.msra.gmra.mrb[16].mxu1 %v8101_v25 }
 0x3d3   : > { %19807 = vmatmul.mubr.bf16.gmra.mrb[20].mxu0 %v15585_v32  ;;  %19130 = vmatprep.mubr.bf16.mxu1 %v8110_v34  ;;  %v16036_v32 = vpop.permute.xlu0 %16035  ;;  %v16046_v34 = vpop.permute.xlu1 %16045 }
 0x3d4   : > { %19810 = vmatprep.mubr.bf16.mxu0 %v15587_v41 }
 0x3d7   : > { %v23597_v42 = vpop.permute.xlu0 %16050  ;;  %v23601_v44 = vpop.permute.xlu1 %16055 }
 0x3da   : > { %19131 = vmatmul.mubr.bf16.gmra.mrb[20].mxu1 %v8119_v51 }
 0x3db   : > { %19811 = vmatmul.mubr.bf16.gmra.mrb[24].mxu0 %v15589_v23  ;;  %19134 = vmatprep.mubr.bf16.mxu1 %v8128_v56  ;;  %v23605_v45 = vpop.permute.xlu0 %16060  ;;  %v23609_v47 = vpop.permute.xlu1 %16065 }
 0x3dc   : > { %19814 = vmatprep.mubr.bf16.mxu0 %v15591_v39 }
 0x3df   : > { %v23620_v61 = vpop.permute.xlu0 %16070  ;;  %v23625_v49 = vpop.permute.xlu1 %16075 }
 0x3e2   : > { %19135 = vmatmul.mubr.bf16.gmra.mrb[24].mxu1 %v8137_v5 }
 0x3e3   : > { %19815 = vmatmul.mubr.bf16.gmra.mrb[28].mxu0 %v15593_v29  ;;  %19138 = vmatprep.mubr.bf16.mxu1 %v8146_v6  ;;  %v23637_v23 = vpop.permute.xlu0 %16080  ;;  %v23639_v56 = vpop.permute.xlu1 %16085 }
 0x3e4   : > { %19818 = vmatprep.mubr.bf16.mxu0 %v15595_v12 }
 0x3e7   : > { %v23646_v39 = vpop.permute.xlu0 %16090  ;;  %v23648_v63 = vpop.permute.xlu1 %16095 }
 0x3ea   : > { %19139 = vmatmul.mubr.bf16.gmra.mrb[28].mxu1 %v8155_v27 }
 0x3eb   : > { %19819 = vmatmul.mubr.bf16.gmra.mrb[32].mxu0 %v15597_v20  ;;  %19142 = vmatprep.mubr.bf16.mxu1 %v8164_v11  ;;  %v23660_v29 = vpop.permute.xlu0 %16100  ;;  %v23663_v8 = vpop.permute.xlu1 %16105 }
 0x3f2   : > { %19143 = vmatmul.mubr.bf16.gmra.mrb[32].mxu1 %v8173_v21 }
 0x45d   : > { %v19060_v25 = vpop.f32.mrb[0].mxu1 }
 0x45e   : > { %v7606_v26 = vpop.f32.mrb[1].mxu1 }
 0x45f   : > { %v19061_v28 = vpop.f32.mrb[2].mxu1 }
 0x460   : > { %v7609_v30 = vpop.f32.mrb[3].mxu1 }
 0x465   : > { %v19064_v35 = vpop.f32.mrb[4].mxu1 }
 0x466   : > { %v7622_v36 = vpop.f32.mrb[5].mxu1 }
 0x467   : > { %v19065_v37 = vpop.f32.mrb[6].mxu1 }
 0x468   : > { %v23599_v41 = vpop.f32.mrb[7].mxu1 }
 0x46d   : > { %v23603_v43 = vpop.f32.mrb[8].mxu1 }
 0x46e   : > { %v23607_v46 = vpop.f32.mrb[9].mxu1 }
 0x46f   : > { %v23611_v48 = vpop.f32.mrb[10].mxu1 }
 0x470   : > { %v23614_v4 = vpop.f32.mrb[11].mxu1 }
 0x475   : > { %v23627_v51 = vpop.f32.mrb[12].mxu1 }
 0x476   : > { %v23629_v52 = vpop.f32.mrb[13].mxu1 }
 0x477   : > { %v23631_v53 = vpop.f32.mrb[14].mxu1 }
 0x478   : > { %v23634_v54 = vpop.f32.mrb[15].mxu1 }
 0x47e   : > { %v19788_v57 = vpop.f32.mrb[0].mxu0 }
 0x47f   : > { %v19838_v59 = vadd.f32 %v19788_v57, %v19060_v25  ;;  %v15698_v33 = vpop.f32.mrb[1].mxu0 }
 0x480   : > { %v19839_v60 = vadd.f32 %v15698_v33, %v7606_v26  ;;  %v19789_v62 = vpop.f32.mrb[2].mxu0 }
 0x481   : > { %v15958_v40 = vadd.f32 %v19838_v59, %v23644_v58  ;;  %v19840_v0 = vadd.f32 %v19789_v62, %v19061_v28  ;;  %v15701_v1 = vpop.f32.mrb[3].mxu0  ;;  %v23672_v28 = vpop.permute.xlu0 %16110 }
 0x482   : > { %v15956_v2 = vadd.f32 %v19839_v60, %v23644_v58  ;;  %v19841_v3 = vadd.f32 %v15701_v1, %v7609_v30 }
 0x483   : > { %v16210_v55 = vmul.f32 %v16041_v9, %v15958_v40  ;;  %v15959_v5 = vadd.f32 %v19840_v0, %v23644_v58 }
 0x484   : > { %v16208_v38 = vmul.f32 %v16031_v22, %v15956_v2  ;;  %v15957_v50 = vadd.f32 %v19841_v3, %v23644_v58 }
 0x485   : > { %16246 = vst [vmem:[%s23654_s9 + $0x10] sm:$0xff] %v16210_v55  ;;  %v16211_v18 = vmul.f32 %v16046_v34, %v15959_v5  ;;  %v16323_v27 = vmul.f32 %v16210_v55, %v16210_v55 }
 0x486   : > { %16244 = vst [vmem:[%s23654_s9] sm:$0xff] %v16208_v38  ;;  %v16209_v6 = vmul.f32 %v16036_v32, %v15957_v50  ;;  %v19792_v7 = vpop.f32.mrb[4].mxu0  ;;  %v16321_v13 = vmul.f32 %v16208_v38, %v16208_v38 }
 0x487   : > { %16247 = vst [vmem:[%s23654_s9 + $0x18] sm:$0xff] %v16211_v18  ;;  %v19842_v10 = vadd.f32 %v19792_v7, %v19064_v35  ;;  %v15714_v12 = vpop.f32.mrb[5].mxu0  ;;  %v16324_v9 = vmul.f32 %v16211_v18, %v16211_v18 }
 0x488   : > { %16245 = vst [vmem:[%s23654_s9 + $0x8] sm:$0xff] %v16209_v6  ;;  %v16280_v14 = vadd.f32 %v16209_v6, %v16208_v38  ;;  %v16322_v15 = vmul.f32 %v16209_v6, %v16209_v6  ;;  %v19843_v16 = vadd.f32 %v15714_v12, %v7622_v36  ;;  %v19793_v17 = vpop.f32.mrb[6].mxu0  ;;  %v23676_v36 = vpop.permute.xlu1 %16115 }
 0x489   : > { %v15962_v24 = vadd.f32 %v19842_v10, %v23644_v58  ;;  %v19844_v19 = vadd.f32 %v19793_v17, %v19065_v37  ;;  %v15717_v20 = vpop.f32.mrb[7].mxu0 }
 0x48a   : > { %v16281_v11 = vadd.f32 %v16280_v14, %v16210_v55  ;;  %v16357_v31 = vadd.f32 %v16322_v15, %v16321_v13  ;;  %v15960_v21 = vadd.f32 %v19843_v16, %v23644_v58  ;;  %v19845_v22 = vadd.f32 %v15717_v20, %v23599_v41 }
 0x48b   : > { %v16214_v25 = vmul.f32 %v23605_v45, %v15962_v24  ;;  %v15963_v26 = vadd.f32 %v19844_v19, %v23644_v58 }
 0x48c   : > { %v16358_v30 = vadd.f32 %v16357_v31, %v16323_v27  ;;  %v16212_v32 = vmul.f32 %v23597_v42, %v15960_v21  ;;  %v16282_v34 = vadd.f32 %v16281_v11, %v16211_v18  ;;  %v15961_v35 = vadd.f32 %v19845_v22, %v23644_v58  ;;  %v23692_v6 = vpop.permute.xlu1 %16125 }
 0x48d   : > { %16250 = vst [vmem:[%s23654_s9 + $0x30] sm:$0xff] %v16214_v25  ;;  %v16215_v37 = vmul.f32 %v23609_v47, %v15963_v26  ;;  %v16327_v3 = vmul.f32 %v16214_v25, %v16214_v25 }
 0x48e   : > { %16248 = vst [vmem:[%s23654_s9 + $0x20] sm:$0xff] %v16212_v32  ;;  %v16283_v41 = vadd.f32 %v16282_v34, %v16212_v32  ;;  %v16325_v45 = vmul.f32 %v16212_v32, %v16212_v32  ;;  %v16359_v57 = vadd.f32 %v16358_v30, %v16324_v9  ;;  %v16213_v59 = vmul.f32 %v23601_v44, %v15961_v35  ;;  %v19796_v33 = vpop.f32.mrb[8].mxu0  ;;  %v23688_v44 = vpop.permute.xlu0 %16120 }
 0x48f   : > { %16251 = vst [vmem:[%s23654_s9 + $0x38] sm:$0xff] %v16215_v37  ;;  %v19846_v60 = vadd.f32 %v19796_v33, %v23603_v43  ;;  %v15730_v42 = vpop.f32.mrb[9].mxu0 }
 0x490   : > { %v16360_v62 = vadd.f32 %v16359_v57, %v16325_v45  ;;  %16249 = vst [vmem:[%s23654_s9 + $0x28] sm:$0xff] %v16213_v59  ;;  %v16284_v40 = vadd.f32 %v16283_v41, %v16213_v59  ;;  %v16326_v0 = vmul.f32 %v16213_v59, %v16213_v59  ;;  %v19847_v1 = vadd.f32 %v15730_v42, %v23607_v46  ;;  %v19797_v2 = vpop.f32.mrb[10].mxu0  ;;  %v23708_v22 = vpop.permute.xlu1 %16135 }
 0x491   : > { %v15966_v47 = vadd.f32 %v19846_v60, %v23644_v58  ;;  %v19848_v55 = vadd.f32 %v19797_v2, %v23611_v48  ;;  %v15733_v5 = vpop.f32.mrb[11].mxu0  ;;  %v16328_v46 = vmul.f32 %v16215_v37, %v16215_v37 }
 0x492   : > { %v16285_v38 = vadd.f32 %v16284_v40, %v16214_v25  ;;  %v16361_v43 = vadd.f32 %v16360_v62, %v16326_v0  ;;  %v15964_v50 = vadd.f32 %v19847_v1, %v23644_v58  ;;  %v19849_v18 = vadd.f32 %v15733_v5, %v23614_v4  ;;  %v23704_v20 = vpop.permute.xlu0 %16130 }
 0x493   : > { %v16218_v7 = vmul.f32 %v23637_v23, %v15966_v47  ;;  %v15967_v10 = vadd.f32 %v19848_v55, %v23644_v58 }
 0x494   : > { %v16362_v12 = vadd.f32 %v16361_v43, %v16327_v3  ;;  %v16216_v48 = vmul.f32 %v23620_v61, %v15964_v50  ;;  %v16286_v13 = vadd.f32 %v16285_v38, %v16215_v37  ;;  %v15965_v14 = vadd.f32 %v19849_v18, %v23644_v58  ;;  %v23724_v40 = vpop.permute.xlu1 %16145 }
 0x495   : > { %16254 = vst [vmem:[%s23654_s9 + $0x50] sm:$0xff] %v16218_v7  ;;  %v16219_v15 = vmul.f32 %v23639_v56, %v15967_v10  ;;  %v16331_v9 = vmul.f32 %v16218_v7, %v16218_v7 }
 0x496   : > { %16252 = vst [vmem:[%s23654_s9 + $0x40] sm:$0xff] %v16216_v48  ;;  %v16287_v4 = vadd.f32 %v16286_v13, %v16216_v48  ;;  %v16329_v16 = vmul.f32 %v16216_v48, %v16216_v48  ;;  %v16363_v17 = vadd.f32 %v16362_v12, %v16328_v46  ;;  %v16217_v27 = vmul.f32 %v23625_v49, %v15965_v14  ;;  %v19800_v24 = vpop.f32.mrb[12].mxu0  ;;  %v23720_v33 = vpop.permute.xlu0 %16140 }
 0x497   : > { %16255 = vst [vmem:[%s23654_s9 + $0x58] sm:$0xff] %v16219_v15  ;;  %v19850_v23 = vadd.f32 %v19800_v24, %v23627_v51  ;;  %v15746_v19 = vpop.f32.mrb[13].mxu0  ;;  %v16332_v35 = vmul.f32 %v16219_v15, %v16219_v15 }
 0x498   : > { %v16364_v61 = vadd.f32 %v16363_v17, %v16329_v16  ;;  %16253 = vst [vmem:[%s23654_s9 + $0x48] sm:$0xff] %v16217_v27  ;;  %v16288_v11 = vadd.f32 %v16287_v4, %v16217_v27  ;;  %v16330_v31 = vmul.f32 %v16217_v27, %v16217_v27  ;;  %v19851_v21 = vadd.f32 %v15746_v19, %v23629_v52  ;;  %v19801_v56 = vpop.f32.mrb[14].mxu0 }
 0x499   : > { %v15970_v49 = vadd.f32 %v19850_v23, %v23644_v58  ;;  %v19852_v25 = vadd.f32 %v19801_v56, %v23631_v53  ;;  %v15749_v51 = vpop.f32.mrb[15].mxu0 }
 0x49a   : > { %v16289_v26 = vadd.f32 %v16288_v11, %v16218_v7  ;;  %v16365_v30 = vadd.f32 %v16364_v61, %v16330_v31  ;;  %v15968_v32 = vadd.f32 %v19851_v21, %v23644_v58  ;;  %v19853_v34 = vadd.f32 %v15749_v51, %v23634_v54  ;;  %v23728_v38 = vpop.permute.xlu0 %16150 }
 0x49b   : > { %v16222_v52 = vmul.f32 %v23660_v29, %v15970_v49  ;;  %v15971_v37 = vadd.f32 %v19852_v25, %v23644_v58 }
 0x49c   : > { %v16366_v41 = vadd.f32 %v16365_v30, %v16331_v9  ;;  %v16220_v45 = vmul.f32 %v23646_v39, %v15968_v32  ;;  %v16290_v57 = vadd.f32 %v16289_v26, %v16219_v15  ;;  %v15969_v53 = vadd.f32 %v19853_v34, %v23644_v58 }
 0x49d   : > { %16258 = vst [vmem:[%s23654_s9 + $0x70] sm:$0xff] %v16222_v52  ;;  %v16223_v59 = vmul.f32 %v23663_v8, %v15971_v37  ;;  %v16335_v8 = vmul.f32 %v16222_v52, %v16222_v52 }
 0x49e   : > { %16256 = vst [vmem:[%s23654_s9 + $0x60] sm:$0xff] %v16220_v45  ;;  %v16291_v54 = vadd.f32 %v16290_v57, %v16220_v45  ;;  %v16333_v60 = vmul.f32 %v16220_v45, %v16220_v45  ;;  %v16367_v42 = vadd.f32 %v16366_v41, %v16332_v35  ;;  %v16221_v29 = vmul.f32 %v23648_v63, %v15969_v53  ;;  %v19804_v62 = vpop.f32.mrb[16].mxu0  ;;  %v23730_v63 = vpop.permute.xlu1 %16155 }
 0x49f   : > { %16259 = vst [vmem:[%s23654_s9 + $0x78] sm:$0xff] %v16223_v59  ;;  %v15762_v39 = vpop.f32.mrb[17].mxu0  ;;  %v16336_v43 = vmul.f32 %v16223_v59, %v16223_v59  ;;  %v23738_v56 = vpop.permute.xlu0 %16160 }
 0x4a0   : > { %v16368_v0 = vadd.f32 %v16367_v42, %v16333_v60  ;;  %16257 = vst [vmem:[%s23654_s9 + $0x68] sm:$0xff] %v16221_v29  ;;  %v16292_v1 = vadd.f32 %v16291_v54, %v16221_v29  ;;  %v16334_v2 = vmul.f32 %v16221_v29, %v16221_v29  ;;  %v19805_v3 = vpop.f32.mrb[18].mxu0 }
 0x4a1   : > { %v15765_v47 = vpop.f32.mrb[19].mxu0 }
 0x4a2   : > { %v16293_v55 = vadd.f32 %v16292_v1, %v16222_v52  ;;  %v16369_v5 = vadd.f32 %v16368_v0, %v16334_v2  ;;  %v23742_v49 = vpop.permute.xlu1 %16165 }
 0x4a4   : > { %v16370_v50 = vadd.f32 %v16369_v5, %v16335_v8  ;;  %v16294_v18 = vadd.f32 %v16293_v55, %v16223_v59  ;;  %v23754_v55 = vpop.permute.xlu0 %16170 }
 0x4a5   : > { %v19128_v46 = vpop.f32.mrb[16].mxu1 }
 0x4a6   : > { %v19854_v7 = vadd.f32 %v19804_v62, %v19128_v46  ;;  %v19808_v10 = vpop.f32.mrb[20].mxu0  ;;  %v8338_v12 = vpop.f32.mrb[17].mxu1  ;;  %v16371_v48 = vadd.f32 %v16370_v50, %v16336_v43 }
 0x4a7   : > { %v19855_v13 = vadd.f32 %v15762_v39, %v8338_v12  ;;  %v15778_v14 = vpop.f32.mrb[21].mxu0  ;;  %v19129_v15 = vpop.f32.mrb[18].mxu1 }
 0x4a8   : > { %v15974_v4 = vadd.f32 %v19854_v7, %v23644_v58  ;;  %v19856_v16 = vadd.f32 %v19805_v3, %v19129_v15  ;;  %v19809_v17 = vpop.f32.mrb[22].mxu0  ;;  %v8341_v27 = vpop.f32.mrb[19].mxu1 }
 0x4a9   : > { %v15972_v24 = vadd.f32 %v19855_v13, %v23644_v58  ;;  %v19857_v23 = vadd.f32 %v15765_v47, %v8341_v27  ;;  %v15781_v19 = vpop.f32.mrb[23].mxu0  ;;  %v23758_v43 = vpop.permute.xlu1 %16175 }
 0x4aa   : > { %v16226_v61 = vmul.f32 %v23688_v44, %v15974_v4  ;;  %v15975_v11 = vadd.f32 %v19856_v16, %v23644_v58 }
 0x4ab   : > { %v16224_v31 = vmul.f32 %v23672_v28, %v15972_v24  ;;  %v15973_v21 = vadd.f32 %v19857_v23, %v23644_v58 }
 0x4ac   : > { %16262 = vst [vmem:[%s23654_s9 + $0x90] sm:$0xff] %v16226_v61  ;;  %v16227_v9 = vmul.f32 %v23692_v6, %v15975_v11  ;;  %v16339_v6 = vmul.f32 %v16226_v61, %v16226_v61 }
 0x4ad   : > { %16260 = vst [vmem:[%s23654_s9 + $0x80] sm:$0xff] %v16224_v31  ;;  %v16295_v25 = vadd.f32 %v16294_v18, %v16224_v31  ;;  %v16337_v51 = vmul.f32 %v16224_v31, %v16224_v31  ;;  %v16225_v26 = vmul.f32 %v23676_v36, %v15973_v21  ;;  %v19132_v44 = vpop.f32.mrb[20].mxu1 }
 0x4ae   : > { %16263 = vst [vmem:[%s23654_s9 + $0x98] sm:$0xff] %v16227_v9  ;;  %v19858_v30 = vadd.f32 %v19808_v10, %v19132_v44  ;;  %v19812_v32 = vpop.f32.mrb[24].mxu0  ;;  %v8354_v28 = vpop.f32.mrb[21].mxu1  ;;  %v16340_v39 = vmul.f32 %v16227_v9, %v16227_v9 }
 0x4af   : > { %v16372_v34 = vadd.f32 %v16371_v48, %v16337_v51  ;;  %16261 = vst [vmem:[%s23654_s9 + $0x88] sm:$0xff] %v16225_v26  ;;  %v16296_v35 = vadd.f32 %v16295_v25, %v16225_v26  ;;  %v16338_v52 = vmul.f32 %v16225_v26, %v16225_v26  ;;  %v19859_v37 = vadd.f32 %v15778_v14, %v8354_v28  ;;  %v15794_v41 = vpop.f32.mrb[25].mxu0  ;;  %v19133_v45 = vpop.f32.mrb[22].mxu1 }
 0x4b0   : > { %v15978_v57 = vadd.f32 %v19858_v30, %v23644_v58  ;;  %v19860_v53 = vadd.f32 %v19809_v17, %v19133_v45  ;;  %v19813_v59 = vpop.f32.mrb[26].mxu0  ;;  %v8357_v54 = vpop.f32.mrb[23].mxu1 }
 0x4b1   : > { %v16297_v36 = vadd.f32 %v16296_v35, %v16226_v61  ;;  %v16373_v60 = vadd.f32 %v16372_v34, %v16338_v52  ;;  %v15976_v42 = vadd.f32 %v19859_v37, %v23644_v58  ;;  %v19861_v29 = vadd.f32 %v15781_v19, %v8357_v54  ;;  %v15797_v62 = vpop.f32.mrb[27].mxu0  ;;  %v16186_v34 = vpop.permute.xlu1 %16185 }
 0x4b2   : > { %v16230_v0 = vmul.f32 %v23720_v33, %v15978_v57  ;;  %v15979_v1 = vadd.f32 %v19860_v53, %v23644_v58 }
 0x4b3   : > { %v16374_v2 = vadd.f32 %v16373_v60, %v16339_v6  ;;  %v16228_v3 = vmul.f32 %v23704_v20, %v15976_v42  ;;  %v16298_v47 = vadd.f32 %v16297_v36, %v16227_v9  ;;  %v15977_v8 = vadd.f32 %v19861_v29, %v23644_v58 }
 0x4b4   : > { %16266 = vst [vmem:[%s23654_s9 + $0xb0] sm:$0xff] %v16230_v0  ;;  %v16231_v5 = vmul.f32 %v23724_v40, %v15979_v1  ;;  %v16343_v16 = vmul.f32 %v16230_v0, %v16230_v0 }
 0x4b5   : > { %16264 = vst [vmem:[%s23654_s9 + $0xa0] sm:$0xff] %v16228_v3  ;;  %v16299_v50 = vadd.f32 %v16298_v47, %v16228_v3  ;;  %v16341_v33 = vmul.f32 %v16228_v3, %v16228_v3  ;;  %v16375_v18 = vadd.f32 %v16374_v2, %v16340_v39  ;;  %v16229_v46 = vmul.f32 %v23708_v22, %v15977_v8  ;;  %v19136_v7 = vpop.f32.mrb[24].mxu1 }
 0x4b6   : > { %16267 = vst [vmem:[%s23654_s9 + $0xb8] sm:$0xff] %v16231_v5  ;;  %v19862_v20 = vadd.f32 %v19812_v32, %v19136_v7  ;;  %v19816_v10 = vpop.f32.mrb[28].mxu0  ;;  %v8370_v12 = vpop.f32.mrb[25].mxu1  ;;  %v16344_v21 = vmul.f32 %v16231_v5, %v16231_v5 }
 0x4b7   : > { %v16376_v48 = vadd.f32 %v16375_v18, %v16341_v33  ;;  %16265 = vst [vmem:[%s23654_s9 + $0xa8] sm:$0xff] %v16229_v46  ;;  %v16300_v13 = vadd.f32 %v16299_v50, %v16229_v46  ;;  %v16342_v14 = vmul.f32 %v16229_v46, %v16229_v46  ;;  %v19863_v15 = vadd.f32 %v15794_v41, %v8370_v12  ;;  %v15810_v4 = vpop.f32.mrb[29].mxu0  ;;  %v19137_v40 = vpop.f32.mrb[26].mxu1 }
 0x4b8   : > { %v15982_v17 = vadd.f32 %v19862_v20, %v23644_v58  ;;  %v19864_v27 = vadd.f32 %v19813_v59, %v19137_v40  ;;  %v19817_v24 = vpop.f32.mrb[30].mxu0  ;;  %v8373_v23 = vpop.f32.mrb[27].mxu1 }
 0x4b9   : > { %v16301_v22 = vadd.f32 %v16300_v13, %v16230_v0  ;;  %v16377_v19 = vadd.f32 %v16376_v48, %v16342_v14  ;;  %v15980_v61 = vadd.f32 %v19863_v15, %v23644_v58  ;;  %v19865_v11 = vadd.f32 %v15797_v62, %v8373_v23  ;;  %v15813_v31 = vpop.f32.mrb[31].mxu0  ;;  %v16181_v32 = vpop.permute.xlu0 %16180 }
 0x4ba   : > { %v16234_v9 = vmul.f32 %v23738_v56, %v15982_v17  ;;  %v15983_v25 = vadd.f32 %v19864_v27, %v23644_v58 }
 0x4bb   : > { %v16378_v51 = vadd.f32 %v16377_v19, %v16343_v16  ;;  %v16232_v26 = vmul.f32 %v23728_v38, %v15980_v61  ;;  %v16302_v44 = vadd.f32 %v16301_v22, %v16231_v5  ;;  %v15981_v30 = vadd.f32 %v19865_v11, %v23644_v58 }
 0x4bc   : > { %16270 = vst [vmem:[%s23654_s9 + $0xd0] sm:$0xff] %v16234_v9  ;;  %v16235_v28 = vmul.f32 %v23742_v49, %v15983_v25  ;;  %v16347_v49 = vmul.f32 %v16234_v9, %v16234_v9 }
 0x4bd   : > { %16268 = vst [vmem:[%s23654_s9 + $0xc0] sm:$0xff] %v16232_v26  ;;  %v16303_v35 = vadd.f32 %v16302_v44, %v16232_v26  ;;  %v16345_v52 = vmul.f32 %v16232_v26, %v16232_v26  ;;  %v16379_v37 = vadd.f32 %v16378_v51, %v16344_v21  ;;  %v16233_v56 = vmul.f32 %v23730_v63, %v15981_v30  ;;  %v19140_v41 = vpop.f32.mrb[28].mxu1  ;;  %v16191_v50 = vpop.permute.xlu0 %16190 }
 0x4be   : > { %16271 = vst [vmem:[%s23654_s9 + $0xd8] sm:$0xff] %v16235_v28  ;;  %v19866_v45 = vadd.f32 %v19816_v10, %v19140_v41  ;;  %v19820_v6 = vpop.f32.mrb[32].mxu0  ;;  %v8386_v38 = vpop.f32.mrb[29].mxu1  ;;  %v16348_v47 = vmul.f32 %v16235_v28, %v16235_v28 }
 0x4bf   : > { %v16380_v57 = vadd.f32 %v16379_v37, %v16345_v52  ;;  %16269 = vst [vmem:[%s23654_s9 + $0xc8] sm:$0xff] %v16233_v56  ;;  %v16304_v53 = vadd.f32 %v16303_v35, %v16233_v56  ;;  %v16346_v59 = vmul.f32 %v16233_v56, %v16233_v56  ;;  %v19867_v54 = vadd.f32 %v15810_v4, %v8386_v38  ;;  %v15826_v36 = vpop.f32.mrb[33].mxu0  ;;  %v19141_v60 = vpop.f32.mrb[30].mxu1 }
 0x4c0   : > { %v15986_v42 = vadd.f32 %v19866_v45, %v23644_v58  ;;  %v19868_v29 = vadd.f32 %v19817_v24, %v19141_v60  ;;  %v19821_v62 = vpop.f32.mrb[34].mxu0  ;;  %v8389_v39 = vpop.f32.mrb[31].mxu1 }
 0x4c1   : > { %v16305_v63 = vadd.f32 %v16304_v53, %v16234_v9  ;;  %v16381_v0 = vadd.f32 %v16380_v57, %v16346_v59  ;;  %v15984_v1 = vadd.f32 %v19867_v54, %v23644_v58  ;;  %v19869_v2 = vadd.f32 %v15813_v31, %v8389_v39  ;;  %v15829_v3 = vpop.f32.mrb[35].mxu0  ;;  %v16196_v10 = vpop.permute.xlu1 %16195 }
 0x4c2   : > { %v16238_v8 = vmul.f32 %v16181_v32, %v15986_v42  ;;  %v15987_v5 = vadd.f32 %v19868_v29, %v23644_v58  ;;  %v16201_v11 = vpop.permute.xlu0 %16200 }
 0x4c3   : > { %v16382_v33 = vadd.f32 %v16381_v0, %v16347_v49  ;;  %v16236_v18 = vmul.f32 %v23754_v55, %v15984_v1  ;;  %v16306_v46 = vadd.f32 %v16305_v63, %v16235_v28  ;;  %v15985_v7 = vadd.f32 %v19869_v2, %v23644_v58 }
 0x4c4   : > { %16274 = vst [vmem:[%s23654_s9 + $0xf0] sm:$0xff] %v16238_v8  ;;  %v16239_v20 = vmul.f32 %v16186_v34, %v15987_v5  ;;  %v16351_v23 = vmul.f32 %v16238_v8, %v16238_v8 }
 0x4c5   : > { %16272 = vst [vmem:[%s23654_s9 + $0xe0] sm:$0xff] %v16236_v18  ;;  %v16307_v12 = vadd.f32 %v16306_v46, %v16236_v18  ;;  %v16349_v48 = vmul.f32 %v16236_v18, %v16236_v18  ;;  %v16383_v13 = vadd.f32 %v16382_v33, %v16348_v47  ;;  %v16237_v14 = vmul.f32 %v23758_v43, %v15985_v7  ;;  %v19144_v15 = vpop.f32.mrb[32].mxu1  ;;  %v16206_v44 = vpop.permute.xlu1 %16205 }
 0x4c6   : > { %16275 = vst [vmem:[%s23654_s9 + $0xf8] sm:$0xff] %v16239_v20  ;;  %v19870_v4 = vadd.f32 %v19820_v6, %v19144_v15  ;;  %v8402_v40 = vpop.f32.mrb[33].mxu1  ;;  %v16352_v25 = vmul.f32 %v16239_v20, %v16239_v20 }
 0x4c7   : > { %v16384_v16 = vadd.f32 %v16383_v13, %v16349_v48  ;;  %16273 = vst [vmem:[%s23654_s9 + $0xe8] sm:$0xff] %v16237_v14  ;;  %v16308_v55 = vadd.f32 %v16307_v12, %v16237_v14  ;;  %v16350_v17 = vmul.f32 %v16237_v14, %v16237_v14  ;;  %v19871_v27 = vadd.f32 %v15826_v36, %v8402_v40  ;;  %v19145_v24 = vpop.f32.mrb[34].mxu1 }
 0x4c8   : > { %v15990_v22 = vadd.f32 %v19870_v4, %v23644_v58  ;;  %v19872_v19 = vadd.f32 %v19821_v62, %v19145_v24  ;;  %v8405_v61 = vpop.f32.mrb[35].mxu1 }
 0x4c9   : > { %v16309_v31 = vadd.f32 %v16308_v55, %v16238_v8  ;;  %v16385_v43 = vadd.f32 %v16384_v16, %v16350_v17  ;;  %v15988_v21 = vadd.f32 %v19871_v27, %v23644_v58  ;;  %v19873_v9 = vadd.f32 %v15829_v3, %v8405_v61 }
 0x4ca   : > { %v16242_v51 = vmul.f32 %v16201_v11, %v15990_v22  ;;  %v15991_v26 = vadd.f32 %v19872_v19, %v23644_v58 }
 0x4cb   : > { %v16386_v30 = vadd.f32 %v16385_v43, %v16351_v23  ;;  %v16240_v32 = vmul.f32 %v16191_v50, %v15988_v21  ;;  %v16310_v28 = vadd.f32 %v16309_v31, %v16239_v20  ;;  %v15989_v34 = vadd.f32 %v19873_v9, %v23644_v58 }
 0x4cc   : > { %16278 = vst [vmem:[%s23654_s9 + $0x110] sm:$0xff] %v16242_v51  ;;  %v16243_v35 = vmul.f32 %v16206_v44, %v15991_v26  ;;  %v16355_v57 = vmul.f32 %v16242_v51, %v16242_v51 }
 0x4cd   : > { %16276 = vst [vmem:[%s23654_s9 + $0x100] sm:$0xff] %v16240_v32  ;;  %v16311_v52 = vadd.f32 %v16310_v28, %v16240_v32  ;;  %v16353_v37 = vmul.f32 %v16240_v32, %v16240_v32  ;;  %v16387_v56 = vadd.f32 %v16386_v30, %v16352_v25  ;;  %v16241_v41 = vmul.f32 %v16196_v10, %v15989_v34 }
 0x4ce   : > { %16279 = vst [vmem:[%s23654_s9 + $0x118] sm:$0xff] %v16243_v35  ;;  %v16356_v54 = vmul.f32 %v16243_v35, %v16243_v35 }
 0x4cf   : > { %v16388_v45 = vadd.f32 %v16387_v56, %v16353_v37  ;;  %16277 = vst [vmem:[%s23654_s9 + $0x108] sm:$0xff] %v16241_v41  ;;  %v16312_v6 = vadd.f32 %v16311_v52, %v16241_v41  ;;  %v16354_v38 = vmul.f32 %v16241_v41, %v16241_v41 }
 0x4d1   : > { %v16313_v53 = vadd.f32 %v16312_v6, %v16242_v51  ;;  %v16389_v59 = vadd.f32 %v16388_v45, %v16354_v38 }
 0x4d3   : > { %v16314_v36 = vadd.f32 %v16313_v53, %v16243_v35  ;;  %v16390_v58 = vadd.f32 %v16389_v59, %v16355_v57 }
 0x4d5   : > { %v16315_v60 = vrot.slane %v16314_v36, 4  ;;  %v16391_v49 = vadd.f32 %v16390_v58, %v16356_v54 }
 0x4d7   : > { %v16316_v42 = vadd.f32 %v16315_v60, %v16314_v36  ;;  %v16392_v29 = vrot.slane %v16391_v49, 4 }
 0x4d9   : > { %v16317_v62 = vrot.slane %v16316_v42, 2  ;;  %v16393_v39 = vadd.f32 %v16392_v29, %v16391_v49 }
 0x4db   : > { %v16318_v63 = vadd.f32 %v16317_v62, %v16316_v42  ;;  %v16394_v0 = vrot.slane %v16393_v39, 2 }
 0x4dd   : > { %v16319_v1 = vrot.slane %v16318_v63, 1  ;;  %v16395_v2 = vadd.f32 %v16394_v0, %v16393_v39 }
 0x4df   : > { %v16396_v3 = vrot.slane %v16395_v2, 1  ;;  %v16320_v47 = vadd.f32 %v16319_v1, %v16318_v63 }
 0x4e1   : > { %v16397_v8 = vadd.f32 %v16396_v3, %v16395_v2 }
 0x4e3   : > { %v16399_v5 = vsel %vm16398_vm6, %v16320_v47, %v16397_v8 }
 0x4e4   : > { %v16401_v50 = vsel %vm16400_vm7, %v16399_v5, 0.0 }
 0x4e5   : > { %16402 = vst [vmem:[%s417_s22] sm:$0xff] %v16401_v50 }
 0x4e6 PF: > { %s18_s28 = sadd.s32 1, %s21594_s28   ;;  %s23822_s24 = smov %s21586_s26 }
 0x4e7   : > { %p15_p10 = scmp.ge.s32.totalorder %s18_s28, 34   ;;  %s23823_s25 = smov %s21590_s27 }
 0x4e8   : > { %s23824_s26 = smov %s23827_s29  ;;  %s23825_s27 = smov %s23831_s30 }
 0x4e9   :  { %17 = sbr.rel (!%p15_p10) target bundleno = 3 (0x3), region = 118 }

// kernel: res_conv_block_unetr.5
= control target key start
LH: loop header
LB: loop body
LE: loop exit
PB: predicated region body
PF: predicated region fallthrough
CT: control target
= control target key end

     0   :  { %s1188_s12 = smov 0   ;;  %s1447_s0 = inlined_call_operand.vmem [shape: f32[8192,128], index: 0, kind: input, shape index: {}]   ;;  %s1448_s1 = inlined_call_operand.vmem [shape: f32[1,128], index: 1, kind: input, shape index: {}]   ;;  %s1449_s2 = inlined_call_operand.vmem [shape: f32[1,128], index: 2, kind: input, shape index: {}]   ;;  %s1450_s3 = inlined_call_operand.vmem [shape: bf16[8192,128], index: 3, kind: output, shape index: {}]  }
   0x1 LB: > { %s820_s13 = sadd.s32 4294967295, %s1166_s12   ;;  %p824_p0 = scmp.ge.s32.totalorder %s1166_s12, 1  ;;  %s1166_s12 = sphi %s1188_s12, %s13_s12  }
   0x2   : > { %p138_p1 = scmp.lt.s32.totalorder %s1166_s12, 17 }
   0x4   : > { %p139_p2 = pnand %p824_p0, %p138_p1 }
   0x5   : > { %s825_s14 = sshll.u32 (!%p139_p2), %s820_s13, 6  ;;  %v1202_v0 = vld [vmem:[%s1448_s1] ss:$0 sm:$0xff] (!%p139_p2) }
   0x6   : > { %142 = sbr.rel (%p139_p2) target bundleno = 79 (0x4f), region = 32  ;;  %p163_p3 = scmp.lt.s32.totalorder (!%p139_p2), %s825_s14, 1023  ;;  %v1212_v1 = vld [vmem:[%s1449_s2] ss:$0 sm:$0xff] (!%p139_p2) }
   0xd   : > { %s1452_s14 = smov (!%p163_p3, %s825_s14), 1023 }
   0xe   : > { %s826_s15 = sshll.u32 %s1452_s14, 3  ;;  %s828_s23 = sshll.u32 %s1452_s14, 2 }
   0xf   : > { %s1207_s20 = scalar_lea.vmem %s1447_s0, %s826_s15  ;;  %s1244_s26 = scalar_lea.vmem %s1450_s3, %s828_s23 }
  0x10   : > { %v174_v2 = vld [vmem:[%s1207_s20] sm:$0xff]  ;;  %v175_v3 = vld [vmem:[%s1207_s20 + $0x8] sm:$0xff]  ;;  %v176_v4 = vld [vmem:[%s1207_s20 + $0x10] sm:$0xff] }
  0x11   : > { %v245_v5 = vmul.f32 %v1202_v0, %v174_v2  ;;  %v246_v6 = vmul.f32 %v1202_v0, %v175_v3  ;;  %v177_v7 = vld [vmem:[%s1207_s20 + $0x18] sm:$0xff]  ;;  %v247_v8 = vmul.f32 %v1202_v0, %v176_v4  ;;  %v178_v9 = vld [vmem:[%s1207_s20 + $0x20] sm:$0xff]  ;;  %v179_v10 = vld [vmem:[%s1207_s20 + $0x28] sm:$0xff] }
  0x12   : > { %v248_v11 = vmul.f32 %v1202_v0, %v177_v7  ;;  %v249_v12 = vmul.f32 %v1202_v0, %v178_v9  ;;  %v250_v13 = vmul.f32 %v1202_v0, %v179_v10  ;;  %v180_v14 = vld [vmem:[%s1207_s20 + $0x30] sm:$0xff]  ;;  %v181_v15 = vld [vmem:[%s1207_s20 + $0x38] sm:$0xff]  ;;  %v182_v24 = vld [vmem:[%s1207_s20 + $0x40] sm:$0xff] }
  0x13   : > { %v316_v16 = vadd.f32 %v1212_v1, %v245_v5  ;;  %v317_v17 = vadd.f32 %v1212_v1, %v246_v6  ;;  %v318_v18 = vadd.f32 %v1212_v1, %v247_v8  ;;  %v251_v19 = vmul.f32 %v1202_v0, %v180_v14  ;;  %v183_v25 = vld [vmem:[%s1207_s20 + $0x48] sm:$0xff]  ;;  %v184_v30 = vld [vmem:[%s1207_s20 + $0x50] sm:$0xff]  ;;  %v185_v35 = vld [vmem:[%s1207_s20 + $0x58] sm:$0xff] }
  0x14   : > { %v319_v20 = vadd.f32 %v1212_v1, %v248_v11  ;;  %v320_v21 = vadd.f32 %v1212_v1, %v249_v12  ;;  %v321_v22 = vadd.f32 %v1212_v1, %v250_v13  ;;  %v252_v23 = vmul.f32 %v1202_v0, %v181_v15  ;;  %v186_v36 = vld [vmem:[%s1207_s20 + $0x60] sm:$0xff]  ;;  %v187_v41 = vld [vmem:[%s1207_s20 + $0x68] sm:$0xff]  ;;  %v188_v42 = vld [vmem:[%s1207_s20 + $0x70] sm:$0xff] }
  0x15   : > { %v380_v26 = vmax.f32 %v316_v16, 0.0  ;;  %v381_v27 = vmax.f32 %v317_v17, 0.0  ;;  %v382_v28 = vmax.f32 %v318_v18, 0.0  ;;  %v322_v29 = vadd.f32 %v1212_v1, %v251_v19  ;;  %v189_v51 = vld [vmem:[%s1207_s20 + $0x78] sm:$0xff]  ;;  %v190_v56 = vld [vmem:[%s1207_s20 + $0x80] sm:$0xff]  ;;  %v191_v61 = vld [vmem:[%s1207_s20 + $0x88] sm:$0xff] }
  0x16   : > { %v383_v31 = vmax.f32 %v319_v20, 0.0  ;;  %v384_v32 = vmax.f32 %v320_v21, 0.0  ;;  %v385_v33 = vmax.f32 %v321_v22, 0.0  ;;  %v323_v34 = vadd.f32 %v1212_v1, %v252_v23  ;;  %v192_v4 = vld [vmem:[%s1207_s20 + $0x90] sm:$0xff]  ;;  %v193_v5 = vld [vmem:[%s1207_s20 + $0x98] sm:$0xff]  ;;  %v194_v10 = vld [vmem:[%s1207_s20 + $0xa0] sm:$0xff] }
  0x17   : > { %v964_v37 = vpack.c.bf16 %v381_v27, %v380_v26  ;;  %v386_v38 = vmax.f32 %v322_v29, 0.0  ;;  %v253_v39 = vmul.f32 %v1202_v0, %v182_v24  ;;  %v254_v40 = vmul.f32 %v1202_v0, %v183_v25  ;;  %v195_v15 = vld [vmem:[%s1207_s20 + $0xa8] sm:$0xff]  ;;  %v196_v20 = vld [vmem:[%s1207_s20 + $0xb0] sm:$0xff]  ;;  %v197_v25 = vld [vmem:[%s1207_s20 + $0xb8] sm:$0xff] }
  0x18   : > { %v969_v43 = vpack.c.bf16 %v383_v31, %v382_v28  ;;  %v974_v44 = vpack.c.bf16 %v385_v33, %v384_v32  ;;  %v387_v45 = vmax.f32 %v323_v34, 0.0  ;;  %v255_v46 = vmul.f32 %v1202_v0, %v184_v30  ;;  %v198_v30 = vld [vmem:[%s1207_s20 + $0xc0] sm:$0xff] }
  0x19   : > { %965 = vst [vmem:[%s1244_s26] sm:$0xff] %v964_v37   ;;  %v324_v47 = vadd.f32 %v1212_v1, %v253_v39  ;;  %v325_v48 = vadd.f32 %v1212_v1, %v254_v40  ;;  %v256_v49 = vmul.f32 %v1202_v0, %v185_v35  ;;  %v257_v50 = vmul.f32 %v1202_v0, %v186_v36  ;;  %v199_v35 = vld [vmem:[%s1207_s20 + $0xc8] sm:$0xff]  ;;  %v200_v40 = vld [vmem:[%s1207_s20 + $0xd0] sm:$0xff] }
  0x1a   : > { %1121 = vst [vmem:[%s1244_s26 + $0x8] sm:$0xff] %v969_v43   ;;  %1122 = vst [vmem:[%s1244_s26 + $0x10] sm:$0xff] %v974_v44   ;;  %v979_v52 = vpack.c.bf16 %v387_v45, %v386_v38  ;;  %v326_v53 = vadd.f32 %v1212_v1, %v255_v46  ;;  %v258_v54 = vmul.f32 %v1202_v0, %v187_v41  ;;  %v201_v41 = vld [vmem:[%s1207_s20 + $0xd8] sm:$0xff]  ;;  %v202_v46 = vld [vmem:[%s1207_s20 + $0xe0] sm:$0xff] }
  0x1b   : > { %v259_v55 = vmul.f32 %v1202_v0, %v188_v42  ;;  %v388_v57 = vmax.f32 %v324_v47, 0.0  ;;  %v389_v58 = vmax.f32 %v325_v48, 0.0  ;;  %v327_v59 = vadd.f32 %v1212_v1, %v256_v49 }
  0x1c   : > { %v328_v60 = vadd.f32 %v1212_v1, %v257_v50  ;;  %1123 = vst [vmem:[%s1244_s26 + $0x18] sm:$0xff] %v979_v52   ;;  %v390_v62 = vmax.f32 %v326_v53, 0.0  ;;  %v329_v63 = vadd.f32 %v1212_v1, %v258_v54  ;;  %v260_v2 = vmul.f32 %v1202_v0, %v189_v51  ;;  %v203_v51 = vld [vmem:[%s1207_s20 + $0xe8] sm:$0xff] }
  0x1d   : > { %v330_v3 = vadd.f32 %v1212_v1, %v259_v55  ;;  %v984_v6 = vpack.c.bf16 %v389_v58, %v388_v57  ;;  %v391_v7 = vmax.f32 %v327_v59, 0.0  ;;  %v261_v9 = vmul.f32 %v1202_v0, %v190_v56  ;;  %v204_v56 = vld [vmem:[%s1207_s20 + $0xf0] sm:$0xff] }
  0x1e   : > { %v392_v8 = vmax.f32 %v328_v60, 0.0  ;;  %v393_v11 = vmax.f32 %v329_v63, 0.0  ;;  %v331_v12 = vadd.f32 %v1212_v1, %v260_v2  ;;  %v262_v14 = vmul.f32 %v1202_v0, %v191_v61  ;;  %v205_v61 = vld [vmem:[%s1207_s20 + $0xf8] sm:$0xff] }
  0x1f   : > { %v394_v13 = vmax.f32 %v330_v3, 0.0  ;;  %1124 = vst [vmem:[%s1244_s26 + $0x20] sm:$0xff] %v984_v6   ;;  %v989_v16 = vpack.c.bf16 %v391_v7, %v390_v62  ;;  %v332_v17 = vadd.f32 %v1212_v1, %v261_v9  ;;  %v263_v18 = vmul.f32 %v1202_v0, %v192_v4  ;;  %v206_v4 = vld [vmem:[%s1207_s20 + $0x100] sm:$0xff]  ;;  %v207_v9 = vld [vmem:[%s1207_s20 + $0x108] sm:$0xff] }
  0x20   : > { %v264_v19 = vmul.f32 %v1202_v0, %v193_v5  ;;  %v994_v21 = vpack.c.bf16 %v393_v11, %v392_v8  ;;  %v395_v22 = vmax.f32 %v331_v12, 0.0  ;;  %v333_v23 = vadd.f32 %v1212_v1, %v262_v14  ;;  %v208_v14 = vld [vmem:[%s1207_s20 + $0x110] sm:$0xff] }
  0x21   : > { %v265_v24 = vmul.f32 %v1202_v0, %v194_v10  ;;  %1125 = vst [vmem:[%s1244_s26 + $0x28] sm:$0xff] %v989_v16   ;;  %v396_v26 = vmax.f32 %v332_v17, 0.0  ;;  %v334_v27 = vadd.f32 %v1212_v1, %v263_v18  ;;  %v266_v29 = vmul.f32 %v1202_v0, %v195_v15  ;;  %v209_v15 = vld [vmem:[%s1207_s20 + $0x118] sm:$0xff] }
  0x22   : > { %v335_v28 = vadd.f32 %v1212_v1, %v264_v19  ;;  %1126 = vst [vmem:[%s1244_s26 + $0x30] sm:$0xff] %v994_v21   ;;  %v999_v31 = vpack.c.bf16 %v395_v22, %v394_v13  ;;  %v397_v32 = vmax.f32 %v333_v23, 0.0  ;;  %v267_v34 = vmul.f32 %v1202_v0, %v196_v20  ;;  %v210_v20 = vld [vmem:[%s1207_s20 + $0x120] sm:$0xff] }
  0x23   : > { %v336_v33 = vadd.f32 %v1212_v1, %v265_v24  ;;  %v398_v36 = vmax.f32 %v334_v27, 0.0  ;;  %v337_v38 = vadd.f32 %v1212_v1, %v266_v29  ;;  %v268_v39 = vmul.f32 %v1202_v0, %v197_v25  ;;  %v211_v25 = vld [vmem:[%s1207_s20 + $0x128] sm:$0xff] }
  0x24   : > { %v399_v37 = vmax.f32 %v335_v28, 0.0  ;;  %1127 = vst [vmem:[%s1244_s26 + $0x38] sm:$0xff] %v999_v31   ;;  %v1004_v42 = vpack.c.bf16 %v397_v32, %v396_v26  ;;  %v338_v44 = vadd.f32 %v1212_v1, %v267_v34  ;;  %v269_v45 = vmul.f32 %v1202_v0, %v198_v30  ;;  %v212_v30 = vld [vmem:[%s1207_s20 + $0x130] sm:$0xff] }
  0x25   : > { %v400_v43 = vmax.f32 %v336_v33, 0.0  ;;  %v401_v48 = vmax.f32 %v337_v38, 0.0  ;;  %v339_v49 = vadd.f32 %v1212_v1, %v268_v39  ;;  %v270_v50 = vmul.f32 %v1202_v0, %v199_v35  ;;  %v213_v35 = vld [vmem:[%s1207_s20 + $0x138] sm:$0xff] }
  0x26   : > { %v1009_v47 = vpack.c.bf16 %v399_v37, %v398_v36  ;;  %1128 = vst [vmem:[%s1244_s26 + $0x40] sm:$0xff] %v1004_v42   ;;  %v402_v52 = vmax.f32 %v338_v44, 0.0  ;;  %v340_v53 = vadd.f32 %v1212_v1, %v269_v45  ;;  %v271_v54 = vmul.f32 %v1202_v0, %v200_v40  ;;  %v214_v40 = vld [vmem:[%s1207_s20 + $0x140] sm:$0xff]  ;;  %v215_v45 = vld [vmem:[%s1207_s20 + $0x148] sm:$0xff] }
  0x27   : > { %v272_v55 = vmul.f32 %v1202_v0, %v201_v41  ;;  %v1014_v57 = vpack.c.bf16 %v401_v48, %v400_v43  ;;  %v403_v58 = vmax.f32 %v339_v49, 0.0  ;;  %v341_v59 = vadd.f32 %v1212_v1, %v270_v50  ;;  %v216_v50 = vld [vmem:[%s1207_s20 + $0x150] sm:$0xff] }
  0x28   : > { %1129 = vst [vmem:[%s1244_s26 + $0x48] sm:$0xff] %v1009_v47   ;;  %v273_v60 = vmul.f32 %v1202_v0, %v202_v46  ;;  %v404_v62 = vmax.f32 %v340_v53, 0.0  ;;  %v342_v63 = vadd.f32 %v1212_v1, %v271_v54  ;;  %v274_v3 = vmul.f32 %v1202_v0, %v203_v51  ;;  %v217_v51 = vld [vmem:[%s1207_s20 + $0x158] sm:$0xff] }
  0x29   : > { %v343_v2 = vadd.f32 %v1212_v1, %v272_v55  ;;  %1130 = vst [vmem:[%s1244_s26 + $0x50] sm:$0xff] %v1014_v57   ;;  %v1019_v5 = vpack.c.bf16 %v403_v58, %v402_v52  ;;  %v405_v6 = vmax.f32 %v341_v59, 0.0  ;;  %v275_v8 = vmul.f32 %v1202_v0, %v204_v56  ;;  %v218_v56 = vld [vmem:[%s1207_s20 + $0x160] sm:$0xff] }
  0x2a   : > { %v344_v7 = vadd.f32 %v1212_v1, %v273_v60  ;;  %v406_v10 = vmax.f32 %v342_v63, 0.0  ;;  %v345_v12 = vadd.f32 %v1212_v1, %v274_v3  ;;  %v276_v13 = vmul.f32 %v1202_v0, %v205_v61  ;;  %v219_v61 = vld [vmem:[%s1207_s20 + $0x168] sm:$0xff] }
  0x2b   : > { %v407_v11 = vmax.f32 %v343_v2, 0.0  ;;  %1131 = vst [vmem:[%s1244_s26 + $0x58] sm:$0xff] %v1019_v5   ;;  %v1024_v16 = vpack.c.bf16 %v405_v6, %v404_v62  ;;  %v346_v18 = vadd.f32 %v1212_v1, %v275_v8  ;;  %v277_v19 = vmul.f32 %v1202_v0, %v206_v4  ;;  %v220_v4 = vld [vmem:[%s1207_s20 + $0x170] sm:$0xff] }
  0x2c   : > { %v408_v17 = vmax.f32 %v344_v7, 0.0  ;;  %v409_v22 = vmax.f32 %v345_v12, 0.0  ;;  %v347_v23 = vadd.f32 %v1212_v1, %v276_v13  ;;  %v278_v24 = vmul.f32 %v1202_v0, %v207_v9  ;;  %v221_v9 = vld [vmem:[%s1207_s20 + $0x178] sm:$0xff] }
  0x2d   : > { %v1029_v21 = vpack.c.bf16 %v407_v11, %v406_v10  ;;  %1132 = vst [vmem:[%s1244_s26 + $0x60] sm:$0xff] %v1024_v16   ;;  %v410_v26 = vmax.f32 %v346_v18, 0.0  ;;  %v348_v27 = vadd.f32 %v1212_v1, %v277_v19  ;;  %v279_v28 = vmul.f32 %v1202_v0, %v208_v14  ;;  %v222_v14 = vld [vmem:[%s1207_s20 + $0x180] sm:$0xff]  ;;  %v223_v19 = vld [vmem:[%s1207_s20 + $0x188] sm:$0xff] }
  0x2e   : > { %v280_v29 = vmul.f32 %v1202_v0, %v209_v15  ;;  %v1034_v31 = vpack.c.bf16 %v409_v22, %v408_v17  ;;  %v411_v32 = vmax.f32 %v347_v23, 0.0  ;;  %v349_v33 = vadd.f32 %v1212_v1, %v278_v24  ;;  %v224_v24 = vld [vmem:[%s1207_s20 + $0x190] sm:$0xff] }
  0x2f   : > { %1133 = vst [vmem:[%s1244_s26 + $0x68] sm:$0xff] %v1029_v21   ;;  %v281_v34 = vmul.f32 %v1202_v0, %v210_v20  ;;  %v412_v36 = vmax.f32 %v348_v27, 0.0  ;;  %v350_v37 = vadd.f32 %v1212_v1, %v279_v28  ;;  %v282_v39 = vmul.f32 %v1202_v0, %v211_v25  ;;  %v225_v25 = vld [vmem:[%s1207_s20 + $0x198] sm:$0xff] }
  0x30   : > { %v351_v38 = vadd.f32 %v1212_v1, %v280_v29  ;;  %1134 = vst [vmem:[%s1244_s26 + $0x70] sm:$0xff] %v1034_v31   ;;  %v1039_v41 = vpack.c.bf16 %v411_v32, %v410_v26  ;;  %v413_v42 = vmax.f32 %v349_v33, 0.0  ;;  %v283_v44 = vmul.f32 %v1202_v0, %v212_v30  ;;  %v226_v30 = vld [vmem:[%s1207_s20 + $0x1a0] sm:$0xff] }
  0x31   : > { %v352_v43 = vadd.f32 %v1212_v1, %v281_v34  ;;  %v414_v46 = vmax.f32 %v350_v37, 0.0  ;;  %v353_v48 = vadd.f32 %v1212_v1, %v282_v39  ;;  %v284_v49 = vmul.f32 %v1202_v0, %v213_v35  ;;  %v227_v35 = vld [vmem:[%s1207_s20 + $0x1a8] sm:$0xff] }
  0x32   : > { %v415_v47 = vmax.f32 %v351_v38, 0.0  ;;  %1135 = vst [vmem:[%s1244_s26 + $0x78] sm:$0xff] %v1039_v41   ;;  %v1044_v52 = vpack.c.bf16 %v413_v42, %v412_v36  ;;  %v354_v54 = vadd.f32 %v1212_v1, %v283_v44  ;;  %v285_v55 = vmul.f32 %v1202_v0, %v214_v40  ;;  %v228_v40 = vld [vmem:[%s1207_s20 + $0x1b0] sm:$0xff] }
  0x33   : > { %v416_v53 = vmax.f32 %v352_v43, 0.0  ;;  %v417_v58 = vmax.f32 %v353_v48, 0.0  ;;  %v355_v59 = vadd.f32 %v1212_v1, %v284_v49  ;;  %v286_v60 = vmul.f32 %v1202_v0, %v215_v45  ;;  %v229_v45 = vld [vmem:[%s1207_s20 + $0x1b8] sm:$0xff] }
  0x34   : > { %v1049_v57 = vpack.c.bf16 %v415_v47, %v414_v46  ;;  %1136 = vst [vmem:[%s1244_s26 + $0x80] sm:$0xff] %v1044_v52   ;;  %v418_v62 = vmax.f32 %v354_v54, 0.0  ;;  %v356_v63 = vadd.f32 %v1212_v1, %v285_v55  ;;  %v287_v2 = vmul.f32 %v1202_v0, %v216_v50  ;;  %v230_v50 = vld [vmem:[%s1207_s20 + $0x1c0] sm:$0xff]  ;;  %v231_v55 = vld [vmem:[%s1207_s20 + $0x1c8] sm:$0xff] }
  0x35   : > { %v288_v3 = vmul.f32 %v1202_v0, %v217_v51  ;;  %v1054_v5 = vpack.c.bf16 %v417_v58, %v416_v53  ;;  %v419_v6 = vmax.f32 %v355_v59, 0.0  ;;  %v357_v7 = vadd.f32 %v1212_v1, %v286_v60  ;;  %v232_v60 = vld [vmem:[%s1207_s20 + $0x1d0] sm:$0xff] }
  0x36   : > { %1137 = vst [vmem:[%s1244_s26 + $0x88] sm:$0xff] %v1049_v57   ;;  %v289_v8 = vmul.f32 %v1202_v0, %v218_v56  ;;  %v420_v10 = vmax.f32 %v356_v63, 0.0  ;;  %v358_v11 = vadd.f32 %v1212_v1, %v287_v2  ;;  %v290_v13 = vmul.f32 %v1202_v0, %v219_v61  ;;  %v233_v61 = vld [vmem:[%s1207_s20 + $0x1d8] sm:$0xff] }
  0x37   : > { %v359_v12 = vadd.f32 %v1212_v1, %v288_v3  ;;  %1138 = vst [vmem:[%s1244_s26 + $0x90] sm:$0xff] %v1054_v5   ;;  %v1059_v15 = vpack.c.bf16 %v419_v6, %v418_v62  ;;  %v421_v16 = vmax.f32 %v357_v7, 0.0  ;;  %v291_v18 = vmul.f32 %v1202_v0, %v220_v4  ;;  %v234_v4 = vld [vmem:[%s1207_s20 + $0x1e0] sm:$0xff] }
  0x38   : > { %v360_v17 = vadd.f32 %v1212_v1, %v289_v8  ;;  %v422_v20 = vmax.f32 %v358_v11, 0.0  ;;  %v361_v22 = vadd.f32 %v1212_v1, %v290_v13  ;;  %v292_v23 = vmul.f32 %v1202_v0, %v221_v9  ;;  %v235_v9 = vld [vmem:[%s1207_s20 + $0x1e8] sm:$0xff] }
  0x39   : > { %v423_v21 = vmax.f32 %v359_v12, 0.0  ;;  %1139 = vst [vmem:[%s1244_s26 + $0x98] sm:$0xff] %v1059_v15   ;;  %v1064_v26 = vpack.c.bf16 %v421_v16, %v420_v10  ;;  %v362_v28 = vadd.f32 %v1212_v1, %v291_v18  ;;  %v293_v29 = vmul.f32 %v1202_v0, %v222_v14  ;;  %v236_v14 = vld [vmem:[%s1207_s20 + $0x1f0] sm:$0xff] }
  0x3a   : > { %v424_v27 = vmax.f32 %v360_v17, 0.0  ;;  %v425_v32 = vmax.f32 %v361_v22, 0.0  ;;  %v363_v33 = vadd.f32 %v1212_v1, %v292_v23  ;;  %v294_v34 = vmul.f32 %v1202_v0, %v223_v19  ;;  %v237_v19 = vld [vmem:[%s1207_s20 + $0x1f8] sm:$0xff] }
  0x3b   : > { %v1069_v31 = vpack.c.bf16 %v423_v21, %v422_v20  ;;  %1140 = vst [vmem:[%s1244_s26 + $0xa0] sm:$0xff] %v1064_v26   ;;  %v426_v36 = vmax.f32 %v362_v28, 0.0  ;;  %v364_v37 = vadd.f32 %v1212_v1, %v293_v29  ;;  %v295_v38 = vmul.f32 %v1202_v0, %v224_v24 }
  0x3c   : > { %v296_v39 = vmul.f32 %v1202_v0, %v225_v25  ;;  %v1074_v41 = vpack.c.bf16 %v425_v32, %v424_v27  ;;  %v427_v42 = vmax.f32 %v363_v33, 0.0  ;;  %v365_v43 = vadd.f32 %v1212_v1, %v294_v34 }
  0x3d   : > { %1141 = vst [vmem:[%s1244_s26 + $0xa8] sm:$0xff] %v1069_v31   ;;  %v297_v44 = vmul.f32 %v1202_v0, %v226_v30  ;;  %v428_v46 = vmax.f32 %v364_v37, 0.0  ;;  %v366_v47 = vadd.f32 %v1212_v1, %v295_v38  ;;  %v298_v49 = vmul.f32 %v1202_v0, %v227_v35 }
  0x3e   : > { %v367_v48 = vadd.f32 %v1212_v1, %v296_v39  ;;  %1142 = vst [vmem:[%s1244_s26 + $0xb0] sm:$0xff] %v1074_v41   ;;  %v1079_v51 = vpack.c.bf16 %v427_v42, %v426_v36  ;;  %v429_v52 = vmax.f32 %v365_v43, 0.0  ;;  %v299_v54 = vmul.f32 %v1202_v0, %v228_v40 }
  0x3f   : > { %v368_v53 = vadd.f32 %v1212_v1, %v297_v44  ;;  %v430_v56 = vmax.f32 %v366_v47, 0.0  ;;  %v369_v58 = vadd.f32 %v1212_v1, %v298_v49  ;;  %v300_v59 = vmul.f32 %v1202_v0, %v229_v45 }
  0x40   : > { %v431_v57 = vmax.f32 %v367_v48, 0.0  ;;  %1143 = vst [vmem:[%s1244_s26 + $0xb8] sm:$0xff] %v1079_v51   ;;  %v1084_v62 = vpack.c.bf16 %v429_v52, %v428_v46  ;;  %v370_v2 = vadd.f32 %v1212_v1, %v299_v54  ;;  %v301_v3 = vmul.f32 %v1202_v0, %v230_v50 }
  0x41   : > { %v432_v63 = vmax.f32 %v368_v53, 0.0  ;;  %v433_v6 = vmax.f32 %v369_v58, 0.0  ;;  %v371_v7 = vadd.f32 %v1212_v1, %v300_v59  ;;  %v302_v8 = vmul.f32 %v1202_v0, %v231_v55 }
  0x42   : > { %v1089_v5 = vpack.c.bf16 %v431_v57, %v430_v56  ;;  %1144 = vst [vmem:[%s1244_s26 + $0xc0] sm:$0xff] %v1084_v62   ;;  %v434_v10 = vmax.f32 %v370_v2, 0.0  ;;  %v372_v11 = vadd.f32 %v1212_v1, %v301_v3  ;;  %v303_v12 = vmul.f32 %v1202_v0, %v232_v60 }
  0x43   : > { %v304_v13 = vmul.f32 %v1202_v0, %v233_v61  ;;  %v1094_v15 = vpack.c.bf16 %v433_v6, %v432_v63  ;;  %v435_v16 = vmax.f32 %v371_v7, 0.0  ;;  %v373_v17 = vadd.f32 %v1212_v1, %v302_v8 }
  0x44   : > { %1145 = vst [vmem:[%s1244_s26 + $0xc8] sm:$0xff] %v1089_v5   ;;  %v305_v18 = vmul.f32 %v1202_v0, %v234_v4  ;;  %v436_v20 = vmax.f32 %v372_v11, 0.0  ;;  %v374_v21 = vadd.f32 %v1212_v1, %v303_v12  ;;  %v306_v23 = vmul.f32 %v1202_v0, %v235_v9 }
  0x45   : > { %v375_v22 = vadd.f32 %v1212_v1, %v304_v13  ;;  %1146 = vst [vmem:[%s1244_s26 + $0xd0] sm:$0xff] %v1094_v15   ;;  %v1099_v24 = vpack.c.bf16 %v435_v16, %v434_v10  ;;  %v437_v25 = vmax.f32 %v373_v17, 0.0  ;;  %v307_v27 = vmul.f32 %v1202_v0, %v236_v14 }
  0x46   : > { %v376_v26 = vadd.f32 %v1212_v1, %v305_v18  ;;  %v438_v28 = vmax.f32 %v374_v21, 0.0  ;;  %v377_v30 = vadd.f32 %v1212_v1, %v306_v23  ;;  %v308_v31 = vmul.f32 %v1202_v0, %v237_v19 }
  0x47   : > { %v439_v29 = vmax.f32 %v375_v22, 0.0  ;;  %1147 = vst [vmem:[%s1244_s26 + $0xd8] sm:$0xff] %v1099_v24   ;;  %v1104_v32 = vpack.c.bf16 %v437_v25, %v436_v20  ;;  %v378_v34 = vadd.f32 %v1212_v1, %v307_v27 }
  0x48   : > { %v440_v33 = vmax.f32 %v376_v26, 0.0  ;;  %v441_v36 = vmax.f32 %v377_v30, 0.0  ;;  %v379_v37 = vadd.f32 %v1212_v1, %v308_v31 }
  0x49   : > { %v1109_v35 = vpack.c.bf16 %v439_v29, %v438_v28  ;;  %1148 = vst [vmem:[%s1244_s26 + $0xe0] sm:$0xff] %v1104_v32   ;;  %v442_v38 = vmax.f32 %v378_v34, 0.0 }
  0x4a   : > { %v1114_v39 = vpack.c.bf16 %v441_v36, %v440_v33  ;;  %v443_v40 = vmax.f32 %v379_v37, 0.0 }
  0x4b   : > { %1149 = vst [vmem:[%s1244_s26 + $0xe8] sm:$0xff] %v1109_v35  }
  0x4c   : > { %1150 = vst [vmem:[%s1244_s26 + $0xf0] sm:$0xff] %v1114_v39   ;;  %v1119_v41 = vpack.c.bf16 %v443_v40, %v442_v38 }
  0x4e   : > { %1151 = vst [vmem:[%s1244_s26 + $0xf8] sm:$0xff] %v1119_v41  }
  0x4f PF: > { %s13_s12 = sadd.s32 1, %s1166_s12  }
  0x50   : > { %p10_p4 = scmp.ge.s32.totalorder %s13_s12, 18  }
  0x52   :  { %12 = sbr.rel (!%p10_p4) target bundleno = 1 (0x1), region = 62 }

// kernel: res_conv_block_unetr.7
= control target key start
LH: loop header
LB: loop body
LE: loop exit
PB: predicated region body
PF: predicated region fallthrough
CT: control target
= control target key end

     0   :  { %s1643_s21 = smov 0   ;;  %s2328_s0 = inlined_call_operand.vmem [shape: f32[8192,128], index: 0, kind: input, shape index: {}]   ;;  %s2329_s1 = inlined_call_operand.vmem [shape: f32[1,128], index: 1, kind: input, shape index: {}]   ;;  %s2330_s2 = inlined_call_operand.vmem [shape: f32[1,128], index: 2, kind: input, shape index: {}]   ;;  %s2331_s3 = inlined_call_operand.vmem [shape: bf16[8192,128], index: 3, kind: input, shape index: {}]   ;;  %s2332_s4 = inlined_call_operand.vmem [shape: bf16[128,128], index: 4, kind: input, shape index: {}]   ;;  %s2333_s5 = inlined_call_operand.vmem [shape: f32[1,128], index: 5, kind: input, shape index: {}]   ;;  %s2334_s6 = inlined_call_operand.vmem [shape: f32[8192,128], index: 6, kind: output, shape index: {}]  }
   0x1 LB: > { %s1360_s22 = sadd.s32 4294967295, %s1606_s21   ;;  %p1364_p0 = scmp.ge.s32.totalorder %s1606_s21, 1  ;;  %s1606_s21 = sphi %s1643_s21, %s16_s21  }
   0x2   : > { %p224_p1 = scmp.lt.s32.totalorder %s1606_s21, 17 }
   0x4   : > { %p225_p2 = pnand %p1364_p0, %p224_p1 }
   0x5   : > { %v1560_v0 = vld [vmem:[%s2332_s4] sm:$0xff] (!%p225_p2)   ;;  %s1365_s25 = sshll.u32 (!%p225_p2), %s1360_s22, 6  ;;  %v1561_v1 = vld [vmem:[%s2332_s4 + $0x8] sm:$0xff] (!%p225_p2)   ;;  %v1562_v2 = vld [vmem:[%s2332_s4 + $0x10] sm:$0xff] (!%p225_p2)  }
   0x6   : > { %228 = sbr.rel (%p225_p2) target bundleno = 316 (0x13c), region = 44  ;;  %p260_p3 = scmp.lt.s32.totalorder (!%p225_p2), %s1365_s25, 1023  ;;  %1456 = vmatprep.subr.bf16.mxu0 (!%p225_p2), %v1560_v0  ;;  %1536 = vmatprep.subr.bf16.mxu1 (!%p225_p2), %v1560_v0  ;;  %v1563_v3 = vld [vmem:[%s2332_s4 + $0x18] sm:$0xff] (!%p225_p2)   ;;  %v1564_v6 = vld [vmem:[%s2332_s4 + $0x20] sm:$0xff] (!%p225_p2)   ;;  %v1565_v7 = vld [vmem:[%s2332_s4 + $0x28] sm:$0xff] (!%p225_p2)  }
   0x7   : > { %1457 = vmatpush3.bf16.msra.mxu0 (!%p225_p2), %v1560_v0  ;;  %1544 = vmatpush3.bf16.msra.mxu1 (!%p225_p2), %v1560_v0  ;;  %v1566_v8 = vld [vmem:[%s2332_s4 + $0x30] sm:$0xff] (!%p225_p2)   ;;  %v1567_v9 = vld [vmem:[%s2332_s4 + $0x38] sm:$0xff] (!%p225_p2)   ;;  %v1727_v41 = vld [vmem:[%s2329_s1] ss:$0 sm:$0xff] (!%p225_p2) }
   0x8   : > { %1458 = vmatprep.subr.bf16.mxu0 (!%p225_p2), %v1561_v1  ;;  %1537 = vmatprep.subr.bf16.mxu1 (!%p225_p2), %v1561_v1  ;;  %v1741_v51 = vld [vmem:[%s2330_s2] ss:$0 sm:$0xff] (!%p225_p2) }
   0xb   : > { %1459 = vmatpush3.bf16.msra.mxu0 (!%p225_p2), %v1561_v1  ;;  %1545 = vmatpush3.bf16.msra.mxu1 (!%p225_p2), %v1561_v1 }
   0xc   : > { %1460 = vmatprep.subr.bf16.mxu0 (!%p225_p2), %v1562_v2  ;;  %1538 = vmatprep.subr.bf16.mxu1 (!%p225_p2), %v1562_v2 }
   0xd   : > { %s2346_s25 = smov (!%p260_p3, %s1365_s25), 1023 }
   0xe   : > { %s1368_s30 = sshll.u32 %s2346_s25, 2  ;;  %s1366_s20 = sshll.u32 %s2346_s25, 3 }
   0xf   : > { %s1669_s11 = scalar_lea.vmem %s2331_s3, %s1368_s30  ;;  %1461 = vmatpush3.bf16.msra.mxu0 %v1562_v2  ;;  %1546 = vmatpush3.bf16.msra.mxu1 %v1562_v2  ;;  %s1721_s24 = scalar_lea.vmem %s2328_s0, %s1366_s20 }
  0x10   : > { %v1568_v4 = vld [vmem:[%s1669_s11] sm:$0xff]   ;;  %1462 = vmatprep.subr.bf16.mxu0 %v1563_v3  ;;  %1539 = vmatprep.subr.bf16.mxu1 %v1563_v3  ;;  %v1570_v10 = vld [vmem:[%s1669_s11 + $0x8] sm:$0xff]   ;;  %v1572_v12 = vld [vmem:[%s1669_s11 + $0x10] sm:$0xff]   ;;  %s1915_s10 = scalar_lea.vmem %s2334_s6, %s1366_s20 }
  0x11   : > { %v1569_v5 = vld [vmem:[%s1669_s11 + $0x80] sm:$0xff]   ;;  %1472 = vmatprep.mubr.bf16.mxu0 %v1568_v4  ;;  %v1571_v11 = vld [vmem:[%s1669_s11 + $0x88] sm:$0xff]   ;;  %v1573_v13 = vld [vmem:[%s1669_s11 + $0x90] sm:$0xff]  }
  0x12   : > { %1504 = vmatprep.mubr.bf16.mxu1 %v1569_v5  ;;  %v1574_v14 = vld [vmem:[%s1669_s11 + $0x18] sm:$0xff]   ;;  %v1576_v16 = vld [vmem:[%s1669_s11 + $0x20] sm:$0xff]   ;;  %v1578_v18 = vld [vmem:[%s1669_s11 + $0x28] sm:$0xff]  }
  0x13   : > { %1463 = vmatpush3.bf16.msra.mxu0 %v1563_v3  ;;  %1547 = vmatpush3.bf16.msra.mxu1 %v1563_v3  ;;  %v1575_v15 = vld [vmem:[%s1669_s11 + $0x98] sm:$0xff]   ;;  %v1577_v17 = vld [vmem:[%s1669_s11 + $0xa0] sm:$0xff]   ;;  %v1579_v19 = vld [vmem:[%s1669_s11 + $0xa8] sm:$0xff]  }
  0x14   : > { %1464 = vmatprep.subr.bf16.mxu0 %v1564_v6  ;;  %1540 = vmatprep.subr.bf16.mxu1 %v1564_v6  ;;  %v1580_v20 = vld [vmem:[%s1669_s11 + $0x30] sm:$0xff]   ;;  %v1582_v22 = vld [vmem:[%s1669_s11 + $0x38] sm:$0xff]   ;;  %v1584_v24 = vld [vmem:[%s1669_s11 + $0x40] sm:$0xff]  }
  0x15   : > { %v1581_v21 = vld [vmem:[%s1669_s11 + $0xb0] sm:$0xff]   ;;  %v1583_v23 = vld [vmem:[%s1669_s11 + $0xb8] sm:$0xff]   ;;  %v1585_v25 = vld [vmem:[%s1669_s11 + $0xc0] sm:$0xff]  }
  0x16   : > { %v1586_v26 = vld [vmem:[%s1669_s11 + $0x48] sm:$0xff]   ;;  %v1588_v28 = vld [vmem:[%s1669_s11 + $0x50] sm:$0xff]   ;;  %v1590_v30 = vld [vmem:[%s1669_s11 + $0x58] sm:$0xff]  }
  0x17   : > { %1465 = vmatpush3.bf16.msra.mxu0 %v1564_v6  ;;  %1548 = vmatpush3.bf16.msra.mxu1 %v1564_v6  ;;  %v1587_v27 = vld [vmem:[%s1669_s11 + $0xc8] sm:$0xff]   ;;  %v1589_v29 = vld [vmem:[%s1669_s11 + $0xd0] sm:$0xff]   ;;  %v1591_v31 = vld [vmem:[%s1669_s11 + $0xd8] sm:$0xff]  }
  0x18   : > { %1466 = vmatprep.subr.bf16.mxu0 %v1565_v7  ;;  %1541 = vmatprep.subr.bf16.mxu1 %v1565_v7  ;;  %v1592_v32 = vld [vmem:[%s1669_s11 + $0x60] sm:$0xff]   ;;  %v1594_v34 = vld [vmem:[%s1669_s11 + $0x68] sm:$0xff]   ;;  %v1596_v36 = vld [vmem:[%s1669_s11 + $0x70] sm:$0xff]  }
  0x19   : > { %v1593_v33 = vld [vmem:[%s1669_s11 + $0xe0] sm:$0xff]   ;;  %v1595_v35 = vld [vmem:[%s1669_s11 + $0xe8] sm:$0xff]   ;;  %v1597_v37 = vld [vmem:[%s1669_s11 + $0xf0] sm:$0xff]  }
  0x1a   : > { %v1598_v38 = vld [vmem:[%s1669_s11 + $0x78] sm:$0xff]   ;;  %v280_v40 = vld [vmem:[%s1721_s24 + $0x10] sm:$0xff]  ;;  %v278_v43 = vld [vmem:[%s1721_s24] sm:$0xff] }
  0x1b   : > { %1467 = vmatpush3.bf16.msra.mxu0 %v1565_v7  ;;  %1549 = vmatpush3.bf16.msra.mxu1 %v1565_v7  ;;  %v1599_v39 = vld [vmem:[%s1669_s11 + $0xf8] sm:$0xff]   ;;  %v312_v42 = vld [vmem:[%s1721_s24 + $0x110] sm:$0xff]  ;;  %v310_v44 = vld [vmem:[%s1721_s24 + $0x100] sm:$0xff]  ;;  %v351_v49 = vmul.f32 %v1727_v41, %v280_v40  ;;  %v349_v52 = vmul.f32 %v1727_v41, %v278_v43 }
  0x1c   : > { %1468 = vmatprep.subr.bf16.mxu0 %v1566_v8  ;;  %1542 = vmatprep.subr.bf16.mxu1 %v1566_v8  ;;  %v281_v45 = vld [vmem:[%s1721_s24 + $0x18] sm:$0xff]  ;;  %v279_v47 = vld [vmem:[%s1721_s24 + $0x8] sm:$0xff]  ;;  %v383_v50 = vmul.f32 %v1727_v41, %v312_v42  ;;  %v381_v53 = vmul.f32 %v1727_v41, %v310_v44  ;;  %v284_v60 = vld [vmem:[%s1721_s24 + $0x30] sm:$0xff] }
  0x1d   : > { %v313_v46 = vld [vmem:[%s1721_s24 + $0x118] sm:$0xff]  ;;  %v311_v48 = vld [vmem:[%s1721_s24 + $0x108] sm:$0xff]  ;;  %v352_v54 = vmul.f32 %v1727_v41, %v281_v45  ;;  %v350_v56 = vmul.f32 %v1727_v41, %v279_v47  ;;  %v1750_v58 = vadd.f32 %v1741_v51, %v351_v49  ;;  %v316_v61 = vld [vmem:[%s1721_s24 + $0x130] sm:$0xff]  ;;  %v1758_v62 = vadd.f32 %v1741_v51, %v349_v52 }
  0x1e   : > { %v384_v55 = vmul.f32 %v1727_v41, %v313_v46  ;;  %v382_v57 = vmul.f32 %v1727_v41, %v311_v48  ;;  %v1753_v59 = vadd.f32 %v1741_v51, %v383_v50  ;;  %v1761_v63 = vadd.f32 %v1741_v51, %v381_v53  ;;  %v282_v1 = vld [vmem:[%s1721_s24 + $0x20] sm:$0xff] }
  0x1f   : > { %1469 = vmatpush3.bf16.msra.mxu0 %v1566_v8  ;;  %1550 = vmatpush3.bf16.msra.mxu1 %v1566_v8  ;;  %v1764_v0 = vadd.f32 %v1741_v51, %v352_v54  ;;  %v314_v2 = vld [vmem:[%s1721_s24 + $0x120] sm:$0xff]  ;;  %v1772_v4 = vadd.f32 %v1741_v51, %v350_v56  ;;  %v355_v6 = vmul.f32 %v1727_v41, %v284_v60  ;;  %v486_v8 = vmax.f32 %v1750_v58, 0.0  ;;  %v292_v56 = vld [vmem:[%s1721_s24 + $0x70] sm:$0xff] }
  0x20   : > { %1470 = vmatprep.subr.bf16.mxu0 %v1567_v9  ;;  %1543 = vmatprep.subr.bf16.mxu1 %v1567_v9  ;;  %v1769_v3 = vadd.f32 %v1741_v51, %v384_v55  ;;  %v1775_v5 = vadd.f32 %v1741_v51, %v382_v57  ;;  %v387_v7 = vmul.f32 %v1727_v41, %v316_v61  ;;  %v324_v57 = vld [vmem:[%s1721_s24 + $0x170] sm:$0xff] }
  0x23   : > { %1471 = vmatpush3.bf16.msra.mxu0 %v1567_v9  ;;  %1551 = vmatpush3.bf16.msra.mxu1 %v1567_v9  ;;  %v518_v9 = vmax.f32 %v1753_v59, 0.0 }
  0x26   : > { %1473 = vmatmul.mubr.bf16.vlgmr.msra.gmra.mrb[0].mxu0 %v1570_v10  ;;  %1505 = vmatmul.mubr.bf16.vlgmr.msra.gmra.mrb[0].mxu1 %v1571_v11  ;;  %v353_v10 = vmul.f32 %v1727_v41, %v282_v1  ;;  %v385_v11 = vmul.f32 %v1727_v41, %v314_v2 }
  0x27   : > { %1476 = vmatprep.mubr.bf16.mxu0 %v1572_v12  ;;  %1508 = vmatprep.mubr.bf16.mxu1 %v1573_v13  ;;  %v285_v12 = vld [vmem:[%s1721_s24 + $0x38] sm:$0xff] }
  0x28   : > { %v317_v13 = vld [vmem:[%s1721_s24 + $0x138] sm:$0xff] }
  0x2e   : > { %1477 = vmatmul.mubr.bf16.gmra.mrb[4].mxu0 %v1574_v14  ;;  %1509 = vmatmul.mubr.bf16.gmra.mrb[4].mxu1 %v1575_v15  ;;  %v283_v14 = vld [vmem:[%s1721_s24 + $0x28] sm:$0xff]  ;;  %v484_v15 = vmax.f32 %v1758_v62, 0.0 }
  0x2f   : > { %1480 = vmatprep.mubr.bf16.mxu0 %v1576_v16  ;;  %1512 = vmatprep.mubr.bf16.mxu1 %v1577_v17  ;;  %v516_v16 = vmax.f32 %v1761_v63, 0.0  ;;  %v487_v17 = vmax.f32 %v1764_v0, 0.0 }
  0x36   : > { %1481 = vmatmul.mubr.bf16.gmra.mrb[8].mxu0 %v1578_v18  ;;  %1513 = vmatmul.mubr.bf16.gmra.mrb[8].mxu1 %v1579_v19  ;;  %v315_v18 = vld [vmem:[%s1721_s24 + $0x128] sm:$0xff]  ;;  %v288_v19 = vld [vmem:[%s1721_s24 + $0x50] sm:$0xff] }
  0x37   : > { %1484 = vmatprep.mubr.bf16.mxu0 %v1580_v20  ;;  %1516 = vmatprep.mubr.bf16.mxu1 %v1581_v21  ;;  %v320_v20 = vld [vmem:[%s1721_s24 + $0x150] sm:$0xff]  ;;  %v519_v21 = vmax.f32 %v1769_v3, 0.0 }
  0x3e   : > { %1485 = vmatmul.mubr.bf16.gmra.mrb[12].mxu0 %v1582_v22  ;;  %1517 = vmatmul.mubr.bf16.gmra.mrb[12].mxu1 %v1583_v23  ;;  %v485_v22 = vmax.f32 %v1772_v4, 0.0  ;;  %v517_v23 = vmax.f32 %v1775_v5, 0.0  ;;  %v297_v4 = vld [vmem:[%s1721_s24 + $0x98] sm:$0xff] }
  0x3f   : > { %1488 = vmatprep.mubr.bf16.mxu0 %v1584_v24  ;;  %1520 = vmatprep.mubr.bf16.mxu1 %v1585_v25  ;;  %v286_v24 = vld [vmem:[%s1721_s24 + $0x40] sm:$0xff] }
  0x40   : > { %v318_v25 = vld [vmem:[%s1721_s24 + $0x140] sm:$0xff]  ;;  %v357_v40 = vmul.f32 %v1727_v41, %v286_v24 }
  0x41   : > { %v389_v42 = vmul.f32 %v1727_v41, %v318_v25 }
  0x42   : > { %v1850_v1 = vadd.f32 %v1741_v51, %v357_v40 }
  0x43   : > { %v1853_v2 = vadd.f32 %v1741_v51, %v389_v42 }
  0x46   : > { %1489 = vmatmul.mubr.bf16.gmra.mrb[16].mxu0 %v1586_v26  ;;  %1521 = vmatmul.mubr.bf16.gmra.mrb[16].mxu1 %v1587_v27  ;;  %v289_v26 = vld [vmem:[%s1721_s24 + $0x58] sm:$0xff]  ;;  %v1799_v27 = vadd.f32 %v1741_v51, %v355_v6  ;;  %v290_v6 = vld [vmem:[%s1721_s24 + $0x60] sm:$0xff] }
  0x47   : > { %1492 = vmatprep.mubr.bf16.mxu0 %v1588_v28  ;;  %1524 = vmatprep.mubr.bf16.mxu1 %v1589_v29  ;;  %v1802_v28 = vadd.f32 %v1741_v51, %v387_v7  ;;  %v356_v29 = vmul.f32 %v1727_v41, %v285_v12  ;;  %v360_v43 = vmul.f32 %v1727_v41, %v289_v26  ;;  %v322_v7 = vld [vmem:[%s1721_s24 + $0x160] sm:$0xff] }
  0x48   : > { %v490_v47 = vmax.f32 %v1799_v27, 0.0  ;;  %v361_v26 = vmul.f32 %v1727_v41, %v290_v6 }
  0x49   : > { %v522_v48 = vmax.f32 %v1802_v28, 0.0  ;;  %v1828_v49 = vadd.f32 %v1741_v51, %v356_v29  ;;  %v393_v29 = vmul.f32 %v1727_v41, %v322_v7 }
  0x4e   : > { %1493 = vmatmul.mubr.bf16.gmra.mrb[20].mxu0 %v1590_v30  ;;  %1525 = vmatmul.mubr.bf16.gmra.mrb[20].mxu1 %v1591_v31  ;;  %v388_v30 = vmul.f32 %v1727_v41, %v317_v13  ;;  %v321_v31 = vld [vmem:[%s1721_s24 + $0x158] sm:$0xff] }
  0x4f   : > { %1496 = vmatprep.mubr.bf16.mxu0 %v1592_v32  ;;  %1528 = vmatprep.mubr.bf16.mxu1 %v1593_v33  ;;  %v287_v32 = vld [vmem:[%s1721_s24 + $0x48] sm:$0xff]  ;;  %v392_v44 = vmul.f32 %v1727_v41, %v321_v31  ;;  %v325_v31 = vld [vmem:[%s1721_s24 + $0x178] sm:$0xff] }
  0x50   : > { %v319_v33 = vld [vmem:[%s1721_s24 + $0x148] sm:$0xff]  ;;  %v358_v45 = vmul.f32 %v1727_v41, %v287_v32  ;;  %v1831_v50 = vadd.f32 %v1741_v51, %v388_v30  ;;  %v293_v30 = vld [vmem:[%s1721_s24 + $0x78] sm:$0xff]  ;;  %v1882_v32 = vld [vmem:[%s2333_s5] ss:$0 sm:$0xff]  ;;  %v396_v40 = vmul.f32 %v1727_v41, %v325_v31 }
  0x51   : > { %v390_v46 = vmul.f32 %v1727_v41, %v319_v33  ;;  %v364_v7 = vmul.f32 %v1727_v41, %v293_v30 }
  0x52   : > { %v1864_v12 = vadd.f32 %v1741_v51, %v358_v45  ;;  %v323_v45 = vld [vmem:[%s1721_s24 + $0x168] sm:$0xff] }
  0x53   : > { %v1867_v13 = vadd.f32 %v1741_v51, %v390_v46 }
  0x56   : > { %1497 = vmatmul.mubr.bf16.gmra.mrb[24].mxu0 %v1594_v34  ;;  %1529 = vmatmul.mubr.bf16.gmra.mrb[24].mxu1 %v1595_v35  ;;  %v1810_v34 = vadd.f32 %v1741_v51, %v353_v10  ;;  %v1813_v35 = vadd.f32 %v1741_v51, %v385_v11  ;;  %v1858_v10 = vadd.f32 %v1741_v51, %v360_v43 }
  0x57   : > { %1500 = vmatprep.mubr.bf16.mxu0 %v1596_v36  ;;  %1532 = vmatprep.mubr.bf16.mxu1 %v1597_v37  ;;  %v354_v36 = vmul.f32 %v1727_v41, %v283_v14  ;;  %v386_v37 = vmul.f32 %v1727_v41, %v315_v18  ;;  %v1861_v11 = vadd.f32 %v1741_v51, %v392_v44  ;;  %v491_v14 = vmax.f32 %v1828_v49, 0.0  ;;  %v291_v44 = vld [vmem:[%s1721_s24 + $0x68] sm:$0xff] }
  0x58   : > { %v488_v52 = vmax.f32 %v1810_v34, 0.0  ;;  %v520_v53 = vmax.f32 %v1813_v35, 0.0  ;;  %v523_v18 = vmax.f32 %v1831_v50, 0.0 }
  0x59   : > { %v1836_v54 = vadd.f32 %v1741_v51, %v354_v36  ;;  %v1839_v55 = vadd.f32 %v1741_v51, %v386_v37  ;;  %v1905_v37 = vadd.f32 %v1741_v51, %v361_v26  ;;  %v362_v26 = vmul.f32 %v1727_v41, %v291_v44  ;;  %v328_v36 = vld [vmem:[%s1721_s24 + $0x190] sm:$0xff] }
  0x5a   : > { %v399_v63 = vmul.f32 %v1727_v41, %v328_v36  ;;  %v1961_v36 = vadd.f32 %v1741_v51, %v396_v40 }
  0x5c   : > { %v531_v50 = vmax.f32 %v1961_v36, 0.0 }
  0x5e   : > { %1501 = vmatmul.mubr.bf16.gmra.mrb[28].mxu0 %v1598_v38  ;;  %1533 = vmatmul.mubr.bf16.gmra.mrb[28].mxu1 %v1599_v39  ;;  %v359_v38 = vmul.f32 %v1727_v41, %v288_v19  ;;  %v391_v39 = vmul.f32 %v1727_v41, %v320_v20  ;;  %v363_v19 = vmul.f32 %v1727_v41, %v292_v56 }
  0x5f   : > { %v395_v20 = vmul.f32 %v1727_v41, %v324_v57 }
  0x60   : > { %v1844_v60 = vadd.f32 %v1741_v51, %v359_v38  ;;  %v1847_v61 = vadd.f32 %v1741_v51, %v391_v39  ;;  %v1895_v57 = vadd.f32 %v1741_v51, %v363_v19  ;;  %v1908_v19 = vadd.f32 %v1741_v51, %v393_v29  ;;  %v296_v29 = vld [vmem:[%s1721_s24 + $0x90] sm:$0xff] }
  0x61   : > { %v1898_v6 = vadd.f32 %v1741_v51, %v395_v20  ;;  %v367_v62 = vmul.f32 %v1727_v41, %v296_v29 }
  0x62   : > { %v498_v3 = vmax.f32 %v1895_v57, 0.0 }
  0xf9   : > { %v1474_v46 = vpop.f32.mrb[0].mxu0  ;;  %v1506_v56 = vpop.f32.mrb[0].mxu1 }
  0xfa   : > { %v918_v42 = vadd.f32 %v1474_v46, %v1882_v32  ;;  %v1046_v43 = vadd.f32 %v1506_v56, %v1882_v32  ;;  %v909_v39 = vpop.f32.mrb[1].mxu0  ;;  %v1037_v38 = vpop.f32.mrb[1].mxu1  ;;  %v394_v56 = vmul.f32 %v1727_v41, %v323_v45 }
  0xfb   : > { %v910_v20 = vadd.f32 %v1882_v32, %v909_v39  ;;  %v1038_v30 = vadd.f32 %v1882_v32, %v1037_v38  ;;  %v1475_v31 = vpop.f32.mrb[2].mxu0  ;;  %v1507_v46 = vpop.f32.mrb[2].mxu1 }
  0xfc   : > { %v1166_v33 = vadd.f32 %v918_v42, %v486_v8  ;;  %v1198_v25 = vadd.f32 %v1046_v43, %v518_v9  ;;  %v921_v38 = vadd.f32 %v1475_v31, %v1882_v32  ;;  %v1049_v39 = vadd.f32 %v1507_v46, %v1882_v32  ;;  %v912_v24 = vpop.f32.mrb[3].mxu0  ;;  %v1040_v44 = vpop.f32.mrb[3].mxu1 }
  0xfd   : > { %v1164_v45 = vadd.f32 %v910_v20, %v484_v15  ;;  %v1196_v58 = vadd.f32 %v1038_v30, %v516_v16  ;;  %v913_v8 = vadd.f32 %v1882_v32, %v912_v24  ;;  %v1041_v59 = vadd.f32 %v1882_v32, %v1040_v44  ;;  %v294_v15 = vld [vmem:[%s1721_s24 + $0x80] sm:$0xff] }
  0xfe   : > { %1230 = vst [vmem:[%s1915_s10 + $0x10] sm:$0xff] %v1166_v33  ;;  %1262 = vst [vmem:[%s1915_s10 + $0x110] sm:$0xff] %v1198_v25  ;;  %v1167_v9 = vadd.f32 %v921_v38, %v487_v17  ;;  %v1199_v42 = vadd.f32 %v1049_v39, %v519_v21  ;;  %v326_v16 = vld [vmem:[%s1721_s24 + $0x180] sm:$0xff]  ;;  %v530_v17 = vmax.f32 %v1898_v6, 0.0  ;;  %v496_v21 = vmax.f32 %v1905_v37, 0.0 }
  0xff   : > { %1228 = vst [vmem:[%s1915_s10] sm:$0xff] %v1164_v45  ;;  %1260 = vst [vmem:[%s1915_s10 + $0x100] sm:$0xff] %v1196_v58  ;;  %v1165_v24 = vadd.f32 %v913_v8, %v485_v22  ;;  %v1197_v0 = vadd.f32 %v1041_v59, %v517_v23  ;;  %v528_v25 = vmax.f32 %v1908_v19, 0.0  ;;  %v1958_v33 = vadd.f32 %v1741_v51, %v364_v7  ;;  %v329_v22 = vld [vmem:[%s1721_s24 + $0x198] sm:$0xff]  ;;  %v295_v59 = vld [vmem:[%s1721_s24 + $0x88] sm:$0xff] }
 0x100   : > { %1231 = vst [vmem:[%s1915_s10 + $0x18] sm:$0xff] %v1167_v9  ;;  %1263 = vst [vmem:[%s1915_s10 + $0x118] sm:$0xff] %v1199_v42  ;;  %v1968_v43 = vadd.f32 %v1741_v51, %v362_v26  ;;  %v1971_v20 = vadd.f32 %v1741_v51, %v394_v56  ;;  %v365_v7 = vmul.f32 %v1727_v41, %v294_v15  ;;  %v327_v9 = vld [vmem:[%s1721_s24 + $0x188] sm:$0xff] }
 0x101   : > { %1229 = vst [vmem:[%s1915_s10 + $0x8] sm:$0xff] %v1165_v24  ;;  %1261 = vst [vmem:[%s1915_s10 + $0x108] sm:$0xff] %v1197_v0  ;;  %v1478_v5 = vpop.f32.mrb[4].mxu0  ;;  %v1510_v23 = vpop.f32.mrb[4].mxu1  ;;  %v397_v30 = vmul.f32 %v1727_v41, %v326_v16  ;;  %v1978_v38 = vadd.f32 %v1741_v51, %v367_v62  ;;  %v1981_v26 = vadd.f32 %v1741_v51, %v399_v63 }
 0x102   : > { %v934_v40 = vadd.f32 %v1478_v5, %v1882_v32  ;;  %v1062_v31 = vadd.f32 %v1510_v23, %v1882_v32  ;;  %v925_v46 = vpop.f32.mrb[5].mxu0  ;;  %v1053_v29 = vpop.f32.mrb[5].mxu1  ;;  %v368_v58 = vmul.f32 %v1727_v41, %v297_v4  ;;  %v400_v8 = vmul.f32 %v1727_v41, %v329_v22 }
 0x103   : > { %v926_v56 = vadd.f32 %v1882_v32, %v925_v46  ;;  %v1054_v39 = vadd.f32 %v1882_v32, %v1053_v29  ;;  %v1479_v44 = vpop.f32.mrb[6].mxu0  ;;  %v1511_v45 = vpop.f32.mrb[6].mxu1  ;;  %v366_v34 = vmul.f32 %v1727_v41, %v295_v59  ;;  %v398_v35 = vmul.f32 %v1727_v41, %v327_v9 }
 0x104   : > { %v1170_v42 = vadd.f32 %v934_v40, %v490_v47  ;;  %v1202_v62 = vadd.f32 %v1062_v31, %v522_v48  ;;  %v937_v63 = vadd.f32 %v1479_v44, %v1882_v32  ;;  %v1065_v15 = vadd.f32 %v1511_v45, %v1882_v32  ;;  %v928_v16 = vpop.f32.mrb[7].mxu0  ;;  %v1056_v24 = vpop.f32.mrb[7].mxu1  ;;  %v332_v31 = vld [vmem:[%s1721_s24 + $0x1b0] sm:$0xff] }
 0x105   : > { %v1168_v0 = vadd.f32 %v926_v56, %v488_v52  ;;  %v1200_v4 = vadd.f32 %v1054_v39, %v520_v53  ;;  %v929_v27 = vadd.f32 %v1882_v32, %v928_v16  ;;  %v1057_v28 = vadd.f32 %v1882_v32, %v1056_v24  ;;  %v298_v24 = vld [vmem:[%s1721_s24 + $0xa0] sm:$0xff] }
 0x106   : > { %1234 = vst [vmem:[%s1915_s10 + $0x30] sm:$0xff] %v1170_v42  ;;  %1266 = vst [vmem:[%s1915_s10 + $0x130] sm:$0xff] %v1202_v62  ;;  %v1171_v47 = vadd.f32 %v937_v63, %v491_v14  ;;  %v1203_v48 = vadd.f32 %v1065_v15, %v523_v18  ;;  %v2335_v52 = vmax.f32 %v1836_v54, 0.0  ;;  %v2336_v22 = vmax.f32 %v1839_v55, 0.0  ;;  %v300_v54 = vld [vmem:[%s1721_s24 + $0xb0] sm:$0xff] }
 0x107   : > { %1232 = vst [vmem:[%s1915_s10 + $0x20] sm:$0xff] %v1168_v0  ;;  %1264 = vst [vmem:[%s1915_s10 + $0x120] sm:$0xff] %v1200_v4  ;;  %v499_v14 = vmax.f32 %v1958_v33, 0.0  ;;  %v497_v18 = vmax.f32 %v1968_v43, 0.0  ;;  %v529_v5 = vmax.f32 %v1971_v20, 0.0  ;;  %v2022_v23 = vadd.f32 %v1741_v51, %v365_v7  ;;  %v330_v0 = vld [vmem:[%s1721_s24 + $0x1a0] sm:$0xff] }
 0x108   : > { %v1169_v53 = vadd.f32 %v929_v27, %v2335_v52  ;;  %v1201_v49 = vadd.f32 %v1057_v28, %v2336_v22  ;;  %1235 = vst [vmem:[%s1915_s10 + $0x38] sm:$0xff] %v1171_v47  ;;  %1267 = vst [vmem:[%s1915_s10 + $0x138] sm:$0xff] %v1203_v48  ;;  %v2025_v40 = vadd.f32 %v1741_v51, %v397_v30  ;;  %v502_v29 = vmax.f32 %v1978_v38, 0.0  ;;  %v305_v43 = vld [vmem:[%s1721_s24 + $0xd8] sm:$0xff] }
 0x109   : > { %v1482_v55 = vpop.f32.mrb[8].mxu0  ;;  %v1514_v46 = vpop.f32.mrb[8].mxu1  ;;  %v534_v56 = vmax.f32 %v1981_v26, 0.0  ;;  %v2034_v39 = vadd.f32 %v1741_v51, %v368_v58  ;;  %v2037_v7 = vadd.f32 %v1741_v51, %v400_v8  ;;  %v2042_v9 = vadd.f32 %v1741_v51, %v366_v34 }
 0x10a   : > { %1233 = vst [vmem:[%s1915_s10 + $0x28] sm:$0xff] %v1169_v53  ;;  %1265 = vst [vmem:[%s1915_s10 + $0x128] sm:$0xff] %v1201_v49  ;;  %v950_v30 = vadd.f32 %v1482_v55, %v1882_v32  ;;  %v1078_v44 = vadd.f32 %v1514_v46, %v1882_v32  ;;  %v941_v45 = vpop.f32.mrb[9].mxu0  ;;  %v1069_v59 = vpop.f32.mrb[9].mxu1  ;;  %v2045_v42 = vadd.f32 %v1741_v51, %v398_v35  ;;  %v2337_v4 = vmax.f32 %v1844_v60, 0.0 }
 0x10b   : > { %v942_v62 = vadd.f32 %v1882_v32, %v941_v45  ;;  %v1070_v58 = vadd.f32 %v1882_v32, %v1069_v59  ;;  %v1483_v63 = vpop.f32.mrb[10].mxu0  ;;  %v1515_v8 = vpop.f32.mrb[10].mxu1  ;;  %v371_v15 = vmul.f32 %v1727_v41, %v300_v54  ;;  %v403_v16 = vmul.f32 %v1727_v41, %v332_v31  ;;  %v333_v45 = vld [vmem:[%s1721_s24 + $0x1b8] sm:$0xff] }
 0x10c   : > { %v1174_v27 = vadd.f32 %v950_v30, %v2337_v4  ;;  %v2338_v28 = vmax.f32 %v1847_v61, 0.0  ;;  %v953_v48 = vadd.f32 %v1483_v63, %v1882_v32  ;;  %v1081_v34 = vadd.f32 %v1515_v8, %v1882_v32  ;;  %v944_v35 = vpop.f32.mrb[11].mxu0  ;;  %v1072_v52 = vpop.f32.mrb[11].mxu1 }
 0x10d   : > { %v2339_v53 = vmax.f32 %v1850_v1, 0.0  ;;  %v2340_v49 = vmax.f32 %v1853_v2, 0.0  ;;  %v945_v54 = vadd.f32 %v1882_v32, %v944_v35  ;;  %v1073_v61 = vadd.f32 %v1882_v32, %v1072_v52 }
 0x10e   : > { %v1206_v47 = vadd.f32 %v1078_v44, %v2338_v28  ;;  %1238 = vst [vmem:[%s1915_s10 + $0x50] sm:$0xff] %v1174_v27  ;;  %v2341_v31 = vmax.f32 %v1858_v10, 0.0  ;;  %v2342_v46 = vmax.f32 %v1861_v11, 0.0  ;;  %v369_v1 = vmul.f32 %v1727_v41, %v298_v24  ;;  %v301_v44 = vld [vmem:[%s1721_s24 + $0xb8] sm:$0xff]  ;;  %v299_v27 = vld [vmem:[%s1721_s24 + $0xa8] sm:$0xff] }
 0x10f   : > { %v1172_v22 = vadd.f32 %v942_v62, %v2339_v53  ;;  %v1204_v60 = vadd.f32 %v1070_v58, %v2340_v49  ;;  %v401_v2 = vmul.f32 %v1727_v41, %v330_v0  ;;  %v2343_v59 = vmax.f32 %v1864_v12, 0.0  ;;  %v331_v12 = vld [vmem:[%s1721_s24 + $0x1a8] sm:$0xff] }
 0x110   : > { %1270 = vst [vmem:[%s1915_s10 + $0x150] sm:$0xff] %v1206_v47  ;;  %v1175_v55 = vadd.f32 %v953_v48, %v2341_v31  ;;  %v1207_v30 = vadd.f32 %v1081_v34, %v2342_v46  ;;  %v2344_v10 = vmax.f32 %v1867_v13, 0.0  ;;  %v500_v11 = vmax.f32 %v2022_v23, 0.0 }
 0x111   : > { %1236 = vst [vmem:[%s1915_s10 + $0x40] sm:$0xff] %v1172_v22  ;;  %1268 = vst [vmem:[%s1915_s10 + $0x140] sm:$0xff] %v1204_v60  ;;  %v1173_v62 = vadd.f32 %v945_v54, %v2343_v59  ;;  %v532_v63 = vmax.f32 %v2025_v40, 0.0  ;;  %v503_v8 = vmax.f32 %v2034_v39, 0.0  ;;  %v535_v24 = vmax.f32 %v2037_v7, 0.0  ;;  %v1486_v13 = vpop.f32.mrb[12].mxu0 }
 0x112   : > { %v1205_v58 = vadd.f32 %v1073_v61, %v2344_v10  ;;  %1239 = vst [vmem:[%s1915_s10 + $0x58] sm:$0xff] %v1175_v55  ;;  %1271 = vst [vmem:[%s1915_s10 + $0x158] sm:$0xff] %v1207_v30  ;;  %v501_v0 = vmax.f32 %v2042_v9, 0.0  ;;  %v533_v4 = vmax.f32 %v2045_v42, 0.0  ;;  %v1518_v28 = vpop.f32.mrb[12].mxu1  ;;  %v2094_v47 = vadd.f32 %v1741_v51, %v371_v15  ;;  %v957_v22 = vpop.f32.mrb[13].mxu0 }
 0x113   : > { %1237 = vst [vmem:[%s1915_s10 + $0x48] sm:$0xff] %v1173_v62  ;;  %v2097_v48 = vadd.f32 %v1741_v51, %v403_v16  ;;  %v372_v34 = vmul.f32 %v1727_v41, %v301_v44  ;;  %v404_v35 = vmul.f32 %v1727_v41, %v333_v45  ;;  %v966_v52 = vadd.f32 %v1486_v13, %v1882_v32  ;;  %v1085_v49 = vpop.f32.mrb[13].mxu1  ;;  %v1487_v61 = vpop.f32.mrb[14].mxu0  ;;  %v304_v30 = vld [vmem:[%s1721_s24 + $0xd0] sm:$0xff] }
 0x114   : > { %1269 = vst [vmem:[%s1915_s10 + $0x148] sm:$0xff] %v1205_v58  ;;  %v1094_v53 = vadd.f32 %v1518_v28, %v1882_v32  ;;  %v2104_v60 = vadd.f32 %v1741_v51, %v369_v1  ;;  %v2107_v15 = vadd.f32 %v1741_v51, %v401_v2  ;;  %v958_v16 = vadd.f32 %v1882_v32, %v957_v22  ;;  %v1519_v31 = vpop.f32.mrb[14].mxu1  ;;  %v336_v44 = vld [vmem:[%s1721_s24 + $0x1d0] sm:$0xff]  ;;  %v960_v62 = vpop.f32.mrb[15].mxu0 }
 0x115   : > { %v1086_v54 = vadd.f32 %v1882_v32, %v1085_v49  ;;  %v370_v55 = vmul.f32 %v1727_v41, %v299_v27  ;;  %v402_v46 = vmul.f32 %v1727_v41, %v331_v12  ;;  %v1178_v1 = vadd.f32 %v966_v52, %v498_v3  ;;  %v1088_v10 = vpop.f32.mrb[15].mxu1  ;;  %v308_v9 = vld [vmem:[%s1721_s24 + $0xf0] sm:$0xff] }
 0x116   : > { %v1210_v2 = vadd.f32 %v1094_v53, %v530_v17  ;;  %v969_v45 = vadd.f32 %v1487_v61, %v1882_v32  ;;  %v1097_v59 = vadd.f32 %v1519_v31, %v1882_v32  ;;  %v1176_v58 = vadd.f32 %v958_v16, %v496_v21  ;;  %v302_v21 = vld [vmem:[%s1721_s24 + $0xc0] sm:$0xff] }
 0x117   : > { %v1208_v57 = vadd.f32 %v1086_v54, %v528_v25  ;;  %v961_v3 = vadd.f32 %v1882_v32, %v960_v62  ;;  %v1089_v6 = vadd.f32 %v1882_v32, %v1088_v10  ;;  %1242 = vst [vmem:[%s1915_s10 + $0x70] sm:$0xff] %v1178_v1  ;;  %v375_v37 = vmul.f32 %v1727_v41, %v304_v30  ;;  %v334_v25 = vld [vmem:[%s1721_s24 + $0x1c0] sm:$0xff]  ;;  %v335_v62 = vld [vmem:[%s1721_s24 + $0x1c8] sm:$0xff] }
 0x118   : > { %1274 = vst [vmem:[%s1915_s10 + $0x170] sm:$0xff] %v1210_v2  ;;  %v1179_v17 = vadd.f32 %v969_v45, %v499_v14  ;;  %v1211_v27 = vadd.f32 %v1097_v59, %v531_v50  ;;  %v407_v19 = vmul.f32 %v1727_v41, %v336_v44  ;;  %1240 = vst [vmem:[%s1915_s10 + $0x60] sm:$0xff] %v1176_v58  ;;  %v506_v36 = vmax.f32 %v2094_v47, 0.0  ;;  %v303_v59 = vld [vmem:[%s1721_s24 + $0xc8] sm:$0xff] }
 0x119   : > { %1272 = vst [vmem:[%s1915_s10 + $0x160] sm:$0xff] %v1208_v57  ;;  %v1177_v12 = vadd.f32 %v961_v3, %v497_v18  ;;  %v1209_v33 = vadd.f32 %v1089_v6, %v529_v5  ;;  %v538_v14 = vmax.f32 %v2097_v48, 0.0  ;;  %v504_v50 = vmax.f32 %v2104_v60, 0.0  ;;  %v337_v18 = vld [vmem:[%s1721_s24 + $0x1d8] sm:$0xff]  ;;  %v1490_v20 = vpop.f32.mrb[16].mxu0  ;;  %v1522_v5 = vpop.f32.mrb[16].mxu1 }
 0x11a   : > { %1243 = vst [vmem:[%s1915_s10 + $0x78] sm:$0xff] %v1179_v17  ;;  %1275 = vst [vmem:[%s1915_s10 + $0x178] sm:$0xff] %v1211_v27  ;;  %v536_v13 = vmax.f32 %v2107_v15, 0.0  ;;  %v2150_v28 = vadd.f32 %v1741_v51, %v372_v34  ;;  %v2153_v52 = vadd.f32 %v1741_v51, %v404_v35  ;;  %v2160_v53 = vadd.f32 %v1741_v51, %v370_v55  ;;  %v973_v54 = vpop.f32.mrb[17].mxu0  ;;  %v1101_v61 = vpop.f32.mrb[17].mxu1  ;;  %v309_v60 = vld [vmem:[%s1721_s24 + $0xf8] sm:$0xff] }
 0x11b   : > { %1241 = vst [vmem:[%s1915_s10 + $0x68] sm:$0xff] %v1177_v12  ;;  %1273 = vst [vmem:[%s1915_s10 + $0x168] sm:$0xff] %v1209_v33  ;;  %v2163_v22 = vadd.f32 %v1741_v51, %v402_v46  ;;  %v373_v34 = vmul.f32 %v1727_v41, %v302_v21  ;;  %v405_v49 = vmul.f32 %v1727_v41, %v334_v25  ;;  %v1491_v44 = vpop.f32.mrb[18].mxu0  ;;  %v1523_v1 = vpop.f32.mrb[18].mxu1  ;;  %v341_v15 = vld [vmem:[%s1721_s24 + $0x1f8] sm:$0xff] }
 0x11c   : > { %v982_v35 = vadd.f32 %v1490_v20, %v1882_v32  ;;  %v1110_v16 = vadd.f32 %v1522_v5, %v1882_v32  ;;  %v2170_v31 = vadd.f32 %v1741_v51, %v375_v37  ;;  %v2173_v55 = vadd.f32 %v1741_v51, %v407_v19  ;;  %v976_v6 = vpop.f32.mrb[19].mxu0  ;;  %v1104_v17 = vpop.f32.mrb[19].mxu1 }
 0x11d   : > { %v974_v46 = vadd.f32 %v1882_v32, %v973_v54  ;;  %v1102_v30 = vadd.f32 %v1882_v32, %v1101_v61  ;;  %v376_v2 = vmul.f32 %v1727_v41, %v305_v43  ;;  %v408_v45 = vmul.f32 %v1727_v41, %v337_v18  ;;  %v306_v61 = vld [vmem:[%s1721_s24 + $0xe0] sm:$0xff] }
 0x11e   : > { %v1182_v10 = vadd.f32 %v982_v35, %v502_v29  ;;  %v1214_v58 = vadd.f32 %v1110_v16, %v534_v56  ;;  %v985_v57 = vadd.f32 %v1491_v44, %v1882_v32  ;;  %v1113_v3 = vadd.f32 %v1523_v1, %v1882_v32 }
 0x11f   : > { %v1180_v27 = vadd.f32 %v974_v46, %v500_v11  ;;  %v1212_v37 = vadd.f32 %v1102_v30, %v532_v63  ;;  %v977_v38 = vadd.f32 %v1882_v32, %v976_v6  ;;  %v1105_v26 = vadd.f32 %v1882_v32, %v1104_v17  ;;  %v338_v46 = vld [vmem:[%s1721_s24 + $0x1e0] sm:$0xff] }
 0x120   : > { %1246 = vst [vmem:[%s1915_s10 + $0x90] sm:$0xff] %v1182_v10  ;;  %1278 = vst [vmem:[%s1915_s10 + $0x190] sm:$0xff] %v1214_v58  ;;  %v1183_v29 = vadd.f32 %v985_v57, %v503_v8  ;;  %v1215_v56 = vadd.f32 %v1113_v3, %v535_v24  ;;  %v374_v23 = vmul.f32 %v1727_v41, %v303_v59  ;;  %v507_v63 = vmax.f32 %v2150_v28, 0.0 }
 0x121   : > { %v406_v40 = vmul.f32 %v1727_v41, %v335_v62  ;;  %1244 = vst [vmem:[%s1915_s10 + $0x80] sm:$0xff] %v1180_v27  ;;  %1276 = vst [vmem:[%s1915_s10 + $0x180] sm:$0xff] %v1212_v37  ;;  %v1181_v11 = vadd.f32 %v977_v38, %v501_v0  ;;  %v1213_v39 = vadd.f32 %v1105_v26, %v533_v4  ;;  %v539_v7 = vmax.f32 %v2153_v52, 0.0  ;;  %v340_v0 = vld [vmem:[%s1721_s24 + $0x1f0] sm:$0xff]  ;;  %v1494_v42 = vpop.f32.mrb[20].mxu0  ;;  %v1526_v4 = vpop.f32.mrb[20].mxu1 }
 0x122   : > { %1247 = vst [vmem:[%s1915_s10 + $0x98] sm:$0xff] %v1183_v29  ;;  %1279 = vst [vmem:[%s1915_s10 + $0x198] sm:$0xff] %v1215_v56  ;;  %v505_v8 = vmax.f32 %v2160_v53, 0.0  ;;  %v537_v24 = vmax.f32 %v2163_v22, 0.0  ;;  %v2214_v19 = vadd.f32 %v1741_v51, %v373_v34  ;;  %v2217_v21 = vadd.f32 %v1741_v51, %v405_v49  ;;  %v989_v18 = vpop.f32.mrb[21].mxu0  ;;  %v1117_v20 = vpop.f32.mrb[21].mxu1 }
 0x123   : > { %1245 = vst [vmem:[%s1915_s10 + $0x88] sm:$0xff] %v1181_v11  ;;  %1277 = vst [vmem:[%s1915_s10 + $0x188] sm:$0xff] %v1213_v39  ;;  %v510_v25 = vmax.f32 %v2170_v31, 0.0  ;;  %v542_v12 = vmax.f32 %v2173_v55, 0.0  ;;  %v2226_v33 = vadd.f32 %v1741_v51, %v376_v2  ;;  %v2229_v28 = vadd.f32 %v1741_v51, %v408_v45  ;;  %v1495_v49 = vpop.f32.mrb[22].mxu0  ;;  %v1527_v35 = vpop.f32.mrb[22].mxu1 }
 0x124   : > { %v998_v52 = vadd.f32 %v1494_v42, %v1882_v32  ;;  %v1126_v43 = vadd.f32 %v1526_v4, %v1882_v32  ;;  %v2234_v5 = vadd.f32 %v1741_v51, %v374_v23  ;;  %v2237_v53 = vadd.f32 %v1741_v51, %v406_v40  ;;  %v992_v45 = vpop.f32.mrb[23].mxu0  ;;  %v1120_v59 = vpop.f32.mrb[23].mxu1  ;;  %v307_v26 = vld [vmem:[%s1721_s24 + $0xe8] sm:$0xff] }
 0x125   : > { %v990_v22 = vadd.f32 %v1882_v32, %v989_v18  ;;  %v1118_v34 = vadd.f32 %v1882_v32, %v1117_v20  ;;  %v379_v16 = vmul.f32 %v1727_v41, %v308_v9  ;;  %v411_v54 = vmul.f32 %v1727_v41, %v340_v0  ;;  %v339_v29 = vld [vmem:[%s1721_s24 + $0x1e8] sm:$0xff] }
 0x126   : > { %v1186_v30 = vadd.f32 %v998_v52, %v506_v36  ;;  %v1218_v44 = vadd.f32 %v1126_v43, %v538_v14  ;;  %v1001_v1 = vadd.f32 %v1495_v49, %v1882_v32  ;;  %v1129_v2 = vadd.f32 %v1527_v35, %v1882_v32 }
 0x127   : > { %v1184_v62 = vadd.f32 %v990_v22, %v504_v50  ;;  %v1216_v47 = vadd.f32 %v1118_v34, %v536_v13  ;;  %v993_v36 = vadd.f32 %v1882_v32, %v992_v45  ;;  %v1121_v48 = vadd.f32 %v1882_v32, %v1120_v59 }
 0x128   : > { %1250 = vst [vmem:[%s1915_s10 + $0xb0] sm:$0xff] %v1186_v30  ;;  %1282 = vst [vmem:[%s1915_s10 + $0x1b0] sm:$0xff] %v1218_v44  ;;  %v1187_v14 = vadd.f32 %v1001_v1, %v507_v63  ;;  %v1219_v10 = vadd.f32 %v1129_v2, %v539_v7  ;;  %v377_v58 = vmul.f32 %v1727_v41, %v306_v61  ;;  %v508_v3 = vmax.f32 %v2214_v19, 0.0 }
 0x129   : > { %v409_v57 = vmul.f32 %v1727_v41, %v338_v46  ;;  %1248 = vst [vmem:[%s1915_s10 + $0xa0] sm:$0xff] %v1184_v62  ;;  %1280 = vst [vmem:[%s1915_s10 + $0x1a0] sm:$0xff] %v1216_v47  ;;  %v1185_v50 = vadd.f32 %v993_v36, %v505_v8  ;;  %v1217_v13 = vadd.f32 %v1121_v48, %v537_v24  ;;  %v540_v6 = vmax.f32 %v2217_v21, 0.0  ;;  %v1498_v56 = vpop.f32.mrb[24].mxu0  ;;  %v1530_v23 = vpop.f32.mrb[24].mxu1 }
 0x12a   : > { %1251 = vst [vmem:[%s1915_s10 + $0xb8] sm:$0xff] %v1187_v14  ;;  %1283 = vst [vmem:[%s1915_s10 + $0x1b8] sm:$0xff] %v1219_v10  ;;  %v511_v17 = vmax.f32 %v2226_v33, 0.0  ;;  %v543_v27 = vmax.f32 %v2229_v28, 0.0  ;;  %v509_v37 = vmax.f32 %v2234_v5, 0.0  ;;  %v541_v38 = vmax.f32 %v2237_v53, 0.0 }
 0x12b   : > { %1249 = vst [vmem:[%s1915_s10 + $0xa8] sm:$0xff] %v1185_v50  ;;  %1281 = vst [vmem:[%s1915_s10 + $0x1a8] sm:$0xff] %v1217_v13  ;;  %v450_v40 = vadd.f32 %v1741_v51, %v379_v16  ;;  %v482_v11 = vadd.f32 %v1741_v51, %v411_v54  ;;  %v380_v39 = vmul.f32 %v1727_v41, %v309_v60  ;;  %v1005_v24 = vpop.f32.mrb[25].mxu0  ;;  %v1133_v19 = vpop.f32.mrb[25].mxu1 }
 0x12c   : > { %v412_v63 = vmul.f32 %v1727_v41, %v341_v15  ;;  %v1014_v7 = vadd.f32 %v1498_v56, %v1882_v32  ;;  %v1142_v8 = vadd.f32 %v1530_v23, %v1882_v32  ;;  %v448_v21 = vadd.f32 %v1741_v51, %v377_v58  ;;  %v1499_v4 = vpop.f32.mrb[26].mxu0  ;;  %v1531_v33 = vpop.f32.mrb[26].mxu1 }
 0x12d   : > { %v480_v9 = vadd.f32 %v1741_v51, %v409_v57  ;;  %v1006_v0 = vadd.f32 %v1882_v32, %v1005_v24  ;;  %v1134_v42 = vadd.f32 %v1882_v32, %v1133_v19  ;;  %v378_v28 = vmul.f32 %v1727_v41, %v307_v26  ;;  %v1008_v53 = vpop.f32.mrb[27].mxu0  ;;  %v1136_v22 = vpop.f32.mrb[27].mxu1 }
 0x12e   : > { %v410_v52 = vmul.f32 %v1727_v41, %v339_v29  ;;  %v1190_v43 = vadd.f32 %v1014_v7, %v510_v25  ;;  %v1222_v18 = vadd.f32 %v1142_v8, %v542_v12  ;;  %v1017_v20 = vadd.f32 %v1499_v4, %v1882_v32 }
 0x12f   : > { %v1145_v5 = vadd.f32 %v1531_v33, %v1882_v32  ;;  %v1188_v34 = vadd.f32 %v1006_v0, %v508_v3  ;;  %v1220_v49 = vadd.f32 %v1134_v42, %v540_v6  ;;  %v1009_v41 = vadd.f32 %v1882_v32, %v1008_v53 }
 0x130   : > { %v1137_v31 = vadd.f32 %v1882_v32, %v1136_v22  ;;  %1254 = vst [vmem:[%s1915_s10 + $0xd0] sm:$0xff] %v1190_v43  ;;  %1286 = vst [vmem:[%s1915_s10 + $0x1d0] sm:$0xff] %v1222_v18  ;;  %v1191_v55 = vadd.f32 %v1017_v20, %v511_v17  ;;  %v451_v12 = vadd.f32 %v1741_v51, %v380_v39  ;;  %v514_v30 = vmax.f32 %v450_v40, 0.0 }
 0x131   : > { %v1223_v25 = vadd.f32 %v1145_v5, %v543_v27  ;;  %v483_v35 = vadd.f32 %v1741_v51, %v412_v63  ;;  %1252 = vst [vmem:[%s1915_s10 + $0xc0] sm:$0xff] %v1188_v34  ;;  %1284 = vst [vmem:[%s1915_s10 + $0x1c0] sm:$0xff] %v1220_v49  ;;  %v1189_v16 = vadd.f32 %v1009_v41, %v509_v37  ;;  %v546_v44 = vmax.f32 %v482_v11, 0.0  ;;  %v1502_v1 = vpop.f32.mrb[28].mxu0  ;;  %v1534_v2 = vpop.f32.mrb[28].mxu1 }
 0x132   : > { %v1221_v54 = vadd.f32 %v1137_v31, %v541_v38  ;;  %v449_v61 = vadd.f32 %v1741_v51, %v378_v28  ;;  %v481_v46 = vadd.f32 %v1741_v51, %v410_v52  ;;  %1255 = vst [vmem:[%s1915_s10 + $0xd8] sm:$0xff] %v1191_v55  ;;  %v512_v45 = vmax.f32 %v448_v21, 0.0  ;;  %v1021_v36 = vpop.f32.mrb[29].mxu0  ;;  %v1149_v48 = vpop.f32.mrb[29].mxu1 }
 0x133   : > { %1287 = vst [vmem:[%s1915_s10 + $0x1d8] sm:$0xff] %v1223_v25  ;;  %1253 = vst [vmem:[%s1915_s10 + $0xc8] sm:$0xff] %v1189_v16  ;;  %v544_v59 = vmax.f32 %v480_v9, 0.0  ;;  %v1030_v62 = vadd.f32 %v1502_v1, %v1882_v32  ;;  %v1158_v47 = vadd.f32 %v1534_v2, %v1882_v32  ;;  %v515_v14 = vmax.f32 %v451_v12, 0.0  ;;  %v1503_v57 = vpop.f32.mrb[30].mxu0  ;;  %v1535_v60 = vpop.f32.mrb[30].mxu1 }
 0x134   : > { %1285 = vst [vmem:[%s1915_s10 + $0x1c8] sm:$0xff] %v1221_v54  ;;  %v547_v10 = vmax.f32 %v483_v35, 0.0  ;;  %v1022_v51 = vadd.f32 %v1882_v32, %v1021_v36  ;;  %v1150_v58 = vadd.f32 %v1882_v32, %v1149_v48  ;;  %v513_v15 = vmax.f32 %v449_v61, 0.0  ;;  %v1024_v27 = vpop.f32.mrb[31].mxu0  ;;  %v1152_v37 = vpop.f32.mrb[31].mxu1 }
 0x135   : > { %v545_v50 = vmax.f32 %v481_v46, 0.0  ;;  %v1194_v13 = vadd.f32 %v1030_v62, %v514_v30  ;;  %v1226_v3 = vadd.f32 %v1158_v47, %v546_v44  ;;  %v1033_v6 = vadd.f32 %v1503_v57, %v1882_v32 }
 0x136   : > { %v1161_v17 = vadd.f32 %v1535_v60, %v1882_v32  ;;  %v1192_v38 = vadd.f32 %v1022_v51, %v512_v45  ;;  %v1224_v26 = vadd.f32 %v1150_v58, %v544_v59  ;;  %v1025_v29 = vadd.f32 %v1882_v32, %v1024_v27 }
 0x137   : > { %v1153_v56 = vadd.f32 %v1882_v32, %v1152_v37  ;;  %1258 = vst [vmem:[%s1915_s10 + $0xf0] sm:$0xff] %v1194_v13  ;;  %1290 = vst [vmem:[%s1915_s10 + $0x1f0] sm:$0xff] %v1226_v3  ;;  %v1195_v23 = vadd.f32 %v1033_v6, %v515_v14 }
 0x138   : > { %v1227_v40 = vadd.f32 %v1161_v17, %v547_v10  ;;  %1256 = vst [vmem:[%s1915_s10 + $0xe0] sm:$0xff] %v1192_v38  ;;  %1288 = vst [vmem:[%s1915_s10 + $0x1e0] sm:$0xff] %v1224_v26  ;;  %v1193_v11 = vadd.f32 %v1025_v29, %v513_v15 }
 0x139   : > { %v1225_v39 = vadd.f32 %v1153_v56, %v545_v50  ;;  %1259 = vst [vmem:[%s1915_s10 + $0xf8] sm:$0xff] %v1195_v23 }
 0x13a   : > { %1291 = vst [vmem:[%s1915_s10 + $0x1f8] sm:$0xff] %v1227_v40  ;;  %1257 = vst [vmem:[%s1915_s10 + $0xe8] sm:$0xff] %v1193_v11 }
 0x13b   : > { %1289 = vst [vmem:[%s1915_s10 + $0x1e8] sm:$0xff] %v1225_v39 }
 0x13c PF: > { %s16_s21 = sadd.s32 1, %s1606_s21  }
 0x13d   : > { %p13_p4 = scmp.ge.s32.totalorder %s16_s21, 18  }
 0x13f   :  { %15 = sbr.rel (!%p13_p4) target bundleno = 1 (0x1), region = 77 }

</bundles_post_ra>
